<compile_context>
chip_gen: v6e
topology: v6e:2x2x1
jax: 0.10.0
libtpu: 0.0.40
codegen_flags: <defaults>
</compile_context>

<pallas_src>
import functools

import numpy as np

import jax
import jax.numpy as jnp
from jax.experimental import pallas as pl
from jax.experimental.pallas import tpu as pltpu

EPS = 1e-5  # PyTorch BatchNorm eps


# --------------------------------------------------------------------------
# The fused kernel (B samples per grid step, row-stacked along sublanes)
# --------------------------------------------------------------------------

def make_fused_kernel(plan):
    """plan: tuple of ('conv',) | ('pool', C)   (C = channels per lane group)."""

    def kernel(*refs):
        x_ref = refs[0]            # (B*H0, W0*cin_pad)  f32 input rows
        o_ref = refs[-1]           # (B, ncls_pad)       f32 padded logits
        params = refs[1:-1]
        idx = 0

        def nxt():
            nonlocal idx
            r = params[idx]
            idx += 1
            return r

        cur = x_ref[...]                                   # f32 (M, L) activation
        for op in plan:
            if op[0] == "conv":
                # ONE wide-K MXU matmul per conv: X = [up | center | down] @ T.
                t_ref, b_ref, mu_ref, md_ref = nxt(), nxt(), nxt(), nxt()
                m = cur.shape[0]
                up = pltpu.roll(cur, shift=1, axis=0) * mu_ref[...]       # row h-1
                dn = pltpu.roll(cur, shift=m - 1, axis=0) * md_ref[...]   # row h+1
                xk = jnp.concatenate(
                    [up.astype(jnp.bfloat16), cur.astype(jnp.bfloat16),
                     dn.astype(jnp.bfloat16)], axis=1)                    # (M, 3L)
                y = jnp.dot(xk, t_ref[...],
                            preferred_element_type=jnp.float32)
                cur = jnp.maximum(y + b_ref[...], 0.0)     # folded BN + ReLU, f32
            else:
                # 2x2 maxpool: VPU maxes over XLU-rolled copies + one row
                # down-select matmul.  The even-column down-select is folded
                # into the NEXT conv's Toeplitz (zero rows at odd lane groups).
                _, C = op
                sd_ref = nxt()
                m, l = cur.shape
                rows = jnp.maximum(cur, pltpu.roll(cur, shift=m - 1, axis=0))
                cols = jnp.maximum(rows, pltpu.roll(rows, shift=l - C, axis=1))
                cur = jnp.dot(sd_ref[...], cols.astype(jnp.bfloat16),
                              preferred_element_type=jnp.float32)

        # Head: the per-sample 2-row AvgPool sum happens inside the MXU f32
        # accumulator (selsum); the 0.25 factor, the lane fold over the two
        # column groups and the BN1d scale are pre-folded into w1.
        sel_ref = nxt()
        w1, b1 = nxt(), nxt()
        w2, b2 = nxt(), nxt()
        w3, b3 = nxt(), nxt()
        rs = jnp.dot(sel_ref[...], cur.astype(jnp.bfloat16),
                     preferred_element_type=jnp.float32)              # (B, 2*Cf)
        h = jnp.maximum(jnp.dot(rs.astype(jnp.bfloat16), w1[...],
                                preferred_element_type=jnp.float32) + b1[...], 0.0)
        h = jnp.maximum(jnp.dot(h.astype(jnp.bfloat16), w2[...],
                                preferred_element_type=jnp.float32) + b2[...], 0.0)
        o_ref[...] = jnp.dot(h.astype(jnp.bfloat16), w3[...],
                             preferred_element_type=jnp.float32) + b3[...]

    return kernel


# --------------------------------------------------------------------------
# Glue: structured-matrix construction (runs once at parameter-prep time)
# --------------------------------------------------------------------------

def _build_conv_weight(w_hwio, win, g_in, stride2):
    """(3,3,Cin,Cout) HWIO weights -> wide-K block-Toeplitz (3*g_in*Cin, win*Cout).

    Rows are laid out as [kh=0 | kh=1 | kh=2]; within a kh block, lane group g
    holds input spatial column wi with g = 2*wi after a maxpool (stride2: the
    even-column down-select is folded in here) or g = wi for a dense layout.
    Spatial zero padding (padding=1) is realised by leaving out-of-range taps
    at zero.
    """
    w = np.asarray(w_hwio, np.float32)
    cin, cout = w.shape[2], w.shape[3]
    step = 2 if stride2 else 1
    T = np.zeros((3 * g_in * cin, win * cout), np.float32)
    for kh in range(3):
        base = kh * g_in * cin
        for wo in range(win):
            for kw in range(3):
                wi = wo + kw - 1
                if 0 <= wi < win:
                    r0 = base + (wi * step) * cin
                    T[r0:r0 + cin, wo * cout:(wo + 1) * cout] = w[kh, kw]
    return T


def _row_masks(B, H):
    """Per-sample boundary masks for the +-1 sublane rolls, shape (B*H, 1)."""
    mu = np.ones((B * H, 1), np.float32)
    md = np.ones((B * H, 1), np.float32)
    mu[0::H, 0] = 0.0           # row h=0 of every sample has no row above
    md[H - 1::H, 0] = 0.0       # row h=H-1 of every sample has no row below
    return mu, md


def _row_downselect(B, H):
    """(B*H/2, B*H) one-hot selecting row 2*hh of every sample block."""
    Hh = H // 2
    Sd = np.zeros((B * Hh, B * H), np.float32)
    for b in range(B):
        for hh in range(Hh):
            Sd[b * Hh + hh, b * H + 2 * hh] = 1.0
    return Sd


# --------------------------------------------------------------------------
# Parameter construction (deterministic, mirrors the module __init__ shapes)
# --------------------------------------------------------------------------

def make_params(key, cfg, num_classes=10, flag=1):
    keys = list(jax.random.split(key, 2 * len(cfg) + 8))
    kidx = 0

    def next_key():
        nonlocal kidx
        k = keys[kidx]
        kidx += 1
        return k

    features = []
    in_ch = 3
    for v in cfg:
        if v == "M":
            features.append("M")
            continue
        # MaskedConv2d(in_ch, v, 3, padding=1, bias=False); mask == ones
        n = 3 * 3 * v
        w_oihw = (jax.random.normal(next_key(), (v, in_ch, 3, 3), jnp.float32)
                  * (2.0 / n) ** 0.5)
        mask = jnp.ones_like(w_oihw)
        w_hwio = jnp.transpose(w_oihw * mask, (2, 3, 1, 0))      # OIHW -> HWIO
        # BatchNorm2d(v): weight=0.5, bias=0 (per _initialize_weights),
        # inference stats mean=0 / var=1, folded into scale/bias.
        gamma = jnp.full((v,), 0.5, jnp.float32)
        beta = jnp.zeros((v,), jnp.float32)
        rmean = jnp.zeros((v,), jnp.float32)
        rvar = jnp.ones((v,), jnp.float32)
        scale = gamma / jnp.sqrt(rvar + EPS)
        bias = beta - rmean * scale
        features.append((w_hwio, scale, bias))
        in_ch = v

    def masked_linear(k, fin, fout):
        kw, kb = jax.random.split(k)
        bound = 1.0 / (fin ** 0.5)
        w = jax.random.uniform(kw, (fout, fin), jnp.float32, -bound, bound)
        b = jax.random.uniform(kb, (fout,), jnp.float32, -bound, bound)
        mask = jnp.ones_like(w)
        return jnp.transpose(w * mask), b                        # (fin,fout), (fout,)

    classifier = []
    fin = cfg[-1] * flag
    for fout in (512, 512):
        w, b_lin = masked_linear(next_key(), fin, fout)
        # BatchNorm1d(512): default init (gamma=1, beta=0), inference stats.
        gamma = jnp.ones((fout,), jnp.float32)
        beta = jnp.zeros((fout,), jnp.float32)
        rmean = jnp.zeros((fout,), jnp.float32)
        rvar = jnp.ones((fout,), jnp.float32)
        scale = gamma / jnp.sqrt(rvar + EPS)
        bias = beta + (b_lin - rmean) * scale    # fold linear bias into BN shift
        classifier.append((w, scale, bias))
        fin = fout
    w, b_lin = masked_linear(next_key(), fin, num_classes)
    classifier.append((w, b_lin))
    return {"features": features, "classifier": classifier}


def pack_fused(raw, H0, W0, B, num_classes=10, cin_pad=8, ncls_pad=128):
    """Fold BN / masks / padding / pool layout / avgpool into kernel params."""
    plan, flat = [], []
    H, W = H0, W0          # spatial size of the current (pooled) map
    G = W0                 # lane groups in the current activation layout
    C = cin_pad            # channels per lane group
    stride2 = False        # valid data only at even lane groups (post-pool)
    first = True

    for entry in raw["features"]:
        if isinstance(entry, str):                      # 'M' -> maxpool 2x2
            sd = _row_downselect(B, H)
            plan.append(("pool", C))
            flat.append(jnp.asarray(sd, jnp.bfloat16))
            H //= 2
            W //= 2
            stride2 = True                              # lane width unchanged
        else:
            w_hwio, scale, bias = entry                 # (3,3,Cin,Cout),(Cout,),(Cout,)
            w = np.asarray(w_hwio, np.float32)
            cout = w.shape[3]
            if first:
                # pad the 3 input channels up to cin_pad lanes (glue pads x too)
                w = np.pad(w, ((0, 0), (0, 0), (0, cin_pad - w.shape[2]), (0, 0)))
                first = False
            assert w.shape[2] == C
            w = w * np.asarray(scale, np.float32)[None, None, None, :]  # fold BN
            T = _build_conv_weight(w, win=W, g_in=G, stride2=stride2)
            brow = np.tile(np.asarray(bias, np.float32), W).reshape(1, W * cout)
            mu, md = _row_masks(B, H)
            plan.append(("conv",))
            flat += [jnp.asarray(T, jnp.bfloat16), jnp.asarray(brow, jnp.float32),
                     jnp.asarray(mu, jnp.float32), jnp.asarray(md, jnp.float32)]
            G, C, stride2 = W, cout, False

    assert (not stride2) and H == 2 and W == 2, (
        "head fold assumes the feature stack ends with a conv producing a 2x2 "
        "map, so AvgPool2d(2) leaves 1x1 spatial (flatten == cfg[-1] features)")

    (w1, s1, b1), (w2, s2, b2), (w3, b3) = raw["classifier"]
    Cf, Gl = C, G                                        # cfg[-1], 2
    # selsum: (B, B*2) one-hot pair -> per-sample sum of the two final rows,
    # accumulated in f32 inside the MXU.
    sel = np.zeros((B, B * H), np.float32)
    for b in range(B):
        sel[b, b * H:(b + 1) * H] = 1.0
    # AvgPool2d(2) + NCHW flatten + BN1d scale folded into the first linear.
    hsum = np.zeros((Gl * Cf, Cf), np.float32)
    for g in range(Gl):
        for c in range(Cf):
            hsum[g * Cf + c, c] = 0.25
    w1f = np.asarray(w1, np.float32) * np.asarray(s1, np.float32)[None, :]
    assert w1f.shape[0] == Cf
    w1p = hsum @ w1f                                                    # (2*Cf, 512)
    w2f = np.asarray(w2, np.float32) * np.asarray(s2, np.float32)[None, :]
    w3np, b3np = np.asarray(w3, np.float32), np.asarray(b3, np.float32)
    w3p = np.zeros((w3np.shape[0], ncls_pad), np.float32)
    w3p[:, :w3np.shape[1]] = w3np
    b3p = np.zeros((1, ncls_pad), np.float32)
    b3p[0, :b3np.shape[0]] = b3np

    flat += [
        jnp.asarray(sel, jnp.bfloat16),
        jnp.asarray(w1p, jnp.bfloat16), jnp.asarray(b1, jnp.float32).reshape(1, -1),
        jnp.asarray(w2f, jnp.bfloat16), jnp.asarray(b2, jnp.float32).reshape(1, -1),
        jnp.asarray(w3p, jnp.bfloat16), jnp.asarray(b3p, jnp.float32),
    ]
    meta = dict(plan=tuple(plan), B=B, cin_pad=cin_pad, H0=H0, W0=W0,
                num_classes=num_classes, ncls_pad=ncls_pad)
    return meta, flat


# --------------------------------------------------------------------------
# Full forward pass (matches masked_vgg_addlinear.forward)
# --------------------------------------------------------------------------

def masked_vgg_addlinear_forward(x_nchw, meta, flat_params):
    H0, W0 = meta["H0"], meta["W0"]
    B = meta["B"]
    cin_pad, ncls_pad = meta["cin_pad"], meta["ncls_pad"]
    N, Cin, H, W = x_nchw.shape
    assert (H, W) == (H0, W0)

    # Pad the batch up to a multiple of the batch block.
    n_pad = (-N) % B
    if n_pad:
        x_nchw = jnp.pad(x_nchw, ((0, n_pad), (0, 0), (0, 0), (0, 0)))
    Np = N + n_pad

    # Glue: NCHW -> sample-major row slab (Np*H, W*cin_pad), channels innermost.
    x = jnp.transpose(x_nchw, (0, 2, 3, 1)).astype(jnp.float32)
    x = jnp.pad(x, ((0, 0), (0, 0), (0, 0), (0, cin_pad - Cin)))
    x = x.reshape(Np * H0, W0 * cin_pad)

    kernel = make_fused_kernel(meta["plan"])

    in_specs = [pl.BlockSpec((B * H0, W0 * cin_pad), lambda i: (i, 0))]
    for p in flat_params:
        in_specs.append(pl.BlockSpec(p.shape, lambda i: (0, 0)))

    out = pl.pallas_call(
        kernel,
        out_shape=jax.ShapeDtypeStruct((Np, ncls_pad), jnp.float32),
        grid=(Np // B,),
        in_specs=in_specs,
        out_specs=pl.BlockSpec((B, ncls_pad), lambda i: (i, 0)),
        compiler_params=pltpu.CompilerParams(
            dimension_semantics=("parallel",),
            vmem_limit_bytes=48 * 1024 * 1024),
    )(x, *flat_params)
    return out[:N, :meta["num_classes"]]


if __name__ == "__main__":
    # Small VGG-style cfg (same structure as defaultcfg: conv blocks + 'M'
    # pools, ending in convs).  Three pools take the 16x16 input to 2x2, and
    # AvgPool2d(2) leaves 1x1 -> flatten == cfg[-1] features (cifar10, flag=1).
    cfg = [16, 16, "M", 32, "M", 64, "M", 64]
    num_classes = 10
    # Batch block: B samples row-stacked along the matmul M axis
    # (M = B*16 = 128 on the big stages; use B=16 to fill v6e/v7x's 256-row
    # MXU).  N=16 / B=8 keeps the grid length even for v7x's two TensorCores.
    B = 8

    key = jax.random.PRNGKey(0)
    k_params, k_x = jax.random.split(key)
    raw = make_params(k_params, cfg, num_classes=num_classes, flag=1)
    meta, flat = pack_fused(raw, H0=16, W0=16, B=B, num_classes=num_classes)

    # PyTorch-convention NCHW input: channels=3 (fixed by make_layers), 16x16.
    x = jax.random.normal(k_x, (16, 3, 16, 16), jnp.float32)

    fwd = jax.jit(functools.partial(masked_vgg_addlinear_forward,
                                    meta=meta, flat_params=flat))
    y = fwd(x)
    jax.block_until_ready(y)
    assert y.shape == (16, num_classes), y.shape
    assert bool(jnp.all(jnp.isfinite(y)))
    print("KERNEL_OK")
</pallas_src>

<mosaic_0001>
module attributes {stable_mosaic.version = 11 : i64} {
  func.func @kernel(%arg0: i32, %arg1: memref<128x128xf32, #tpu.memory_space<vmem>>, %arg2: memref<384x256xbf16, #tpu.memory_space<vmem>>, %arg3: memref<1x256xf32, #tpu.memory_space<vmem>>, %arg4: memref<128x1xf32, #tpu.memory_space<vmem>>, %arg5: memref<128x1xf32, #tpu.memory_space<vmem>>, %arg6: memref<768x256xbf16, #tpu.memory_space<vmem>>, %arg7: memref<1x256xf32, #tpu.memory_space<vmem>>, %arg8: memref<128x1xf32, #tpu.memory_space<vmem>>, %arg9: memref<128x1xf32, #tpu.memory_space<vmem>>, %arg10: memref<64x128xbf16, #tpu.memory_space<vmem>>, %arg11: memref<768x256xbf16, #tpu.memory_space<vmem>>, %arg12: memref<1x256xf32, #tpu.memory_space<vmem>>, %arg13: memref<64x1xf32, #tpu.memory_space<vmem>>, %arg14: memref<64x1xf32, #tpu.memory_space<vmem>>, %arg15: memref<32x64xbf16, #tpu.memory_space<vmem>>, %arg16: memref<768x256xbf16, #tpu.memory_space<vmem>>, %arg17: memref<1x256xf32, #tpu.memory_space<vmem>>, %arg18: memref<32x1xf32, #tpu.memory_space<vmem>>, %arg19: memref<32x1xf32, #tpu.memory_space<vmem>>, %arg20: memref<16x32xbf16, #tpu.memory_space<vmem>>, %arg21: memref<768x128xbf16, #tpu.memory_space<vmem>>, %arg22: memref<1x128xf32, #tpu.memory_space<vmem>>, %arg23: memref<16x1xf32, #tpu.memory_space<vmem>>, %arg24: memref<16x1xf32, #tpu.memory_space<vmem>>, %arg25: memref<8x16xbf16, #tpu.memory_space<vmem>>, %arg26: memref<128x512xbf16, #tpu.memory_space<vmem>>, %arg27: memref<1x512xf32, #tpu.memory_space<vmem>>, %arg28: memref<512x512xbf16, #tpu.memory_space<vmem>>, %arg29: memref<1x512xf32, #tpu.memory_space<vmem>>, %arg30: memref<512x128xbf16, #tpu.memory_space<vmem>>, %arg31: memref<1x128xf32, #tpu.memory_space<vmem>>, %arg32: memref<8x128xf32, #tpu.memory_space<vmem>>) attributes {dimension_semantics = [#tpu.dimension_semantics<parallel>], iteration_bounds = array<i64: 2>, scalar_prefetch = 0 : i64, scratch_operands = 0 : i64, tpu.core_type = #tpu.core_type<tc>, window_params = [{transform_indices = @transform_0, window_bounds = array<i64: 128, 128>}, {pipeline_mode = #tpu.pipeline_mode<synchronous>, transform_indices = @transform_1, window_bounds = array<i64: 384, 256>}, {pipeline_mode = #tpu.pipeline_mode<synchronous>, transform_indices = @transform_2, window_bounds = array<i64: 1, 256>}, {pipeline_mode = #tpu.pipeline_mode<synchronous>, transform_indices = @transform_3, window_bounds = array<i64: 128, 1>}, {pipeline_mode = #tpu.pipeline_mode<synchronous>, transform_indices = @transform_4, window_bounds = array<i64: 128, 1>}, {pipeline_mode = #tpu.pipeline_mode<synchronous>, transform_indices = @transform_5, window_bounds = array<i64: 768, 256>}, {pipeline_mode = #tpu.pipeline_mode<synchronous>, transform_indices = @transform_6, window_bounds = array<i64: 1, 256>}, {pipeline_mode = #tpu.pipeline_mode<synchronous>, transform_indices = @transform_7, window_bounds = array<i64: 128, 1>}, {pipeline_mode = #tpu.pipeline_mode<synchronous>, transform_indices = @transform_8, window_bounds = array<i64: 128, 1>}, {pipeline_mode = #tpu.pipeline_mode<synchronous>, transform_indices = @transform_9, window_bounds = array<i64: 64, 128>}, {pipeline_mode = #tpu.pipeline_mode<synchronous>, transform_indices = @transform_10, window_bounds = array<i64: 768, 256>}, {pipeline_mode = #tpu.pipeline_mode<synchronous>, transform_indices = @transform_11, window_bounds = array<i64: 1, 256>}, {pipeline_mode = #tpu.pipeline_mode<synchronous>, transform_indices = @transform_12, window_bounds = array<i64: 64, 1>}, {pipeline_mode = #tpu.pipeline_mode<synchronous>, transform_indices = @transform_13, window_bounds = array<i64: 64, 1>}, {pipeline_mode = #tpu.pipeline_mode<synchronous>, transform_indices = @transform_14, window_bounds = array<i64: 32, 64>}, {pipeline_mode = #tpu.pipeline_mode<synchronous>, transform_indices = @transform_15, window_bounds = array<i64: 768, 256>}, {pipeline_mode = #tpu.pipeline_mode<synchronous>, transform_indices = @transform_16, window_bounds = array<i64: 1, 256>}, {pipeline_mode = #tpu.pipeline_mode<synchronous>, transform_indices = @transform_17, window_bounds = array<i64: 32, 1>}, {pipeline_mode = #tpu.pipeline_mode<synchronous>, transform_indices = @transform_18, window_bounds = array<i64: 32, 1>}, {pipeline_mode = #tpu.pipeline_mode<synchronous>, transform_indices = @transform_19, window_bounds = array<i64: 16, 32>}, {pipeline_mode = #tpu.pipeline_mode<synchronous>, transform_indices = @transform_20, window_bounds = array<i64: 768, 128>}, {pipeline_mode = #tpu.pipeline_mode<synchronous>, transform_indices = @transform_21, window_bounds = array<i64: 1, 128>}, {pipeline_mode = #tpu.pipeline_mode<synchronous>, transform_indices = @transform_22, window_bounds = array<i64: 16, 1>}, {pipeline_mode = #tpu.pipeline_mode<synchronous>, transform_indices = @transform_23, window_bounds = array<i64: 16, 1>}, {pipeline_mode = #tpu.pipeline_mode<synchronous>, transform_indices = @transform_24, window_bounds = array<i64: 8, 16>}, {pipeline_mode = #tpu.pipeline_mode<synchronous>, transform_indices = @transform_25, window_bounds = array<i64: 128, 512>}, {pipeline_mode = #tpu.pipeline_mode<synchronous>, transform_indices = @transform_26, window_bounds = array<i64: 1, 512>}, {pipeline_mode = #tpu.pipeline_mode<synchronous>, transform_indices = @transform_27, window_bounds = array<i64: 512, 512>}, {pipeline_mode = #tpu.pipeline_mode<synchronous>, transform_indices = @transform_28, window_bounds = array<i64: 1, 512>}, {pipeline_mode = #tpu.pipeline_mode<synchronous>, transform_indices = @transform_29, window_bounds = array<i64: 512, 128>}, {pipeline_mode = #tpu.pipeline_mode<synchronous>, transform_indices = @transform_30, window_bounds = array<i64: 1, 128>}, {transform_indices = @transform_31, window_bounds = array<i64: 8, 128>}]} {
    %c0 = arith.constant 0 : index
    %c0_0 = arith.constant 0 : index
    %0 = vector.load %arg1[%c0, %c0_0] : memref<128x128xf32, #tpu.memory_space<vmem>>, vector<128x128xf32>
    %c1_i32 = arith.constant 1 : i32
    %1 = tpu.dynamic_rotate %0 by %c1_i32 dim 0 : vector<128x128xf32>, i32 -> vector<128x128xf32>
    %c0_1 = arith.constant 0 : index
    %c0_2 = arith.constant 0 : index
    %2 = vector.load %arg4[%c0_1, %c0_2] : memref<128x1xf32, #tpu.memory_space<vmem>>, vector<128x1xf32>
    %3 = vector.broadcast %2 : vector<128x1xf32> to vector<128x128xf32>
    %4 = arith.mulf %1, %3 : vector<128x128xf32>
    %c127_i32 = arith.constant 127 : i32
    %5 = tpu.dynamic_rotate %0 by %c127_i32 dim 0 : vector<128x128xf32>, i32 -> vector<128x128xf32>
    %c0_3 = arith.constant 0 : index
    %c0_4 = arith.constant 0 : index
    %6 = vector.load %arg5[%c0_3, %c0_4] : memref<128x1xf32, #tpu.memory_space<vmem>>, vector<128x1xf32>
    %7 = vector.broadcast %6 : vector<128x1xf32> to vector<128x128xf32>
    %8 = arith.mulf %5, %7 : vector<128x128xf32>
    %9 = arith.truncf %4 : vector<128x128xf32> to vector<128x128xbf16>
    %10 = arith.truncf %0 : vector<128x128xf32> to vector<128x128xbf16>
    %11 = arith.truncf %8 : vector<128x128xf32> to vector<128x128xbf16>
    %12 = tpu.concatenate %9, %10, %11 in 1 : vector<128x128xbf16>, vector<128x128xbf16>, vector<128x128xbf16> -> vector<128x384xbf16>
    %c0_5 = arith.constant 0 : index
    %c0_6 = arith.constant 0 : index
    %13 = vector.load %arg2[%c0_5, %c0_6] : memref<384x256xbf16, #tpu.memory_space<vmem>>, vector<384x256xbf16>
    %cst = arith.constant dense<0.000000e+00> : vector<128x256xf32>
    %14 = tpu.matmul %12, %13, %cst {dimension_numbers = #tpu.dot_dimension_numbers<[1], [0], [0], [1], [0, 0, 1, 1], [], []>} : vector<128x384xbf16>, vector<384x256xbf16>, vector<128x256xf32> -> vector<128x256xf32>
    %c0_7 = arith.constant 0 : index
    %c0_8 = arith.constant 0 : index
    %15 = vector.load %arg3[%c0_7, %c0_8] : memref<1x256xf32, #tpu.memory_space<vmem>>, vector<1x256xf32>
    %16 = vector.broadcast %15 : vector<1x256xf32> to vector<128x256xf32>
    %17 = arith.addf %14, %16 : vector<128x256xf32>
    %cst_9 = arith.constant 0.000000e+00 : f32
    %18 = vector.broadcast %cst_9 : f32 to vector<128x256xf32>
    %19 = arith.maximumf %17, %18 : vector<128x256xf32>
    %c1_i32_10 = arith.constant 1 : i32
    %20 = tpu.dynamic_rotate %19 by %c1_i32_10 dim 0 : vector<128x256xf32>, i32 -> vector<128x256xf32>
    %c0_11 = arith.constant 0 : index
    %c0_12 = arith.constant 0 : index
    %21 = vector.load %arg8[%c0_11, %c0_12] : memref<128x1xf32, #tpu.memory_space<vmem>>, vector<128x1xf32>
    %22 = vector.broadcast %21 : vector<128x1xf32> to vector<128x256xf32>
    %23 = arith.mulf %20, %22 : vector<128x256xf32>
    %c127_i32_13 = arith.constant 127 : i32
    %24 = tpu.dynamic_rotate %19 by %c127_i32_13 dim 0 : vector<128x256xf32>, i32 -> vector<128x256xf32>
    %c0_14 = arith.constant 0 : index
    %c0_15 = arith.constant 0 : index
    %25 = vector.load %arg9[%c0_14, %c0_15] : memref<128x1xf32, #tpu.memory_space<vmem>>, vector<128x1xf32>
    %26 = vector.broadcast %25 : vector<128x1xf32> to vector<128x256xf32>
    %27 = arith.mulf %24, %26 : vector<128x256xf32>
    %28 = arith.truncf %23 : vector<128x256xf32> to vector<128x256xbf16>
    %29 = arith.truncf %19 : vector<128x256xf32> to vector<128x256xbf16>
    %30 = arith.truncf %27 : vector<128x256xf32> to vector<128x256xbf16>
    %31 = tpu.concatenate %28, %29, %30 in 1 : vector<128x256xbf16>, vector<128x256xbf16>, vector<128x256xbf16> -> vector<128x768xbf16>
    %c0_16 = arith.constant 0 : index
    %c0_17 = arith.constant 0 : index
    %32 = vector.load %arg6[%c0_16, %c0_17] : memref<768x256xbf16, #tpu.memory_space<vmem>>, vector<768x256xbf16>
    %cst_18 = arith.constant dense<0.000000e+00> : vector<128x256xf32>
    %33 = tpu.matmul %31, %32, %cst_18 {dimension_numbers = #tpu.dot_dimension_numbers<[1], [0], [0], [1], [0, 0, 1, 1], [], []>} : vector<128x768xbf16>, vector<768x256xbf16>, vector<128x256xf32> -> vector<128x256xf32>
    %c0_19 = arith.constant 0 : index
    %c0_20 = arith.constant 0 : index
    %34 = vector.load %arg7[%c0_19, %c0_20] : memref<1x256xf32, #tpu.memory_space<vmem>>, vector<1x256xf32>
    %35 = vector.broadcast %34 : vector<1x256xf32> to vector<128x256xf32>
    %36 = arith.addf %33, %35 : vector<128x256xf32>
    %cst_21 = arith.constant 0.000000e+00 : f32
    %37 = vector.broadcast %cst_21 : f32 to vector<128x256xf32>
    %38 = arith.maximumf %36, %37 : vector<128x256xf32>
    %c127_i32_22 = arith.constant 127 : i32
    %39 = tpu.dynamic_rotate %38 by %c127_i32_22 dim 0 : vector<128x256xf32>, i32 -> vector<128x256xf32>
    %40 = arith.maximumf %38, %39 : vector<128x256xf32>
    %c240_i32 = arith.constant 240 : i32
    %41 = tpu.dynamic_rotate %40 by %c240_i32 dim 1 : vector<128x256xf32>, i32 -> vector<128x256xf32>
    %42 = arith.maximumf %40, %41 : vector<128x256xf32>
    %c0_23 = arith.constant 0 : index
    %c0_24 = arith.constant 0 : index
    %43 = vector.load %arg10[%c0_23, %c0_24] : memref<64x128xbf16, #tpu.memory_space<vmem>>, vector<64x128xbf16>
    %44 = arith.truncf %42 : vector<128x256xf32> to vector<128x256xbf16>
    %cst_25 = arith.constant dense<0.000000e+00> : vector<64x256xf32>
    %45 = tpu.matmul %43, %44, %cst_25 {dimension_numbers = #tpu.dot_dimension_numbers<[1], [0], [0], [1], [0, 0, 1, 1], [], []>} : vector<64x128xbf16>, vector<128x256xbf16>, vector<64x256xf32> -> vector<64x256xf32>
    %c1_i32_26 = arith.constant 1 : i32
    %46 = tpu.dynamic_rotate %45 by %c1_i32_26 dim 0 : vector<64x256xf32>, i32 -> vector<64x256xf32>
    %c0_27 = arith.constant 0 : index
    %c0_28 = arith.constant 0 : index
    %47 = vector.load %arg13[%c0_27, %c0_28] : memref<64x1xf32, #tpu.memory_space<vmem>>, vector<64x1xf32>
    %48 = vector.broadcast %47 : vector<64x1xf32> to vector<64x256xf32>
    %49 = arith.mulf %46, %48 : vector<64x256xf32>
    %c63_i32 = arith.constant 63 : i32
    %50 = tpu.dynamic_rotate %45 by %c63_i32 dim 0 : vector<64x256xf32>, i32 -> vector<64x256xf32>
    %c0_29 = arith.constant 0 : index
    %c0_30 = arith.constant 0 : index
    %51 = vector.load %arg14[%c0_29, %c0_30] : memref<64x1xf32, #tpu.memory_space<vmem>>, vector<64x1xf32>
    %52 = vector.broadcast %51 : vector<64x1xf32> to vector<64x256xf32>
    %53 = arith.mulf %50, %52 : vector<64x256xf32>
    %54 = arith.truncf %49 : vector<64x256xf32> to vector<64x256xbf16>
    %55 = arith.truncf %45 : vector<64x256xf32> to vector<64x256xbf16>
    %56 = arith.truncf %53 : vector<64x256xf32> to vector<64x256xbf16>
    %57 = tpu.concatenate %54, %55, %56 in 1 : vector<64x256xbf16>, vector<64x256xbf16>, vector<64x256xbf16> -> vector<64x768xbf16>
    %c0_31 = arith.constant 0 : index
    %c0_32 = arith.constant 0 : index
    %58 = vector.load %arg11[%c0_31, %c0_32] : memref<768x256xbf16, #tpu.memory_space<vmem>>, vector<768x256xbf16>
    %cst_33 = arith.constant dense<0.000000e+00> : vector<64x256xf32>
    %59 = tpu.matmul %57, %58, %cst_33 {dimension_numbers = #tpu.dot_dimension_numbers<[1], [0], [0], [1], [0, 0, 1, 1], [], []>} : vector<64x768xbf16>, vector<768x256xbf16>, vector<64x256xf32> -> vector<64x256xf32>
    %c0_34 = arith.constant 0 : index
    %c0_35 = arith.constant 0 : index
    %60 = vector.load %arg12[%c0_34, %c0_35] : memref<1x256xf32, #tpu.memory_space<vmem>>, vector<1x256xf32>
    %61 = vector.broadcast %60 : vector<1x256xf32> to vector<64x256xf32>
    %62 = arith.addf %59, %61 : vector<64x256xf32>
    %cst_36 = arith.constant 0.000000e+00 : f32
    %63 = vector.broadcast %cst_36 : f32 to vector<64x256xf32>
    %64 = arith.maximumf %62, %63 : vector<64x256xf32>
    %c63_i32_37 = arith.constant 63 : i32
    %65 = tpu.dynamic_rotate %64 by %c63_i32_37 dim 0 : vector<64x256xf32>, i32 -> vector<64x256xf32>
    %66 = arith.maximumf %64, %65 : vector<64x256xf32>
    %c224_i32 = arith.constant 224 : i32
    %67 = tpu.dynamic_rotate %66 by %c224_i32 dim 1 : vector<64x256xf32>, i32 -> vector<64x256xf32>
    %68 = arith.maximumf %66, %67 : vector<64x256xf32>
    %c0_38 = arith.constant 0 : index
    %c0_39 = arith.constant 0 : index
    %69 = vector.load %arg15[%c0_38, %c0_39] : memref<32x64xbf16, #tpu.memory_space<vmem>>, vector<32x64xbf16>
    %70 = arith.truncf %68 : vector<64x256xf32> to vector<64x256xbf16>
    %cst_40 = arith.constant dense<0.000000e+00> : vector<32x256xf32>
    %71 = tpu.matmul %69, %70, %cst_40 {dimension_numbers = #tpu.dot_dimension_numbers<[1], [0], [0], [1], [0, 0, 1, 1], [], []>} : vector<32x64xbf16>, vector<64x256xbf16>, vector<32x256xf32> -> vector<32x256xf32>
    %c1_i32_41 = arith.constant 1 : i32
    %72 = tpu.dynamic_rotate %71 by %c1_i32_41 dim 0 : vector<32x256xf32>, i32 -> vector<32x256xf32>
    %c0_42 = arith.constant 0 : index
    %c0_43 = arith.constant 0 : index
    %73 = vector.load %arg18[%c0_42, %c0_43] : memref<32x1xf32, #tpu.memory_space<vmem>>, vector<32x1xf32>
    %74 = vector.broadcast %73 : vector<32x1xf32> to vector<32x256xf32>
    %75 = arith.mulf %72, %74 : vector<32x256xf32>
    %c31_i32 = arith.constant 31 : i32
    %76 = tpu.dynamic_rotate %71 by %c31_i32 dim 0 : vector<32x256xf32>, i32 -> vector<32x256xf32>
    %c0_44 = arith.constant 0 : index
    %c0_45 = arith.constant 0 : index
    %77 = vector.load %arg19[%c0_44, %c0_45] : memref<32x1xf32, #tpu.memory_space<vmem>>, vector<32x1xf32>
    %78 = vector.broadcast %77 : vector<32x1xf32> to vector<32x256xf32>
    %79 = arith.mulf %76, %78 : vector<32x256xf32>
    %80 = arith.truncf %75 : vector<32x256xf32> to vector<32x256xbf16>
    %81 = arith.truncf %71 : vector<32x256xf32> to vector<32x256xbf16>
    %82 = arith.truncf %79 : vector<32x256xf32> to vector<32x256xbf16>
    %83 = tpu.concatenate %80, %81, %82 in 1 : vector<32x256xbf16>, vector<32x256xbf16>, vector<32x256xbf16> -> vector<32x768xbf16>
    %c0_46 = arith.constant 0 : index
    %c0_47 = arith.constant 0 : index
    %84 = vector.load %arg16[%c0_46, %c0_47] : memref<768x256xbf16, #tpu.memory_space<vmem>>, vector<768x256xbf16>
    %cst_48 = arith.constant dense<0.000000e+00> : vector<32x256xf32>
    %85 = tpu.matmul %83, %84, %cst_48 {dimension_numbers = #tpu.dot_dimension_numbers<[1], [0], [0], [1], [0, 0, 1, 1], [], []>} : vector<32x768xbf16>, vector<768x256xbf16>, vector<32x256xf32> -> vector<32x256xf32>
    %c0_49 = arith.constant 0 : index
    %c0_50 = arith.constant 0 : index
    %86 = vector.load %arg17[%c0_49, %c0_50] : memref<1x256xf32, #tpu.memory_space<vmem>>, vector<1x256xf32>
    %87 = vector.broadcast %86 : vector<1x256xf32> to vector<32x256xf32>
    %88 = arith.addf %85, %87 : vector<32x256xf32>
    %cst_51 = arith.constant 0.000000e+00 : f32
    %89 = vector.broadcast %cst_51 : f32 to vector<32x256xf32>
    %90 = arith.maximumf %88, %89 : vector<32x256xf32>
    %c31_i32_52 = arith.constant 31 : i32
    %91 = tpu.dynamic_rotate %90 by %c31_i32_52 dim 0 : vector<32x256xf32>, i32 -> vector<32x256xf32>
    %92 = arith.maximumf %90, %91 : vector<32x256xf32>
    %c192_i32 = arith.constant 192 : i32
    %93 = tpu.dynamic_rotate %92 by %c192_i32 dim 1 : vector<32x256xf32>, i32 -> vector<32x256xf32>
    %94 = arith.maximumf %92, %93 : vector<32x256xf32>
    %c0_53 = arith.constant 0 : index
    %c0_54 = arith.constant 0 : index
    %95 = vector.load %arg20[%c0_53, %c0_54] : memref<16x32xbf16, #tpu.memory_space<vmem>>, vector<16x32xbf16>
    %96 = arith.truncf %94 : vector<32x256xf32> to vector<32x256xbf16>
    %cst_55 = arith.constant dense<0.000000e+00> : vector<16x256xf32>
    %97 = tpu.matmul %95, %96, %cst_55 {dimension_numbers = #tpu.dot_dimension_numbers<[1], [0], [0], [1], [0, 0, 1, 1], [], []>} : vector<16x32xbf16>, vector<32x256xbf16>, vector<16x256xf32> -> vector<16x256xf32>
    %c1_i32_56 = arith.constant 1 : i32
    %98 = tpu.dynamic_rotate %97 by %c1_i32_56 dim 0 : vector<16x256xf32>, i32 -> vector<16x256xf32>
    %c0_57 = arith.constant 0 : index
    %c0_58 = arith.constant 0 : index
    %99 = vector.load %arg23[%c0_57, %c0_58] : memref<16x1xf32, #tpu.memory_space<vmem>>, vector<16x1xf32>
    %100 = vector.broadcast %99 : vector<16x1xf32> to vector<16x256xf32>
    %101 = arith.mulf %98, %100 : vector<16x256xf32>
    %c15_i32 = arith.constant 15 : i32
    %102 = tpu.dynamic_rotate %97 by %c15_i32 dim 0 : vector<16x256xf32>, i32 -> vector<16x256xf32>
    %c0_59 = arith.constant 0 : index
    %c0_60 = arith.constant 0 : index
    %103 = vector.load %arg24[%c0_59, %c0_60] : memref<16x1xf32, #tpu.memory_space<vmem>>, vector<16x1xf32>
    %104 = vector.broadcast %103 : vector<16x1xf32> to vector<16x256xf32>
    %105 = arith.mulf %102, %104 : vector<16x256xf32>
    %106 = arith.truncf %101 : vector<16x256xf32> to vector<16x256xbf16>
    %107 = arith.truncf %97 : vector<16x256xf32> to vector<16x256xbf16>
    %108 = arith.truncf %105 : vector<16x256xf32> to vector<16x256xbf16>
    %109 = tpu.concatenate %106, %107, %108 in 1 : vector<16x256xbf16>, vector<16x256xbf16>, vector<16x256xbf16> -> vector<16x768xbf16>
    %c0_61 = arith.constant 0 : index
    %c0_62 = arith.constant 0 : index
    %110 = vector.load %arg21[%c0_61, %c0_62] : memref<768x128xbf16, #tpu.memory_space<vmem>>, vector<768x128xbf16>
    %cst_63 = arith.constant dense<0.000000e+00> : vector<16x128xf32>
    %111 = tpu.matmul %109, %110, %cst_63 {dimension_numbers = #tpu.dot_dimension_numbers<[1], [0], [0], [1], [0, 0, 1, 1], [], []>} : vector<16x768xbf16>, vector<768x128xbf16>, vector<16x128xf32> -> vector<16x128xf32>
    %c0_64 = arith.constant 0 : index
    %c0_65 = arith.constant 0 : index
    %112 = vector.load %arg22[%c0_64, %c0_65] : memref<1x128xf32, #tpu.memory_space<vmem>>, vector<1x128xf32>
    %113 = vector.broadcast %112 : vector<1x128xf32> to vector<16x128xf32>
    %114 = arith.addf %111, %113 : vector<16x128xf32>
    %cst_66 = arith.constant 0.000000e+00 : f32
    %115 = vector.broadcast %cst_66 : f32 to vector<16x128xf32>
    %116 = arith.maximumf %114, %115 : vector<16x128xf32>
    %c0_67 = arith.constant 0 : index
    %c0_68 = arith.constant 0 : index
    %117 = vector.load %arg25[%c0_67, %c0_68] : memref<8x16xbf16, #tpu.memory_space<vmem>>, vector<8x16xbf16>
    %118 = arith.truncf %116 : vector<16x128xf32> to vector<16x128xbf16>
    %cst_69 = arith.constant dense<0.000000e+00> : vector<8x128xf32>
    %119 = tpu.matmul %117, %118, %cst_69 {dimension_numbers = #tpu.dot_dimension_numbers<[1], [0], [0], [1], [0, 0, 1, 1], [], []>} : vector<8x16xbf16>, vector<16x128xbf16>, vector<8x128xf32> -> vector<8x128xf32>
    %120 = arith.truncf %119 : vector<8x128xf32> to vector<8x128xbf16>
    %c0_70 = arith.constant 0 : index
    %c0_71 = arith.constant 0 : index
    %121 = vector.load %arg26[%c0_70, %c0_71] : memref<128x512xbf16, #tpu.memory_space<vmem>>, vector<128x512xbf16>
    %cst_72 = arith.constant dense<0.000000e+00> : vector<8x512xf32>
    %122 = tpu.matmul %120, %121, %cst_72 {dimension_numbers = #tpu.dot_dimension_numbers<[1], [0], [0], [1], [0, 0, 1, 1], [], []>} : vector<8x128xbf16>, vector<128x512xbf16>, vector<8x512xf32> -> vector<8x512xf32>
    %c0_73 = arith.constant 0 : index
    %c0_74 = arith.constant 0 : index
    %123 = vector.load %arg27[%c0_73, %c0_74] : memref<1x512xf32, #tpu.memory_space<vmem>>, vector<1x512xf32>
    %124 = vector.broadcast %123 : vector<1x512xf32> to vector<8x512xf32>
    %125 = arith.addf %122, %124 : vector<8x512xf32>
    %cst_75 = arith.constant 0.000000e+00 : f32
    %126 = vector.broadcast %cst_75 : f32 to vector<8x512xf32>
    %127 = arith.maximumf %125, %126 : vector<8x512xf32>
    %128 = arith.truncf %127 : vector<8x512xf32> to vector<8x512xbf16>
    %c0_76 = arith.constant 0 : index
    %c0_77 = arith.constant 0 : index
    %129 = vector.load %arg28[%c0_76, %c0_77] : memref<512x512xbf16, #tpu.memory_space<vmem>>, vector<512x512xbf16>
    %cst_78 = arith.constant dense<0.000000e+00> : vector<8x512xf32>
    %130 = tpu.matmul %128, %129, %cst_78 {dimension_numbers = #tpu.dot_dimension_numbers<[1], [0], [0], [1], [0, 0, 1, 1], [], []>} : vector<8x512xbf16>, vector<512x512xbf16>, vector<8x512xf32> -> vector<8x512xf32>
    %c0_79 = arith.constant 0 : index
    %c0_80 = arith.constant 0 : index
    %131 = vector.load %arg29[%c0_79, %c0_80] : memref<1x512xf32, #tpu.memory_space<vmem>>, vector<1x512xf32>
    %132 = vector.broadcast %131 : vector<1x512xf32> to vector<8x512xf32>
    %133 = arith.addf %130, %132 : vector<8x512xf32>
    %cst_81 = arith.constant 0.000000e+00 : f32
    %134 = vector.broadcast %cst_81 : f32 to vector<8x512xf32>
    %135 = arith.maximumf %133, %134 : vector<8x512xf32>
    %136 = arith.truncf %135 : vector<8x512xf32> to vector<8x512xbf16>
    %c0_82 = arith.constant 0 : index
    %c0_83 = arith.constant 0 : index
    %137 = vector.load %arg30[%c0_82, %c0_83] : memref<512x128xbf16, #tpu.memory_space<vmem>>, vector<512x128xbf16>
    %cst_84 = arith.constant dense<0.000000e+00> : vector<8x128xf32>
    %138 = tpu.matmul %136, %137, %cst_84 {dimension_numbers = #tpu.dot_dimension_numbers<[1], [0], [0], [1], [0, 0, 1, 1], [], []>} : vector<8x512xbf16>, vector<512x128xbf16>, vector<8x128xf32> -> vector<8x128xf32>
    %c0_85 = arith.constant 0 : index
    %c0_86 = arith.constant 0 : index
    %139 = vector.load %arg31[%c0_85, %c0_86] : memref<1x128xf32, #tpu.memory_space<vmem>>, vector<1x128xf32>
    %140 = vector.broadcast %139 : vector<1x128xf32> to vector<8x128xf32>
    %141 = arith.addf %138, %140 : vector<8x128xf32>
    %c0_87 = arith.constant 0 : index
    %c0_88 = arith.constant 0 : index
    %142 = vector.load %arg32[%c0_87, %c0_88] : memref<8x128xf32, #tpu.memory_space<vmem>>, vector<8x128xf32>
    tpu.vector_store %arg32[%c0_87, %c0_88], %141 {strides = array<i32>} : memref<8x128xf32, #tpu.memory_space<vmem>>, vector<8x128xf32>,
    return
  }
  func.func @transform_0(%arg0: i32) -> (i32, i32) {
    %c0_i32 = arith.constant 0 : i32
    %c0_i32_0 = arith.constant 0 : i32
    return %arg0, %c0_i32 : i32, i32
  }
  func.func @transform_1(%arg0: i32) -> (i32, i32) {
    %c0_i32 = arith.constant 0 : i32
    %c0_i32_0 = arith.constant 0 : i32
    %c0_i32_1 = arith.constant 0 : i32
    return %c0_i32, %c0_i32_0 : i32, i32
  }
  func.func @transform_2(%arg0: i32) -> (i32, i32) {
    %c0_i32 = arith.constant 0 : i32
    %c0_i32_0 = arith.constant 0 : i32
    %c0_i32_1 = arith.constant 0 : i32
    return %c0_i32, %c0_i32_0 : i32, i32
  }
  func.func @transform_3(%arg0: i32) -> (i32, i32) {
    %c0_i32 = arith.constant 0 : i32
    %c0_i32_0 = arith.constant 0 : i32
    %c0_i32_1 = arith.constant 0 : i32
    return %c0_i32, %c0_i32_0 : i32, i32
  }
  func.func @transform_4(%arg0: i32) -> (i32, i32) {
    %c0_i32 = arith.constant 0 : i32
    %c0_i32_0 = arith.constant 0 : i32
    %c0_i32_1 = arith.constant 0 : i32
    return %c0_i32, %c0_i32_0 : i32, i32
  }
  func.func @transform_5(%arg0: i32) -> (i32, i32) {
    %c0_i32 = arith.constant 0 : i32
    %c0_i32_0 = arith.constant 0 : i32
    %c0_i32_1 = arith.constant 0 : i32
    return %c0_i32, %c0_i32_0 : i32, i32
  }
  func.func @transform_6(%arg0: i32) -> (i32, i32) {
    %c0_i32 = arith.constant 0 : i32
    %c0_i32_0 = arith.constant 0 : i32
    %c0_i32_1 = arith.constant 0 : i32
    return %c0_i32, %c0_i32_0 : i32, i32
  }
  func.func @transform_7(%arg0: i32) -> (i32, i32) {
    %c0_i32 = arith.constant 0 : i32
    %c0_i32_0 = arith.constant 0 : i32
    %c0_i32_1 = arith.constant 0 : i32
    return %c0_i32, %c0_i32_0 : i32, i32
  }
  func.func @transform_8(%arg0: i32) -> (i32, i32) {
    %c0_i32 = arith.constant 0 : i32
    %c0_i32_0 = arith.constant 0 : i32
    %c0_i32_1 = arith.constant 0 : i32
    return %c0_i32, %c0_i32_0 : i32, i32
  }
  func.func @transform_9(%arg0: i32) -> (i32, i32) {
    %c0_i32 = arith.constant 0 : i32
    %c0_i32_0 = arith.constant 0 : i32
    %c0_i32_1 = arith.constant 0 : i32
    return %c0_i32, %c0_i32_0 : i32, i32
  }
  func.func @transform_10(%arg0: i32) -> (i32, i32) {
    %c0_i32 = arith.constant 0 : i32
    %c0_i32_0 = arith.constant 0 : i32
    %c0_i32_1 = arith.constant 0 : i32
    return %c0_i32, %c0_i32_0 : i32, i32
  }
  func.func @transform_11(%arg0: i32) -> (i32, i32) {
    %c0_i32 = arith.constant 0 : i32
    %c0_i32_0 = arith.constant 0 : i32
    %c0_i32_1 = arith.constant 0 : i32
    return %c0_i32, %c0_i32_0 : i32, i32
  }
  func.func @transform_12(%arg0: i32) -> (i32, i32) {
    %c0_i32 = arith.constant 0 : i32
    %c0_i32_0 = arith.constant 0 : i32
    %c0_i32_1 = arith.constant 0 : i32
    return %c0_i32, %c0_i32_0 : i32, i32
  }
  func.func @transform_13(%arg0: i32) -> (i32, i32) {
    %c0_i32 = arith.constant 0 : i32
    %c0_i32_0 = arith.constant 0 : i32
    %c0_i32_1 = arith.constant 0 : i32
    return %c0_i32, %c0_i32_0 : i32, i32
  }
  func.func @transform_14(%arg0: i32) -> (i32, i32) {
    %c0_i32 = arith.constant 0 : i32
    %c0_i32_0 = arith.constant 0 : i32
    %c0_i32_1 = arith.constant 0 : i32
    return %c0_i32, %c0_i32_0 : i32, i32
  }
  func.func @transform_15(%arg0: i32) -> (i32, i32) {
    %c0_i32 = arith.constant 0 : i32
    %c0_i32_0 = arith.constant 0 : i32
    %c0_i32_1 = arith.constant 0 : i32
    return %c0_i32, %c0_i32_0 : i32, i32
  }
  func.func @transform_16(%arg0: i32) -> (i32, i32) {
    %c0_i32 = arith.constant 0 : i32
    %c0_i32_0 = arith.constant 0 : i32
    %c0_i32_1 = arith.constant 0 : i32
    return %c0_i32, %c0_i32_0 : i32, i32
  }
  func.func @transform_17(%arg0: i32) -> (i32, i32) {
    %c0_i32 = arith.constant 0 : i32
    %c0_i32_0 = arith.constant 0 : i32
    %c0_i32_1 = arith.constant 0 : i32
    return %c0_i32, %c0_i32_0 : i32, i32
  }
  func.func @transform_18(%arg0: i32) -> (i32, i32) {
    %c0_i32 = arith.constant 0 : i32
    %c0_i32_0 = arith.constant 0 : i32
    %c0_i32_1 = arith.constant 0 : i32
    return %c0_i32, %c0_i32_0 : i32, i32
  }
  func.func @transform_19(%arg0: i32) -> (i32, i32) {
    %c0_i32 = arith.constant 0 : i32
    %c0_i32_0 = arith.constant 0 : i32
    %c0_i32_1 = arith.constant 0 : i32
    return %c0_i32, %c0_i32_0 : i32, i32
  }
  func.func @transform_20(%arg0: i32) -> (i32, i32) {
    %c0_i32 = arith.constant 0 : i32
    %c0_i32_0 = arith.constant 0 : i32
    %c0_i32_1 = arith.constant 0 : i32
    return %c0_i32, %c0_i32_0 : i32, i32
  }
  func.func @transform_21(%arg0: i32) -> (i32, i32) {
    %c0_i32 = arith.constant 0 : i32
    %c0_i32_0 = arith.constant 0 : i32
    %c0_i32_1 = arith.constant 0 : i32
    return %c0_i32, %c0_i32_0 : i32, i32
  }
  func.func @transform_22(%arg0: i32) -> (i32, i32) {
    %c0_i32 = arith.constant 0 : i32
    %c0_i32_0 = arith.constant 0 : i32
    %c0_i32_1 = arith.constant 0 : i32
    return %c0_i32, %c0_i32_0 : i32, i32
  }
  func.func @transform_23(%arg0: i32) -> (i32, i32) {
    %c0_i32 = arith.constant 0 : i32
    %c0_i32_0 = arith.constant 0 : i32
    %c0_i32_1 = arith.constant 0 : i32
    return %c0_i32, %c0_i32_0 : i32, i32
  }
  func.func @transform_24(%arg0: i32) -> (i32, i32) {
    %c0_i32 = arith.constant 0 : i32
    %c0_i32_0 = arith.constant 0 : i32
    %c0_i32_1 = arith.constant 0 : i32
    return %c0_i32, %c0_i32_0 : i32, i32
  }
  func.func @transform_25(%arg0: i32) -> (i32, i32) {
    %c0_i32 = arith.constant 0 : i32
    %c0_i32_0 = arith.constant 0 : i32
    %c0_i32_1 = arith.constant 0 : i32
    return %c0_i32, %c0_i32_0 : i32, i32
  }
  func.func @transform_26(%arg0: i32) -> (i32, i32) {
    %c0_i32 = arith.constant 0 : i32
    %c0_i32_0 = arith.constant 0 : i32
    %c0_i32_1 = arith.constant 0 : i32
    return %c0_i32, %c0_i32_0 : i32, i32
  }
  func.func @transform_27(%arg0: i32) -> (i32, i32) {
    %c0_i32 = arith.constant 0 : i32
    %c0_i32_0 = arith.constant 0 : i32
    %c0_i32_1 = arith.constant 0 : i32
    return %c0_i32, %c0_i32_0 : i32, i32
  }
  func.func @transform_28(%arg0: i32) -> (i32, i32) {
    %c0_i32 = arith.constant 0 : i32
    %c0_i32_0 = arith.constant 0 : i32
    %c0_i32_1 = arith.constant 0 : i32
    return %c0_i32, %c0_i32_0 : i32, i32
  }
  func.func @transform_29(%arg0: i32) -> (i32, i32) {
    %c0_i32 = arith.constant 0 : i32
    %c0_i32_0 = arith.constant 0 : i32
    %c0_i32_1 = arith.constant 0 : i32
    return %c0_i32, %c0_i32_0 : i32, i32
  }
  func.func @transform_30(%arg0: i32) -> (i32, i32) {
    %c0_i32 = arith.constant 0 : i32
    %c0_i32_0 = arith.constant 0 : i32
    %c0_i32_1 = arith.constant 0 : i32
    return %c0_i32, %c0_i32_0 : i32, i32
  }
  func.func @transform_31(%arg0: i32) -> (i32, i32) {
    %c0_i32 = arith.constant 0 : i32
    %c0_i32_0 = arith.constant 0 : i32
    return %arg0, %c0_i32 : i32, i32
  }
}

</mosaic_0001>

<bundles_post_ra>
// kernel: masked_vgg_addlinear_forward.1
= control target key start
LH: loop header
LB: loop body
LE: loop exit
PB: predicated region body
PF: predicated region fallthrough
CT: control target
= control target key end

     0   :  { %s9962_s6 = smov 1   ;;  %s9963_s10 = smov 2   ;;  %s13110_s0 = inlined_call_operand.smem [shape: u32[32], index: -1, kind: input, shape index: {}] }
   0x1   :  { %s10008_s5 = sld [smem:[%s13110_s0]]   ;;  %s9964_s14 = smov 3  }
   0x2   :  { %s10013_s9 = sld [smem:[%s13110_s0 + %s9962_s6]]   ;;  %s9965_s18 = smov 4  }
   0x3   :  { %s10018_s13 = sld [smem:[%s13110_s0 + %s9963_s10]]   ;;  %s9966_s22 = smov 5  }
   0x4   :  { %s10023_s17 = sld [smem:[%s13110_s0 + %s9964_s14]]   ;;  %s9967_s26 = smov 6  }
   0x5   :  { %s10028_s21 = sld [smem:[%s13110_s0 + %s9965_s18]]   ;;  %s9968_s30 = smov 7  }
   0x6   :  { %s10033_s25 = sld [smem:[%s13110_s0 + %s9966_s22]]   ;;  %s9969_s4 = smov 8  }
   0x7   :  { %13185 = sst [smem:[#allocation5_spill]] %s10008_s5  ;;  %s9970_s10 = smov 9  }
   0x8   :  { %13186 = sst [smem:[#allocation6_spill]] %s10013_s9  ;;  %s9971_s15 = smov 10  }
   0x9   :  { %s10038_s29 = sld [smem:[%s13110_s0 + %s9967_s26]]   ;;  %s9972_s20 = smov 11  }
   0xa   :  { %s10043_s3 = sld [smem:[%s13110_s0 + %s9968_s30]]   ;;  %s9973_s26 = smov 12  }
   0xb   :  { %s10048_s8 = sld [smem:[%s13110_s0 + %s9969_s4]]   ;;  %s9974_s1 = smov 13  }
   0xc   :  { %s10053_s14 = sld [smem:[%s13110_s0 + %s9970_s10]]   ;;  %s9975_s7 = smov 14  }
   0xd   :  { %s10058_s19 = sld [smem:[%s13110_s0 + %s9971_s15]]   ;;  %s9976_s15 = smov 15  }
   0xe   :  { %s10063_s24 = sld [smem:[%s13110_s0 + %s9972_s20]]   ;;  %s9977_s22 = smov 16  }
   0xf   :  { %s10068_s30 = sld [smem:[%s13110_s0 + %s9973_s26]]   ;;  %s9978_s28 = smov 17  }
  0x10   :  { %13187 = sst [smem:[#allocation7_spill]] %s10043_s3 }
  0x11   :  { %13188 = sst [smem:[#allocation8_spill]] %s10048_s8 }
  0x12   :  { %s10073_s6 = sld [smem:[%s13110_s0 + %s9974_s1]]  }
  0x13   :  { %s10078_s12 = sld [smem:[%s13110_s0 + %s9975_s7]]   ;;  %s9979_s7 = smov 18  }
  0x14   :  { %s10083_s20 = sld [smem:[%s13110_s0 + %s9976_s15]]   ;;  %s9980_s15 = smov 19  }
  0x15   :  { %s10088_s27 = sld [smem:[%s13110_s0 + %s9977_s22]]   ;;  %s9981_s22 = smov 20  }
  0x16   :  { %s10093_s4 = sld [smem:[%s13110_s0 + %s9978_s28]]   ;;  %s9982_s28 = smov 21  }
  0x18   :  { %13189 = sst [smem:[#allocation9_spill]] %s10073_s6 }
  0x19   :  { %13190 = sst [smem:[#allocation10_spill]] %s10078_s12 }
  0x1a   :  { %13191 = sst [smem:[#allocation11_spill]] %s10083_s20 }
  0x1b   :  { %13192 = sst [smem:[#allocation12_spill]] %s10088_s27 }
  0x1c   :  { %13193 = sst [smem:[#allocation13_spill]] %s10093_s4 }
  0x1d   :  { %s10098_s12 = sld [smem:[%s13110_s0 + %s9979_s7]]   ;;  %s9983_s7 = smov 22  }
  0x1e   :  { %s10103_s20 = sld [smem:[%s13110_s0 + %s9980_s15]]   ;;  %s9984_s15 = smov 23  }
  0x1f   :  { %s10108_s27 = sld [smem:[%s13110_s0 + %s9981_s22]]   ;;  %s9985_s22 = smov 24  }
  0x20   :  { %s10113_s4 = sld [smem:[%s13110_s0 + %s9982_s28]]   ;;  %s9986_s28 = smov 25  }
  0x23   :  { %13194 = sst [smem:[#allocation14_spill]] %s10098_s12 }
  0x24   :  { %13195 = sst [smem:[#allocation15_spill]] %s10103_s20 }
  0x25   :  { %13196 = sst [smem:[#allocation16_spill]] %s10108_s27 }
  0x26   :  { %13197 = sst [smem:[#allocation17_spill]] %s10113_s4 }
  0x27   :  { %s10118_s12 = sld [smem:[%s13110_s0 + %s9983_s7]]   ;;  %s9987_s7 = smov 26  }
  0x28   :  { %s10123_s20 = sld [smem:[%s13110_s0 + %s9984_s15]]   ;;  %s9988_s15 = smov 27  }
  0x29   :  { %s10128_s27 = sld [smem:[%s13110_s0 + %s9985_s22]]   ;;  %s9989_s22 = smov 28  }
  0x2a   :  { %s10133_s4 = sld [smem:[%s13110_s0 + %s9986_s28]]   ;;  %s9990_s28 = smov 29  }
  0x2d   :  { %13198 = sst [smem:[#allocation18_spill]] %s10118_s12 }
  0x2e   :  { %13199 = sst [smem:[#allocation19_spill]] %s10123_s20 }
  0x2f   :  { %13200 = sst [smem:[#allocation20_spill]] %s10128_s27 }
  0x30   :  { %13201 = sst [smem:[#allocation21_spill]] %s10133_s4 }
  0x31   :  { %s10138_s12 = sld [smem:[%s13110_s0 + %s9987_s7]]   ;;  %s9991_s7 = smov 30  }
  0x32   :  { %s10143_s20 = sld [smem:[%s13110_s0 + %s9988_s15]]   ;;  %s9992_s15 = smov 31  }
  0x33   :  { %s10148_s27 = sld [smem:[%s13110_s0 + %s9989_s22]]  }
  0x34   :  { %s10153_s4 = sld [smem:[%s13110_s0 + %s9990_s28]]  }
  0x37   :  { %13202 = sst [smem:[#allocation22_spill]] %s10138_s12 }
  0x38   :  { %13203 = sst [smem:[#allocation23_spill]] %s10143_s20 }
  0x39   :  { %s10158_s12 = sld [smem:[%s13110_s0 + %s9991_s7]]  }
  0x3a   :  { %13204 = sst [smem:[#allocation24_spill]] %s10153_s4 }
  0x3b   :  { %s10163_s20 = sld [smem:[%s13110_s0 + %s9992_s15]]  }
  0x3f   :  { %13205 = sst [smem:[#allocation25_spill]] %s10158_s12 }
  0x40   :  { %68 = vsyncpa [#allocation3], 0 }
  0x41   :  { %70 = vsyncpa [#allocation3 + $0x1], 0  ;;  %s10165_s22 = smov 0   ;;  %s10167_s23 = smov 0  }
  0x42   :  { %s10169_s26 = smov 0   ;;  %s10171_s28 = smov 0  }
  0x43 LB: > { %s13206_s9 = sld [smem:[#allocation6_spill]]  ;;  %s10186_s0 = sadd.s32 4294967295, %s9960_s28   ;;  %s9948_s22 = sphi %s10165_s22, %s13401_s22   ;;  %s9960_s28 = sphi %s10171_s28, %s13404_s28   ;;  %s9956_s26 = sphi %s10169_s26, %s13403_s26   ;;  %s9952_s23 = sphi %s10167_s23, %s13402_s23  }
  0x44   : > { %s13207_s8 = sld [smem:[#allocation8_spill]]  ;;  %s8132_s1 = sadd.s32 4294967294, %s9960_s28  }
  0x45   : > { %s13208_s4 = sld [smem:[#allocation24_spill]]  ;;  %s10190_s2 = sadd.s32 1, %s9960_s28  }
  0x46   : > { %s13209_s6 = sld [smem:[#allocation9_spill]]  ;;  %s739_s7 = sadd.s32 1, %s9956_s26 }
  0x47   : > { %s13210_s3 = sld [smem:[#allocation7_spill]]  ;;  %s736_s10 = ssub.s32 %s9960_s28, %s10190_s2 }
  0x48   : > { %p749_p0 = scmp.ne.s32.totalorder %s9956_s26, %s9952_s23  ;;  %p737_p1 = scmp.eq.s32.totalorder %s736_s10, 0 }
  0x49   : > { %p750_p2 = scmp.eq.s32.totalorder %s10186_s0, 1  ;;  %p755_p3 = scmp.ne.s32.totalorder %s9952_s23, %s9948_s22 }
  0x4a   : > { %p756_p4 = scmp.eq.s32.totalorder %s8132_s1, 1  ;;  %p8135_p7 = scmp.ge.s32.totalorder %s9960_s28, 1 }
  0x4b   : > { %s10201_s11 = scalar_select %p737_p1, %s9956_s26, %s739_s7  }
  0x4c   : > { %p10203_p5 = por %p750_p2, %p749_p0  ;;  %p10207_p6 = por %p756_p4, %p755_p3 }
  0x4d   : > { %p873_p8 = scmp.lt.s32.totalorder %s9960_s28, 3 }
  0x4f   : > { %p874_p9 = pnand %p8135_p7, %p873_p8 }
  0x51   : > { %877 = sbr.rel (%p874_p9) target bundleno = 3616 (0xe20), region = 144 }
  0x56   : > { %v1156_v0 = vld [vmem:[%s10028_s21] sm:$0xff]  ;;  %v13123_v2 = vmov 0   ;;  %v1157_v3 = vld [vmem:[%s10028_s21 + $0x8] sm:$0xff]  ;;  %v1014_v5 = vld [vmem:[%s10023_s17 + $0x18] sm:$0xff]  ;;  %s8137_s18 = sshll.u32 %s10186_s0, 4  ;;  %v13120_v45 = vlaneseq  ;;  %s13213_s5 = sld [smem:[#allocation5_spill]] }
  0x57   : > { %v1011_v1 = vld [vmem:[%s10023_s17] sm:$0xff]  ;;  %8927 = vset.pattern.permute.xlu1 %v13123_v2  ;;  %8926 = vset.pattern.permute.xlu0 %v13123_v2  ;;  %v1012_v4 = vld [vmem:[%s10023_s17 + $0x8] sm:$0xff]  ;;  %v1013_v6 = vld [vmem:[%s10023_s17 + $0x10] sm:$0xff]  ;;  %p954_p10 = scmp.lt.s32.totalorder %s8137_s18, 31  ;;  %s9994_s10 = smov 112   ;;  %vm4763_vm4 = vcmask 523264  }
  0x58   : > { %1174 = vperm.xlu1 %8927, %v1156_v0   ;;  %1029 = vperm.xlu0 %8926, %v1011_v1   ;;  %v1159_v7 = vld [vmem:[%s10028_s21 + $0x18] sm:$0xff]  ;;  %v1158_v8 = vld [vmem:[%s10028_s21 + $0x10] sm:$0xff]  ;;  %v1016_v11 = vld [vmem:[%s10023_s17 + $0x28] sm:$0xff]  ;;  %v10270_v54 = vshrl.u32 %v13120_v45, 7  ;;  %vm5754_vm6 = vcmask 261120   ;;  %vm9998_vm7 = vmmov 0  }
  0x59   : > { %1737 = vmatprep.mubr.bf16.mxu1 %v13123_v2  ;;  %v9068_v9 = vld [vmem:[%s13206_s9 + $0x74] ss:$8 sps:$4 sm:$0xff]   ;;  %v9070_v10 = vld [vmem:[%s13206_s9 + $0x70] ss:$8 sps:$4 sm:$0xff]   ;;  %v9071_v12 = vld [vmem:[%s13206_s9 + $0x64] ss:$8 sps:$4 sm:$0xff]  }
  0x5a   : > { %v1015_v13 = vld [vmem:[%s10023_s17 + $0x20] sm:$0xff]  ;;  %1592 = vmatprep.subr.bf16.mxu0 %v9068_v9  ;;  %v9074_v15 = vld [vmem:[%s13206_s9 + $0x54] ss:$8 sps:$4 sm:$0xff]   ;;  %v1161_v16 = vld [vmem:[%s10028_s21 + $0x28] sm:$0xff]  ;;  %s13406_s18 = smov (!%p954_p10, %s8137_s18), 31  ;;  %vm1139_vm0 = vcmp.lt.s32.totalorder %v10270_v54, 7 }
  0x5b   : > { %1593 = vmatpush1.bf16.msra.mxu0 %v9070_v10  ;;  %v9073_v14 = vld [vmem:[%s13206_s9 + $0x60] ss:$8 sps:$4 sm:$0xff]   ;;  %v9076_v18 = vld [vmem:[%s13206_s9 + $0x50] ss:$8 sps:$4 sm:$0xff]   ;;  %v9077_v19 = vld [vmem:[%s13206_s9 + $0x44] ss:$8 sps:$4 sm:$0xff]  }
  0x5c   : > { %1179 = vperm.xlu1 %8927, %v1157_v3   ;;  %1034 = vperm.xlu0 %8926, %v1012_v4   ;;  %v1160_v17 = vld [vmem:[%s10028_s21 + $0x20] sm:$0xff]  ;;  %v1018_v20 = vld [vmem:[%s10023_s17 + $0x38] sm:$0xff]  ;;  %v1017_v21 = vld [vmem:[%s10023_s17 + $0x30] sm:$0xff]  ;;  %s8138_s1 = sshll.u32 %s13406_s18, 3  ;;  %vm994_vm1 = vcmp.lt.s32.totalorder %v10270_v54, 1  ;;  %s9995_s18 = smov 96  }
  0x5d   : > { %1594 = vmatprep.subr.bf16.mxu0 %v9071_v12  ;;  %v9079_v22 = vld [vmem:[%s13206_s9 + $0x40] ss:$8 sps:$4 sm:$0xff]   ;;  %v9080_v23 = vld [vmem:[%s13206_s9 + $0x34] ss:$8 sps:$4 sm:$0xff]   ;;  %v9082_v26 = vld [vmem:[%s13206_s9 + $0x30] ss:$8 sps:$4 sm:$0xff]   ;;  %s10274_s7 = scalar_lea.vmem %s13213_s5, %s8138_s1 }
  0x5e   : > { %v1163_v24 = vld [vmem:[%s10028_s21 + $0x38] sm:$0xff]  ;;  %v1162_v25 = vld [vmem:[%s10028_s21 + $0x30] sm:$0xff]  ;;  %v9083_v27 = vld [vmem:[%s13206_s9 + $0x24] ss:$8 sps:$4 sm:$0xff]   ;;  %s13385_s1 = sld [smem:[#allocation13_spill]]  ;;  %vm6373_vm8 = vcmask 130048  }
  0x5f   : > { %1595 = vmatpush1.bf16.msra.mxu0 %v9073_v14  ;;  %v9094_v28 = vld [vmem:[%s13206_s9 + $0x174] ss:$8 sps:$4 sm:$0xff]   ;;  %v1020_v29 = vld [vmem:[%s10023_s17 + $0x48] sm:$0xff]  ;;  %v9097_v30 = vld [vmem:[%s13206_s9 + $0x170] ss:$8 sps:$4 sm:$0xff]   ;;  %s13393_s5 = sld [smem:[#allocation16_spill]] }
  0x60   : > { %1044 = vperm.xlu1 %8927, %v1014_v5   ;;  %1039 = vperm.xlu0 %8926, %v1013_v6   ;;  %v1019_v31 = vld [vmem:[%s10023_s17 + $0x40] sm:$0xff]  ;;  %v1165_v34 = vld [vmem:[%s10028_s21 + $0x48] sm:$0xff]  ;;  %v9086_v35 = vld [vmem:[%s13206_s9 + $0x14] ss:$8 sps:$4 sm:$0xff]   ;;  %s13400_s12 = sld [smem:[#allocation25_spill]] }
  0x61   : > { %1596 = vmatprep.subr.bf16.mxu0 %v9074_v15  ;;  %1705 = vmatprep.subr.bf16.mxu1 %v9094_v28  ;;  %v9085_v32 = vld [vmem:[%s13206_s9 + $0x20] ss:$8 sps:$4 sm:$0xff]   ;;  %v9100_v33 = vld [vmem:[%s13206_s9 + $0x164] ss:$8 sps:$4 sm:$0xff]   ;;  %v9106_v38 = vld [vmem:[%s13206_s9 + $0x154] ss:$8 sps:$4 sm:$0xff]  }
  0x62   : > { %1706 = vmatpush1.bf16.msra.mxu1 %v9097_v30  ;;  %v9103_v36 = vld [vmem:[%s13206_s9 + $0x160] ss:$8 sps:$4 sm:$0xff]   ;;  %v9088_v39 = vld [vmem:[%s13206_s9 + $0x10] ss:$8 sps:$4 sm:$0xff]   ;;  %v9089_v40 = vld [vmem:[%s13206_s9 + $0x4] ss:$8 sps:$4 sm:$0xff]  }
  0x63   : > { %1597 = vmatpush1.bf16.msra.mxu0 %v9076_v18  ;;  %v1164_v37 = vld [vmem:[%s10028_s21 + $0x40] sm:$0xff]  ;;  %1707 = vmatprep.subr.bf16.mxu1 %v9100_v33  ;;  %v9109_v41 = vld [vmem:[%s13206_s9 + $0x150] ss:$8 sps:$4 sm:$0xff]   ;;  %v9092_v48 = vld [vmem:[%s13206_s9 + $0xf4] ss:$8 sps:$4 sm:$0xff]  }
  0x64   : > { %1189 = vperm.xlu1 %8927, %v1159_v7   ;;  %1184 = vperm.xlu0 %8926, %v1158_v8   ;;  %v1022_v42 = vld [vmem:[%s10023_s17 + $0x58] sm:$0xff]  ;;  %v1021_v43 = vld [vmem:[%s10023_s17 + $0x50] sm:$0xff]  ;;  %v9112_v44 = vld [vmem:[%s13206_s9 + $0x144] ss:$8 sps:$4 sm:$0xff]  }
  0x65   : > { %1598 = vmatprep.subr.bf16.mxu0 %v9077_v19  ;;  %v9091_v46 = vld [vmem:[%s13206_s9] ss:$8 sps:$4 sm:$0xff]   ;;  %v1167_v49 = vld [vmem:[%s10028_s21 + $0x58] sm:$0xff]  ;;  %v1166_v51 = vld [vmem:[%s10028_s21 + $0x50] sm:$0xff] }
  0x66   : > { %1708 = vmatpush1.bf16.msra.mxu1 %v9103_v36  ;;  %v9115_v47 = vld [vmem:[%s13206_s9 + $0x140] ss:$8 sps:$4 sm:$0xff]   ;;  %v9118_v50 = vld [vmem:[%s13206_s9 + $0x134] ss:$8 sps:$4 sm:$0xff]   ;;  %v9096_v52 = vld [vmem:[%s13206_s9 + $0xf0] ss:$8 sps:$4 sm:$0xff]  }
  0x67   : > { %1599 = vmatpush1.bf16.msra.mxu0 %v9079_v22  ;;  %1709 = vmatprep.subr.bf16.mxu1 %v9106_v38  ;;  %v9098_v53 = vld [vmem:[%s13206_s9 + $0xe4] ss:$8 sps:$4 sm:$0xff]   ;;  %v9121_v55 = vld [vmem:[%s13206_s9 + $0x130] ss:$8 sps:$4 sm:$0xff]   ;;  %v9102_v59 = vld [vmem:[%s13206_s9 + $0xe0] ss:$8 sps:$4 sm:$0xff]  }
  0x68   : > { %1054 = vperm.xlu1 %8927, %v1016_v11   ;;  %1049 = vperm.xlu0 %8926, %v1015_v13   ;;  %v9124_v56 = vld [vmem:[%s13206_s9 + $0x124] ss:$8 sps:$4 sm:$0xff]   ;;  %v9127_v60 = vld [vmem:[%s13206_s9 + $0x120] ss:$8 sps:$4 sm:$0xff]   ;;  %v10289_v1 = vld [vmem:[%s10274_s7 + $0x78] sm:$0xff] }
  0x69   : > { %1600 = vmatprep.subr.bf16.mxu0 %v9080_v23  ;;  %v1024_v57 = vld [vmem:[%s10023_s17 + $0x68] sm:$0xff]  ;;  %v1023_v58 = vld [vmem:[%s10023_s17 + $0x60] sm:$0xff]  ;;  %v9104_v5 = vld [vmem:[%s13206_s9 + $0xd4] ss:$8 sps:$4 sm:$0xff]   ;;  %v991_v6 = vrot.slane %v10289_v1, 7  ;;  %v1138_v36 = vrot.slane %v10289_v1, 1 }
  0x6a   : > { %1710 = vmatpush1.bf16.msra.mxu1 %v9109_v41  ;;  %v10282_v61 = vld [vmem:[%s10274_s7] sm:$0xff]  ;;  %v961_v62 = vld [vmem:[%s10274_s7 + $0x8] sm:$0xff]  ;;  %v9130_v11 = vld [vmem:[%s13206_s9 + $0x114] ss:$8 sps:$4 sm:$0xff]  }
  0x6b   : > { %1601 = vmatpush1.bf16.msra.mxu0 %v9082_v26  ;;  %1711 = vmatprep.subr.bf16.mxu1 %v9112_v44  ;;  %v1123_v63 = vrot.slane %v10282_v61, 1  ;;  %v1124_v0 = vrot.slane %v961_v62, 1  ;;  %v976_v3 = vrot.slane %v10282_v61, 7  ;;  %v1276_v4 = vpack.c.bf16 %v961_v62, %v10282_v61  ;;  %v1169_v8 = vld [vmem:[%s10028_s21 + $0x68] sm:$0xff]  ;;  %v1168_v9 = vld [vmem:[%s10028_s21 + $0x60] sm:$0xff]  ;;  %v10313_v15 = vld [vmem:[%s10274_s7 + $0x10] sm:$0xff] }
  0x6c   : > { %1199 = vperm.xlu1 %8927, %v1161_v16   ;;  %1194 = vperm.xlu0 %8926, %v1160_v17   ;;  %v977_v7 = vrot.slane %v961_v62, 7  ;;  %v9108_v12 = vld [vmem:[%s13206_s9 + $0xd0] ss:$8 sps:$4 sm:$0xff]   ;;  %v9110_v13 = vld [vmem:[%s13206_s9 + $0xc4] ss:$8 sps:$4 sm:$0xff]   ;;  %v1125_v18 = vrot.slane %v10313_v15, 1 }
  0x6d   : > { %1602 = vmatprep.subr.bf16.mxu0 %v9083_v27  ;;  %v10301_v10 = vsel %vm1139_vm0, %v1123_v63, %v1124_v0  ;;  %v10310_v14 = vsel %vm994_vm1, %v991_v6, %v976_v3  ;;  %1624 = vmatprep.mubr.bf16.mxu0 %v1276_v4  ;;  %v9133_v17 = vld [vmem:[%s13206_s9 + $0x110] ss:$8 sps:$4 sm:$0xff]   ;;  %v978_v19 = vrot.slane %v10313_v15, 7  ;;  %v9139_v26 = vld [vmem:[%s13206_s9 + $0x100] ss:$8 sps:$4 sm:$0xff]   ;;  %v10359_v41 = vsel %vm1139_vm0, %v1138_v36, %v1123_v63 }
  0x6e   : > { %1712 = vmatpush1.bf16.msra.mxu1 %v9115_v47  ;;  %v10317_v16 = vsel %vm994_vm1, %v976_v3, %v977_v7  ;;  %v1026_v23 = vld [vmem:[%s10023_s17 + $0x78] sm:$0xff]  ;;  %v1914_v33 = vld [vmem:[%s13210_s3] sm:$0xff]  ;;  %v1916_v38 = vld [vmem:[%s13210_s3 + $0x10] sm:$0xff] }
  0x6f   : > { %1603 = vmatpush1.bf16.msra.mxu0 %v9085_v32  ;;  %1713 = vmatprep.subr.bf16.mxu1 %v9118_v50  ;;  %v10333_v22 = vsel %vm994_vm1, %v977_v7, %v978_v19  ;;  %v9116_v27 = vld [vmem:[%s13206_s9 + $0xb4] ss:$8 sps:$4 sm:$0xff]   ;;  %v9120_v30 = vld [vmem:[%s13206_s9 + $0xb0] ss:$8 sps:$4 sm:$0xff]   ;;  %v1915_v32 = vld [vmem:[%s13210_s3 + $0x8] sm:$0xff] }
  0x70   : > { %1064 = vperm.xlu1 %8927, %v1018_v20   ;;  %1059 = vperm.xlu0 %8926, %v1017_v21   ;;  %v9136_v20 = vld [vmem:[%s13206_s9 + $0x104] ss:$8 sps:$4 sm:$0xff]   ;;  %v10327_v21 = vsel %vm1139_vm0, %v1124_v0, %v1125_v18  ;;  %v1171_v28 = vld [vmem:[%s10028_s21 + $0x78] sm:$0xff]  ;;  %v9138_v44 = vld [vmem:[%s13206_s9 + $0x80] ss:$8 sps:$4 sm:$0xff]  }
  0x71   : > { %1604 = vmatprep.subr.bf16.mxu0 %v9086_v35  ;;  %v9128_v35 = vld [vmem:[%s13206_s9 + $0x94] ss:$8 sps:$4 sm:$0xff]   ;;  %v2111_v61 = vld [vmem:[%s13207_s8 + $0x28] sm:$0xff]  ;;  %v2110_v62 = vld [vmem:[%s13207_s8 + $0x20] sm:$0xff] }
  0x72   : > { %1714 = vmatpush1.bf16.msra.mxu1 %v9121_v55  ;;  %v1920_v47 = vld [vmem:[%s13210_s3 + $0x30] sm:$0xff]  ;;  %v1925_v50 = vld [vmem:[%s13210_s3 + $0x58] sm:$0xff]  ;;  %v2115_v3 = vld [vmem:[%s13207_s8 + $0x48] sm:$0xff] }
  0x73   : > { %1605 = vmatpush1.bf16.msra.mxu0 %v9088_v39  ;;  %1715 = vmatprep.subr.bf16.mxu1 %v9124_v56  ;;  %v9132_v39 = vld [vmem:[%s13206_s9 + $0x90] ss:$8 sps:$4 sm:$0xff]   ;;  %v2114_v4 = vld [vmem:[%s13207_s8 + $0x40] sm:$0xff] }
  0x74   : > { %1209 = vperm.xlu1 %8927, %v1163_v24   ;;  %1204 = vperm.xlu0 %8926, %v1162_v25   ;;  %v1025_v24 = vld [vmem:[%s10023_s17 + $0x70] sm:$0xff]  ;;  %v9114_v25 = vld [vmem:[%s13206_s9 + $0xc0] ss:$8 sps:$4 sm:$0xff]   ;;  %v1929_v55 = vld [vmem:[%s13210_s3 + $0x78] sm:$0xff] }
  0x75   : > { %1606 = vmatprep.subr.bf16.mxu0 %v9089_v40  ;;  %v9134_v40 = vld [vmem:[%s13206_s9 + $0x84] ss:$8 sps:$4 sm:$0xff]   ;;  %v1928_v56 = vld [vmem:[%s13210_s3 + $0x70] sm:$0xff]  ;;  %v2113_v63 = vld [vmem:[%s13207_s8 + $0x38] sm:$0xff] }
  0x76   : > { %1716 = vmatpush1.bf16.msra.mxu1 %v9127_v60  ;;  %v2108_v60 = vld [vmem:[%s13207_s8 + $0x10] sm:$0xff] }
  0x77   : > { %1607 = vmatpush1.bf16.msra.mxu0 %v9091_v46  ;;  %1717 = vmatprep.subr.bf16.mxu1 %v9130_v11  ;;  %v1921_v46 = vld [vmem:[%s13210_s3 + $0x38] sm:$0xff]  ;;  %v2112_v0 = vld [vmem:[%s13207_s8 + $0x30] sm:$0xff] }
  0x78   : > { %1074 = vperm.xlu1 %8927, %v1020_v29   ;;  %1069 = vperm.xlu0 %8926, %v1019_v31   ;;  %v1170_v29 = vld [vmem:[%s10028_s21 + $0x70] sm:$0xff]  ;;  %v9122_v31 = vld [vmem:[%s13206_s9 + $0xa4] ss:$8 sps:$4 sm:$0xff]  }
  0x79   : > { %1608 = vmatprep.subr.bf16.mxu0 %v9092_v48  ;;  %v1923_v48 = vld [vmem:[%s13210_s3 + $0x48] sm:$0xff]  ;;  %v2116_v7 = vld [vmem:[%s13207_s8 + $0x50] sm:$0xff] }
  0x7a   : > { %1718 = vmatpush1.bf16.msra.mxu1 %v9133_v17  ;;  %v9142_v11 = vld [vmem:[%s10033_s25 + $0x174] ss:$8 sps:$4 sm:$0xff]  }
  0x7b   : > { %1609 = vmatpush2.bf16.msra.mxu0 %v9096_v52  ;;  %1719 = vmatprep.subr.bf16.mxu1 %v9136_v20  ;;  %v1927_v52 = vld [vmem:[%s13210_s3 + $0x68] sm:$0xff]  ;;  %v963_v17 = vld [vmem:[%s10274_s7 + $0x18] sm:$0xff] }
  0x7c   : > { %1219 = vperm.xlu1 %8927, %v1165_v34   ;;  %1214 = vperm.xlu0 %8926, %v1164_v37   ;;  %v9126_v34 = vld [vmem:[%s13206_s9 + $0xa0] ss:$8 sps:$4 sm:$0xff]   ;;  %v1917_v37 = vld [vmem:[%s13210_s3 + $0x18] sm:$0xff] }
  0x7d   : > { %1610 = vmatprep.subr.bf16.mxu0 %v9098_v53  ;;  %v1926_v53 = vld [vmem:[%s13210_s3 + $0x60] sm:$0xff] }
  0x7e   : > { %1720 = vmatpush1.bf16.msra.mxu1 %v9139_v26 }
  0x7f   : > { %1611 = vmatpush2.bf16.msra.mxu0 %v9102_v59  ;;  %v2109_v59 = vld [vmem:[%s13207_s8 + $0x18] sm:$0xff] }
  0x80   : > { %1084 = vperm.xlu1 %8927, %v1022_v42   ;;  %1079 = vperm.xlu0 %8926, %v1021_v43   ;;  %v1919_v42 = vld [vmem:[%s13210_s3 + $0x28] sm:$0xff]  ;;  %v1918_v43 = vld [vmem:[%s13210_s3 + $0x20] sm:$0xff] }
  0x81   : > { %1612 = vmatprep.subr.bf16.mxu0 %v9104_v5  ;;  %v2117_v5 = vld [vmem:[%s13207_s8 + $0x58] sm:$0xff] }
  0x83   : > { %1613 = vmatpush2.bf16.msra.mxu0 %v9108_v12  ;;  %v2121_v12 = vld [vmem:[%s13207_s8 + $0x78] sm:$0xff] }
  0x84   : > { %1229 = vperm.xlu1 %8927, %v1167_v49   ;;  %1224 = vperm.xlu0 %8926, %v1166_v51   ;;  %v1922_v49 = vld [vmem:[%s13210_s3 + $0x40] sm:$0xff]  ;;  %v1924_v51 = vld [vmem:[%s13210_s3 + $0x50] sm:$0xff]  ;;  %s13392_s3 = sld [smem:[#allocation19_spill]] }
  0x85   : > { %1614 = vmatprep.subr.bf16.mxu0 %v9110_v13  ;;  %v2120_v13 = vld [vmem:[%s13207_s8 + $0x70] sm:$0xff] }
  0x87   : > { %1615 = vmatpush2.bf16.msra.mxu0 %v9114_v25  ;;  %v964_v25 = vld [vmem:[%s10274_s7 + $0x20] sm:$0xff] }
  0x88   : > { %1094 = vperm.xlu1 %8927, %v1024_v57   ;;  %1089 = vperm.xlu0 %8926, %v1023_v58   ;;  %v2107_v57 = vld [vmem:[%s13207_s8 + $0x8] sm:$0xff]  ;;  %v2106_v58 = vld [vmem:[%s13207_s8] sm:$0xff] }
  0x89   : > { %1616 = vmatprep.subr.bf16.mxu0 %v9116_v27 }
  0x8b   : > { %1617 = vmatpush2.bf16.msra.mxu0 %v9120_v30 }
  0x8c   : > { %1239 = vperm.xlu1 %8927, %v1169_v8   ;;  %1234 = vperm.xlu0 %8926, %v1168_v9   ;;  %v2119_v8 = vld [vmem:[%s13207_s8 + $0x68] sm:$0xff]  ;;  %v2118_v9 = vld [vmem:[%s13207_s8 + $0x60] sm:$0xff] }
  0x8d   : > { %1618 = vmatprep.subr.bf16.mxu0 %v9122_v31 }
  0x8f   : > { %1619 = vmatpush2.bf16.msra.mxu0 %v9126_v34  ;;  %v1126_v34 = vrot.slane %v963_v17, 1 }
  0x90   : > { %1104 = vperm.xlu1 %8927, %v1026_v23   ;;  %1099 = vperm.xlu0 %8926, %v1025_v24   ;;  %v979_v24 = vrot.slane %v963_v17, 7 }
  0x91   : > { %1620 = vmatprep.subr.bf16.mxu0 %v9128_v35  ;;  %v1127_v35 = vrot.slane %v964_v25, 1 }
  0x93   : > { %1621 = vmatpush2.bf16.msra.mxu0 %v9132_v39  ;;  %v10405_v39 = vld [vmem:[%s10274_s7 + $0x28] sm:$0xff] }
  0x94   : > { %1249 = vperm.xlu1 %8927, %v1171_v28   ;;  %1244 = vperm.xlu0 %8926, %v1170_v29  }
  0x95   : > { %1622 = vmatprep.subr.bf16.mxu0 %v9134_v40 }
  0x97   : > { %1623 = vmatpush2.bf16.msra.mxu0 %v9138_v44  ;;  %v1151_v44 = vsel %vm1139_vm0, %v1126_v34, %v1127_v35 }
  0x98   : > { %1937 = vperm.xlu1 %8927, %v1915_v32   ;;  %1932 = vperm.xlu0 %8926, %v1914_v33   ;;  %v9140_v32 = vld [vmem:[%s10033_s25 + $0x170] ss:$8 sps:$4 sm:$0xff]   ;;  %v1007_v33 = vsel %vm994_vm1, %v978_v19, %v979_v24  ;;  %v9143_v19 = vld [vmem:[%s10033_s25 + $0x160] ss:$8 sps:$4 sm:$0xff]  }
  0x99   : > { %2983 = vmatprep.subr.bf16.mxu0 %v9142_v11 }
  0x9c   : > { %1947 = vperm.xlu1 %8927, %v1917_v37   ;;  %1942 = vperm.xlu0 %8926, %v1916_v38   ;;  %v1277_v37 = vpack.c.bf16 %v963_v17, %v10313_v15  ;;  %v9145_v38 = vld [vmem:[%s10033_s25 + $0x164] ss:$8 sps:$4 sm:$0xff]   ;;  %v9146_v15 = vld [vmem:[%s10033_s25 + $0x150] ss:$8 sps:$4 sm:$0xff]  }
  0xa0   : > { %1957 = vperm.xlu1 %8927, %v1919_v42   ;;  %1952 = vperm.xlu0 %8926, %v1918_v43   ;;  %v10409_v43 = vld [vmem:[%s10274_s7 + $0x30] sm:$0xff] }
  0xa4   : > { %1967 = vperm.xlu1 %8927, %v1921_v46   ;;  %1962 = vperm.xlu0 %8926, %v1920_v47   ;;  %v1152_v46 = vsel %vm1139_vm0, %v1125_v18, %v1126_v34  ;;  %v9148_v47 = vld [vmem:[%s10033_s25 + $0x154] ss:$8 sps:$4 sm:$0xff]   ;;  %v1128_v18 = vrot.slane %v10405_v39, 1 }
  0xa8   : > { %1977 = vperm.xlu1 %8927, %v1923_v48   ;;  %1972 = vperm.xlu0 %8926, %v1922_v49  }
  0xac   : > { %1987 = vperm.xlu1 %8927, %v1925_v50   ;;  %1982 = vperm.xlu0 %8926, %v1924_v51   ;;  %v980_v50 = vrot.slane %v964_v25, 7  ;;  %v981_v51 = vrot.slane %v10405_v39, 7 }
  0xb0   : > { %1997 = vperm.xlu1 %8927, %v1927_v52   ;;  %1992 = vperm.xlu0 %8926, %v1926_v53  }
  0xb4   : > { %2007 = vperm.xlu1 %8927, %v1929_v55   ;;  %2002 = vperm.xlu0 %8926, %v1928_v56   ;;  %v1129_v55 = vrot.slane %v10409_v43, 1  ;;  %v1278_v56 = vpack.c.bf16 %v10405_v39, %v964_v25  ;;  %v9160_v39 = vld [vmem:[%s10033_s25 + $0x114] ss:$8 sps:$4 sm:$0xff]  }
  0xb8   : > { %2129 = vperm.xlu1 %8927, %v2107_v57   ;;  %2124 = vperm.xlu0 %8926, %v2106_v58   ;;  %v9151_v57 = vld [vmem:[%s10033_s25 + $0x144] ss:$8 sps:$4 sm:$0xff]  }
  0xbc   : > { %2139 = vperm.xlu1 %8927, %v2109_v59   ;;  %2134 = vperm.xlu0 %8926, %v2108_v60   ;;  %v10427_v59 = vld [vmem:[%s10274_s7 + $0x38] sm:$0xff] }
  0xbd   : > { %v983_v17 = vrot.slane %v10427_v59, 7  ;;  %v1130_v25 = vrot.slane %v10427_v59, 1 }
  0xc0   : > { %2149 = vperm.xlu1 %8927, %v2111_v61   ;;  %2144 = vperm.xlu0 %8926, %v2110_v62   ;;  %v1005_v61 = vsel %vm994_vm1, %v980_v50, %v981_v51 }
  0xc4   : > { %2159 = vperm.xlu1 %8927, %v2113_v63   ;;  %2154 = vperm.xlu0 %8926, %v2112_v0   ;;  %v1006_v63 = vsel %vm994_vm1, %v979_v24, %v980_v50  ;;  %v10434_v0 = vld [vmem:[%s10274_s7 + $0x40] sm:$0xff]  ;;  %v9152_v24 = vld [vmem:[%s10033_s25 + $0x130] ss:$8 sps:$4 sm:$0xff]  }
  0xc5   : > { %v9163_v50 = vld [vmem:[%s10033_s25 + $0x104] ss:$8 sps:$4 sm:$0xff]  }
  0xc8   : > { %2169 = vperm.xlu1 %8927, %v2115_v3   ;;  %2164 = vperm.xlu0 %8926, %v2114_v4   ;;  %v9149_v3 = vld [vmem:[%s10033_s25 + $0x140] ss:$8 sps:$4 sm:$0xff]   ;;  %v1149_v4 = vsel %vm1139_vm0, %v1128_v18, %v1129_v55 }
  0xcc   : > { %2179 = vperm.xlu1 %8927, %v2117_v5   ;;  %2174 = vperm.xlu0 %8926, %v2116_v7   ;;  %v1150_v5 = vsel %vm1139_vm0, %v1127_v35, %v1128_v18  ;;  %v9154_v7 = vld [vmem:[%s10033_s25 + $0x134] ss:$8 sps:$4 sm:$0xff]  }
  0xd0   : > { %2189 = vperm.xlu1 %8927, %v2119_v8   ;;  %2184 = vperm.xlu0 %8926, %v2118_v9  }
  0xd3   : > { %v1175_v20 = vpop.permute.xlu1 %1174  ;;  %v1030_v23 = vpop.permute.xlu0 %1029 }
  0xd4   : > { %2199 = vperm.xlu1 %8927, %v2121_v12   ;;  %2194 = vperm.xlu0 %8926, %v2120_v13   ;;  %v1252_v28 = vmul.f32 %v1175_v20, %v10301_v10  ;;  %v1107_v29 = vmul.f32 %v1030_v23, %v10310_v14  ;;  %v982_v13 = vrot.slane %v10409_v43, 7 }
  0xd6   : > { %v1004_v35 = vsel %vm994_vm1, %v981_v51, %v982_v13 }
  0xd7   : > { %v1180_v26 = vpop.permute.xlu1 %1179  ;;  %v1035_v27 = vpop.permute.xlu0 %1034 }
  0xd8   : > { %v1253_v30 = vmul.f32 %v1180_v26, %v10327_v21  ;;  %v1108_v31 = vmul.f32 %v1035_v27, %v10317_v16  ;;  %v1131_v26 = vrot.slane %v10434_v0, 1  ;;  %v1279_v27 = vpack.c.bf16 %v10427_v59, %v10409_v43 }
  0xd9   : > { %v984_v43 = vrot.slane %v10434_v0, 7 }
  0xda   : > { %v1284_v10 = vpack.c.bf16 %v1253_v30, %v1252_v28  ;;  %v1268_v14 = vpack.c.bf16 %v1108_v31, %v1107_v29  ;;  %v9157_v28 = vld [vmem:[%s10033_s25 + $0x124] ss:$8 sps:$4 sm:$0xff]  }
  0xdb   : > { %v1045_v21 = vpop.permute.xlu1 %1044  ;;  %v1040_v16 = vpop.permute.xlu0 %1039  ;;  %v10452_v31 = vld [vmem:[%s10274_s7 + $0x48] sm:$0xff] }
  0xdc   : > { %v1110_v40 = vmul.f32 %v1045_v21, %v1007_v33  ;;  %v1109_v42 = vmul.f32 %v1040_v16, %v10333_v22  ;;  %1625 = vmatmul.mubr.bf16.vlgmr.msra.gmra.mxu0 %v1268_v14  ;;  %1738 = vmatmul.mubr.bf16.vlgmr.msra.gmra.mxu1 %v1284_v10  ;;  %v1003_v33 = vsel %vm994_vm1, %v982_v13, %v983_v17 }
  0xdd   : > { %1634 = vmatprep.mubr.bf16.mxu0 %v1277_v37  ;;  %1747 = vmatprep.mubr.bf16.mxu1 %v13123_v2  ;;  %v10459_v37 = vld [vmem:[%s10274_s7 + $0x50] sm:$0xff]  ;;  %v1147_v10 = vsel %vm1139_vm0, %v1130_v25, %v1131_v26  ;;  %v1148_v14 = vsel %vm1139_vm0, %v1129_v55, %v1130_v25 }
  0xde   : > { %v1269_v22 = vpack.c.bf16 %v1110_v40, %v1109_v42  ;;  %2984 = vmatpush1.bf16.msra.mxu0 %v9140_v32 }
  0xdf   : > { %v1190_v48 = vpop.permute.xlu1 %1189  ;;  %v1185_v49 = vpop.permute.xlu0 %1184  ;;  %2985 = vmatprep.subr.bf16.mxu0 %v9145_v38  ;;  %v9155_v38 = vld [vmem:[%s10033_s25 + $0x120] ss:$8 sps:$4 sm:$0xff]  }
  0xe0   : > { %v1255_v52 = vmul.f32 %v1190_v48, %v1151_v44  ;;  %v1254_v53 = vmul.f32 %v1185_v49, %v1152_v46  ;;  %v1133_v48 = vrot.slane %v10459_v37, 1  ;;  %v1280_v49 = vpack.c.bf16 %v10452_v31, %v10434_v0 }
  0xe2   : > { %v1285_v58 = vpack.c.bf16 %v1255_v52, %v1254_v53  ;;  %2986 = vmatpush1.bf16.msra.mxu0 %v9143_v19  ;;  %v985_v19 = vrot.slane %v10452_v31, 7  ;;  %v10477_v53 = vld [vmem:[%s10274_s7 + $0x58] sm:$0xff] }
  0xe3   : > { %v1055_v60 = vpop.permute.xlu1 %1054  ;;  %v1050_v62 = vpop.permute.xlu0 %1049  ;;  %2987 = vmatprep.subr.bf16.mxu0 %v9148_v47  ;;  %v9158_v47 = vld [vmem:[%s10033_s25 + $0x110] ss:$8 sps:$4 sm:$0xff]   ;;  %v1134_v13 = vrot.slane %v10477_v53, 1 }
  0xe4   : > { %1635 = vmatmul.mubr.bf16.gmra.mxu0 %v1269_v22  ;;  %1748 = vmatmul.mubr.bf16.gmra.mxu1 %v1285_v58  ;;  %v1112_v8 = vmul.f32 %v1055_v60, %v1005_v61  ;;  %v1111_v9 = vmul.f32 %v1050_v62, %v1006_v63  ;;  %v1132_v22 = vrot.slane %v10452_v31, 1  ;;  %v1001_v18 = vsel %vm994_vm1, %v984_v43, %v985_v19  ;;  %v9161_v58 = vld [vmem:[%s10033_s25 + $0x100] ss:$8 sps:$4 sm:$0xff]   ;;  %v9166_v61 = vld [vmem:[%s10033_s25 + $0x1f4] ss:$8 sps:$4 sm:$0xff]  }
  0xe5   : > { %1644 = vmatprep.mubr.bf16.mxu0 %v1278_v56  ;;  %1757 = vmatprep.mubr.bf16.mxu1 %v13123_v2  ;;  %v1002_v56 = vsel %vm994_vm1, %v983_v17, %v984_v43  ;;  %v9170_v43 = vld [vmem:[%s10033_s25 + $0x1d0] ss:$8 sps:$4 sm:$0xff]  }
  0xe6   : > { %2988 = vmatpush1.bf16.msra.mxu0 %v9146_v15  ;;  %v1270_v29 = vpack.c.bf16 %v1112_v8, %v1111_v9  ;;  %v1145_v59 = vsel %vm1139_vm0, %v1132_v22, %v1133_v48  ;;  %v1146_v60 = vsel %vm1139_vm0, %v1131_v26, %v1132_v22  ;;  %v10499_v8 = vld [vmem:[%s10274_s7 + $0x70] sm:$0xff] }
  0xe7   : > { %v1200_v11 = vpop.permute.xlu1 %1199  ;;  %v1195_v12 = vpop.permute.xlu0 %1194  ;;  %2989 = vmatprep.subr.bf16.mxu0 %v9151_v57  ;;  %v10484_v57 = vld [vmem:[%s10274_s7 + $0x60] sm:$0xff] }
  0xe8   : > { %v1257_v20 = vmul.f32 %v1200_v11, %v1149_v4  ;;  %v1256_v23 = vmul.f32 %v1195_v12, %v1150_v5  ;;  %v986_v4 = vrot.slane %v10459_v37, 7  ;;  %v987_v5 = vrot.slane %v10477_v53, 7  ;;  %v9164_v12 = vld [vmem:[%s10033_s25 + $0x1f0] ss:$8 sps:$4 sm:$0xff]  }
  0xe9   : > { %v1135_v17 = vrot.slane %v10484_v57, 1 }
  0xea   : > { %v1286_v30 = vpack.c.bf16 %v1257_v20, %v1256_v23  ;;  %2990 = vmatpush1.bf16.msra.mxu0 %v9149_v3  ;;  %v1281_v20 = vpack.c.bf16 %v10477_v53, %v10459_v37  ;;  %v9169_v23 = vld [vmem:[%s10033_s25 + $0x1e4] ss:$8 sps:$4 sm:$0xff]   ;;  %v1144_v37 = vsel %vm1139_vm0, %v1133_v48, %v1134_v13 }
  0xeb   : > { %v1065_v32 = vpop.permute.xlu1 %1064  ;;  %v1060_v34 = vpop.permute.xlu0 %1059  ;;  %2991 = vmatprep.subr.bf16.mxu0 %v9154_v7  ;;  %v10496_v7 = vld [vmem:[%s10274_s7 + $0x68] sm:$0xff] }
  0xec   : > { %1645 = vmatmul.mubr.bf16.gmra.mxu0 %v1270_v29  ;;  %1758 = vmatmul.mubr.bf16.gmra.mxu1 %v1286_v30  ;;  %v1114_v21 = vmul.f32 %v1065_v32, %v1003_v33  ;;  %v1113_v16 = vmul.f32 %v1060_v34, %v1004_v35  ;;  %v1000_v29 = vsel %vm994_vm1, %v985_v19, %v986_v4  ;;  %v988_v30 = vrot.slane %v10484_v57, 7  ;;  %v9167_v34 = vld [vmem:[%s10033_s25 + $0x1e0] ss:$8 sps:$4 sm:$0xff]  }
  0xed   : > { %1654 = vmatprep.mubr.bf16.mxu0 %v1279_v27  ;;  %1767 = vmatprep.mubr.bf16.mxu1 %v13123_v2  ;;  %v999_v27 = vsel %vm994_vm1, %v986_v4, %v987_v5  ;;  %v989_v31 = vrot.slane %v10496_v7, 7  ;;  %v1136_v32 = vrot.slane %v10496_v7, 1  ;;  %v1137_v33 = vrot.slane %v10499_v8, 1 }
  0xee   : > { %2992 = vmatpush1.bf16.msra.mxu0 %v9152_v24  ;;  %v1271_v51 = vpack.c.bf16 %v1114_v21, %v1113_v16  ;;  %v1143_v35 = vsel %vm1139_vm0, %v1134_v13, %v1135_v17  ;;  %v1282_v19 = vpack.c.bf16 %v10496_v7, %v10484_v57 }
  0xef   : > { %v1210_v40 = vpop.permute.xlu1 %1209  ;;  %v1205_v42 = vpop.permute.xlu0 %1204  ;;  %2993 = vmatprep.subr.bf16.mxu0 %v9157_v28  ;;  %v997_v48 = vsel %vm994_vm1, %v988_v30, %v989_v31  ;;  %v1142_v53 = vsel %vm1139_vm0, %v1135_v17, %v1136_v32  ;;  %v9176_v17 = vld [vmem:[%s10033_s25 + $0x1b0] ss:$8 sps:$4 sm:$0xff]  }
  0xf0   : > { %v1259_v44 = vmul.f32 %v1210_v40, %v1147_v10  ;;  %v1258_v46 = vmul.f32 %v1205_v42, %v1148_v14  ;;  %v9172_v10 = vld [vmem:[%s10033_s25 + $0x1d4] ss:$8 sps:$4 sm:$0xff]  }
  0xf2   : > { %v1287_v52 = vpack.c.bf16 %v1259_v44, %v1258_v46  ;;  %2994 = vmatpush1.bf16.msra.mxu0 %v9155_v38  ;;  %v990_v38 = vrot.slane %v10499_v8, 7  ;;  %v9175_v44 = vld [vmem:[%s10033_s25 + $0x1c4] ss:$8 sps:$4 sm:$0xff]  }
  0xf3   : > { %v1075_v15 = vpop.permute.xlu1 %1074  ;;  %v1070_v55 = vpop.permute.xlu0 %1069  ;;  %2995 = vmatprep.subr.bf16.mxu0 %v9160_v39 }
  0xf4   : > { %1655 = vmatmul.mubr.bf16.gmra.mxu0 %v1271_v51  ;;  %1768 = vmatmul.mubr.bf16.gmra.mxu1 %v1287_v52  ;;  %v1116_v62 = vmul.f32 %v1075_v15, %v1001_v18  ;;  %v1115_v63 = vmul.f32 %v1070_v55, %v1002_v56  ;;  %v9173_v51 = vld [vmem:[%s10033_s25 + $0x1c0] ss:$8 sps:$4 sm:$0xff]   ;;  %v1141_v52 = vsel %vm1139_vm0, %v1136_v32, %v1137_v33  ;;  %v9194_v32 = vld [vmem:[%s10033_s25 + $0x50] ss:$8 sps:$4 sm:$0xff]  }
  0xf5   : > { %1664 = vmatprep.mubr.bf16.mxu0 %v1280_v49  ;;  %1777 = vmatprep.mubr.bf16.mxu1 %v13123_v2  ;;  %v996_v4 = vsel %vm994_vm1, %v989_v31, %v990_v38  ;;  %v9196_v31 = vld [vmem:[%s10033_s25 + $0x54] ss:$8 sps:$4 sm:$0xff]  }
  0xf6   : > { %2996 = vmatpush1.bf16.msra.mxu0 %v9158_v47  ;;  %v1272_v24 = vpack.c.bf16 %v1116_v62, %v1115_v63 }
  0xf7   : > { %v1220_v0 = vpop.permute.xlu1 %1219  ;;  %v1215_v3 = vpop.permute.xlu0 %1214  ;;  %2997 = vmatprep.subr.bf16.mxu0 %v9163_v50  ;;  %v998_v50 = vsel %vm994_vm1, %v987_v5, %v988_v30  ;;  %v1140_v5 = vsel %vm1139_vm0, %v1137_v33, %v1138_v36  ;;  %v9178_v36 = vld [vmem:[%s10033_s25 + $0x1b4] ss:$8 sps:$4 sm:$0xff]   ;;  %v9191_v30 = vld [vmem:[%s10033_s25 + $0x60] ss:$8 sps:$4 sm:$0xff]   ;;  %v9199_v33 = vld [vmem:[%s10033_s25 + $0x44] ss:$8 sps:$4 sm:$0xff]  }
  0xf8   : > { %v1261_v9 = vmul.f32 %v1220_v0, %v1145_v59  ;;  %v1260_v11 = vmul.f32 %v1215_v3, %v1146_v60  ;;  %v9899_v59 = vld [vmem:[%s10274_s7 + $0x78] sm:$0xff]  ;;  %v995_v0 = vsel %vm994_vm1, %v990_v38, %v991_v6  ;;  %v9205_v38 = vld [vmem:[%s10033_s25 + $0x24] ss:$8 sps:$4 sm:$0xff]   ;;  %s13386_s7 = sld [smem:[#allocation14_spill]] }
  0xf9   : > { %v1283_v60 = vpack.c.bf16 %v9899_v59, %v10499_v8 }
  0xfa   : > { %v1288_v25 = vpack.c.bf16 %v1261_v9, %v1260_v11  ;;  %2998 = vmatpush1.bf16.msra.mxu0 %v9161_v58 }
  0xfb   : > { %v1085_v26 = vpop.permute.xlu1 %1084  ;;  %v1080_v28 = vpop.permute.xlu0 %1079  ;;  %2999 = vmatprep.subr.bf16.mxu0 %v9166_v61 }
  0xfc   : > { %1665 = vmatmul.mubr.bf16.gmra.mxu0 %v1272_v24  ;;  %1778 = vmatmul.mubr.bf16.gmra.mxu1 %v1288_v25  ;;  %v1118_v14 = vmul.f32 %v1085_v26, %v999_v27  ;;  %v1117_v39 = vmul.f32 %v1080_v28, %v1000_v29  ;;  %v9182_v24 = vld [vmem:[%s10033_s25 + $0x190] ss:$8 sps:$4 sm:$0xff]   ;;  %v9187_v25 = vld [vmem:[%s10033_s25 + $0x184] ss:$8 sps:$4 sm:$0xff]   ;;  %v9185_v26 = vld [vmem:[%s10033_s25 + $0x180] ss:$8 sps:$4 sm:$0xff]  }
  0xfd   : > { %1674 = vmatprep.mubr.bf16.mxu0 %v1281_v20  ;;  %1787 = vmatprep.mubr.bf16.mxu1 %v13123_v2  ;;  %v9181_v20 = vld [vmem:[%s10033_s25 + $0x1a4] ss:$8 sps:$4 sm:$0xff]   ;;  %v9190_v27 = vld [vmem:[%s10033_s25 + $0x74] ss:$8 sps:$4 sm:$0xff]   ;;  %v9188_v28 = vld [vmem:[%s10033_s25 + $0x70] ss:$8 sps:$4 sm:$0xff]  }
  0xfe   : > { %3000 = vmatpush2.bf16.msra.mxu0 %v9164_v12  ;;  %v1273_v46 = vpack.c.bf16 %v1118_v14, %v1117_v39  ;;  %2870 = vmatprep.subr.bf16.mxu1 %v9190_v27  ;;  %v9193_v29 = vld [vmem:[%s10033_s25 + $0x64] ss:$8 sps:$4 sm:$0xff]   ;;  %v9208_v14 = vld [vmem:[%s10033_s25 + $0x14] ss:$8 sps:$4 sm:$0xff]   ;;  %v9206_v39 = vld [vmem:[%s10033_s25 + $0x10] ss:$8 sps:$4 sm:$0xff]  }
  0xff   : > { %v1230_v21 = vpop.permute.xlu1 %1229  ;;  %v1225_v16 = vpop.permute.xlu0 %1224  ;;  %3001 = vmatprep.subr.bf16.mxu0 %v9169_v23  ;;  %v9179_v23 = vld [vmem:[%s10033_s25 + $0x1a0] ss:$8 sps:$4 sm:$0xff]   ;;  %2871 = vmatpush1.bf16.msra.mxu1 %v9188_v28 }
 0x100   : > { %v1263_v40 = vmul.f32 %v1230_v21, %v1143_v35  ;;  %v1262_v42 = vmul.f32 %v1225_v16, %v1144_v37  ;;  %2872 = vmatprep.subr.bf16.mxu1 %v9193_v29  ;;  %v9202_v35 = vld [vmem:[%s10033_s25 + $0x34] ss:$8 sps:$4 sm:$0xff]   ;;  %v9200_v37 = vld [vmem:[%s10033_s25 + $0x30] ss:$8 sps:$4 sm:$0xff]   ;;  %v9211_v21 = vld [vmem:[%s10033_s25 + $0x4] ss:$8 sps:$4 sm:$0xff]  }
 0x101   : > { %v9209_v16 = vld [vmem:[%s10033_s25] ss:$8 sps:$4 sm:$0xff]  }
 0x102   : > { %v1289_v47 = vpack.c.bf16 %v1263_v40, %v1262_v42  ;;  %3002 = vmatpush2.bf16.msra.mxu0 %v9167_v34  ;;  %v9197_v34 = vld [vmem:[%s10033_s25 + $0x40] ss:$8 sps:$4 sm:$0xff]   ;;  %v9214_v40 = vld [vmem:[%s10033_s25 + $0xf4] ss:$8 sps:$4 sm:$0xff]   ;;  %v9212_v42 = vld [vmem:[%s10033_s25 + $0xf0] ss:$8 sps:$4 sm:$0xff]  }
 0x103   : > { %v1095_v22 = vpop.permute.xlu1 %1094  ;;  %v1090_v49 = vpop.permute.xlu0 %1089  ;;  %3003 = vmatprep.subr.bf16.mxu0 %v9172_v10  ;;  %2873 = vmatpush1.bf16.msra.mxu1 %v9191_v30  ;;  %v9203_v10 = vld [vmem:[%s10033_s25 + $0x20] ss:$8 sps:$4 sm:$0xff]  }
 0x104   : > { %1675 = vmatmul.mubr.bf16.gmra.mxu0 %v1273_v46  ;;  %1788 = vmatmul.mubr.bf16.gmra.mxu1 %v1289_v47  ;;  %v1120_v15 = vmul.f32 %v1095_v22, %v997_v48  ;;  %v1119_v18 = vmul.f32 %v1090_v49, %v998_v50  ;;  %v9218_v46 = vld [vmem:[%s10033_s25 + $0xd0] ss:$8 sps:$4 sm:$0xff]   ;;  %v9223_v47 = vld [vmem:[%s10033_s25 + $0xc4] ss:$8 sps:$4 sm:$0xff]   ;;  %v9221_v22 = vld [vmem:[%s10033_s25 + $0xc0] ss:$8 sps:$4 sm:$0xff]  }
 0x105   : > { %1684 = vmatprep.mubr.bf16.mxu0 %v1282_v19  ;;  %1797 = vmatprep.mubr.bf16.mxu1 %v13123_v2  ;;  %v9215_v19 = vld [vmem:[%s10033_s25 + $0xe0] ss:$8 sps:$4 sm:$0xff]   ;;  %v9226_v48 = vld [vmem:[%s10033_s25 + $0xb4] ss:$8 sps:$4 sm:$0xff]   ;;  %v9224_v49 = vld [vmem:[%s10033_s25 + $0xb0] ss:$8 sps:$4 sm:$0xff]  }
 0x106   : > { %3004 = vmatpush2.bf16.msra.mxu0 %v9170_v43  ;;  %v1274_v61 = vpack.c.bf16 %v1120_v15, %v1119_v18  ;;  %2874 = vmatprep.subr.bf16.mxu1 %v9196_v31  ;;  %v9217_v43 = vld [vmem:[%s10033_s25 + $0xe4] ss:$8 sps:$4 sm:$0xff]   ;;  %v9233_v18 = vld [vmem:[%s10033_s25 + $0x80] ss:$8 sps:$4 sm:$0xff]  }
 0x107   : > { %v1240_v55 = vpop.permute.xlu1 %1239  ;;  %v1235_v56 = vpop.permute.xlu0 %1234  ;;  %3005 = vmatprep.subr.bf16.mxu0 %v9175_v44  ;;  %2875 = vmatpush1.bf16.msra.mxu1 %v9194_v32  ;;  %v9220_v44 = vld [vmem:[%s10033_s25 + $0xd4] ss:$8 sps:$4 sm:$0xff]   ;;  %v9229_v50 = vld [vmem:[%s10033_s25 + $0xa4] ss:$8 sps:$4 sm:$0xff]  }
 0x108   : > { %v1265_v57 = vmul.f32 %v1240_v55, %v1141_v52  ;;  %v1264_v58 = vmul.f32 %v1235_v56, %v1142_v53  ;;  %2876 = vmatprep.subr.bf16.mxu1 %v9199_v33  ;;  %v9230_v52 = vld [vmem:[%s10033_s25 + $0x90] ss:$8 sps:$4 sm:$0xff]   ;;  %v9232_v53 = vld [vmem:[%s10033_s25 + $0x94] ss:$8 sps:$4 sm:$0xff]   ;;  %v9235_v15 = vld [vmem:[%s10033_s25 + $0x84] ss:$8 sps:$4 sm:$0xff]  }
 0x109   : > { %v9238_v55 = vld [vmem:[%s10033_s25 + $0x274] ss:$8 sps:$4 sm:$0xff]  }
 0x10a   : > { %v1290_v62 = vpack.c.bf16 %v1265_v57, %v1264_v58  ;;  %3006 = vmatpush2.bf16.msra.mxu0 %v9173_v51  ;;  %v9227_v51 = vld [vmem:[%s10033_s25 + $0xa0] ss:$8 sps:$4 sm:$0xff]   ;;  %v10595_v57 = vsub.s32 0, %v10270_v54 }
 0x10b   : > { %v1105_v63 = vpop.permute.xlu1 %1104  ;;  %v1100_v3 = vpop.permute.xlu0 %1099  ;;  %3007 = vmatprep.subr.bf16.mxu0 %v9178_v36  ;;  %2877 = vmatpush1.bf16.msra.mxu1 %v9197_v34  ;;  %v1340_v58 = vld [vmem:[%s10018_s13] sm:$0x3] }
 0x10c   : > { %1685 = vmatmul.mubr.bf16.gmra.mxu0 %v1274_v61  ;;  %1798 = vmatmul.mubr.bf16.gmra.mxu1 %v1290_v62  ;;  %v1122_v7 = vmul.f32 %v1105_v63, %v995_v0  ;;  %v1121_v6 = vmul.f32 %v1100_v3, %v996_v4  ;;  %13214 = vst [vmem:[#allocation26_spill] sm:$0xff] %v10595_v57 }
 0x10d   : > { %1694 = vmatprep.mubr.bf16.mxu0 %v1283_v60  ;;  %1807 = vmatprep.mubr.bf16.mxu1 %v13123_v2  ;;  %v10601_v60 = vsub.s32 1, %v10270_v54  ;;  %v10604_v61 = vrot.slane %v1340_v58, %v10595_v57 }
 0x10e   : > { %v1275_v13 = vpack.c.bf16 %v1122_v7, %v1121_v6  ;;  %3008 = vmatpush2.bf16.msra.mxu0 %v9176_v17  ;;  %2878 = vmatprep.subr.bf16.mxu1 %v9202_v35 }
 0x10f   : > { %v1250_v8 = vpop.permute.xlu1 %1249  ;;  %v1245_v9 = vpop.permute.xlu0 %1244  ;;  %3009 = vmatprep.subr.bf16.mxu0 %v9181_v20  ;;  %2879 = vmatpush1.bf16.msra.mxu1 %v9200_v37  ;;  %13215 = vst [vmem:[#allocation27_spill] sm:$0xff] %v10601_v60  ;;  %v10609_v63 = vrot.slane %v1340_v58, %v10601_v60 }
 0x110   : > { %v1267_v11 = vmul.f32 %v1250_v8, %v10359_v41  ;;  %v1266_v12 = vmul.f32 %v1245_v9, %v1140_v5  ;;  %v9184_v41 = vld [vmem:[%s10033_s25 + $0x194] ss:$8 sps:$4 sm:$0xff]   ;;  %2880 = vmatprep.subr.bf16.mxu1 %v9205_v38 }
 0x112   : > { %v1291_v1 = vpack.c.bf16 %v1267_v11, %v1266_v12  ;;  %3010 = vmatpush2.bf16.msra.mxu0 %v9179_v23 }
 0x113   : > { %3011 = vmatprep.subr.bf16.mxu0 %v9184_v41  ;;  %2881 = vmatpush1.bf16.msra.mxu1 %v9203_v10  ;;  %v10592_v56 = vpop.permute.xlu0 %1932  ;;  %v10598_v59 = vpop.permute.xlu1 %1937 }
 0x114   : > { %1695 = vmatmul.mubr.bf16.gmra.mxu0 %v1275_v13  ;;  %1808 = vmatmul.mubr.bf16.gmra.mxu1 %v1291_v1 }
 0x115   : > { %2882 = vmatprep.subr.bf16.mxu1 %v9208_v14 }
 0x116   : > { %3012 = vmatpush2.bf16.msra.mxu0 %v9182_v24 }
 0x117   : > { %3013 = vmatprep.subr.bf16.mxu0 %v9187_v25  ;;  %2883 = vmatpush1.bf16.msra.mxu1 %v9206_v39  ;;  %v10606_v62 = vpop.permute.xlu0 %1942  ;;  %v10611_v4 = vpop.permute.xlu1 %1947 }
 0x118   : > { %2884 = vmatprep.subr.bf16.mxu1 %v9211_v21 }
 0x11a   : > { %3014 = vmatpush2.bf16.msra.mxu0 %v9185_v26 }
 0x11b   : > { %2885 = vmatpush1.bf16.msra.mxu1 %v9209_v16  ;;  %v10615_v13 = vpop.permute.xlu0 %1952  ;;  %v10618_v23 = vpop.permute.xlu1 %1957 }
 0x11c   : > { %2886 = vmatprep.subr.bf16.mxu1 %v9214_v40 }
 0x11f   : > { %2887 = vmatpush2.bf16.msra.mxu1 %v9212_v42  ;;  %v10628_v34 = vpop.permute.xlu0 %1962  ;;  %v10634_v21 = vpop.permute.xlu1 %1967 }
 0x120   : > { %2888 = vmatprep.subr.bf16.mxu1 %v9217_v43  ;;  %13216 = vst [vmem:[#allocation28_spill] sm:$0xff] %v10628_v34 }
 0x123   : > { %2889 = vmatpush2.bf16.msra.mxu1 %v9215_v19 }
 0x124   : > { %2890 = vmatprep.subr.bf16.mxu1 %v9220_v44 }
 0x127   : > { %2891 = vmatpush2.bf16.msra.mxu1 %v9218_v46 }
 0x128   : > { %2892 = vmatprep.subr.bf16.mxu1 %v9223_v47 }
 0x12b   : > { %2893 = vmatpush2.bf16.msra.mxu1 %v9221_v22 }
 0x12c   : > { %2894 = vmatprep.subr.bf16.mxu1 %v9226_v48 }
 0x12f   : > { %2895 = vmatpush2.bf16.msra.mxu1 %v9224_v49 }
 0x130   : > { %2896 = vmatprep.subr.bf16.mxu1 %v9229_v50 }
 0x133   : > { %2897 = vmatpush2.bf16.msra.mxu1 %v9227_v51 }
 0x134   : > { %2898 = vmatprep.subr.bf16.mxu1 %v9232_v53  ;;  %v10660_v53 = vpop.permute.xlu0 %1972 }
 0x135   : > { %13218 = vst [vmem:[#allocation30_spill] sm:$0xff] %v10660_v53 }
 0x137   : > { %2899 = vmatpush2.bf16.msra.mxu1 %v9230_v52 }
 0x138   : > { %2900 = vmatprep.subr.bf16.mxu1 %v9235_v15 }
 0x13b   : > { %2901 = vmatpush2.bf16.msra.mxu1 %v9233_v18 }
 0x13c   : > { %3096 = vmatprep.subr.bf16.mxu1 %v9238_v55 }
 0x19c   : > { %v1626_v0 = vpop.f32.mrf.mxu0  ;;  %v1739_v3 = vpop.f32.mrf.mxu1 }
 0x19d   : > { %v1627_v5 = vadd.f32 %v1626_v0, %v10604_v61 }
 0x19e   : > { %v1628_v7 = vpop.f32.mrf.mxu0  ;;  %v1741_v6 = vpop.f32.mrf.mxu1 }
 0x19f   : > { %v1740_v8 = vadd.f32 %v1739_v3, %v1627_v5  ;;  %v1629_v9 = vadd.f32 %v1628_v7, %v10609_v63  ;;  %v10670_v7 = vpop.permute.xlu1 %1977 }
 0x1a0   : > { %v1630_v11 = vpop.f32.mrf.mxu0  ;;  %v1743_v12 = vpop.f32.mrf.mxu1  ;;  %13219 = vst [vmem:[#allocation31_spill] sm:$0xff] %v10670_v7 }
 0x1a1   : > { %v1631_v1 = vadd.f32 %v1630_v11, %v10604_v61  ;;  %v1742_v36 = vadd.f32 %v1741_v6, %v1629_v9  ;;  %v10620_v41 = vmax.f32 %v1740_v8, 0.0 }
 0x1a2   : > { %v1632_v17 = vpop.f32.mrf.mxu0  ;;  %v1745_v20 = vpop.f32.mrf.mxu1 }
 0x1a3   : > { %v1744_v24 = vadd.f32 %v1743_v12, %v1631_v1  ;;  %v1633_v25 = vadd.f32 %v1632_v17, %v10609_v63  ;;  %v10626_v30 = vmax.f32 %v1742_v36, 0.0  ;;  %v13121_v35 = vrot.slane %v10620_v41, 1 }
 0x1a4   : > { %v1636_v26 = vpop.f32.mrf.mxu0  ;;  %v1749_v27 = vpop.f32.mrf.mxu1 }
 0x1a5   : > { %v10623_v28 = vmax.f32 %v1744_v24, 0.0  ;;  %v1637_v29 = vadd.f32 %v1636_v26, %v10604_v61  ;;  %v1746_v31 = vadd.f32 %v1745_v20, %v1633_v25  ;;  %v13122_v19 = vrot.slane %v10626_v30, 1  ;;  %v10680_v24 = vpop.permute.xlu0 %1982 }
 0x1a6   : > { %v1638_v32 = vpop.f32.mrf.mxu0  ;;  %v1751_v33 = vpop.f32.mrf.mxu1  ;;  %13220 = vst [vmem:[#allocation32_spill] sm:$0xff] %v10680_v24 }
 0x1a7   : > { %v2044_v37 = vrot.slane %v10623_v28, 1  ;;  %v1750_v38 = vadd.f32 %v1749_v27, %v1637_v29  ;;  %v10632_v10 = vmax.f32 %v1746_v31, 0.0  ;;  %v1639_v42 = vadd.f32 %v1638_v32, %v10609_v63 }
 0x1a8   : > { %v1640_v14 = vpop.f32.mrf.mxu0  ;;  %v1753_v39 = vpop.f32.mrf.mxu1  ;;  %v2250_v15 = vpack.c.bf16 %v10623_v28, %v10620_v41 }
 0x1a9   : > { %v10640_v16 = vsel %vm1139_vm0, %v13121_v35, %v2044_v37  ;;  %v10642_v40 = vmax.f32 %v1750_v38, 0.0  ;;  %v1641_v43 = vadd.f32 %v1640_v14, %v10604_v61  ;;  %v13127_v44 = vrot.slane %v10632_v10, 1 }
 0x1aa   : > { %v1642_v46 = vpop.f32.mrf.mxu0  ;;  %v1755_v47 = vpop.f32.mrf.mxu1  ;;  %v2251_v49 = vpack.c.bf16 %v10632_v10, %v10626_v30  ;;  %v1752_v55 = vadd.f32 %v1751_v33, %v1639_v42 }
 0x1ab   : > { %13217 = vst [vmem:[#allocation29_spill] sm:$0xff] %v10642_v40  ;;  %v13125_v22 = vrot.slane %v10642_v40, 1  ;;  %v1643_v48 = vadd.f32 %v1642_v46, %v10609_v63  ;;  %v10658_v52 = vsel %vm1139_vm0, %v13122_v19, %v13127_v44  ;;  %v1754_v58 = vadd.f32 %v1753_v39, %v1641_v43  ;;  %v10686_v33 = vpop.permute.xlu1 %1987 }
 0x1ac   : > { %v1646_v50 = vpop.f32.mrf.mxu0  ;;  %v1759_v51 = vpop.f32.mrf.mxu1  ;;  %3015 = vmatprep.mubr.bf16.mxu0 %v2251_v49  ;;  %v10675_v12 = vmax.f32 %v1752_v55, 0.0  ;;  %13221 = vst [vmem:[#allocation33_spill] sm:$0xff] %v10686_v33  ;;  %v1854_v19 = vrot.slane %v10642_v40, 7 }
 0x1ad   : > { %v10668_v18 = vsel %vm1139_vm0, %v2044_v37, %v13125_v22  ;;  %v1756_v0 = vadd.f32 %v1755_v47, %v1643_v48  ;;  %3016 = vmatmul.mubr.bf16.vlgmr.msra.gmra.mxu0 %v2250_v15  ;;  %v10677_v1 = vmax.f32 %v1754_v58, 0.0  ;;  %v1647_v25 = vadd.f32 %v1646_v50, %v10604_v61  ;;  %v10695_v15 = vpop.permute.xlu0 %1992 }
 0x1ae   : > { %v1648_v3 = vpop.f32.mrf.mxu0  ;;  %v1761_v5 = vpop.f32.mrf.mxu1  ;;  %13222 = vst [vmem:[#allocation34_spill] sm:$0xff] %v10695_v15 }
 0x1af   : > { %v10672_v6 = vmax.f32 %v1756_v0, 0.0  ;;  %v1649_v8 = vadd.f32 %v1648_v3, %v10609_v63  ;;  %v2252_v14 = vpack.c.bf16 %v10677_v1, %v10642_v40  ;;  %v1760_v43 = vadd.f32 %v1759_v51, %v1647_v25 }
 0x1b0   : > { %v1650_v9 = vpop.f32.mrf.mxu0  ;;  %v1763_v11 = vpop.f32.mrf.mxu1 }
 0x1b1   : > { %v1651_v36 = vadd.f32 %v1650_v9, %v10604_v61  ;;  %v2253_v27 = vpack.c.bf16 %v10672_v6, %v10675_v12  ;;  %v1762_v29 = vadd.f32 %v1761_v5, %v1649_v8  ;;  %v10702_v5 = vpop.permute.xlu1 %1997  ;;  %v10704_v8 = vmax.f32 %v1760_v43, 0.0 }
 0x1b2   : > { %v1652_v17 = vpop.f32.mrf.mxu0  ;;  %v1765_v20 = vpop.f32.mrf.mxu1  ;;  %13224 = vst [vmem:[#allocation36_spill] sm:$0xff] %v10702_v5 }
 0x1b3   : > { %v1653_v26 = vadd.f32 %v1652_v17, %v10609_v63  ;;  %v1764_v37 = vadd.f32 %v1763_v11, %v1651_v36  ;;  %3025 = vmatprep.mubr.bf16.mxu0 %v2253_v27  ;;  %v10692_v47 = vmax.f32 %v1762_v29, 0.0 }
 0x1b4   : > { %v1656_v31 = vpop.f32.mrf.mxu0  ;;  %v1769_v32 = vpop.f32.mrf.mxu1 }
 0x1b5   : > { %v1766_v38 = vadd.f32 %v1765_v20, %v1653_v26  ;;  %3026 = vmatmul.mubr.bf16.gmra.mxu0 %v2252_v14  ;;  %v10697_v55 = vmax.f32 %v1764_v37, 0.0  ;;  %v1657_v9 = vadd.f32 %v1656_v31, %v10604_v61  ;;  %v1852_v14 = vrot.slane %v10623_v28, 7 }
 0x1b6   : > { %v1658_v39 = vpop.f32.mrf.mxu0  ;;  %v1771_v42 = vpop.f32.mrf.mxu1  ;;  %v1853_v28 = vrot.slane %v10632_v10, 7 }
 0x1b7   : > { %v10690_v46 = vmax.f32 %v1766_v38, 0.0  ;;  %v1659_v48 = vadd.f32 %v1658_v39, %v10609_v63  ;;  %13223 = vst [vmem:[#allocation35_spill] sm:$0xff] %v10697_v55  ;;  %v2254_v27 = vpack.c.bf16 %v10697_v55, %v10704_v8  ;;  %v10710_v38 = vpop.permute.xlu0 %2002  ;;  %v1770_v39 = vadd.f32 %v1769_v32, %v1657_v9 }
 0x1b8   : > { %v1660_v49 = vpop.f32.mrf.mxu0  ;;  %v1773_v50 = vpop.f32.mrf.mxu1  ;;  %13225 = vst [vmem:[#allocation37_spill] sm:$0xff] %v10710_v38 }
 0x1b9   : > { %v1661_v58 = vadd.f32 %v1660_v49, %v10604_v61  ;;  %v2255_v51 = vpack.c.bf16 %v10690_v46, %v10692_v47  ;;  %v1772_v36 = vadd.f32 %v1771_v42, %v1659_v48  ;;  %v13233_v34 = vrot.slane %v10690_v46, 7 }
 0x1ba   : > { %v1662_v0 = vpop.f32.mrf.mxu0  ;;  %v1775_v3 = vpop.f32.mrf.mxu1 }
 0x1bb   : > { %v1663_v11 = vadd.f32 %v1662_v0, %v10609_v63  ;;  %3035 = vmatprep.mubr.bf16.mxu0 %v2255_v51  ;;  %v1774_v25 = vadd.f32 %v1773_v50, %v1661_v58  ;;  %v10715_v31 = vmax.f32 %v1772_v36, 0.0  ;;  %v10718_v50 = vpop.permute.xlu1 %2007  ;;  %v13126_v58 = vrot.slane %v10620_v41, 7  ;;  %v10736_v35 = vpop.permute.xlu0 %2124 }
 0x1bc   : > { %v1666_v17 = vpop.f32.mrf.mxu0  ;;  %v1779_v20 = vpop.f32.mrf.mxu1  ;;  %13226 = vst [vmem:[#allocation38_spill] sm:$0xff] %v10718_v50  ;;  %v10731_v36 = vmax.f32 %v1770_v39, 0.0 }
 0x1bd   : > { %v1776_v26 = vadd.f32 %v1775_v3, %v1663_v11  ;;  %3036 = vmatmul.mubr.bf16.gmra.mxu0 %v2254_v27  ;;  %v10721_v0 = vmax.f32 %v1774_v25, 0.0  ;;  %v1910_v11 = vsel %vm994_vm1, %v13126_v58, %v1852_v14  ;;  %v13130_v27 = vrot.slane %v10626_v30, 7 }
 0x1be   : > { %v1668_v29 = vpop.f32.mrf.mxu0  ;;  %v1781_v37 = vpop.f32.mrf.mxu1  ;;  %v10742_v58 = vmul.f32 %v10598_v59, %v1910_v11 }
 0x1bf   : > { %v10713_v43 = vmax.f32 %v1776_v26, 0.0  ;;  %v1669_v42 = vadd.f32 %v1668_v29, %v10609_v63  ;;  %v1667_v26 = vadd.f32 %v1666_v17, %v10604_v61  ;;  %v2256_v39 = vpack.c.bf16 %v10721_v0, %v10731_v36 }
 0x1c0   : > { %v1670_v48 = vpop.f32.mrf.mxu0  ;;  %v1783_v49 = vpop.f32.mrf.mxu1  ;;  %v1855_v17 = vrot.slane %v10675_v12, 7 }
 0x1c1   : > { %v1671_v3 = vadd.f32 %v1670_v48, %v10604_v61  ;;  %v2257_v9 = vpack.c.bf16 %v10713_v43, %v10715_v31  ;;  %v1782_v29 = vadd.f32 %v1781_v37, %v1669_v42  ;;  %v1911_v37 = vsel %vm994_vm1, %v13130_v27, %v1853_v28  ;;  %v10749_v42 = vpop.permute.xlu1 %2129 }
 0x1c2   : > { %v1672_v32 = vpop.f32.mrf.mxu0  ;;  %v1785_v51 = vpop.f32.mrf.mxu1  ;;  %v10760_v11 = vmul.f32 %v10749_v42, %v10668_v18 }
 0x1c3   : > { %v1673_v25 = vadd.f32 %v1672_v32, %v10609_v63  ;;  %3045 = vmatprep.mubr.bf16.mxu0 %v2257_v9  ;;  %v1784_v2 = vadd.f32 %v1783_v49, %v1671_v3  ;;  %v10753_v49 = vmul.f32 %v10736_v35, %v10640_v16  ;;  %v10763_v60 = vmax.f32 %v1782_v29, 0.0 }
 0x1c4   : > { %v1676_v48 = vpop.f32.mrf.mxu0  ;;  %v1789_v45 = vpop.f32.mrf.mxu1 }
 0x1c5   : > { %v1786_v22 = vadd.f32 %v1785_v51, %v1673_v25  ;;  %v1780_v51 = vadd.f32 %v1779_v20, %v1667_v26  ;;  %3046 = vmatmul.mubr.bf16.gmra.mxu0 %v2256_v39  ;;  %v1856_v25 = vrot.slane %v10677_v1, 7  ;;  %v10766_v16 = vmax.f32 %v1784_v2, 0.0  ;;  %v10818_v7 = vpop.permute.xlu1 %2139 }
 0x1c6   : > { %v1678_v32 = vpop.f32.mrf.mxu0  ;;  %v1791_v44 = vpop.f32.mrf.mxu1  ;;  %v1908_v20 = vsel %vm994_vm1, %v1852_v14, %v1854_v19  ;;  %v1909_v2 = vsel %vm994_vm1, %v1853_v28, %v1855_v17  ;;  %v13227_v14 = vrot.slane %v10672_v6, 7 }
 0x1c7   : > { %v10756_v9 = vmax.f32 %v1786_v22, 0.0  ;;  %v1679_v27 = vadd.f32 %v1678_v32, %v10609_v63  ;;  %v10770_v22 = vmul.f32 %v10598_v59, %v1911_v37  ;;  %v10780_v50 = vmax.f32 %v1780_v51, 0.0 }
 0x1c8   : > { %v1680_v57 = vpop.f32.mrf.mxu0  ;;  %v1793_v38 = vpop.f32.mrf.mxu1  ;;  %v1907_v37 = vsel %vm994_vm1, %v1855_v17, %v13227_v14  ;;  %v1906_v28 = vsel %vm994_vm1, %v1854_v19, %v1856_v25  ;;  %v10792_v51 = vmul.f32 %v10606_v62, %v1908_v20  ;;  %v1859_v17 = vrot.slane %v10692_v47, 7 }
 0x1c9   : > { %v1681_v3 = vadd.f32 %v1680_v57, %v10604_v61  ;;  %v2259_v32 = vpack.c.bf16 %v10756_v9, %v10763_v60  ;;  %v1677_v57 = vadd.f32 %v1676_v48, %v10604_v61  ;;  %v1792_v18 = vadd.f32 %v1791_v44, %v1679_v27  ;;  %v10805_v20 = vpop.permute.xlu0 %2134 }
 0x1ca   : > { %v1682_v29 = vpop.f32.mrf.mxu0  ;;  %v1795_v39 = vpop.f32.mrf.mxu1  ;;  %13228 = vst [vmem:[#allocation39_spill] sm:$0xff] %v10792_v51  ;;  %v1858_v48 = vrot.slane %v10704_v8, 7  ;;  %v2258_v33 = vpack.c.bf16 %v10766_v16, %v10780_v50  ;;  %v10800_v14 = vmul.f32 %v10606_v62, %v1909_v2  ;;  %v10803_v19 = vmul.f32 %v10611_v4, %v1907_v37 }
 0x1cb   : > { %v1683_v59 = vadd.f32 %v1682_v29, %v10609_v63  ;;  %3055 = vmatprep.mubr.bf16.mxu0 %v2259_v32  ;;  %v1794_v29 = vadd.f32 %v1793_v38, %v1681_v3  ;;  %v10812_v44 = vmax.f32 %v1792_v18, 0.0  ;;  %v10816_v37 = vmul.f32 %v10611_v4, %v1906_v28 }
 0x1cc   : > { %v1686_v15 = vpop.f32.mrf.mxu0  ;;  %v1799_v5 = vpop.f32.mrf.mxu1  ;;  %13229 = vst [vmem:[#allocation40_spill] sm:$0xff] %v10800_v14  ;;  %13230 = vst [vmem:[#allocation41_spill] sm:$0xff] %v10803_v19  ;;  %v13231_v28 = vrot.slane %v10672_v6, 7  ;;  %v1903_v4 = vsel %vm994_vm1, %v1859_v17, %v13233_v34 }
 0x1cd   : > { %v1796_v24 = vadd.f32 %v1795_v39, %v1683_v59  ;;  %v1790_v39 = vadd.f32 %v1789_v45, %v1677_v57  ;;  %3056 = vmatmul.mubr.bf16.gmra.mxu0 %v2258_v33  ;;  %v10821_v3 = vmax.f32 %v1794_v29, 0.0  ;;  %v13232_v29 = vrot.slane %v10697_v55, 7 }
 0x1ce   : > { %v1688_v27 = vpop.f32.mrf.mxu0  ;;  %v1801_v32 = vpop.f32.mrf.mxu1 }
 0x1cf   : > { %v10809_v59 = vmax.f32 %v1796_v24, 0.0  ;;  %v1689_v62 = vadd.f32 %v1688_v27, %v10609_v63  ;;  %v1904_v24 = vsel %vm994_vm1, %v1856_v25, %v1858_v48  ;;  %v1905_v27 = vsel %vm994_vm1, %v13231_v28, %v1859_v17 }
 0x1d0   : > { %v1690_v2 = vpop.f32.mrf.mxu0  ;;  %v1803_v53 = vpop.f32.mrf.mxu1  ;;  %v10838_v38 = vmax.f32 %v1790_v39, 0.0  ;;  %v1687_v25 = vadd.f32 %v1686_v15, %v10604_v61 }
 0x1d1   : > { %v1691_v45 = vadd.f32 %v1690_v2, %v10604_v61  ;;  %v2261_v57 = vpack.c.bf16 %v10809_v59, %v10812_v44  ;;  %v1902_v2 = vsel %vm994_vm1, %v1858_v48, %v13232_v29  ;;  %v1802_v19 = vadd.f32 %v1801_v32, %v1689_v62  ;;  %v10850_v39 = vpop.permute.xlu0 %2144  ;;  %v10865_v48 = vpop.permute.xlu1 %2149 }
 0x1d2   : > { %v1692_v33 = vpop.f32.mrf.mxu0  ;;  %v1805_v18 = vpop.f32.mrf.mxu1  ;;  %v2260_v34 = vpack.c.bf16 %v10821_v3, %v10838_v38  ;;  %v10857_v32 = vmul.f32 %v10615_v13, %v1905_v27  ;;  %v10860_v62 = vmul.f32 %v10618_v23, %v1903_v4 }
 0x1d3   : > { %v1693_v26 = vadd.f32 %v1692_v33, %v10609_v63  ;;  %3065 = vmatprep.mubr.bf16.mxu0 %v2261_v57  ;;  %v1804_v33 = vadd.f32 %v1803_v53, %v1691_v45  ;;  %v10863_v57 = vmul.f32 %v10618_v23, %v1902_v2  ;;  %v1863_v53 = vrot.slane %v10715_v31, 7 }
 0x1d4   : > { %v1696_v55 = vpop.f32.mrf.mxu0  ;;  %v1809_v40 = vpop.f32.mrf.mxu1  ;;  %13234 = vst [vmem:[#allocation42_spill] sm:$0xff] %v10857_v32  ;;  %13235 = vst [vmem:[#allocation43_spill] sm:$0xff] %v10860_v62  ;;  %v10874_v15 = vmax.f32 %v1802_v19, 0.0 }
 0x1d5   : > { %v1806_v29 = vadd.f32 %v1805_v18, %v1693_v26  ;;  %v1800_v26 = vadd.f32 %v1799_v5, %v1687_v25  ;;  %3066 = vmatmul.mubr.bf16.gmra.mxu0 %v2260_v34  ;;  %v10871_v18 = vmul.f32 %v10615_v13, %v1904_v24  ;;  %v1697_v4 = vadd.f32 %v1696_v55, %v10604_v61 }
 0x1d6   : > { %v1698_v14 = vpop.f32.mrf.mxu0  ;;  %v1811_v28 = vpop.f32.mrf.mxu1  ;;  %v10880_v25 = vmax.f32 %v1804_v33, 0.0  ;;  %v13237_v55 = vrot.slane %v10690_v46, 7 }
 0x1d7   : > { %v10868_v45 = vmax.f32 %v1806_v29, 0.0  ;;  %v1699_v23 = vadd.f32 %v1698_v14, %v10609_v63  ;;  %v13236_v14 = vrot.slane %v10713_v43, 7  ;;  %v10893_v51 = vmax.f32 %v1800_v26, 0.0  ;;  %v10906_v26 = vpop.permute.xlu1 %2159 }
 0x1d8   : > { %v1700_v2 = vpop.f32.mrf.mxu0  ;;  %v1813_v17 = vpop.f32.mrf.mxu1  ;;  %v1810_v32 = vadd.f32 %v1809_v40, %v1697_v4  ;;  %v2059_v40 = vrot.slane %v10763_v60, 1  ;;  %v10962_v4 = vmul.f32 %v10736_v35, %v10658_v52  ;;  %v13242_v52 = vrot.slane %v10692_v47, 1 }
 0x1d9   : > { %v1701_v29 = vadd.f32 %v1700_v2, %v10604_v61  ;;  %v2263_v24 = vpack.c.bf16 %v10868_v45, %v10874_v15  ;;  %v1899_v34 = vsel %vm994_vm1, %v1863_v53, %v13236_v14  ;;  %v1812_v33 = vadd.f32 %v1811_v28, %v1699_v23  ;;  %v10896_v2 = vpop.permute.xlu0 %2154 }
 0x1da   : > { %v1702_v13 = vpop.f32.mrf.mxu0  ;;  %v1815_v62 = vpop.f32.mrf.mxu1  ;;  %v10904_v14 = vsel %vm994_vm1, %v13237_v55, %v1863_v53  ;;  %v10913_v23 = vmul.f32 %v10634_v21, %v1899_v34  ;;  %v13238_v53 = vrot.slane %v10675_v12, 1  ;;  %v10933_v19 = vmax.f32 %v1810_v32, 0.0 }
 0x1db   : > { %v1814_v5 = vadd.f32 %v1813_v17, %v1701_v29  ;;  %v1703_v61 = vadd.f32 %v1702_v13, %v10609_v63  ;;  %3075 = vmatprep.mubr.bf16.mxu0 %v2263_v24  ;;  %v2262_v17 = vpack.c.bf16 %v10880_v25, %v10893_v51  ;;  %v13239_v13 = vrot.slane %v10632_v10, 1 }
 0x1dc   : > { %v10925_v24 = vmax.f32 %v1812_v33, 0.0 }
 0x1dd   : > { %v10908_v28 = vmax.f32 %v1814_v5, 0.0  ;;  %v1816_v63 = vadd.f32 %v1815_v62, %v1703_v61  ;;  %v2101_v5 = vsel %vm1139_vm0, %v13239_v13, %v13238_v53  ;;  %3076 = vmatmul.mubr.bf16.gmra.mxu0 %v2262_v17  ;;  %v13240_v53 = vrot.slane %v10620_v41, 7  ;;  %v10945_v13 = vpop.permute.xlu0 %2164  ;;  %v10951_v62 = vpop.permute.xlu1 %2169 }
 0x1df   : > { %v13150_v55 = vrot.slane %v10908_v28, 7  ;;  %v10928_v34 = vmax.f32 %v1816_v63, 0.0 }
 0x1e1   : > { %v1912_v33 = vsel %vm994_vm1, %v13150_v55, %v13240_v53  ;;  %v13151_v63 = vrot.slane %v10928_v34, 7  ;;  %v2265_v17 = vpack.c.bf16 %v10928_v34, %v10925_v24  ;;  %v13241_v55 = vrot.slane %v10626_v30, 7  ;;  %v9236_v53 = vld [vmem:[%s10033_s25 + $0x270] ss:$8 sps:$4 sm:$0xff]  }
 0x1e2   : > { %v2010_v61 = vmul.f32 %v10592_v56, %v1912_v33  ;;  %v10965_v33 = vmul.f32 %v10749_v42, %v2101_v5  ;;  %v13243_v42 = vrot.slane %v10672_v6, 1  ;;  %v13246_v6 = vrot.slane %v10704_v8, 1 }
 0x1e3   : > { %3085 = vmatprep.mubr.bf16.mxu0 %v2265_v17  ;;  %v1913_v29 = vsel %vm994_vm1, %v13151_v63, %v13241_v55  ;;  %v2264_v55 = vpack.c.bf16 %v10908_v28, %v10933_v19 }
 0x1e4   : > { %v2011_v17 = vmul.f32 %v10592_v56, %v1913_v29  ;;  %v2097_v5 = vsel %vm1139_vm0, %v13243_v42, %v13242_v52  ;;  %v13244_v63 = vmov %v13243_v42  ;;  %v13245_v56 = vrot.slane %v10675_v12, 1  ;;  %v9241_v52 = vld [vmem:[%s10033_s25 + $0x264] ss:$8 sps:$4 sm:$0xff]  }
 0x1e5   : > { %v2234_v10 = vpack.c.bf16 %v10742_v58, %v2010_v61  ;;  %v10995_v27 = vmul.f32 %v10818_v7, %v2097_v5  ;;  %3086 = vmatmul.mubr.bf16.gmra.mxu0 %v2264_v55  ;;  %v13247_v12 = vrot.slane %v10677_v1, 1  ;;  %v13251_v42 = vrot.slane %v10715_v31, 1  ;;  %v2175_v1 = vpop.permute.xlu0 %2174 }
 0x1e6   : > { %v2099_v29 = vsel %vm1139_vm0, %v13245_v56, %v13244_v63  ;;  %v2235_v32 = vpack.c.bf16 %v10770_v22, %v2011_v17  ;;  %v13249_v17 = vld [vmem:[#allocation29_spill] sm:$0xff]  ;;  %v13252_v5 = vrot.slane %v10690_v46, 1 }
 0x1e7   : > { %v10992_v35 = vmul.f32 %v10805_v20, %v2099_v29  ;;  %v2096_v63 = vsel %vm1139_vm0, %v13247_v12, %v13246_v6  ;;  %v13248_v22 = vmov %v13247_v12  ;;  %v13250_v58 = vrot.slane %v13249_v17, 1 }
 0x1e8   : > { %v2093_v55 = vsel %vm1139_vm0, %v13252_v5, %v13251_v42  ;;  %v13253_v56 = vmov %v13252_v5  ;;  %v13254_v29 = vrot.slane %v10692_v47, 1  ;;  %2902 = vmatprep.mubr.bf16.mxu1 %v2235_v32  ;;  %v11028_v17 = vmul.f32 %v10818_v7, %v2096_v63  ;;  %v2180_v47 = vpop.permute.xlu1 %2179  ;;  %v13256_v42 = vld [vmem:[#allocation35_spill] sm:$0xff] }
 0x1e9   : > { %v2098_v61 = vsel %vm1139_vm0, %v13250_v58, %v13248_v22  ;;  %2903 = vmatmul.mubr.bf16.vlgmr.msra.gmra.mxu1 %v2234_v10  ;;  %v11034_v58 = vmul.f32 %v10865_v48, %v2093_v55  ;;  %v13255_v32 = vrot.slane %v10731_v36, 1  ;;  %v13257_v5 = vrot.slane %v13256_v42, 1 }
 0x1ea   : > { %v2095_v6 = vsel %vm1139_vm0, %v13254_v29, %v13253_v56  ;;  %v11025_v22 = vmul.f32 %v10805_v20, %v2098_v61  ;;  %v13259_v7 = vrot.slane %v10704_v8, 1  ;;  %v13260_v10 = vrot.slane %v10713_v43, 1  ;;  %v13261_v29 = vld [vmem:[#allocation41_spill] sm:$0xff]  ;;  %3097 = vmatpush1.bf16.msra.mxu1 %v9236_v53 }
 0x1eb   : > { %v11031_v46 = vmul.f32 %v10850_v39, %v2095_v6  ;;  %v2092_v20 = vsel %vm1139_vm0, %v13257_v5, %v13255_v32  ;;  %v13258_v61 = vmov %v13257_v5  ;;  %v13262_v6 = vld [vmem:[#allocation40_spill] sm:$0xff]  ;;  %3098 = vmatprep.subr.bf16.mxu1 %v9241_v52  ;;  %v13265_v53 = vrot.slane %v10715_v31, 1 }
 0x1ec   : > { %v2094_v63 = vsel %vm1139_vm0, %v13259_v7, %v13258_v61  ;;  %v2089_v55 = vsel %vm1139_vm0, %v13260_v10, %v2059_v40  ;;  %v13263_v12 = vpack.c.bf16 %v13261_v29, %v13262_v6  ;;  %v9239_v32 = vld [vmem:[%s10033_s25 + $0x260] ss:$8 sps:$4 sm:$0xff]   ;;  %v11065_v61 = vmul.f32 %v10865_v48, %v2092_v20  ;;  %v9244_v7 = vld [vmem:[%s10033_s25 + $0x254] ss:$8 sps:$4 sm:$0xff]  }
 0x1ed   : > { %v11062_v5 = vmul.f32 %v10850_v39, %v2094_v63  ;;  %v13264_v29 = vmov %v13260_v10  ;;  %v11077_v6 = vmul.f32 %v10906_v26, %v2089_v55  ;;  %v13266_v39 = vrot.slane %v10780_v50, 1 }
 0x1ee   : > { %2912 = vmatprep.mubr.bf16.mxu1 %v13263_v12  ;;  %v2091_v12 = vsel %vm1139_vm0, %v13265_v53, %v13264_v29  ;;  %v13267_v48 = vrot.slane %v10721_v0, 1  ;;  %v13270_v29 = vrot.slane %v10731_v36, 1  ;;  %v13272_v10 = vmov 0   ;;  %3099 = vmatpush1.bf16.msra.mxu1 %v9239_v32  ;;  %v9247_v32 = vld [vmem:[%s10033_s25 + $0x244] ss:$8 sps:$4 sm:$0xff]  }
 0x1ef   : > { %v11088_v63 = vmul.f32 %v10896_v2, %v2091_v12  ;;  %3548 = vmatprep.mubr.bf16.mxu0 %v13272_v10  ;;  %v13275_v12 = vrot.slane %v10756_v9, 1  ;;  %3100 = vmatprep.subr.bf16.mxu1 %v9244_v7 }
 0x1f0   : > { %v2088_v52 = vsel %vm1139_vm0, %v13267_v48, %v13266_v39  ;;  %v13269_v31 = vmov %v13267_v48  ;;  %v13274_v48 = vrot.slane %v10812_v44, 1 }
 0x1f1   : > { %13268 = vst [vmem:[#allocation29_spill] sm:$0xff] %v11088_v63  ;;  %v2090_v55 = vsel %vm1139_vm0, %v13270_v29, %v13269_v31  ;;  %v11097_v53 = vmul.f32 %v10906_v26, %v2088_v52  ;;  %v13276_v8 = vmov %v13275_v12  ;;  %v13277_v52 = vrot.slane %v10838_v38, 1  ;;  %v2185_v29 = vpop.permute.xlu0 %2184 }
 0x1f2   : > { %v11101_v39 = vmul.f32 %v10896_v2, %v2090_v55  ;;  %v2085_v20 = vsel %vm1139_vm0, %v13275_v12, %v13274_v48  ;;  %v2087_v26 = vsel %vm1139_vm0, %v2059_v40, %v13276_v8  ;;  %v13278_v31 = vrot.slane %v10766_v16, 1  ;;  %v9242_v55 = vld [vmem:[%s10033_s25 + $0x250] ss:$8 sps:$4 sm:$0xff]  }
 0x1f3   : > { %13271 = vst [vmem:[#allocation35_spill] sm:$0xff] %v11097_v53  ;;  %v11125_v12 = vmul.f32 %v10945_v13, %v2087_v26  ;;  %v11128_v56 = vmul.f32 %v10951_v62, %v2085_v20  ;;  %v13282_v8 = vrot.slane %v10780_v50, 1  ;;  %v13284_v48 = vrot.slane %v10874_v15, 1  ;;  %v13297_v53 = vld [vmem:[#allocation42_spill] sm:$0xff]  ;;  %3101 = vmatpush1.bf16.msra.mxu1 %v9242_v55 }
 0x1f4   : > { %13273 = vst [vmem:[#allocation41_spill] sm:$0xff] %v11101_v39  ;;  %v2084_v2 = vsel %vm1139_vm0, %v13278_v31, %v13277_v52  ;;  %v13281_v40 = vmov %v13278_v31  ;;  %v2190_v52 = vpop.permute.xlu1 %2189  ;;  %v13285_v63 = vrot.slane %v10809_v59, 1  ;;  %v13287_v31 = vrot.slane %v10812_v44, 1  ;;  %3102 = vmatprep.subr.bf16.mxu1 %v9247_v32 }
 0x1f5   : > { %13279 = vst [vmem:[#allocation40_spill] sm:$0xff] %v11125_v12  ;;  %13280 = vst [vmem:[#allocation44_spill] sm:$0xff] %v11128_v56  ;;  %v2086_v10 = vsel %vm1139_vm0, %v13282_v8, %v13281_v40  ;;  %v11143_v20 = vmul.f32 %v10951_v62, %v2084_v2  ;;  %v13289_v2 = vrot.slane %v10821_v3, 1  ;;  %v13301_v12 = vrot.slane %v10868_v45, 1 }
 0x1f6   : > { %v11140_v26 = vmul.f32 %v10945_v13, %v2086_v10  ;;  %v2081_v40 = vsel %vm1139_vm0, %v13285_v63, %v13284_v48  ;;  %v13286_v8 = vmov %v13285_v63  ;;  %v13288_v10 = vrot.slane %v10893_v51, 1  ;;  %v13290_v48 = vld [vmem:[#allocation39_spill] sm:$0xff] }
 0x1f7   : > { %v2083_v13 = vsel %vm1139_vm0, %v13287_v31, %v13286_v8  ;;  %v11159_v62 = vmul.f32 %v2180_v47, %v2081_v40  ;;  %v13291_v7 = vpack.c.bf16 %v10816_v37, %v13290_v48  ;;  %v13293_v31 = vmov %v13289_v2 }
 0x1f8   : > { %13283 = vst [vmem:[#allocation45_spill] sm:$0xff] %v11140_v26  ;;  %v2080_v63 = vsel %vm1139_vm0, %v13289_v2, %v13288_v10  ;;  %v11172_v56 = vmul.f32 %v2175_v1, %v2083_v13  ;;  %v13294_v40 = vrot.slane %v10838_v38, 1  ;;  %v2072_v10 = vrot.slane %v10908_v28, 1  ;;  %v13296_v2 = vld [vmem:[#allocation43_spill] sm:$0xff] }
 0x1f9   : > { %2913 = vmatmul.mubr.bf16.gmra.mxu1 %v13291_v7  ;;  %v11180_v39 = vmul.f32 %v2180_v47, %v2080_v63  ;;  %v13298_v37 = vpack.c.bf16 %v13296_v2, %v13297_v53  ;;  %v9245_v7 = vld [vmem:[%s10033_s25 + $0x240] ss:$8 sps:$4 sm:$0xff]   ;;  %v13300_v13 = vrot.slane %v10925_v24, 1  ;;  %v13302_v47 = vmov %v13301_v12  ;;  %v9250_v53 = vld [vmem:[%s10033_s25 + $0x234] ss:$8 sps:$4 sm:$0xff]  }
 0x1fa   : > { %13292 = vst [vmem:[#allocation39_spill] sm:$0xff] %v11172_v56  ;;  %v2082_v8 = vsel %vm1139_vm0, %v13294_v40, %v13293_v31  ;;  %v13303_v63 = vrot.slane %v10874_v15, 1  ;;  %3103 = vmatpush1.bf16.msra.mxu1 %v9245_v7  ;;  %v13312_v56 = vld [vmem:[#allocation28_spill] sm:$0xff]  ;;  %v13313_v32 = vrot.slane %v10933_v19, 1 }
 0x1fb   : > { %13295 = vst [vmem:[#allocation46_spill] sm:$0xff] %v11180_v39  ;;  %2922 = vmatprep.mubr.bf16.mxu1 %v13298_v37  ;;  %v11187_v48 = vmul.f32 %v2175_v1, %v2082_v8  ;;  %v2077_v26 = vsel %vm1139_vm0, %v13301_v12, %v13300_v13  ;;  %v13304_v8 = vrot.slane %v10933_v19, 1  ;;  %v13305_v12 = vrot.slane %v10880_v25, 1  ;;  %v2195_v37 = vpop.permute.xlu0 %2194  ;;  %3104 = vmatprep.subr.bf16.mxu1 %v9250_v53  ;;  %v9253_v7 = vld [vmem:[%s10033_s25 + $0x224] ss:$8 sps:$4 sm:$0xff]  }
 0x1fc   : > { %v2079_v31 = vsel %vm1139_vm0, %v13303_v63, %v13302_v47  ;;  %v11206_v40 = vmul.f32 %v2190_v52, %v2077_v26  ;;  %v13307_v47 = vrot.slane %v10893_v51, 1  ;;  %v13309_v1 = vrot.slane %v10925_v24, 1 }
 0x1fd   : > { %13299 = vst [vmem:[#allocation43_spill] sm:$0xff] %v11187_v48  ;;  %v11204_v55 = vmul.f32 %v2185_v29, %v2079_v31  ;;  %v2076_v2 = vsel %vm1139_vm0, %v13305_v12, %v13304_v8  ;;  %v13306_v13 = vmov %v13305_v12  ;;  %v13308_v31 = vrot.slane %v10928_v34, 1  ;;  %v2200_v12 = vpop.permute.xlu1 %2199 }
 0x1fe   : > { %v2078_v63 = vsel %vm1139_vm0, %v13307_v47, %v13306_v13  ;;  %v11222_v26 = vmul.f32 %v2190_v52, %v2076_v2  ;;  %v13310_v39 = vrot.slane %v10626_v30, 1  ;;  %v9248_v47 = vld [vmem:[%s10033_s25 + $0x230] ss:$8 sps:$4 sm:$0xff]   ;;  %v13314_v30 = vrot.slane %v10620_v41, 1 }
 0x1ff   : > { %v2075_v8 = vsel %vm1139_vm0, %v13309_v1, %v13308_v31  ;;  %v11232_v48 = vmul.f32 %v2185_v29, %v2078_v63  ;;  %v13311_v13 = vmov %v13308_v31  ;;  %v2023_v1 = vmul.f32 %v13312_v56, %v10904_v14  ;;  %3105 = vmatpush1.bf16.msra.mxu1 %v9248_v47 }
 0x200   : > { %v2105_v52 = vsel %vm1139_vm0, %v13311_v13, %v13310_v39  ;;  %v11240_v2 = vmul.f32 %v2195_v37, %v2075_v8  ;;  %v2074_v29 = vsel %vm1139_vm0, %v13313_v32, %v2072_v10  ;;  %v2104_v39 = vsel %vm1139_vm0, %v2072_v10, %v13314_v30  ;;  %3106 = vmatprep.subr.bf16.mxu1 %v9253_v7  ;;  %v9254_v7 = vld [vmem:[%s10033_s25 + $0x210] ss:$8 sps:$4 sm:$0xff]  }
 0x201   : > { %v11245_v31 = vmul.f32 %v2200_v12, %v2105_v52  ;;  %v1867_v63 = vrot.slane %v10763_v60, 7  ;;  %v2278_v14 = vpack.c.bf16 %v11222_v26, %v11232_v48  ;;  %v11259_v8 = vmul.f32 %v2195_v37, %v2074_v29  ;;  %v13356_v26 = vld [vmem:[#allocation26_spill] sm:$0xff] }
 0x202   : > { %v11261_v13 = vmul.f32 %v2200_v12, %v2104_v39  ;;  %v2241_v32 = vpack.c.bf16 %v10913_v23, %v2023_v1  ;;  %v13315_v41 = vrot.slane %v10721_v0, 7  ;;  %v13316_v52 = vrot.slane %v10731_v36, 7  ;;  %v9251_v1 = vld [vmem:[%s10033_s25 + $0x220] ss:$8 sps:$4 sm:$0xff]   ;;  %v9256_v39 = vld [vmem:[%s10033_s25 + $0x214] ss:$8 sps:$4 sm:$0xff]  }
 0x203   : > { %v2281_v60 = vpack.c.bf16 %v11245_v31, %v11240_v2  ;;  %v13317_v53 = vpack.c.bf16 %v10863_v57, %v10871_v18  ;;  %v13318_v37 = vrot.slane %v10756_v9, 7  ;;  %v13320_v30 = vrot.slane %v13256_v42, 7  ;;  %3107 = vmatpush1.bf16.msra.mxu1 %v9251_v1 }
 0x204   : > { %v1898_v10 = vsel %vm994_vm1, %v13316_v52, %v13315_v41  ;;  %v2280_v23 = vpack.c.bf16 %v11261_v13, %v11259_v8  ;;  %v13319_v29 = vmov %v13316_v52  ;;  %v13321_v41 = vrot.slane %v10713_v43, 7  ;;  %3108 = vmatprep.subr.bf16.mxu1 %v9256_v39 }
 0x205   : > { %2923 = vmatmul.mubr.bf16.gmra.mxu1 %v13317_v53  ;;  %v1895_v12 = vsel %vm994_vm1, %v1867_v63, %v13318_v37  ;;  %v1900_v57 = vsel %vm994_vm1, %v13320_v30, %v13319_v29  ;;  %v2024_v18 = vmul.f32 %v10634_v21, %v1898_v10  ;;  %v1868_v47 = vrot.slane %v10766_v16, 7  ;;  %v13323_v21 = vld [vmem:[#allocation30_spill] sm:$0xff] }
 0x206   : > { %2932 = vmatprep.mubr.bf16.mxu1 %v2241_v32  ;;  %v1897_v52 = vsel %vm994_vm1, %v13321_v41, %v1867_v63  ;;  %v13322_v32 = vld [vmem:[#allocation31_spill] sm:$0xff]  ;;  %v1873_v36 = vrot.slane %v10809_v59, 7  ;;  %v2022_v42 = vmul.f32 %v13312_v56, %v1900_v57  ;;  %v1866_v37 = vrot.slane %v10780_v50, 7  ;;  %v9259_v63 = vld [vmem:[%s10033_s25 + $0x204] ss:$8 sps:$4 sm:$0xff]  }
 0x207   : > { %v2029_v53 = vmul.f32 %v13322_v32, %v1895_v12  ;;  %v2027_v10 = vmul.f32 %v13323_v21, %v1897_v52  ;;  %v1871_v43 = vrot.slane %v10812_v44, 7  ;;  %3109 = vmatpush1.bf16.msra.mxu1 %v9254_v7  ;;  %v9257_v50 = vld [vmem:[%s10033_s25 + $0x200] ss:$8 sps:$4 sm:$0xff]   ;;  %v13324_v56 = vrot.slane %v10721_v0, 7  ;;  %v9262_v30 = vld [vmem:[%s10033_s25 + $0x2f4] ss:$8 sps:$4 sm:$0xff]  }
 0x208   : > { %v2240_v29 = vpack.c.bf16 %v2024_v18, %v2022_v42  ;;  %v1894_v12 = vsel %vm994_vm1, %v1866_v37, %v1868_v47  ;;  %3110 = vmatprep.subr.bf16.mxu1 %v9259_v63  ;;  %v13325_v57 = vrot.slane %v10756_v9, 7  ;;  %v1872_v39 = vrot.slane %v10821_v3, 7  ;;  %v13326_v41 = vld [vmem:[#allocation33_spill] sm:$0xff]  ;;  %v9268_v63 = vld [vmem:[%s10033_s25 + $0x2d4] ss:$8 sps:$4 sm:$0xff]  }
 0x209   : > { %v2243_v16 = vpack.c.bf16 %v2029_v53, %v2027_v10  ;;  %v1891_v59 = vsel %vm994_vm1, %v1871_v43, %v1873_v36  ;;  %v1896_v44 = vsel %vm994_vm1, %v13324_v56, %v1866_v37  ;;  %v2028_v1 = vmul.f32 %v13322_v32, %v1894_v12  ;;  %v9260_v37 = vld [vmem:[%s10033_s25 + $0x2f0] ss:$8 sps:$4 sm:$0xff]   ;;  %v13327_v32 = vld [vmem:[#allocation32_spill] sm:$0xff] }
 0x20a   : > { %v1893_v18 = vsel %vm994_vm1, %v13325_v57, %v1871_v43  ;;  %v2033_v52 = vmul.f32 %v13326_v41, %v1891_v59  ;;  %v1877_v53 = vrot.slane %v10868_v45, 7  ;;  %v2026_v0 = vmul.f32 %v13323_v21, %v1896_v44  ;;  %v9265_v43 = vld [vmem:[%s10033_s25 + $0x2e4] ss:$8 sps:$4 sm:$0xff]  }
 0x20b   : > { %v1870_v42 = vrot.slane %v10838_v38, 7  ;;  %3111 = vmatpush1.bf16.msra.mxu1 %v9257_v50  ;;  %v2031_v7 = vmul.f32 %v13327_v32, %v1893_v18  ;;  %v1875_v9 = vrot.slane %v10874_v15, 7  ;;  %v9263_v38 = vld [vmem:[%s10033_s25 + $0x2e0] ss:$8 sps:$4 sm:$0xff]   ;;  %v1876_v12 = vrot.slane %v10880_v25, 7 }
 0x20c   : > { %v2242_v10 = vpack.c.bf16 %v2028_v1, %v2026_v0  ;;  %3112 = vmatprep.subr.bf16.mxu1 %v9262_v30  ;;  %v13328_v59 = vld [vmem:[#allocation36_spill] sm:$0xff]  ;;  %v1874_v44 = vrot.slane %v10893_v51, 7  ;;  %v9266_v1 = vld [vmem:[%s10033_s25 + $0x2d0] ss:$8 sps:$4 sm:$0xff]   ;;  %v1879_v57 = vrot.slane %v10925_v24, 7 }
 0x20d   : > { %2933 = vmatmul.mubr.bf16.gmra.mxu1 %v2240_v29  ;;  %v2245_v3 = vpack.c.bf16 %v2033_v52, %v2031_v7  ;;  %v1890_v29 = vsel %vm994_vm1, %v1870_v42, %v1872_v39  ;;  %v1887_v45 = vsel %vm994_vm1, %v1875_v9, %v1877_v53  ;;  %v1892_v21 = vsel %vm994_vm1, %v1868_v47, %v1870_v42  ;;  %v13329_v30 = vld [vmem:[#allocation34_spill] sm:$0xff]  ;;  %v9269_v0 = vld [vmem:[%s10033_s25 + $0x2c0] ss:$8 sps:$4 sm:$0xff]  }
 0x20e   : > { %2942 = vmatprep.mubr.bf16.mxu1 %v2243_v16  ;;  %v2032_v15 = vmul.f32 %v13326_v41, %v1890_v29  ;;  %v1889_v16 = vsel %vm994_vm1, %v1873_v36, %v1875_v9  ;;  %v2037_v50 = vmul.f32 %v13328_v59, %v1887_v45  ;;  %v2030_v56 = vmul.f32 %v13327_v32, %v1892_v21  ;;  %v9271_v41 = vld [vmem:[%s10033_s25 + $0x2c4] ss:$8 sps:$4 sm:$0xff]   ;;  %v13331_v7 = vld [vmem:[#allocation38_spill] sm:$0xff] }
 0x20f   : > { %3113 = vmatpush2.bf16.msra.mxu1 %v9260_v37  ;;  %v2035_v47 = vmul.f32 %v13329_v30, %v1889_v16  ;;  %v1886_v25 = vsel %vm994_vm1, %v1874_v44, %v1876_v12  ;;  %v13330_v52 = vrot.slane %v10928_v34, 7  ;;  %v1888_v24 = vsel %vm994_vm1, %v1872_v39, %v1874_v44  ;;  %v9274_v37 = vld [vmem:[%s10033_s25 + $0x2b4] ss:$8 sps:$4 sm:$0xff]   ;;  %v9277_v45 = vld [vmem:[%s10033_s25 + $0x2a4] ss:$8 sps:$4 sm:$0xff]  }
 0x210   : > { %3114 = vmatprep.subr.bf16.mxu1 %v9265_v43  ;;  %v2244_v18 = vpack.c.bf16 %v2032_v15, %v2030_v56  ;;  %v2036_v42 = vmul.f32 %v13328_v59, %v1886_v25  ;;  %v1885_v32 = vsel %vm994_vm1, %v1877_v53, %v1879_v57  ;;  %v2034_v9 = vmul.f32 %v13329_v30, %v1888_v24  ;;  %v9272_v43 = vld [vmem:[%s10033_s25 + $0x2b0] ss:$8 sps:$4 sm:$0xff]   ;;  %v9280_v16 = vld [vmem:[%s10033_s25 + $0x294] ss:$8 sps:$4 sm:$0xff]   ;;  %v9283_v56 = vld [vmem:[%s10033_s25 + $0x284] ss:$8 sps:$4 sm:$0xff]  }
 0x211   : > { %v2247_v36 = vpack.c.bf16 %v2037_v50, %v2035_v47  ;;  %v1883_v51 = vsel %vm994_vm1, %v1879_v57, %v13330_v52  ;;  %v13333_v21 = vrot.slane %v10908_v28, 7  ;;  %v9278_v50 = vld [vmem:[%s10033_s25 + $0x290] ss:$8 sps:$4 sm:$0xff]   ;;  %v13334_v44 = vpack.c.bf16 %v10965_v33, %v10962_v4  ;;  %v13340_v33 = vld [vmem:[#allocation29_spill] sm:$0xff] }
 0x212   : > { %v2041_v34 = vmul.f32 %v13331_v7, %v1883_v51  ;;  %v2246_v39 = vpack.c.bf16 %v2036_v42, %v2034_v9  ;;  %v13336_v30 = vpack.c.bf16 %v10995_v27, %v10992_v35  ;;  %v13337_v47 = vpack.c.bf16 %v11028_v17, %v11025_v22  ;;  %v13343_v27 = vld [vmem:[#allocation41_spill] sm:$0xff]  ;;  %v13346_v22 = vld [vmem:[#allocation40_spill] sm:$0xff]  ;;  %v13357_v42 = vld [vmem:[#allocation27_spill] sm:$0xff] }
 0x213   : > { %3115 = vmatpush2.bf16.msra.mxu1 %v9263_v38  ;;  %v13338_v57 = vpack.c.bf16 %v11034_v58, %v11031_v46  ;;  %v13339_v4 = vpack.c.bf16 %v11065_v61, %v11062_v5  ;;  %v13348_v46 = vld [vmem:[#allocation45_spill] sm:$0xff]  ;;  %v13350_v5 = vld [vmem:[#allocation39_spill] sm:$0xff]  ;;  %v13355_v25 = vpack.c.bf16 %v11206_v40, %v11204_v55  ;;  %v2378_v40 = vld [vmem:[%s10038_s29] sm:$0x3] }
 0x214   : > { %3116 = vmatprep.subr.bf16.mxu1 %v9268_v63  ;;  %v13349_v58 = vpack.c.bf16 %v11143_v20, %v13348_v46  ;;  %v13351_v61 = vpack.c.bf16 %v11159_v62, %v13350_v5 }
 0x215   : > { %2943 = vmatmul.mubr.bf16.gmra.mxu1 %v2242_v10  ;;  %v1878_v10 = vrot.slane %v10933_v19, 7  ;;  %v9275_v19 = vld [vmem:[%s10033_s25 + $0x2a0] ss:$8 sps:$4 sm:$0xff]  }
 0x216   : > { %2952 = vmatprep.mubr.bf16.mxu1 %v2245_v3  ;;  %v13332_v3 = vld [vmem:[#allocation37_spill] sm:$0xff] }
 0x217   : > { %3117 = vmatpush2.bf16.msra.mxu1 %v9266_v1  ;;  %v2039_v29 = vmul.f32 %v13332_v3, %v1885_v32  ;;  %v1882_v53 = vsel %vm994_vm1, %v1878_v10, %v13333_v21  ;;  %v1884_v15 = vsel %vm994_vm1, %v1876_v12, %v1878_v10  ;;  %v9281_v1 = vld [vmem:[%s10033_s25 + $0x280] ss:$8 sps:$4 sm:$0xff]   ;;  %v13335_v12 = vpack.c.bf16 %v10760_v11, %v10753_v49  ;;  %v13342_v11 = vld [vmem:[#allocation35_spill] sm:$0xff] }
 0x218   : > { %3118 = vmatprep.subr.bf16.mxu1 %v9271_v41  ;;  %v2040_v63 = vmul.f32 %v13331_v7, %v1882_v53  ;;  %v2038_v59 = vmul.f32 %v13332_v3, %v1884_v15  ;;  %v13341_v49 = vpack.c.bf16 %v11077_v6, %v13340_v33  ;;  %v13344_v35 = vpack.c.bf16 %v13342_v11, %v13343_v27  ;;  %v13352_v41 = vld [vmem:[#allocation46_spill] sm:$0xff]  ;;  %v13353_v6 = vld [vmem:[#allocation43_spill] sm:$0xff] }
 0x219   : > { %v2249_v38 = vpack.c.bf16 %v2041_v34, %v2039_v29 }
 0x21a   : > { %v2248_v28 = vpack.c.bf16 %v2040_v63, %v2038_v59 }
 0x21b   : > { %3119 = vmatpush2.bf16.msra.mxu1 %v9269_v0 }
 0x21c   : > { %3120 = vmatprep.subr.bf16.mxu1 %v9274_v37  ;;  %v11440_v37 = vrot.slane %v2378_v40, %v13357_v42 }
 0x21d   : > { %2953 = vmatmul.mubr.bf16.gmra.mxu1 %v2244_v18  ;;  %v13345_v18 = vld [vmem:[#allocation44_spill] sm:$0xff] }
 0x21e   : > { %2962 = vmatprep.mubr.bf16.mxu1 %v2247_v36  ;;  %v13347_v17 = vpack.c.bf16 %v13345_v18, %v13346_v22  ;;  %v13354_v36 = vpack.c.bf16 %v13352_v41, %v13353_v6 }
 0x21f   : > { %3121 = vmatpush2.bf16.msra.mxu1 %v9272_v43 }
 0x220   : > { %3122 = vmatprep.subr.bf16.mxu1 %v9277_v45 }
 0x223   : > { %3123 = vmatpush2.bf16.msra.mxu1 %v9275_v19 }
 0x224   : > { %3124 = vmatprep.subr.bf16.mxu1 %v9280_v16 }
 0x225   : > { %2963 = vmatmul.mubr.bf16.gmra.mxu1 %v2246_v39 }
 0x226   : > { %2972 = vmatprep.mubr.bf16.mxu1 %v2249_v38 }
 0x227   : > { %3125 = vmatpush2.bf16.msra.mxu1 %v9278_v50 }
 0x228   : > { %3126 = vmatprep.subr.bf16.mxu1 %v9283_v56 }
 0x22b   : > { %3127 = vmatpush2.bf16.msra.mxu1 %v9281_v1 }
 0x22d   : > { %2973 = vmatmul.mubr.bf16.gmra.mxu1 %v2248_v28 }
 0x22e   : > { %3128 = vmatprep.mubr.bf16.mxu1 %v13334_v44 }
 0x235   : > { %3129 = vmatmul.mubr.bf16.vlgmr.msra.gmra.mxu1 %v13335_v12 }
 0x236   : > { %3138 = vmatprep.mubr.bf16.mxu1 %v13336_v30 }
 0x23d   : > { %3139 = vmatmul.mubr.bf16.gmra.mxu1 %v13337_v47 }
 0x23e   : > { %3148 = vmatprep.mubr.bf16.mxu1 %v13338_v57 }
 0x245   : > { %3149 = vmatmul.mubr.bf16.gmra.mxu1 %v13339_v4 }
 0x246   : > { %3158 = vmatprep.mubr.bf16.mxu1 %v13341_v49 }
 0x24d   : > { %3159 = vmatmul.mubr.bf16.gmra.mxu1 %v13344_v35 }
 0x24e   : > { %3168 = vmatprep.mubr.bf16.mxu1 %v13347_v17 }
 0x255   : > { %3169 = vmatmul.mubr.bf16.gmra.mxu1 %v13349_v58 }
 0x256   : > { %3178 = vmatprep.mubr.bf16.mxu1 %v13351_v61 }
 0x25d   : > { %3179 = vmatmul.mubr.bf16.gmra.mxu1 %v13354_v36 }
 0x25e   : > { %3188 = vmatprep.mubr.bf16.mxu1 %v13355_v25 }
 0x265   : > { %3189 = vmatmul.mubr.bf16.gmra.mxu1 %v2278_v14  ;;  %v11434_v14 = vrot.slane %v2378_v40, %v13356_v26 }
 0x266   : > { %3198 = vmatprep.mubr.bf16.mxu1 %v2281_v60 }
 0x26d   : > { %3199 = vmatmul.mubr.bf16.gmra.mxu1 %v2280_v23  ;;  %v11426_v20 = vpop.f32.mrf.mxu0 }
 0x26f   : > { %v11428_v62 = vpop.f32.mrf.mxu0 }
 0x271   : > { %v3021_v52 = vpop.f32.mrf.mxu0 }
 0x273   : > { %v11430_v51 = vpop.f32.mrf.mxu0 }
 0x275   : > { %v3027_v55 = vpop.f32.mrf.mxu0 }
 0x277   : > { %v3029_v2 = vpop.f32.mrf.mxu0 }
 0x279   : > { %v3031_v23 = vpop.f32.mrf.mxu0 }
 0x27b   : > { %v11446_v10 = vpop.f32.mrf.mxu0 }
 0x27d   : > { %v3037_v38 = vpop.f32.mrf.mxu0 }
 0x27f   : > { %v3039_v16 = vpop.f32.mrf.mxu0 }
 0x281   : > { %v11479_v33 = vpop.f32.mrf.mxu0 }
 0x283   : > { %v11485_v27 = vpop.f32.mrf.mxu0 }
 0x285   : > { %v11491_v22 = vpop.f32.mrf.mxu0 }
 0x287   : > { %v11497_v58 = vpop.f32.mrf.mxu0 }
 0x289   : > { %v11503_v41 = vpop.f32.mrf.mxu0 }
 0x28b   : > { %v11509_v25 = vpop.f32.mrf.mxu0 }
 0x2a9   : > { %v2904_v0 = vpop.f32.mrf.mxu1 }
 0x2ab   : > { %v2906_v48 = vpop.f32.mrf.mxu1 }
 0x2ac   : > { %v2907_v40 = vadd.f32 %v2906_v48, %v11440_v37 }
 0x2ad   : > { %v2908_v31 = vpop.f32.mrf.mxu1 }
 0x2ae   : > { %v2909_v60 = vadd.f32 %v2908_v31, %v11434_v14  ;;  %v11517_v31 = vpop.f32.mrf.mxu0 }
 0x2af   : > { %v2910_v8 = vpop.f32.mrf.mxu1 }
 0x2b0   : > { %v11437_v13 = vadd.f32 %v3021_v52, %v2909_v60  ;;  %v2905_v52 = vadd.f32 %v2904_v0, %v11434_v14 }
 0x2b2   : > { %v3018_v60 = vadd.f32 %v11426_v20, %v2905_v52 }
 0x2b9   : > { %v2914_v24 = vpop.f32.mrf.mxu1 }
 0x2ba   : > { %v2915_v32 = vadd.f32 %v2914_v24, %v11434_v14  ;;  %v2911_v24 = vadd.f32 %v2910_v8, %v11440_v37 }
 0x2bb   : > { %v2916_v7 = vpop.f32.mrf.mxu1 }
 0x2bc   : > { %v2917_v34 = vadd.f32 %v2916_v7, %v11440_v37  ;;  %v11444_v9 = vadd.f32 %v3027_v55, %v2915_v32  ;;  %v3020_v7 = vadd.f32 %v11428_v62, %v2907_v40 }
 0x2bd   : > { %v2918_v43 = vpop.f32.mrf.mxu1 }
 0x2be   : > { %v2919_v3 = vadd.f32 %v2918_v43, %v11434_v14  ;;  %v11449_v29 = vadd.f32 %v3029_v2, %v2917_v34  ;;  %v11522_v43 = vpop.f32.mrf.mxu0 }
 0x2bf   : > { %v2920_v39 = vpop.f32.mrf.mxu1 }
 0x2c0   : > { %v11451_v45 = vadd.f32 %v3031_v23, %v2919_v3  ;;  %v2921_v8 = vadd.f32 %v2920_v39, %v11440_v37 }
 0x2c5   : > { %v2924_v21 = vpop.f32.mrf.mxu1 }
 0x2c6   : > { %v2925_v53 = vadd.f32 %v2924_v21, %v11434_v14  ;;  %v3024_v21 = vadd.f32 %v11430_v51, %v2911_v24 }
 0x2c7   : > { %v2926_v19 = vpop.f32.mrf.mxu1 }
 0x2c8   : > { %v2927_v15 = vadd.f32 %v2926_v19, %v11440_v37  ;;  %v11455_v63 = vadd.f32 %v3037_v38, %v2925_v53 }
 0x2c9   : > { %v11457_v59 = vpop.f32.mrf.mxu1 }
 0x2ca   : > { %v11459_v50 = vadd.f32 %v3039_v16, %v2927_v15  ;;  %v11526_v15 = vpop.f32.mrf.mxu0 }
 0x2cb   : > { %v11461_v28 = vpop.f32.mrf.mxu1 }
 0x2cd   : > { %v11463_v56 = vpop.f32.mrf.mxu1 }
 0x2cf   : > { %v11465_v44 = vpop.f32.mrf.mxu1 }
 0x2d1   : > { %v11467_v1 = vpop.f32.mrf.mxu1 }
 0x2d3   : > { %v11469_v12 = vpop.f32.mrf.mxu1 }
 0x2d5   : > { %v11471_v30 = vpop.f32.mrf.mxu1 }
 0x2d7   : > { %v11473_v47 = vpop.f32.mrf.mxu1 }
 0x2d9   : > { %v11475_v57 = vpop.f32.mrf.mxu1 }
 0x2db   : > { %v11477_v4 = vpop.f32.mrf.mxu1 }
 0x2dd   : > { %v11481_v49 = vpop.f32.mrf.mxu1 }
 0x2df   : > { %v11483_v11 = vpop.f32.mrf.mxu1 }
 0x2e1   : > { %v11487_v35 = vpop.f32.mrf.mxu1 }
 0x2e3   : > { %v11489_v18 = vpop.f32.mrf.mxu1 }
 0x2e5   : > { %v11493_v17 = vpop.f32.mrf.mxu1 }
 0x2e7   : > { %v11495_v46 = vpop.f32.mrf.mxu1 }
 0x2e9   : > { %v11499_v5 = vpop.f32.mrf.mxu1 }
 0x2eb   : > { %v11501_v61 = vpop.f32.mrf.mxu1 }
 0x2ed   : > { %v11505_v6 = vpop.f32.mrf.mxu1 }
 0x2ef   : > { %v11507_v36 = vpop.f32.mrf.mxu1 }
 0x2f1   : > { %v11512_v55 = vpop.f32.mrf.mxu1 }
 0x2f3   : > { %v11515_v2 = vpop.f32.mrf.mxu1 }
 0x2f5   : > { %v3130_v23 = vpop.f32.mrf.mxu1 }
 0x2f6   : > { %v3131_v32 = vadd.f32 %v3130_v23, %v3018_v60 }
 0x2f7   : > { %v3132_v34 = vpop.f32.mrf.mxu1 }
 0x2f8   : > { %v3133_v0 = vadd.f32 %v3132_v34, %v3020_v7  ;;  %v3209_v38 = vmax.f32 %v3131_v32, 0.0  ;;  %v11534_v7 = vpop.f32.mrf.mxu0 }
 0x2f9   : > { %v3134_v3 = vpop.f32.mrf.mxu1 }
 0x2fa   : > { %v3135_v48 = vadd.f32 %v3134_v3, %v11437_v13  ;;  %v3210_v53 = vmax.f32 %v3133_v0, 0.0  ;;  %v11529_v62 = vrot.slane %v3209_v38, 1  ;;  %v3034_v3 = vadd.f32 %v11446_v10, %v2921_v8 }
 0x2fb   : > { %v3136_v19 = vpop.f32.mrf.mxu1 }
 0x2fc   : > { %v3211_v20 = vmax.f32 %v3135_v48, 0.0  ;;  %v3137_v16 = vadd.f32 %v3136_v19, %v3024_v21  ;;  %v11532_v32 = vrot.slane %v3210_v53, 1 }
 0x2fd   : > { %v3140_v52 = vpop.f32.mrf.mxu1 }
 0x2fe   : > { %v3243_v40 = vrot.slane %v3211_v20, 1  ;;  %v3212_v60 = vmax.f32 %v3137_v16, 0.0  ;;  %v3141_v23 = vadd.f32 %v3140_v52, %v11444_v9 }
 0x2ff   : > { %v3142_v13 = vpop.f32.mrf.mxu1 }
 0x300   : > { %v3244_v51 = vrot.slane %v3212_v60, 1  ;;  %v3213_v24 = vmax.f32 %v3141_v23, 0.0  ;;  %v3143_v34 = vadd.f32 %v3142_v13, %v11449_v29  ;;  %v3301_v39 = vsel %vm1139_vm0, %v11529_v62, %v3243_v40  ;;  %v11551_v13 = vpop.f32.mrf.mxu0 }
 0x301   : > { %v3144_v0 = vpop.f32.mrf.mxu1  ;;  %v11541_v48 = vmax.f32 %v3209_v38, %v3301_v39  ;;  %v2929_v29 = vadd.f32 %v11457_v59, %v11434_v14 }
 0x302   : > { %v3245_v21 = vrot.slane %v3213_v24, 1  ;;  %v3214_v9 = vmax.f32 %v3143_v34, 0.0  ;;  %v3145_v19 = vadd.f32 %v3144_v0, %v11451_v45  ;;  %v3302_v16 = vsel %vm1139_vm0, %v11532_v32, %v3244_v51 }
 0x303   : > { %13358 = vst [vmem:[#allocation42_spill] sm:$0xff] %v11541_v48  ;;  %v3146_v52 = vpop.f32.mrf.mxu1  ;;  %v11549_v23 = vmax.f32 %v3210_v53, %v3302_v16  ;;  %v2935_v53 = vadd.f32 %v11463_v56, %v11434_v14 }
 0x304   : > { %v3246_v42 = vrot.slane %v3214_v9, 1  ;;  %v3215_v10 = vmax.f32 %v3145_v19, 0.0  ;;  %v3147_v38 = vadd.f32 %v3146_v52, %v3034_v3  ;;  %v3299_v8 = vsel %vm1139_vm0, %v3243_v40, %v3245_v21  ;;  %v11565_v52 = vpop.f32.mrf.mxu0 }
 0x305   : > { %13359 = vst [vmem:[#allocation28_spill] sm:$0xff] %v11549_v23  ;;  %v3150_v34 = vpop.f32.mrf.mxu1  ;;  %v11555_v45 = vmax.f32 %v3211_v20, %v3299_v8  ;;  %v3042_v19 = vadd.f32 %v11479_v33, %v2929_v29 }
 0x306   : > { %v3247_v39 = vrot.slane %v3215_v10, 1  ;;  %v3216_v0 = vmax.f32 %v3147_v38, 0.0  ;;  %v3151_v26 = vadd.f32 %v3150_v34, %v11455_v63  ;;  %v3300_v59 = vsel %vm1139_vm0, %v3244_v51, %v3246_v42 }
 0x307   : > { %13360 = vst [vmem:[#allocation31_spill] sm:$0xff] %v11555_v45  ;;  %v3152_v16 = vpop.f32.mrf.mxu1  ;;  %v11563_v3 = vmax.f32 %v3212_v60, %v3300_v59 }
 0x308   : > { %v3248_v40 = vrot.slane %v3216_v0, 1  ;;  %v3217_v20 = vmax.f32 %v3151_v26, 0.0  ;;  %v11568_v8 = vadd.f32 %v3152_v16, %v11459_v50  ;;  %v3297_v63 = vsel %vm1139_vm0, %v3245_v21, %v3247_v39  ;;  %v3071_v50 = vpop.f32.mrf.mxu0 }
 0x309   : > { %13361 = vst [vmem:[#allocation30_spill] sm:$0xff] %v11563_v3  ;;  %v3154_v38 = vpop.f32.mrf.mxu1  ;;  %v11572_v51 = vmax.f32 %v3213_v24, %v3297_v63  ;;  %v3048_v26 = vadd.f32 %v11491_v22, %v2935_v53  ;;  %v2939_v21 = vadd.f32 %v11467_v1, %v11434_v14 }
 0x30a   : > { %v3249_v34 = vrot.slane %v3217_v20, 1  ;;  %v13162_v56 = vmax.f32 %v11568_v8, 0.0  ;;  %v3155_v23 = vadd.f32 %v3154_v38, %v3042_v19  ;;  %v3298_v33 = vsel %vm1139_vm0, %v3246_v42, %v3248_v40  ;;  %v11599_v53 = vpop.f32.mrf.mxu0 }
 0x30b   : > { %13362 = vst [vmem:[#allocation33_spill] sm:$0xff] %v11572_v51  ;;  %v11577_v60 = vpop.f32.mrf.mxu1  ;;  %v11580_v29 = vmax.f32 %v3214_v9, %v3298_v33 }
 0x30c   : > { %v11586_v24 = vrot.slane %v13162_v56, 1  ;;  %v3219_v59 = vmax.f32 %v3155_v23, 0.0  ;;  %v3295_v16 = vsel %vm1139_vm0, %v3247_v39, %v3249_v34  ;;  %v2945_v23 = vadd.f32 %v11471_v30, %v11434_v14 }
 0x30d   : > { %13363 = vst [vmem:[#allocation32_spill] sm:$0xff] %v11580_v29  ;;  %v3160_v19 = vpop.f32.mrf.mxu1  ;;  %v11590_v42 = vmax.f32 %v3215_v10, %v3295_v16  ;;  %v3052_v39 = vadd.f32 %v11503_v41, %v2939_v21 }
 0x30e   : > { %v3251_v63 = vrot.slane %v3219_v59, 1  ;;  %v3161_v38 = vadd.f32 %v3160_v19, %v3048_v26  ;;  %v3296_v22 = vsel %vm1139_vm0, %v3248_v40, %v11586_v24  ;;  %v3058_v30 = vadd.f32 %v11517_v31, %v2945_v23 }
 0x30f   : > { %13364 = vst [vmem:[#allocation36_spill] sm:$0xff] %v11590_v42  ;;  %v11595_v9 = vpop.f32.mrf.mxu1  ;;  %v11597_v1 = vmax.f32 %v3216_v0, %v3296_v22  ;;  %v3077_v0 = vpop.f32.mrf.mxu0  ;;  %v2949_v22 = vadd.f32 %v11475_v57, %v11434_v14 }
 0x310   : > { %v3221_v33 = vmax.f32 %v3161_v38, 0.0  ;;  %v3293_v10 = vsel %vm1139_vm0, %v3249_v34, %v3251_v63 }
 0x311   : > { %13365 = vst [vmem:[#allocation34_spill] sm:$0xff] %v11597_v1  ;;  %v3164_v26 = vpop.f32.mrf.mxu1  ;;  %v11606_v16 = vmax.f32 %v3217_v20, %v3293_v10  ;;  %v3062_v57 = vadd.f32 %v11526_v15, %v2949_v22 }
 0x312   : > { %v3253_v19 = vrot.slane %v3221_v33, 1  ;;  %v3165_v40 = vadd.f32 %v3164_v26, %v3052_v39  ;;  %v3079_v39 = vpop.f32.mrf.mxu0  ;;  %v2955_v26 = vadd.f32 %v11481_v49, %v11434_v14 }
 0x313   : > { %v11608_v56 = vpop.f32.mrf.mxu1 }
 0x314   : > { %v3223_v3 = vmax.f32 %v3165_v40, 0.0  ;;  %v3291_v41 = vsel %vm1139_vm0, %v3251_v63, %v3253_v19  ;;  %v3068_v49 = vadd.f32 %v11551_v13, %v2955_v26 }
 0x315   : > { %v3170_v21 = vpop.f32.mrf.mxu1  ;;  %v11615_v38 = vmax.f32 %v3219_v59, %v3291_v41 }
 0x316   : > { %v3255_v34 = vrot.slane %v3223_v3, 1  ;;  %v3171_v20 = vadd.f32 %v3170_v21, %v3058_v30  ;;  %v3081_v30 = vpop.f32.mrf.mxu0  ;;  %v2959_v21 = vadd.f32 %v11487_v35, %v11434_v14 }
 0x317   : > { %v11617_v10 = vpop.f32.mrf.mxu1 }
 0x318   : > { %v3225_v45 = vmax.f32 %v3171_v20, 0.0  ;;  %v3289_v31 = vsel %vm1139_vm0, %v3253_v19, %v3255_v34  ;;  %v3072_v29 = vadd.f32 %v3071_v50, %v2959_v21 }
 0x319   : > { %v3174_v23 = vpop.f32.mrf.mxu1  ;;  %v11624_v40 = vmax.f32 %v3221_v33, %v3289_v31 }
 0x31a   : > { %v3257_v63 = vrot.slane %v3225_v45, 1  ;;  %v3175_v59 = vadd.f32 %v3174_v23, %v3062_v57  ;;  %v3083_v57 = vpop.f32.mrf.mxu0  ;;  %v2965_v23 = vadd.f32 %v11493_v17, %v11434_v14 }
 0x31b   : > { %v11626_v41 = vpop.f32.mrf.mxu1 }
 0x31c   : > { %v3227_v48 = vmax.f32 %v3175_v59, 0.0  ;;  %v3287_v15 = vsel %vm1139_vm0, %v3255_v34, %v3257_v63  ;;  %v3078_v17 = vadd.f32 %v3077_v0, %v2965_v23 }
 0x31d   : > { %v3180_v22 = vpop.f32.mrf.mxu1  ;;  %v11633_v20 = vmax.f32 %v3223_v3, %v3287_v15  ;;  %v2967_v3 = vadd.f32 %v11495_v46, %v11440_v37 }
 0x31e   : > { %v3259_v19 = vrot.slane %v3227_v48, 1  ;;  %v3181_v33 = vadd.f32 %v3180_v22, %v3068_v49  ;;  %v2969_v49 = vadd.f32 %v11499_v5, %v11434_v14  ;;  %v3087_v22 = vpop.f32.mrf.mxu0  ;;  %v2975_v5 = vadd.f32 %v11505_v6, %v11434_v14 }
 0x31f   : > { %v11635_v31 = vpop.f32.mrf.mxu1 }
 0x320   : > { %v3229_v1 = vmax.f32 %v3181_v33, 0.0  ;;  %v3285_v35 = vsel %vm1139_vm0, %v3257_v63, %v3259_v19  ;;  %v3089_v51 = vpop.f32.mrf.mxu0 }
 0x321   : > { %v3184_v13 = vpop.f32.mrf.mxu1  ;;  %v11641_v26 = vmax.f32 %v3225_v45, %v3285_v35  ;;  %v2971_v45 = vadd.f32 %v11501_v61, %v11440_v37  ;;  %v3080_v35 = vadd.f32 %v3079_v39, %v2967_v3  ;;  %v2977_v61 = vadd.f32 %v11507_v36, %v11440_v37 }
 0x322   : > { %v3261_v34 = vrot.slane %v3229_v1, 1  ;;  %v3185_v59 = vadd.f32 %v3184_v13, %v3072_v29  ;;  %v3082_v13 = vadd.f32 %v3081_v30, %v2969_v49  ;;  %v2979_v30 = vadd.f32 %v11512_v55, %v11434_v14  ;;  %v3091_v6 = vpop.f32.mrf.mxu0 }
 0x323   : > { %v3186_v15 = vpop.f32.mrf.mxu1  ;;  %v3084_v39 = vadd.f32 %v3083_v57, %v2971_v45  ;;  %v2981_v36 = vadd.f32 %v11515_v2, %v11440_v37 }
 0x324   : > { %v3231_v42 = vmax.f32 %v3185_v59, 0.0  ;;  %v3283_v50 = vsel %vm1139_vm0, %v3259_v19, %v3261_v34 }
 0x325   : > { %v3190_v21 = vpop.f32.mrf.mxu1  ;;  %v11649_v63 = vmax.f32 %v3227_v48, %v3283_v50 }
 0x326   : > { %v3263_v33 = vrot.slane %v3231_v42, 1  ;;  %v3191_v46 = vadd.f32 %v3190_v21, %v3078_v17 }
 0x327   : > { %v3192_v29 = vpop.f32.mrf.mxu1 }
 0x328   : > { %v3233_v59 = vmax.f32 %v3191_v46, 0.0  ;;  %v3193_v0 = vadd.f32 %v3192_v29, %v3080_v35  ;;  %v3281_v19 = vsel %vm1139_vm0, %v3261_v34, %v3263_v33  ;;  %v3088_v35 = vadd.f32 %v3087_v22, %v2975_v5 }
 0x329   : > { %v3194_v23 = vpop.f32.mrf.mxu1  ;;  %v11657_v48 = vmax.f32 %v3229_v1, %v3281_v19  ;;  %v2961_v1 = vadd.f32 %v11489_v18, %v11440_v37  ;;  %v3093_v19 = vpop.f32.mrf.mxu0 }
 0x32a   : > { %v3265_v50 = vrot.slane %v3233_v59, 1  ;;  %v3195_v17 = vadd.f32 %v3194_v23, %v3082_v13  ;;  %v3234_v3 = vmax.f32 %v3193_v0, 0.0  ;;  %v3090_v13 = vadd.f32 %v3089_v51, %v2977_v61 }
 0x32b   : > { %v3196_v49 = vpop.f32.mrf.mxu1  ;;  %v2957_v0 = vadd.f32 %v11483_v11, %v11440_v37  ;;  %v3094_v61 = vadd.f32 %v3093_v19, %v2981_v36 }
 0x32c   : > { %v3235_v21 = vmax.f32 %v3195_v17, 0.0  ;;  %v3197_v46 = vadd.f32 %v3196_v49, %v3084_v39  ;;  %v3279_v34 = vsel %vm1139_vm0, %v3263_v33, %v3265_v50  ;;  %v11673_v22 = vrot.slane %v3234_v3, 1 }
 0x32d   : > { %v3200_v29 = vpop.f32.mrf.mxu1  ;;  %v11669_v57 = vmax.f32 %v3231_v42, %v3279_v34  ;;  %v3092_v33 = vadd.f32 %v3091_v6, %v2979_v30  ;;  %v2951_v42 = vadd.f32 %v11477_v4, %v11440_v37  ;;  %v3074_v39 = vadd.f32 %v11599_v53, %v2961_v1 }
 0x32e   : > { %v3267_v45 = vrot.slane %v3235_v21, 1  ;;  %v3236_v14 = vmax.f32 %v3197_v46, 0.0  ;;  %v3201_v55 = vadd.f32 %v3200_v29, %v3088_v35  ;;  %v2947_v6 = vadd.f32 %v11473_v47, %v11440_v37 }
 0x32f   : > { %v3202_v5 = vpop.f32.mrf.mxu1  ;;  %v3187_v34 = vadd.f32 %v3186_v15, %v3074_v39 }
 0x330   : > { %v3268_v23 = vrot.slane %v3236_v14, 1  ;;  %v3237_v18 = vmax.f32 %v3201_v55, 0.0  ;;  %v3203_v17 = vadd.f32 %v3202_v5, %v3090_v13  ;;  %v3277_v2 = vsel %vm1139_vm0, %v3265_v50, %v3267_v45 }
 0x331   : > { %v3204_v51 = vpop.f32.mrf.mxu1  ;;  %v11680_v49 = vmax.f32 %v3233_v59, %v3277_v2  ;;  %v3070_v50 = vadd.f32 %v11565_v52, %v2957_v0  ;;  %v2941_v55 = vadd.f32 %v11469_v12, %v11440_v37  ;;  %v3064_v13 = vadd.f32 %v11534_v7, %v2951_v42 }
 0x332   : > { %v3269_v11 = vrot.slane %v3237_v18, 1  ;;  %v3238_v46 = vmax.f32 %v3203_v17, 0.0  ;;  %v3205_v35 = vadd.f32 %v3204_v51, %v3092_v33  ;;  %v3278_v30 = vsel %vm1139_vm0, %v11673_v22, %v3268_v23 }
 0x333   : > { %v3206_v4 = vpop.f32.mrf.mxu1  ;;  %v11688_v29 = vmax.f32 %v3234_v3, %v3278_v30  ;;  %v3183_v47 = vadd.f32 %v11635_v31, %v3070_v50  ;;  %v2937_v0 = vadd.f32 %v11465_v44, %v11440_v37  ;;  %v3060_v33 = vadd.f32 %v11522_v43, %v2947_v6 }
 0x334   : > { %v3270_v53 = vrot.slane %v3238_v46, 1  ;;  %v3239_v1 = vmax.f32 %v3205_v35, 0.0  ;;  %v3207_v59 = vadd.f32 %v3206_v4, %v3094_v61  ;;  %v3275_v36 = vsel %vm1139_vm0, %v3267_v45, %v3269_v11 }
 0x335   : > { %v11695_v5 = vmax.f32 %v3235_v21, %v3275_v36  ;;  %v3177_v45 = vadd.f32 %v11626_v41, %v3064_v13  ;;  %v3232_v12 = vmax.f32 %v3187_v34, 0.0  ;;  %v3054_v44 = vadd.f32 %v11509_v25, %v2941_v55 }
 0x336   : > { %v3271_v52 = vrot.slane %v3239_v1, 1  ;;  %v3240_v15 = vmax.f32 %v3207_v59, 0.0  ;;  %v3276_v3 = vsel %vm1139_vm0, %v3268_v23, %v3270_v53  ;;  %v2931_v23 = vadd.f32 %v11461_v28, %v11440_v37 }
 0x337   : > { %v11704_v19 = vmax.f32 %v3236_v14, %v3276_v3  ;;  %v3173_v41 = vadd.f32 %v11617_v10, %v3060_v33  ;;  %v3230_v14 = vmax.f32 %v3183_v47, 0.0  ;;  %v3050_v25 = vadd.f32 %v11497_v58, %v2937_v0 }
 0x338   : > { %v3303_v7 = vsel %vm1139_vm0, %v3271_v52, %v11529_v62  ;;  %v3272_v31 = vrot.slane %v3240_v15, 1  ;;  %v3273_v21 = vsel %vm1139_vm0, %v3269_v11, %v3271_v52  ;;  %v3228_v10 = vmax.f32 %v3177_v45, 0.0 }
 0x339   : > { %v11714_v17 = vmax.f32 %v3239_v1, %v3303_v7  ;;  %v11716_v43 = vmax.f32 %v3237_v18, %v3273_v21  ;;  %v3167_v18 = vadd.f32 %v11608_v56, %v3054_v44  ;;  %v3264_v39 = vrot.slane %v3232_v12, 1 }
 0x33a   : > { %v3304_v62 = vsel %vm1139_vm0, %v3272_v31, %v11532_v32  ;;  %v3274_v2 = vsel %vm1139_vm0, %v3270_v53, %v3272_v31  ;;  %v3044_v51 = vadd.f32 %v11485_v27, %v2931_v23  ;;  %v3163_v61 = vadd.f32 %v11595_v9, %v3050_v25  ;;  %v13368_v25 = vld [vmem:[#allocation36_spill] sm:$0xff] }
 0x33b   : > { %v11724_v42 = vmax.f32 %v3240_v15, %v3304_v62  ;;  %v8928_v37 = vpack.i.bf16 %v11714_v17, %v11716_v43  ;;  %v11728_v28 = vmax.f32 %v3238_v46, %v3274_v2  ;;  %v3226_v11 = vmax.f32 %v3173_v41, 0.0 }
 0x33c   : > { %v3262_v35 = vrot.slane %v3230_v14, 1  ;;  %v3280_v58 = vsel %vm1139_vm0, %v3264_v39, %v11673_v22  ;;  %v8933_v56 = vpack.i.bf16 %v11695_v5, %v11680_v49  ;;  %v3157_v27 = vadd.f32 %v11577_v60, %v3044_v51  ;;  %v13371_v51 = vld [vmem:[#allocation42_spill] sm:$0xff] }
 0x33d   : > { %8929 = vrot.lane.b32.xlu0 %v8928_v37, %s9994_s10  ;;  %v8938_v32 = vpack.i.bf16 %v11724_v42, %v11728_v28  ;;  %v3224_v46 = vmax.f32 %v3167_v18, 0.0  ;;  %v3260_v30 = vrot.slane %v3228_v10, 1  ;;  %v8943_v9 = vpack.i.bf16 %v11704_v19, %v11688_v29  ;;  %v13367_v37 = vld [vmem:[#allocation33_spill] sm:$0xff] }
 0x33e   : > { %v3282_v6 = vsel %vm1139_vm0, %v3262_v35, %v3264_v39  ;;  %v11749_v50 = vmax.f32 %v3232_v12, %v3280_v58  ;;  %v3222_v22 = vmax.f32 %v3163_v61, 0.0  ;;  %v3258_v34 = vrot.slane %v3226_v11, 1  ;;  %v13370_v39 = vld [vmem:[#allocation34_spill] sm:$0xff] }
 0x33f   : > { %8939 = vrot.lane.b32.xlu1 %v8938_v32, %s9994_s10  ;;  %v3284_v4 = vsel %vm1139_vm0, %v3260_v30, %v3262_v35  ;;  %v8948_v60 = vpack.i.bf16 %v11669_v57, %v11657_v48  ;;  %v11756_v53 = vmax.f32 %v3230_v14, %v3282_v6  ;;  %v3220_v1 = vmax.f32 %v3157_v27, 0.0  ;;  %v13372_v32 = vld [vmem:[#allocation31_spill] sm:$0xff]  ;;  %v13374_v35 = vld [vmem:[#allocation30_spill] sm:$0xff]  ;;  %v3622_v27 = vld [vmem:[%s10068_s30 + $0x8] sm:$0xff] }
 0x340   : > { %v3256_v59 = vrot.slane %v3224_v46, 1  ;;  %v3286_v36 = vsel %vm1139_vm0, %v3258_v34, %v3260_v30  ;;  %v11763_v13 = vmax.f32 %v3228_v10, %v3284_v4  ;;  %v3254_v47 = vrot.slane %v3222_v22, 1  ;;  %v13369_v10 = vld [vmem:[#allocation32_spill] sm:$0xff]  ;;  %v3624_v30 = vld [vmem:[%s10068_s30 + $0x18] sm:$0xff] }
 0x341   : > { %8934 = vrot.lane.b32.xlu0 %v8933_v56, %s9994_s10  ;;  %v8953_v55 = vpack.i.bf16 %v11749_v50, %v11756_v53  ;;  %v8958_v15 = vpack.i.bf16 %v11649_v63, %v11641_v26  ;;  %v11770_v3 = vmax.f32 %v3226_v11, %v3286_v36  ;;  %v3252_v0 = vrot.slane %v3220_v1, 1  ;;  %v13373_v11 = vld [vmem:[#allocation28_spill] sm:$0xff] }
 0x342   : > { %v3288_v52 = vsel %vm1139_vm0, %v3256_v59, %v3258_v34  ;;  %v3290_v33 = vsel %vm1139_vm0, %v3254_v47, %v3256_v59  ;;  %v8968_v31 = vpack.i.bf16 %v11633_v20, %v11624_v40  ;;  %v8978_v14 = vpack.i.bf16 %v11615_v38, %v11606_v16  ;;  %v3621_v56 = vld [vmem:[%s10068_s30] sm:$0xff]  ;;  %v3628_v34 = vld [vmem:[%s10068_s30 + $0x38] sm:$0xff] }
 0x343   : > { %8944 = vrot.lane.b32.xlu1 %v8943_v9, %s9994_s10  ;;  %v8963_v45 = vpack.i.bf16 %v11763_v13, %v11770_v3  ;;  %v11777_v12 = vmax.f32 %v3224_v46, %v3288_v52  ;;  %v3292_v7 = vsel %vm1139_vm0, %v3252_v0, %v3254_v47  ;;  %v11784_v21 = vmax.f32 %v3222_v22, %v3290_v33  ;;  %v3623_v46 = vld [vmem:[%s10068_s30 + $0x10] sm:$0xff]  ;;  %v3625_v6 = vld [vmem:[%s10068_s30 + $0x20] sm:$0xff]  ;;  %v3626_v9 = vld [vmem:[%s10068_s30 + $0x28] sm:$0xff] }
 0x344   : > { %v3294_v23 = vsel %vm1139_vm0, %v11586_v24, %v3252_v0  ;;  %v11792_v41 = vmax.f32 %v3220_v1, %v3292_v7  ;;  %v13366_v62 = vmax.f32 %v11568_v8, 0.0  ;;  %v8988_v18 = vpack.i.bf16 %v13368_v25, %v13367_v37  ;;  %v3627_v22 = vld [vmem:[%s10068_s30 + $0x30] sm:$0xff]  ;;  %v3717_v4 = vld [vmem:[%s13209_s6] sm:$0xff]  ;;  %v3720_v59 = vld [vmem:[%s13209_s6 + $0x18] sm:$0xff] }
 0x345   : > { %8949 = vrot.lane.b32.xlu0 %v8948_v60, %s9994_s10  ;;  %v8973_v44 = vpack.i.bf16 %v11777_v12, %v11784_v21  ;;  %v8993_v8 = vpack.i.bf16 %v13370_v39, %v13369_v10  ;;  %v8998_v61 = vpack.i.bf16 %v13372_v32, %v13371_v51  ;;  %v9003_v58 = vpack.i.bf16 %v13374_v35, %v13373_v11  ;;  %v3718_v60 = vld [vmem:[%s13209_s6 + $0x8] sm:$0xff]  ;;  %v3719_v1 = vld [vmem:[%s13209_s6 + $0x10] sm:$0xff]  ;;  %v3721_v36 = vld [vmem:[%s13209_s6 + $0x20] sm:$0xff] }
 0x346   : > { %v11799_v2 = vmax.f32 %v13366_v62, %v3294_v23  ;;  %v3723_v47 = vld [vmem:[%s13209_s6 + $0x30] sm:$0xff]  ;;  %v3724_v52 = vld [vmem:[%s13209_s6 + $0x38] sm:$0xff]  ;;  %v9317_v33 = vld [vmem:[%s10058_s19 + $0x64] ss:$8 sps:$4 sm:$0xff]  }
 0x347   : > { %8954 = vrot.lane.b32.xlu1 %v8953_v55, %s9994_s10  ;;  %v3722_v55 = vld [vmem:[%s13209_s6 + $0x28] sm:$0xff]  ;;  %v9311_v0 = vld [vmem:[%s10058_s19 + $0x74] ss:$8 sps:$4 sm:$0xff]   ;;  %v9333_v62 = vld [vmem:[%s10058_s19 + $0x30] ss:$8 sps:$4 sm:$0xff]   ;;  %s9996_s6 = smov 64  }
 0x348   : > { %v8983_v24 = vpack.i.bf16 %v11792_v41, %v11799_v2  ;;  %4393 = vmatprep.subr.bf16.mxu1 %v9311_v0  ;;  %v9323_v7 = vld [vmem:[%s10058_s19 + $0x54] ss:$8 sps:$4 sm:$0xff]   ;;  %v9329_v23 = vld [vmem:[%s10058_s19 + $0x44] ss:$8 sps:$4 sm:$0xff]  }
 0x349   : > { %8959 = vrot.lane.b32.xlu0 %v8958_v15, %s9994_s10  ;;  %v9309_v15 = vld [vmem:[%s10058_s19 + $0x70] ss:$8 sps:$4 sm:$0xff]  }
 0x34a   : > { %4394 = vmatpush1.bf16.msra.mxu1 %v9309_v15 }
 0x34b   : > { %8964 = vrot.lane.b32.xlu1 %v8963_v45, %s9994_s10  ;;  %v9315_v45 = vld [vmem:[%s10058_s19 + $0x60] ss:$8 sps:$4 sm:$0xff]   ;;  %4395 = vmatprep.subr.bf16.mxu1 %v9317_v33 }
 0x34d   : > { %8969 = vrot.lane.b32.xlu0 %v8968_v31, %s9994_s10  ;;  %v9321_v31 = vld [vmem:[%s10058_s19 + $0x50] ss:$8 sps:$4 sm:$0xff]  }
 0x34e   : > { %4396 = vmatpush1.bf16.msra.mxu1 %v9315_v45 }
 0x34f   : > { %8974 = vrot.lane.b32.xlu1 %v8973_v44, %s9994_s10  ;;  %4397 = vmatprep.subr.bf16.mxu1 %v9323_v7  ;;  %v9327_v44 = vld [vmem:[%s10058_s19 + $0x40] ss:$8 sps:$4 sm:$0xff]  }
 0x351   : > { %8979 = vrot.lane.b32.xlu0 %v8978_v14, %s9994_s10  ;;  %v9335_v14 = vld [vmem:[%s10058_s19 + $0x34] ss:$8 sps:$4 sm:$0xff]  }
 0x352   : > { %4398 = vmatpush1.bf16.msra.mxu1 %v9321_v31 }
 0x353   : > { %8984 = vrot.lane.b32.xlu1 %v8983_v24, %s9994_s10  ;;  %4399 = vmatprep.subr.bf16.mxu1 %v9329_v23  ;;  %v9341_v24 = vld [vmem:[%s10058_s19 + $0x24] ss:$8 sps:$4 sm:$0xff]  }
 0x355   : > { %8989 = vrot.lane.b32.xlu0 %v8988_v18, %s9994_s10  ;;  %v9339_v18 = vld [vmem:[%s10058_s19 + $0x20] ss:$8 sps:$4 sm:$0xff]  }
 0x356   : > { %4400 = vmatpush1.bf16.msra.mxu1 %v9327_v44 }
 0x357   : > { %8994 = vrot.lane.b32.xlu1 %v8993_v8, %s9994_s10  ;;  %4401 = vmatprep.subr.bf16.mxu1 %v9335_v14  ;;  %v9347_v8 = vld [vmem:[%s10058_s19 + $0x14] ss:$8 sps:$4 sm:$0xff]  }
 0x359   : > { %8999 = vrot.lane.b32.xlu0 %v8998_v61, %s9994_s10  ;;  %v9345_v61 = vld [vmem:[%s10058_s19 + $0x10] ss:$8 sps:$4 sm:$0xff]  }
 0x35a   : > { %4402 = vmatpush1.bf16.msra.mxu1 %v9333_v62 }
 0x35b   : > { %9004 = vrot.lane.b32.xlu1 %v9003_v58, %s9994_s10  ;;  %4403 = vmatprep.subr.bf16.mxu1 %v9341_v24  ;;  %v13375_v58 = vlaneseq  ;;  %s13387_s10 = sld [smem:[#allocation11_spill]] }
 0x35d   : > { %3631 = vperm.xlu0 %8926, %v3621_v56   ;;  %v11848_v56 = vand.u32 127, %v13375_v58 }
 0x35e   : > { %4404 = vmatpush1.bf16.msra.mxu1 %v9339_v18 }
 0x35f   : > { %3636 = vperm.xlu1 %8927, %v3622_v27   ;;  %4405 = vmatprep.subr.bf16.mxu1 %v9347_v8  ;;  %vm3403_vm2 = vcmp.lt.s32.totalorder %v11848_v56, 112  ;;  %vm4708_vm3 = vcmp.lt.s32.totalorder %v11848_v56, 96  ;;  %vm5726_vm5 = vcmp.lt.s32.totalorder %v11848_v56, 64  ;;  %v9579_v56 = vld [vmem:[%s13393_s5 + $0x78] sm:$0xff]  }
 0x361   : > { %3641 = vperm.xlu0 %8926, %v3623_v46  }
 0x362   : > { %4406 = vmatpush1.bf16.msra.mxu1 %v9345_v61 }
 0x363   : > { %3646 = vperm.xlu1 %8927, %v3624_v30  }
 0x365   : > { %3651 = vperm.xlu0 %8926, %v3625_v6  }
 0x367   : > { %3656 = vperm.xlu1 %8927, %v3626_v9  }
 0x369   : > { %3661 = vperm.xlu0 %8926, %v3627_v22  }
 0x36b   : > { %3666 = vperm.xlu1 %8927, %v3628_v34  }
 0x36d   : > { %3727 = vperm.xlu0 %8926, %v3717_v4  }
 0x36f   : > { %3732 = vperm.xlu1 %8927, %v3718_v60  }
 0x371   : > { %3737 = vperm.xlu0 %8926, %v3719_v1  }
 0x373   : > { %3742 = vperm.xlu1 %8927, %v3720_v59  }
 0x375   : > { %3747 = vperm.xlu0 %8926, %v3721_v36  }
 0x377   : > { %3752 = vperm.xlu1 %8927, %v3722_v55  }
 0x379   : > { %3757 = vperm.xlu0 %8926, %v3723_v47  }
 0x37b   : > { %3762 = vperm.xlu1 %8927, %v3724_v52  }
 0x3af   : > { %v8930_v27 = vpop.permute.xlu0 %8929 }
 0x3b0   : > { %v8932_v30 = vunpack.i.h.bf16 %v8930_v27  ;;  %v8931_v6 = vunpack.i.l.bf16 %v8930_v27 }
 0x3b1   : > { %v8940_v46 = vpop.permute.xlu1 %8939 }
 0x3b2   : > { %v8942_v9 = vunpack.i.h.bf16 %v8940_v46  ;;  %v8941_v22 = vunpack.i.l.bf16 %v8940_v46 }
 0x3b3   : > { %v8935_v34 = vpop.permute.xlu0 %8934 }
 0x3b4   : > { %v3418_v4 = vsel %vm3403_vm2, %v8931_v6, %v8941_v22  ;;  %v3419_v60 = vsel %vm3403_vm2, %v8932_v30, %v8942_v9  ;;  %v3434_v1 = vsel %vm3403_vm2, %v8941_v22, %v8931_v6  ;;  %v3435_v59 = vsel %vm3403_vm2, %v8942_v9, %v8932_v30 }
 0x3b5   : > { %v3464_v36 = vmax.f32 %v11716_v43, %v3418_v4  ;;  %v3466_v55 = vmax.f32 %v11714_v17, %v3419_v60  ;;  %v8937_v47 = vunpack.i.h.bf16 %v8935_v34  ;;  %v8936_v52 = vunpack.i.l.bf16 %v8935_v34  ;;  %v8945_v15 = vpop.permute.xlu1 %8944 }
 0x3b6   : > { %v8947_v0 = vunpack.i.h.bf16 %v8945_v15  ;;  %v8946_v33 = vunpack.i.l.bf16 %v8945_v15  ;;  %v3465_v45 = vmax.f32 %v11728_v28, %v3434_v1  ;;  %v3467_v7 = vmax.f32 %v11724_v42, %v3435_v59 }
 0x3b7   : > { %v8950_v31 = vpop.permute.xlu0 %8949  ;;  %v3490_v23 = vpack.c.bf16 %v3466_v55, %v3464_v36 }
 0x3b8   : > { %v3416_v44 = vsel %vm3403_vm2, %v8936_v52, %v8946_v33  ;;  %v3417_v14 = vsel %vm3403_vm2, %v8937_v47, %v8947_v0  ;;  %v3432_v17 = vsel %vm3403_vm2, %v8946_v33, %v8936_v52  ;;  %v3433_v43 = vsel %vm3403_vm2, %v8947_v0, %v8937_v47 }
 0x3b9   : > { %v3460_v62 = vmax.f32 %v11680_v49, %v3416_v44  ;;  %v3462_v28 = vmax.f32 %v11695_v5, %v3417_v14  ;;  %v8952_v24 = vunpack.i.h.bf16 %v8950_v31  ;;  %v8951_v42 = vunpack.i.l.bf16 %v8950_v31  ;;  %v8955_v18 = vpop.permute.xlu1 %8954 }
 0x3ba   : > { %v8957_v8 = vunpack.i.h.bf16 %v8955_v18  ;;  %v8956_v61 = vunpack.i.l.bf16 %v8955_v18  ;;  %v3491_v58 = vpack.c.bf16 %v3467_v7, %v3465_v45  ;;  %v3461_v27 = vmax.f32 %v11688_v29, %v3432_v17 }
 0x3bb   : > { %v8960_v46 = vpop.permute.xlu0 %8959  ;;  %v3463_v30 = vmax.f32 %v11704_v19, %v3433_v43  ;;  %v3488_v6 = vpack.c.bf16 %v3462_v28, %v3460_v62 }
 0x3bc   : > { %v3414_v9 = vsel %vm3403_vm2, %v8951_v42, %v8956_v61  ;;  %v3415_v49 = vsel %vm3403_vm2, %v8952_v24, %v8957_v8  ;;  %v3430_v5 = vsel %vm3403_vm2, %v8956_v61, %v8951_v42  ;;  %v3431_v22 = vsel %vm3403_vm2, %v8957_v8, %v8952_v24  ;;  %3516 = vmatprep.subr.bf16.mxu0 %v3491_v58 }
 0x3bd   : > { %v3456_v34 = vmax.f32 %v11657_v48, %v3414_v9  ;;  %v3458_v29 = vmax.f32 %v11669_v57, %v3415_v49  ;;  %3517 = vmatpush1.bf16.msra.mxu0 %v3490_v23  ;;  %v8962_v19 = vunpack.i.h.bf16 %v8960_v46  ;;  %v8961_v4 = vunpack.i.l.bf16 %v8960_v46  ;;  %v8965_v60 = vpop.permute.xlu1 %8964 }
 0x3be   : > { %v8967_v1 = vunpack.i.h.bf16 %v8965_v60  ;;  %v8966_v59 = vunpack.i.l.bf16 %v8965_v60  ;;  %v3489_v36 = vpack.c.bf16 %v3463_v30, %v3461_v27  ;;  %v3457_v55 = vmax.f32 %v11756_v53, %v3430_v5 }
 0x3bf   : > { %v8970_v47 = vpop.permute.xlu0 %8969  ;;  %v3459_v52 = vmax.f32 %v11749_v50, %v3431_v22  ;;  %v3486_v15 = vpack.c.bf16 %v3458_v29, %v3456_v34 }
 0x3c0   : > { %v3412_v0 = vsel %vm3403_vm2, %v8961_v4, %v8966_v59  ;;  %v3413_v48 = vsel %vm3403_vm2, %v8962_v19, %v8967_v1  ;;  %v3428_v57 = vsel %vm3403_vm2, %v8966_v59, %v8961_v4  ;;  %v3429_v33 = vsel %vm3403_vm2, %v8967_v1, %v8962_v19  ;;  %3518 = vmatprep.subr.bf16.mxu0 %v3489_v36 }
 0x3c1   : > { %v3452_v45 = vmax.f32 %v11641_v26, %v3412_v0  ;;  %v3454_v53 = vmax.f32 %v11649_v63, %v3413_v48  ;;  %3519 = vmatpush1.bf16.msra.mxu0 %v3488_v6  ;;  %v8972_v50 = vunpack.i.h.bf16 %v8970_v47  ;;  %v8971_v7 = vunpack.i.l.bf16 %v8970_v47  ;;  %v8975_v31 = vpop.permute.xlu1 %8974 }
 0x3c2   : > { %v8977_v23 = vunpack.i.h.bf16 %v8975_v31  ;;  %v8976_v44 = vunpack.i.l.bf16 %v8975_v31  ;;  %v3487_v14 = vpack.c.bf16 %v3459_v52, %v3457_v55  ;;  %v3453_v17 = vmax.f32 %v11770_v3, %v3428_v57 }
 0x3c3   : > { %v8980_v43 = vpop.permute.xlu0 %8979  ;;  %v3455_v62 = vmax.f32 %v11763_v13, %v3429_v33  ;;  %v3484_v28 = vpack.c.bf16 %v3454_v53, %v3452_v45 }
 0x3c4   : > { %v3410_v24 = vsel %vm3403_vm2, %v8971_v7, %v8976_v44  ;;  %v3411_v26 = vsel %vm3403_vm2, %v8972_v50, %v8977_v23  ;;  %v3426_v63 = vsel %vm3403_vm2, %v8976_v44, %v8971_v7  ;;  %v3427_v42 = vsel %vm3403_vm2, %v8977_v23, %v8972_v50  ;;  %3520 = vmatprep.subr.bf16.mxu0 %v3487_v14 }
 0x3c5   : > { %v3448_v18 = vmax.f32 %v11624_v40, %v3410_v24  ;;  %v3450_v3 = vmax.f32 %v11633_v20, %v3411_v26  ;;  %3521 = vmatpush1.bf16.msra.mxu0 %v3486_v15  ;;  %v8982_v13 = vunpack.i.h.bf16 %v8980_v43  ;;  %v8981_v8 = vunpack.i.l.bf16 %v8980_v43  ;;  %v8985_v61 = vpop.permute.xlu1 %8984  ;;  %v9290_v24 = vld [vmem:[%s10058_s19 + $0x174] ss:$8 sps:$4 sm:$0xff]   ;;  %v9293_v26 = vld [vmem:[%s10058_s19 + $0x164] ss:$8 sps:$4 sm:$0xff]  }
 0x3c6   : > { %v8987_v58 = vunpack.i.h.bf16 %v8985_v61  ;;  %v8986_v27 = vunpack.i.l.bf16 %v8985_v61  ;;  %v3485_v46 = vpack.c.bf16 %v3455_v62, %v3453_v17  ;;  %v3449_v30 = vmax.f32 %v11784_v21, %v3426_v63  ;;  %v9296_v63 = vld [vmem:[%s10058_s19 + $0x154] ss:$8 sps:$4 sm:$0xff]  }
 0x3c7   : > { %v8990_v6 = vpop.permute.xlu0 %8989  ;;  %v3451_v9 = vmax.f32 %v11777_v12, %v3427_v42  ;;  %v3482_v49 = vpack.c.bf16 %v3450_v3, %v3448_v18  ;;  %v9285_v42 = vld [vmem:[%s10053_s14 + $0x8] sm:$0xff]   ;;  %v9294_v18 = vld [vmem:[%s10058_s19 + $0x150] ss:$8 sps:$4 sm:$0xff]  }
 0x3c8   : > { %v3408_v5 = vsel %vm3403_vm2, %v8981_v8, %v8986_v27  ;;  %v3409_v40 = vsel %vm3403_vm2, %v8982_v13, %v8987_v58  ;;  %v3424_v20 = vsel %vm3403_vm2, %v8986_v27, %v8981_v8  ;;  %v3425_v22 = vsel %vm3403_vm2, %v8987_v58, %v8982_v13  ;;  %3522 = vmatprep.subr.bf16.mxu0 %v3485_v46  ;;  %v9299_v3 = vld [vmem:[%s10058_s19 + $0x144] ss:$8 sps:$4 sm:$0xff]   ;;  %v9297_v13 = vld [vmem:[%s10058_s19 + $0x140] ss:$8 sps:$4 sm:$0xff]   ;;  %v9302_v8 = vld [vmem:[%s10058_s19 + $0x134] ss:$8 sps:$4 sm:$0xff]  }
 0x3c9   : > { %v3444_v34 = vmax.f32 %v11606_v16, %v3408_v5  ;;  %v3446_v21 = vmax.f32 %v11615_v38, %v3409_v40  ;;  %3523 = vmatpush1.bf16.msra.mxu0 %v3484_v28  ;;  %v8992_v12 = vunpack.i.h.bf16 %v8990_v6  ;;  %v8991_v29 = vunpack.i.l.bf16 %v8990_v6  ;;  %v8995_v19 = vpop.permute.xlu1 %8994  ;;  %v9286_v61 = vld [vmem:[%s10053_s14 + $0x10] sm:$0xff]   ;;  %v9305_v27 = vld [vmem:[%s10058_s19 + $0x124] ss:$8 sps:$4 sm:$0xff]   ;;  %v9303_v46 = vld [vmem:[%s10058_s19 + $0x120] ss:$8 sps:$4 sm:$0xff]  }
 0x3ca   : > { %v8997_v4 = vunpack.i.h.bf16 %v8995_v19  ;;  %v8996_v60 = vunpack.i.l.bf16 %v8995_v19  ;;  %v3483_v1 = vpack.c.bf16 %v3451_v9, %v3449_v30  ;;  %v3445_v59 = vmax.f32 %v11799_v2, %v3424_v20  ;;  %v9300_v58 = vld [vmem:[%s10058_s19 + $0x130] ss:$8 sps:$4 sm:$0xff]   ;;  %v9308_v30 = vld [vmem:[%s10058_s19 + $0x114] ss:$8 sps:$4 sm:$0xff]   ;;  %v9312_v5 = vld [vmem:[%s10058_s19 + $0x100] ss:$8 sps:$4 sm:$0xff]  }
 0x3cb   : > { %v9000_v36 = vpop.permute.xlu0 %8999  ;;  %v3447_v55 = vmax.f32 %v11792_v41, %v3425_v22  ;;  %v3480_v47 = vpack.c.bf16 %v3446_v21, %v3444_v34  ;;  %v9287_v6 = vld [vmem:[%s10053_s14 + $0x18] sm:$0xff]   ;;  %v9326_v22 = vld [vmem:[%s10058_s19 + $0x1e4] ss:$8 sps:$4 sm:$0xff]   ;;  %v9324_v34 = vld [vmem:[%s10058_s19 + $0x1e0] ss:$8 sps:$4 sm:$0xff]  }
 0x3cc   : > { %v3406_v52 = vsel %vm3403_vm2, %v8991_v29, %v8996_v60  ;;  %v3407_v16 = vsel %vm3403_vm2, %v8992_v12, %v8997_v4  ;;  %v3422_v38 = vsel %vm3403_vm2, %v8996_v60, %v8991_v29  ;;  %v3423_v15 = vsel %vm3403_vm2, %v8997_v4, %v8992_v12  ;;  %3524 = vmatprep.subr.bf16.mxu0 %v3483_v1  ;;  %v9306_v9 = vld [vmem:[%s10058_s19 + $0x110] ss:$8 sps:$4 sm:$0xff]   ;;  %v9320_v40 = vld [vmem:[%s10058_s19 + $0x1f4] ss:$8 sps:$4 sm:$0xff]   ;;  %v9338_v29 = vld [vmem:[%s10058_s19 + $0x1c4] ss:$8 sps:$4 sm:$0xff]  }
 0x3cd   : > { %v3440_v0 = vmax.f32 %v13367_v37, %v3406_v52  ;;  %v3442_v2 = vmax.f32 %v13368_v25, %v3407_v16  ;;  %3525 = vmatpush1.bf16.msra.mxu0 %v3482_v49  ;;  %v9002_v41 = vunpack.i.h.bf16 %v9000_v36  ;;  %v9001_v48 = vunpack.i.l.bf16 %v9000_v36  ;;  %v9005_v57 = vpop.permute.xlu1 %9004  ;;  %v9314_v49 = vld [vmem:[%s10058_s19 + $0x104] ss:$8 sps:$4 sm:$0xff]   ;;  %v9318_v20 = vld [vmem:[%s10058_s19 + $0x1f0] ss:$8 sps:$4 sm:$0xff]   ;;  %v9332_v21 = vld [vmem:[%s10058_s19 + $0x1d4] ss:$8 sps:$4 sm:$0xff]  }
 0x3ce   : > { %v9007_v33 = vunpack.i.h.bf16 %v9005_v57  ;;  %v9006_v45 = vunpack.i.l.bf16 %v9005_v57  ;;  %v3481_v53 = vpack.c.bf16 %v3447_v55, %v3445_v59  ;;  %v3441_v50 = vmax.f32 %v13369_v10, %v3422_v38  ;;  %v9330_v12 = vld [vmem:[%s10058_s19 + $0x1d0] ss:$8 sps:$4 sm:$0xff]   ;;  %v9336_v19 = vld [vmem:[%s10058_s19 + $0x1c0] ss:$8 sps:$4 sm:$0xff]   ;;  %v9344_v4 = vld [vmem:[%s10058_s19 + $0x1b4] ss:$8 sps:$4 sm:$0xff]  }
 0x3cf   : > { %v3443_v7 = vmax.f32 %v13370_v39, %v3423_v15  ;;  %v3478_v31 = vpack.c.bf16 %v3442_v2, %v3440_v0  ;;  %v9342_v60 = vld [vmem:[%s10058_s19 + $0x1b0] ss:$8 sps:$4 sm:$0xff]   ;;  %v9348_v1 = vld [vmem:[%s10058_s19 + $0x1a0] ss:$8 sps:$4 sm:$0xff]   ;;  %v9350_v59 = vld [vmem:[%s10058_s19 + $0x1a4] ss:$8 sps:$4 sm:$0xff]  }
 0x3d0   : > { %v3404_v23 = vsel %vm3403_vm2, %v9001_v48, %v9006_v45  ;;  %v3405_v37 = vsel %vm3403_vm2, %v9002_v41, %v9007_v33  ;;  %v3420_v25 = vsel %vm3403_vm2, %v9006_v45, %v9001_v48  ;;  %v3421_v44 = vsel %vm3403_vm2, %v9007_v33, %v9002_v41  ;;  %3526 = vmatprep.subr.bf16.mxu0 %v3481_v53  ;;  %v9351_v36 = vld [vmem:[%s10058_s19] ss:$8 sps:$4 sm:$0xff]   ;;  %v9353_v55 = vld [vmem:[%s10058_s19 + $0x4] ss:$8 sps:$4 sm:$0xff]   ;;  %v9356_v52 = vld [vmem:[%s10058_s19 + $0x194] ss:$8 sps:$4 sm:$0xff]  }
 0x3d1   : > { %v3436_v10 = vmax.f32 %v13371_v51, %v3404_v23  ;;  %v3438_v39 = vmax.f32 %v13372_v32, %v3405_v37  ;;  %3527 = vmatpush1.bf16.msra.mxu0 %v3480_v47  ;;  %v3479_v14 = vpack.c.bf16 %v3443_v7, %v3441_v50  ;;  %v3437_v17 = vmax.f32 %v13373_v11, %v3420_v25  ;;  %v9284_v51 = vld [vmem:[%s10053_s14] sm:$0xff]   ;;  %v9288_v32 = vld [vmem:[%s10058_s19 + $0x170] ss:$8 sps:$4 sm:$0xff]   ;;  %v9359_v38 = vld [vmem:[%s10058_s19 + $0xf4] ss:$8 sps:$4 sm:$0xff]  }
 0x3d2   : > { %v3439_v43 = vmax.f32 %v13374_v35, %v3421_v44  ;;  %v13376_v11 = vmov 0   ;;  %v9291_v35 = vld [vmem:[%s10058_s19 + $0x160] ss:$8 sps:$4 sm:$0xff]   ;;  %4407 = vmatprep.subr.bf16.mxu1 %v9353_v55  ;;  %v9354_v47 = vld [vmem:[%s10058_s19 + $0x190] ss:$8 sps:$4 sm:$0xff]  }
 0x3d3   : > { %3528 = vmatprep.subr.bf16.mxu0 %v3479_v14  ;;  %v3476_v28 = vpack.c.bf16 %v3438_v39, %v3436_v10  ;;  %4408 = vmatpush1.bf16.msra.mxu1 %v9351_v36  ;;  %v9357_v16 = vld [vmem:[%s10058_s19 + $0xf0] ss:$8 sps:$4 sm:$0xff]   ;;  %v9360_v15 = vld [vmem:[%s10058_s19 + $0x180] ss:$8 sps:$4 sm:$0xff]   ;;  %v9362_v0 = vld [vmem:[%s10058_s19 + $0x184] ss:$8 sps:$4 sm:$0xff]  }
 0x3d4   : > { %v3477_v62 = vpack.c.bf16 %v3439_v43, %v3437_v17  ;;  %4409 = vmatprep.subr.bf16.mxu1 %v9359_v38  ;;  %v9363_v2 = vld [vmem:[%s10058_s19 + $0xe0] ss:$8 sps:$4 sm:$0xff]   ;;  %v9365_v41 = vld [vmem:[%s10058_s19 + $0xe4] ss:$8 sps:$4 sm:$0xff]   ;;  %v9368_v48 = vld [vmem:[%s10058_s19 + $0xd4] ss:$8 sps:$4 sm:$0xff]  }
 0x3d5   : > { %3529 = vmatpush1.bf16.msra.mxu0 %v3478_v31  ;;  %v9366_v57 = vld [vmem:[%s10058_s19 + $0xd0] ss:$8 sps:$4 sm:$0xff]   ;;  %v9371_v33 = vld [vmem:[%s10058_s19 + $0xc4] ss:$8 sps:$4 sm:$0xff]   ;;  %v9369_v45 = vld [vmem:[%s10058_s19 + $0xc0] ss:$8 sps:$4 sm:$0xff]  }
 0x3d6   : > { %3530 = vmatprep.subr.bf16.mxu0 %v3477_v62  ;;  %v9374_v53 = vld [vmem:[%s10058_s19 + $0xb4] ss:$8 sps:$4 sm:$0xff]   ;;  %v9372_v50 = vld [vmem:[%s10058_s19 + $0xb0] ss:$8 sps:$4 sm:$0xff]   ;;  %v9377_v7 = vld [vmem:[%s10058_s19 + $0xa4] ss:$8 sps:$4 sm:$0xff]  }
 0x3d7   : > { %4410 = vmatpush2.bf16.msra.mxu1 %v9357_v16  ;;  %v9375_v31 = vld [vmem:[%s10058_s19 + $0xa0] ss:$8 sps:$4 sm:$0xff]   ;;  %v9378_v23 = vld [vmem:[%s10058_s19 + $0x90] ss:$8 sps:$4 sm:$0xff]   ;;  %v9380_v37 = vld [vmem:[%s10058_s19 + $0x94] ss:$8 sps:$4 sm:$0xff]  }
 0x3d8   : > { %4411 = vmatprep.subr.bf16.mxu1 %v9365_v41  ;;  %v9383_v25 = vld [vmem:[%s10058_s19 + $0x84] ss:$8 sps:$4 sm:$0xff]   ;;  %v9381_v44 = vld [vmem:[%s10058_s19 + $0x80] ss:$8 sps:$4 sm:$0xff]   ;;  %v9386_v10 = vld [vmem:[%s10058_s19 + $0x274] ss:$8 sps:$4 sm:$0xff]   ;;  %v12005_v39 = vpop.permute.xlu0 %3631 }
 0x3d9   : > { %3531 = vmatpush1.bf16.msra.mxu0 %v3476_v28 }
 0x3da   : > { %4466 = vmatprep.subr.bf16.mxu0 %v9290_v24  ;;  %v12007_v14 = vpop.permute.xlu1 %3636 }
 0x3db   : > { %4412 = vmatpush2.bf16.msra.mxu1 %v9363_v2 }
 0x3dc   : > { %3549 = vmatmul.mubr.bf16.vlgmr.msra.gmra.mxu0 %v9284_v51  ;;  %4413 = vmatprep.subr.bf16.mxu1 %v9368_v48  ;;  %v12009_v17 = vpop.permute.xlu0 %3641 }
 0x3dd   : > { %3558 = vmatprep.mubr.bf16.mxu0 %v13376_v11  ;;  %4467 = vmatpush1.bf16.msra.mxu0 %v9288_v32 }
 0x3de   : > { %4468 = vmatprep.subr.bf16.mxu0 %v9293_v26  ;;  %v12011_v43 = vpop.permute.xlu1 %3646 }
 0x3df   : > { %4414 = vmatpush2.bf16.msra.mxu1 %v9366_v57 }
 0x3e0   : > { %4415 = vmatprep.subr.bf16.mxu1 %v9371_v33  ;;  %v12013_v62 = vpop.permute.xlu0 %3651 }
 0x3e1   : > { %4469 = vmatpush1.bf16.msra.mxu0 %v9291_v35 }
 0x3e2   : > { %4470 = vmatprep.subr.bf16.mxu0 %v9296_v63  ;;  %v12015_v28 = vpop.permute.xlu1 %3656 }
 0x3e3   : > { %4416 = vmatpush2.bf16.msra.mxu1 %v9369_v45 }
 0x3e4   : > { %3559 = vmatmul.mubr.bf16.gmra.mxu0 %v9285_v42  ;;  %4417 = vmatprep.subr.bf16.mxu1 %v9374_v53  ;;  %v12023_v26 = vpop.permute.xlu0 %3661 }
 0x3e5   : > { %3568 = vmatprep.mubr.bf16.mxu0 %v13376_v11  ;;  %4471 = vmatpush1.bf16.msra.mxu0 %v9294_v18 }
 0x3e6   : > { %4472 = vmatprep.subr.bf16.mxu0 %v9299_v3  ;;  %v12025_v35 = vpop.permute.xlu1 %3666 }
 0x3e7   : > { %4418 = vmatpush2.bf16.msra.mxu1 %v9372_v50 }
 0x3e8   : > { %4419 = vmatprep.subr.bf16.mxu1 %v9377_v7 }
 0x3e9   : > { %4473 = vmatpush1.bf16.msra.mxu0 %v9297_v13 }
 0x3ea   : > { %4474 = vmatprep.subr.bf16.mxu0 %v9302_v8 }
 0x3eb   : > { %4420 = vmatpush2.bf16.msra.mxu1 %v9375_v31 }
 0x3ec   : > { %3569 = vmatmul.mubr.bf16.gmra.mxu0 %v9286_v61  ;;  %4421 = vmatprep.subr.bf16.mxu1 %v9380_v37 }
 0x3ed   : > { %3578 = vmatprep.mubr.bf16.mxu0 %v13376_v11  ;;  %4475 = vmatpush1.bf16.msra.mxu0 %v9300_v58 }
 0x3ee   : > { %4476 = vmatprep.subr.bf16.mxu0 %v9305_v27 }
 0x3ef   : > { %4422 = vmatpush2.bf16.msra.mxu1 %v9378_v23 }
 0x3f0   : > { %4423 = vmatprep.subr.bf16.mxu1 %v9383_v25 }
 0x3f1   : > { %4477 = vmatpush1.bf16.msra.mxu0 %v9303_v46  ;;  %v12044_v46 = vpop.permute.xlu0 %3727 }
 0x3f2   : > { %4478 = vmatprep.subr.bf16.mxu0 %v9308_v30  ;;  %v12046_v30 = vpop.permute.xlu1 %3732 }
 0x3f3   : > { %4424 = vmatpush2.bf16.msra.mxu1 %v9381_v44 }
 0x3f4   : > { %3579 = vmatmul.mubr.bf16.gmra.mxu0 %v9287_v6  ;;  %4539 = vmatprep.subr.bf16.mxu1 %v9386_v10 }
 0x3f5   : > { %4479 = vmatpush1.bf16.msra.mxu0 %v9306_v9 }
 0x3f6   : > { %4480 = vmatprep.subr.bf16.mxu0 %v9314_v49 }
 0x3f9   : > { %4481 = vmatpush1.bf16.msra.mxu0 %v9312_v5 }
 0x3fa   : > { %4482 = vmatprep.subr.bf16.mxu0 %v9320_v40 }
 0x3fd   : > { %4483 = vmatpush2.bf16.msra.mxu0 %v9318_v20 }
 0x3fe   : > { %4484 = vmatprep.subr.bf16.mxu0 %v9326_v22 }
 0x401   : > { %4485 = vmatpush2.bf16.msra.mxu0 %v9324_v34 }
 0x402   : > { %4486 = vmatprep.subr.bf16.mxu0 %v9332_v21 }
 0x405   : > { %4487 = vmatpush2.bf16.msra.mxu0 %v9330_v12 }
 0x406   : > { %4488 = vmatprep.subr.bf16.mxu0 %v9338_v29 }
 0x409   : > { %4489 = vmatpush2.bf16.msra.mxu0 %v9336_v19 }
 0x40a   : > { %4490 = vmatprep.subr.bf16.mxu0 %v9344_v4 }
 0x40d   : > { %4491 = vmatpush2.bf16.msra.mxu0 %v9342_v60 }
 0x40e   : > { %4492 = vmatprep.subr.bf16.mxu0 %v9350_v59  ;;  %v3743_v59 = vpop.permute.xlu1 %3742 }
 0x411   : > { %4493 = vmatpush2.bf16.msra.mxu0 %v9348_v1  ;;  %v3738_v1 = vpop.permute.xlu0 %3737 }
 0x412   : > { %4494 = vmatprep.subr.bf16.mxu0 %v9356_v52  ;;  %v3753_v23 = vpop.permute.xlu1 %3752 }
 0x415   : > { %4495 = vmatpush2.bf16.msra.mxu0 %v9354_v47  ;;  %v3748_v31 = vpop.permute.xlu0 %3747 }
 0x416   : > { %4496 = vmatprep.subr.bf16.mxu0 %v9362_v0 }
 0x419   : > { %4497 = vmatpush2.bf16.msra.mxu0 %v9360_v15 }
 0x49c   : > { %v12017_v24 = vpop.f32.mrf.mxu0 }
 0x49d   : > { %v3685_v63 = vrot.slane %v12017_v24, 1 }
 0x49e   : > { %v12019_v51 = vpop.f32.mrf.mxu0 }
 0x4a0   : > { %v12021_v32 = vpop.f32.mrf.mxu0 }
 0x4a1   : > { %v3687_v42 = vrot.slane %v12021_v32, 1  ;;  %v3789_v61 = vpack.c.bf16 %v12021_v32, %v12017_v24  ;;  %v3591_v37 = vrot.slane %v12021_v32, 7 }
 0x4a2   : > { %v12029_v18 = vpop.f32.mrf.mxu0 }
 0x4a3   : > { %v3713_v3 = vsel %vm1139_vm0, %v3685_v63, %v3687_v42  ;;  %v3790_v13 = vpack.c.bf16 %v12029_v18, %v12019_v51  ;;  %v3592_v25 = vrot.slane %v12029_v18, 7 }
 0x4a4   : > { %v12037_v8 = vpop.f32.mrf.mxu0  ;;  %v12051_v9 = vmul.f32 %v12044_v46, %v3713_v3 }
 0x4a5   : > { %v3689_v58 = vrot.slane %v12037_v8, 1  ;;  %4498 = vmatprep.mubr.bf16.mxu0 %v3790_v13 }
 0x4a6   : > { %v12042_v27 = vpop.f32.mrf.mxu0  ;;  %4499 = vmatmul.mubr.bf16.vlgmr.msra.gmra.mxu0 %v3789_v61 }
 0x4a7   : > { %v3711_v6 = vsel %vm1139_vm0, %v3687_v42, %v3689_v58  ;;  %v13171_v36 = vrot.slane %v12042_v27, 1 }
 0x4a8   : > { %v12054_v49 = vmul.f32 %v12046_v30, %v3711_v6  ;;  %v12056_v5 = vpop.f32.mrf.mxu0  ;;  %v3590_v6 = vrot.slane %v12019_v51, 7 }
 0x4a9   : > { %v3691_v40 = vrot.slane %v12056_v5, 1  ;;  %v3791_v29 = vpack.c.bf16 %v12056_v5, %v12037_v8 }
 0x4aa   : > { %v12061_v22 = vpop.f32.mrf.mxu0 }
 0x4ab   : > { %v3709_v34 = vsel %vm1139_vm0, %v3689_v58, %v3691_v40  ;;  %v3792_v21 = vpack.c.bf16 %v12061_v22, %v12042_v27  ;;  %v3692_v19 = vrot.slane %v12061_v22, 1  ;;  %v3596_v42 = vrot.slane %v12061_v22, 7 }
 0x4ac   : > { %v12067_v12 = vpop.f32.mrf.mxu0  ;;  %v12079_v52 = vmul.f32 %v3738_v1, %v3709_v34  ;;  %v3589_v58 = vrot.slane %v12017_v24, 7 }
 0x4ad   : > { %v3693_v4 = vrot.slane %v12067_v12, 1  ;;  %4508 = vmatprep.mubr.bf16.mxu0 %v3792_v21  ;;  %v3710_v0 = vsel %vm1139_vm0, %v13171_v36, %v3692_v19  ;;  %v3594_v21 = vrot.slane %v12042_v27, 7 }
 0x4ae   : > { %v12073_v60 = vpop.f32.mrf.mxu0  ;;  %4509 = vmatmul.mubr.bf16.gmra.mxu0 %v3791_v29  ;;  %v12103_v50 = vmul.f32 %v3738_v1, %v3710_v0  ;;  %v3617_v1 = vsel %vm994_vm1, %v3589_v58, %v3591_v37 }
 0x4af   : > { %v3707_v55 = vsel %vm1139_vm0, %v3691_v40, %v3693_v4  ;;  %v3694_v47 = vrot.slane %v12073_v60, 1  ;;  %v3614_v0 = vsel %vm994_vm1, %v3594_v21, %v3596_v42 }
 0x4b0   : > { %v12081_v16 = vmul.f32 %v3743_v59, %v3707_v55  ;;  %v12083_v38 = vpop.f32.mrf.mxu0 }
 0x4b1   : > { %v3695_v15 = vrot.slane %v12083_v38, 1  ;;  %v3708_v41 = vsel %vm1139_vm0, %v3692_v19, %v3694_v47  ;;  %v3793_v44 = vpack.c.bf16 %v12083_v38, %v12067_v12 }
 0x4b2   : > { %v12090_v2 = vpop.f32.mrf.mxu0  ;;  %v12105_v7 = vmul.f32 %v3743_v59, %v3708_v41 }
 0x4b3   : > { %v3705_v57 = vsel %vm1139_vm0, %v3693_v4, %v3695_v15  ;;  %v3696_v33 = vrot.slane %v12090_v2, 1  ;;  %v3794_v45 = vpack.c.bf16 %v12090_v2, %v12073_v60 }
 0x4b4   : > { %v12101_v53 = vpop.f32.mrf.mxu0  ;;  %v12125_v29 = vmul.f32 %v3748_v31, %v3705_v57  ;;  %v3671_v57 = vmul.f32 %v12007_v14, %v3617_v1 }
 0x4b5   : > { %v3697_v10 = vrot.slane %v12101_v53, 1  ;;  %4518 = vmatprep.mubr.bf16.mxu0 %v3794_v45  ;;  %v3706_v61 = vsel %vm1139_vm0, %v3694_v47, %v3696_v33  ;;  %v3618_v47 = vsel %vm994_vm1, %v3590_v6, %v3592_v25  ;;  %v12151_v45 = vpop.permute.xlu0 %3757 }
 0x4b6   : > { %v12113_v3 = vpop.f32.mrf.mxu0  ;;  %4519 = vmatmul.mubr.bf16.gmra.mxu0 %v3793_v44  ;;  %v12153_v44 = vpop.permute.xlu1 %3762 }
 0x4b7   : > { %v3703_v40 = vsel %vm1139_vm0, %v3695_v15, %v3697_v10  ;;  %v13170_v34 = vrot.slane %v12113_v3, 1 }
 0x4b8   : > { %v12127_v19 = vmul.f32 %v3753_v23, %v3703_v40  ;;  %v12129_v4 = vpop.f32.mrf.mxu0 }
 0x4b9   : > { %v3603_v59 = vrot.slane %v12129_v4, 7  ;;  %v3699_v55 = vrot.slane %v12129_v4, 1  ;;  %v3704_v41 = vsel %vm1139_vm0, %v3696_v33, %v13170_v34  ;;  %v3795_v1 = vpack.c.bf16 %v12129_v4, %v12101_v53  ;;  %v9404_v4 = vld [vmem:[%s10058_s19 + $0x214] ss:$8 sps:$4 sm:$0xff]  }
 0x4ba   : > { %v12139_v15 = vpop.f32.mrf.mxu0 }
 0x4bb   : > { %v3619_v40 = vsel %vm994_vm1, %v3603_v59, %v3589_v58  ;;  %v3701_v48 = vsel %vm1139_vm0, %v3697_v10, %v3699_v55  ;;  %v3715_v33 = vsel %vm1139_vm0, %v3699_v55, %v3685_v63  ;;  %v3604_v34 = vrot.slane %v12139_v15, 7 }
 0x4bc   : > { %v12168_v13 = vmul.f32 %v12151_v45, %v3701_v48  ;;  %v12171_v20 = vmul.f32 %v12153_v44, %v3715_v33  ;;  %v3672_v58 = vmul.f32 %v12007_v14, %v3618_v47  ;;  %v3669_v36 = vmul.f32 %v12005_v39, %v3619_v40 }
 0x4bd   : > { %v3796_v24 = vpack.c.bf16 %v12139_v15, %v12113_v3  ;;  %v3620_v63 = vsel %vm994_vm1, %v3604_v34, %v3590_v6  ;;  %v3616_v10 = vsel %vm994_vm1, %v3592_v25, %v3594_v21  ;;  %v3595_v48 = vrot.slane %v12056_v5, 7  ;;  %v9384_v21 = vld [vmem:[%s10058_s19 + $0x270] ss:$8 sps:$4 sm:$0xff]  }
 0x4be   : > { %v3670_v14 = vmul.f32 %v12005_v39, %v3620_v63  ;;  %v3676_v55 = vmul.f32 %v12011_v43, %v3614_v0  ;;  %v3600_v47 = vrot.slane %v12090_v2, 7  ;;  %v12187_v40 = vmul.f32 %v3748_v31, %v3706_v61 }
 0x4bf   : > { %4528 = vmatprep.mubr.bf16.mxu0 %v3796_v24  ;;  %v12189_v33 = vmul.f32 %v3753_v23, %v3704_v41  ;;  %v3803_v25 = vpack.c.bf16 %v12171_v20, %v12168_v13  ;;  %v3593_v5 = vrot.slane %v12037_v8, 7  ;;  %v3674_v39 = vmul.f32 %v12009_v17, %v3616_v10  ;;  %v9389_v24 = vld [vmem:[%s10058_s19 + $0x264] ss:$8 sps:$4 sm:$0xff]   ;;  %v9392_v41 = vld [vmem:[%s10058_s19 + $0x254] ss:$8 sps:$4 sm:$0xff]  }
 0x4c0   : > { %4529 = vmatmul.mubr.bf16.gmra.mxu0 %v3795_v1  ;;  %v3782_v6 = vpack.c.bf16 %v3672_v58, %v3670_v14  ;;  %v3598_v0 = vrot.slane %v12073_v60, 7  ;;  %v3781_v2 = vpack.c.bf16 %v3671_v57, %v3669_v36  ;;  %v9387_v60 = vld [vmem:[%s10058_s19 + $0x260] ss:$8 sps:$4 sm:$0xff]   ;;  %v3599_v63 = vrot.slane %v12083_v38, 7 }
 0x4c1   : > { %v3802_v31 = vpack.c.bf16 %v12189_v33, %v12187_v40  ;;  %4802 = vmatprep.mubr.bf16.mxu0 %v13376_v11  ;;  %v3784_v23 = vpack.c.bf16 %v3676_v55, %v3674_v39  ;;  %v3613_v8 = vsel %vm994_vm1, %v3593_v5, %v3595_v48  ;;  %v3615_v36 = vsel %vm994_vm1, %v3591_v37, %v3593_v5  ;;  %v9390_v37 = vld [vmem:[%s10058_s19 + $0x250] ss:$8 sps:$4 sm:$0xff]   ;;  %v9395_v55 = vld [vmem:[%s10058_s19 + $0x244] ss:$8 sps:$4 sm:$0xff]  }
 0x4c2   : > { %4425 = vmatprep.mubr.bf16.mxu1 %v3782_v6  ;;  %v3610_v61 = vsel %vm994_vm1, %v3598_v0, %v3600_v47  ;;  %v3675_v57 = vmul.f32 %v12011_v43, %v3613_v8  ;;  %v3612_v58 = vsel %vm994_vm1, %v3596_v42, %v3598_v0  ;;  %v3673_v32 = vmul.f32 %v12009_v17, %v3615_v36  ;;  %v9398_v6 = vld [vmem:[%s10058_s19 + $0x234] ss:$8 sps:$4 sm:$0xff]  }
 0x4c3   : > { %4426 = vmatmul.mubr.bf16.vlgmr.msra.gmra.mxu1 %v3781_v2  ;;  %v3680_v10 = vmul.f32 %v12015_v28, %v3610_v61  ;;  %v3597_v1 = vrot.slane %v12067_v12, 7  ;;  %v3678_v14 = vmul.f32 %v12013_v62, %v3612_v58  ;;  %v3602_v43 = vrot.slane %v12113_v3, 7  ;;  %v9393_v12 = vld [vmem:[%s10058_s19 + $0x240] ss:$8 sps:$4 sm:$0xff]   ;;  %v9402_v58 = vld [vmem:[%s10058_s19 + $0x210] ss:$8 sps:$4 sm:$0xff]  }
 0x4c4   : > { %4540 = vmatpush1.bf16.msra.mxu1 %v9384_v21  ;;  %4435 = vmatprep.mubr.bf16.mxu1 %v3784_v23  ;;  %v3783_v22 = vpack.c.bf16 %v3675_v57, %v3673_v32 }
 0x4c5   : > { %4541 = vmatprep.subr.bf16.mxu1 %v9389_v24  ;;  %v3786_v42 = vpack.c.bf16 %v3680_v10, %v3678_v14  ;;  %v3609_v38 = vsel %vm994_vm1, %v3597_v1, %v3599_v63  ;;  %v3606_v17 = vsel %vm994_vm1, %v3602_v43, %v3604_v34  ;;  %v3611_v5 = vsel %vm994_vm1, %v3595_v48, %v3597_v1  ;;  %v9396_v24 = vld [vmem:[%s10058_s19 + $0x230] ss:$8 sps:$4 sm:$0xff]   ;;  %v9416_v14 = vld [vmem:[%s10058_s19 + $0x2d4] ss:$8 sps:$4 sm:$0xff]  }
 0x4c6   : > { %v3679_v21 = vmul.f32 %v12015_v28, %v3609_v38  ;;  %v3608_v39 = vsel %vm994_vm1, %v3600_v47, %v3602_v43  ;;  %v3684_v0 = vmul.f32 %v12025_v35, %v3606_v17  ;;  %v3677_v2 = vmul.f32 %v12013_v62, %v3611_v5  ;;  %v9401_v28 = vld [vmem:[%s10058_s19 + $0x224] ss:$8 sps:$4 sm:$0xff]   ;;  %v9408_v1 = vld [vmem:[%s10058_s19 + $0x2f0] ss:$8 sps:$4 sm:$0xff]   ;;  %v9428_v5 = vld [vmem:[%s10058_s19 + $0x294] ss:$8 sps:$4 sm:$0xff]  }
 0x4c7   : > { %v3601_v34 = vrot.slane %v12101_v53, 7  ;;  %v3682_v23 = vmul.f32 %v12023_v26, %v3608_v39  ;;  %v3688_v48 = vrot.slane %v12029_v18, 1  ;;  %v3686_v47 = vrot.slane %v12019_v51, 1  ;;  %v9399_v18 = vld [vmem:[%s10058_s19 + $0x220] ss:$8 sps:$4 sm:$0xff]  }
 0x4c8   : > { %4542 = vmatpush1.bf16.msra.mxu1 %v9387_v60  ;;  %v3785_v8 = vpack.c.bf16 %v3679_v21, %v3677_v2  ;;  %v13377_v53 = vrot.slane %v12042_v27, 1  ;;  %v9414_v43 = vld [vmem:[%s10058_s19 + $0x2d0] ss:$8 sps:$4 sm:$0xff]   ;;  %v9425_v17 = vld [vmem:[%s10058_s19 + $0x2a4] ss:$8 sps:$4 sm:$0xff]   ;;  %v13379_v2 = vpack.c.bf16 %v12105_v7, %v12103_v50 }
 0x4c9   : > { %4543 = vmatprep.subr.bf16.mxu1 %v9392_v41  ;;  %v3788_v61 = vpack.c.bf16 %v3684_v0, %v3682_v23  ;;  %v3605_v62 = vsel %vm994_vm1, %v3601_v34, %v3603_v59  ;;  %v3607_v36 = vsel %vm994_vm1, %v3599_v63, %v3601_v34  ;;  %v3714_v27 = vsel %vm1139_vm0, %v3686_v47, %v3688_v48  ;;  %v9420_v38 = vld [vmem:[%s10058_s19 + $0x2b0] ss:$8 sps:$4 sm:$0xff]   ;;  %v9431_v21 = vld [vmem:[%s10058_s19 + $0x284] ss:$8 sps:$4 sm:$0xff]   ;;  %v9429_v39 = vld [vmem:[%s10058_s19 + $0x280] ss:$8 sps:$4 sm:$0xff]  }
 0x4ca   : > { %v3712_v60 = vsel %vm1139_vm0, %v3688_v48, %v13377_v53  ;;  %v3683_v59 = vmul.f32 %v12025_v35, %v3605_v62  ;;  %v3681_v57 = vmul.f32 %v12023_v26, %v3607_v36  ;;  %v3766_v63 = vmul.f32 %v12044_v46, %v3714_v27  ;;  %v9407_v35 = vld [vmem:[%s10058_s19 + $0x204] ss:$8 sps:$4 sm:$0xff]   ;;  %v9410_v26 = vld [vmem:[%s10058_s19 + $0x2f4] ss:$8 sps:$4 sm:$0xff]  }
 0x4cb   : > { %4436 = vmatmul.mubr.bf16.gmra.mxu1 %v3783_v22  ;;  %v3768_v41 = vmul.f32 %v12046_v30, %v3712_v60  ;;  %v9405_v30 = vld [vmem:[%s10058_s19 + $0x200] ss:$8 sps:$4 sm:$0xff]   ;;  %v9413_v46 = vld [vmem:[%s10058_s19 + $0x2e4] ss:$8 sps:$4 sm:$0xff]   ;;  %v13378_v0 = vpack.c.bf16 %v12054_v49, %v12051_v9  ;;  %v3700_v34 = vrot.slane %v12139_v15, 1  ;;  %v13381_v23 = vrot.slane %v12113_v3, 1 }
 0x4cc   : > { %4544 = vmatpush1.bf16.msra.mxu1 %v9390_v37  ;;  %4445 = vmatprep.mubr.bf16.mxu1 %v3786_v42  ;;  %v3787_v10 = vpack.c.bf16 %v3683_v59, %v3681_v57  ;;  %v9411_v37 = vld [vmem:[%s10058_s19 + $0x2e0] ss:$8 sps:$4 sm:$0xff]   ;;  %v9419_v22 = vld [vmem:[%s10058_s19 + $0x2c4] ss:$8 sps:$4 sm:$0xff]   ;;  %v9422_v42 = vld [vmem:[%s10058_s19 + $0x2b4] ss:$8 sps:$4 sm:$0xff]  }
 0x4cd   : > { %4545 = vmatprep.subr.bf16.mxu1 %v9395_v55  ;;  %v3798_v32 = vpack.c.bf16 %v3768_v41, %v3766_v63  ;;  %v9417_v55 = vld [vmem:[%s10058_s19 + $0x2c0] ss:$8 sps:$4 sm:$0xff]   ;;  %v3702_v48 = vsel %vm1139_vm0, %v13381_v23, %v3700_v34  ;;  %v3716_v9 = vsel %vm1139_vm0, %v3700_v34, %v3686_v47 }
 0x4ce   : > { %v3778_v49 = vmul.f32 %v12151_v45, %v3702_v48  ;;  %v3780_v50 = vmul.f32 %v12153_v44, %v3716_v9 }
 0x4d0   : > { %4546 = vmatpush1.bf16.msra.mxu1 %v9393_v12  ;;  %v9423_v12 = vld [vmem:[%s10058_s19 + $0x2a0] ss:$8 sps:$4 sm:$0xff]  }
 0x4d1   : > { %4547 = vmatprep.subr.bf16.mxu1 %v9398_v6  ;;  %v9426_v6 = vld [vmem:[%s10058_s19 + $0x290] ss:$8 sps:$4 sm:$0xff]  }
 0x4d3   : > { %4446 = vmatmul.mubr.bf16.gmra.mxu1 %v3785_v8 }
 0x4d4   : > { %4548 = vmatpush1.bf16.msra.mxu1 %v9396_v24  ;;  %4455 = vmatprep.mubr.bf16.mxu1 %v3788_v61  ;;  %v13380_v24 = vpack.c.bf16 %v12081_v16, %v12079_v52  ;;  %v3804_v52 = vpack.c.bf16 %v3780_v50, %v3778_v49  ;;  %v13382_v16 = vpack.c.bf16 %v12127_v19, %v12125_v29 }
 0x4d5   : > { %4549 = vmatprep.subr.bf16.mxu1 %v9401_v28 }
 0x4d8   : > { %4550 = vmatpush1.bf16.msra.mxu1 %v9399_v18 }
 0x4d9   : > { %4551 = vmatprep.subr.bf16.mxu1 %v9404_v4 }
 0x4db   : > { %4456 = vmatmul.mubr.bf16.gmra.mxu1 %v3787_v10  ;;  %v3901_v10 = vld [vmem:[%s10063_s24] sm:$0x3] }
 0x4dc   : > { %4552 = vmatpush1.bf16.msra.mxu1 %v9402_v58  ;;  %4571 = vmatprep.mubr.bf16.mxu1 %v3798_v32 }
 0x4dd   : > { %4553 = vmatprep.subr.bf16.mxu1 %v9407_v35 }
 0x4e0   : > { %4554 = vmatpush1.bf16.msra.mxu1 %v9405_v30 }
 0x4e1   : > { %4555 = vmatprep.subr.bf16.mxu1 %v9410_v26  ;;  %v13383_v26 = vld [vmem:[#allocation26_spill] sm:$0xff] }
 0x4e4   : > { %4556 = vmatpush2.bf16.msra.mxu1 %v9408_v1  ;;  %v3906_v1 = vrot.slane %v3901_v10, %v13383_v26 }
 0x4e5   : > { %4557 = vmatprep.subr.bf16.mxu1 %v9413_v46  ;;  %v13384_v46 = vld [vmem:[#allocation27_spill] sm:$0xff] }
 0x4e8   : > { %4558 = vmatpush2.bf16.msra.mxu1 %v9411_v37  ;;  %v3910_v37 = vrot.slane %v3901_v10, %v13384_v46 }
 0x4e9   : > { %4559 = vmatprep.subr.bf16.mxu1 %v9416_v14 }
 0x4ec   : > { %4560 = vmatpush2.bf16.msra.mxu1 %v9414_v43 }
 0x4ed   : > { %4561 = vmatprep.subr.bf16.mxu1 %v9419_v22 }
 0x4f0   : > { %4562 = vmatpush2.bf16.msra.mxu1 %v9417_v55 }
 0x4f1   : > { %4563 = vmatprep.subr.bf16.mxu1 %v9422_v42 }
 0x4f4   : > { %4564 = vmatpush2.bf16.msra.mxu1 %v9420_v38 }
 0x4f5   : > { %4565 = vmatprep.subr.bf16.mxu1 %v9425_v17 }
 0x4f8   : > { %4566 = vmatpush2.bf16.msra.mxu1 %v9423_v12 }
 0x4f9   : > { %4567 = vmatprep.subr.bf16.mxu1 %v9428_v5 }
 0x4fc   : > { %4568 = vmatpush2.bf16.msra.mxu1 %v9426_v6 }
 0x4fd   : > { %4569 = vmatprep.subr.bf16.mxu1 %v9431_v21 }
 0x500   : > { %4570 = vmatpush2.bf16.msra.mxu1 %v9429_v39 }
 0x503   : > { %4572 = vmatmul.mubr.bf16.vlgmr.msra.gmra.mxu1 %v13378_v0 }
 0x504   : > { %4581 = vmatprep.mubr.bf16.mxu1 %v13379_v2 }
 0x50b   : > { %4582 = vmatmul.mubr.bf16.gmra.mxu1 %v13380_v24 }
 0x50c   : > { %4591 = vmatprep.mubr.bf16.mxu1 %v3802_v31 }
 0x513   : > { %4592 = vmatmul.mubr.bf16.gmra.mxu1 %v13382_v16 }
 0x514   : > { %4601 = vmatprep.mubr.bf16.mxu1 %v3804_v52 }
 0x51b   : > { %4602 = vmatmul.mubr.bf16.gmra.mxu1 %v3803_v25 }
 0x566   : > { %v4500_v45 = vpop.f32.mrf.mxu0 }
 0x568   : > { %v4502_v44 = vpop.f32.mrf.mxu0 }
 0x56a   : > { %v4504_v61 = vpop.f32.mrf.mxu0 }
 0x56c   : > { %v4506_v29 = vpop.f32.mrf.mxu0 }
 0x56e   : > { %v4510_v47 = vpop.f32.mrf.mxu0 }
 0x570   : > { %v4512_v20 = vpop.f32.mrf.mxu0 }
 0x572   : > { %v4514_v25 = vpop.f32.mrf.mxu0 }
 0x574   : > { %v4516_v18 = vpop.f32.mrf.mxu0 }
 0x576   : > { %v4520_v4 = vpop.f32.mrf.mxu0 }
 0x578   : > { %v4522_v41 = vpop.f32.mrf.mxu0 }
 0x57a   : > { %v4524_v63 = vpop.f32.mrf.mxu0 }
 0x57c   : > { %v4526_v30 = vpop.f32.mrf.mxu0 }
 0x580   : > { %v4530_v22 = vpop.f32.mrf.mxu0 }
 0x582   : > { %v4532_v12 = vpop.f32.mrf.mxu0 }
 0x583   : > { %v4427_v51 = vpop.f32.mrf.mxu1 }
 0x584   : > { %v4428_v55 = vadd.f32 %v4427_v51, %v3906_v1 }
 0x585   : > { %v4429_v7 = vpop.f32.mrf.mxu1 }
 0x586   : > { %v4430_v42 = vadd.f32 %v4429_v7, %v3910_v37  ;;  %v4501_v21 = vadd.f32 %v4500_v45, %v4428_v55  ;;  %v4534_v7 = vpop.f32.mrf.mxu0 }
 0x587   : > { %v4431_v3 = vpop.f32.mrf.mxu1 }
 0x588   : > { %v4432_v5 = vadd.f32 %v4431_v3, %v3906_v1  ;;  %v4503_v2 = vadd.f32 %v4502_v44, %v4430_v42 }
 0x589   : > { %v4433_v15 = vpop.f32.mrf.mxu1 }
 0x58a   : > { %v4434_v6 = vadd.f32 %v4433_v15, %v3910_v37  ;;  %v4505_v3 = vadd.f32 %v4504_v61, %v4432_v5 }
 0x58b   : > { %v4437_v40 = vpop.f32.mrf.mxu1 }
 0x58c   : > { %v4438_v39 = vadd.f32 %v4437_v40, %v3906_v1  ;;  %v4507_v15 = vadd.f32 %v4506_v29, %v4434_v6 }
 0x58d   : > { %v4439_v33 = vpop.f32.mrf.mxu1 }
 0x58e   : > { %v4440_v0 = vadd.f32 %v4439_v33, %v3910_v37  ;;  %v4511_v45 = vadd.f32 %v4510_v47, %v4438_v39 }
 0x58f   : > { %v4441_v31 = vpop.f32.mrf.mxu1 }
 0x590   : > { %v4442_v24 = vadd.f32 %v4441_v31, %v3906_v1  ;;  %v4513_v44 = vadd.f32 %v4512_v20, %v4440_v0 }
 0x591   : > { %v4443_v8 = vpop.f32.mrf.mxu1 }
 0x592   : > { %v4444_v49 = vadd.f32 %v4443_v8, %v3910_v37 }
 0x593   : > { %v4447_v28 = vpop.f32.mrf.mxu1 }
 0x594   : > { %v4448_v50 = vadd.f32 %v4447_v28, %v3906_v1  ;;  %v4517_v28 = vadd.f32 %v4516_v18, %v4444_v49 }
 0x595   : > { %v4449_v62 = vpop.f32.mrf.mxu1 }
 0x596   : > { %v4450_v52 = vadd.f32 %v4449_v62, %v3910_v37  ;;  %v4521_v62 = vadd.f32 %v4520_v4, %v4448_v50 }
 0x597   : > { %v4451_v19 = vpop.f32.mrf.mxu1 }
 0x598   : > { %v4452_v23 = vadd.f32 %v4451_v19, %v3906_v1 }
 0x599   : > { %v4453_v53 = vpop.f32.mrf.mxu1 }
 0x59a   : > { %v4454_v16 = vadd.f32 %v4453_v53, %v3910_v37  ;;  %v4523_v53 = vadd.f32 %v4522_v41, %v4450_v52 }
 0x59b   : > { %v4457_v13 = vpop.f32.mrf.mxu1 }
 0x59c   : > { %v4458_v48 = vadd.f32 %v4457_v13, %v3906_v1  ;;  %v4515_v13 = vadd.f32 %v4514_v25, %v4442_v24  ;;  %v4527_v55 = vadd.f32 %v4526_v30, %v4454_v16 }
 0x59d   : > { %v4459_v60 = vpop.f32.mrf.mxu1 }
 0x59e   : > { %v4460_v10 = vadd.f32 %v4459_v60, %v3910_v37  ;;  %v4531_v8 = vadd.f32 %v4530_v22, %v4458_v48  ;;  %v4536_v60 = vpop.f32.mrf.mxu0 }
 0x59f   : > { %v4461_v36 = vpop.f32.mrf.mxu1 }
 0x5a0   : > { %v4462_v40 = vadd.f32 %v4461_v36, %v3906_v1  ;;  %v4533_v36 = vadd.f32 %v4532_v12, %v4460_v10 }
 0x5a1   : > { %v4463_v59 = vpop.f32.mrf.mxu1 }
 0x5a2   : > { %v4464_v33 = vadd.f32 %v4463_v59, %v3910_v37  ;;  %v4535_v1 = vadd.f32 %v4534_v7, %v4462_v40 }
 0x5a4   : > { %v4537_v37 = vadd.f32 %v4536_v60, %v4464_v33 }
 0x5c3   : > { %v4573_v27 = vpop.f32.mrf.mxu1 }
 0x5c4   : > { %v12316_v9 = vadd.f32 %v4573_v27, %v4501_v21  ;;  %v4525_v27 = vadd.f32 %v4524_v63, %v4452_v23 }
 0x5c5   : > { %v4575_v57 = vpop.f32.mrf.mxu1 }
 0x5c6   : > { %v12318_v46 = vadd.f32 %v4575_v57, %v4503_v2  ;;  %v4612_v19 = vmax.f32 %v12316_v9, 0.0 }
 0x5c7   : > { %v4577_v58 = vpop.f32.mrf.mxu1 }
 0x5c8   : > { %v4613_v57 = vmax.f32 %v12318_v46, 0.0  ;;  %v12324_v25 = vrot.slane %v4612_v19, 1  ;;  %v12326_v18 = vadd.f32 %v4577_v58, %v4505_v3  ;;  %v4840_v46 = vld [vmem:[%s13385_s1 + $0x8] sm:$0xff] }
 0x5c9   : > { %v4579_v35 = vpop.f32.mrf.mxu1 }
 0x5ca   : > { %v12328_v63 = vadd.f32 %v4579_v35, %v4507_v15 }
 0x5cb   : > { %v4583_v32 = vpop.f32.mrf.mxu1 }
 0x5cc   : > { %v12330_v30 = vadd.f32 %v4583_v32, %v4511_v45  ;;  %v4614_v32 = vmax.f32 %v12326_v18, 0.0  ;;  %v4615_v48 = vmax.f32 %v12328_v63, 0.0 }
 0x5cd   : > { %v12314_v14 = vpop.f32.mrf.mxu1 }
 0x5ce   : > { %v12337_v0 = vadd.f32 %v12314_v14, %v4513_v44  ;;  %v4616_v49 = vmax.f32 %v12330_v30, 0.0 }
 0x5cf   : > { %v4587_v43 = vpop.f32.mrf.mxu1 }
 0x5d0   : > { %v4588_v22 = vadd.f32 %v4587_v43, %v4515_v13 }
 0x5d1   : > { %v4589_v38 = vpop.f32.mrf.mxu1 }
 0x5d2   : > { %v4590_v58 = vadd.f32 %v4589_v38, %v4517_v28  ;;  %v4618_v50 = vmax.f32 %v4588_v22, 0.0  ;;  %v4617_v38 = vmax.f32 %v12337_v0, 0.0 }
 0x5d3   : > { %v4593_v17 = vpop.f32.mrf.mxu1 }
 0x5d4   : > { %v4594_v59 = vadd.f32 %v4593_v17, %v4521_v62  ;;  %v12334_v17 = vrot.slane %v4613_v57, 1  ;;  %v4619_v10 = vmax.f32 %v4590_v58, 0.0 }
 0x5d5   : > { %v4595_v34 = vpop.f32.mrf.mxu1 }
 0x5d6   : > { %v4596_v5 = vadd.f32 %v4595_v34, %v4523_v53  ;;  %v4620_v2 = vmax.f32 %v4594_v59, 0.0  ;;  %v4635_v59 = vrot.slane %v4619_v10, 1 }
 0x5d7   : > { %v4597_v51 = vpop.f32.mrf.mxu1 }
 0x5d8   : > { %v4598_v61 = vadd.f32 %v4597_v51, %v4525_v27  ;;  %v4621_v52 = vmax.f32 %v4596_v5, 0.0  ;;  %v4636_v3 = vrot.slane %v4620_v2, 1 }
 0x5d9   : > { %v4599_v31 = vpop.f32.mrf.mxu1 }
 0x5da   : > { %v4600_v47 = vadd.f32 %v4599_v31, %v4527_v55  ;;  %v4622_v6 = vmax.f32 %v4598_v61, 0.0  ;;  %v4634_v31 = vrot.slane %v4618_v50, 1  ;;  %v4637_v13 = vrot.slane %v4621_v52, 1 }
 0x5db   : > { %v4603_v42 = vpop.f32.mrf.mxu1 }
 0x5dc   : > { %v4604_v29 = vadd.f32 %v4603_v42, %v4531_v8  ;;  %v4623_v24 = vmax.f32 %v4600_v47, 0.0  ;;  %v4638_v16 = vrot.slane %v4622_v6, 1  ;;  %v4650_v47 = vsel %vm1139_vm0, %v4634_v31, %v4636_v3 }
 0x5dd   : > { %v4605_v20 = vpop.f32.mrf.mxu1  ;;  %v4651_v30 = vsel %vm1139_vm0, %v4635_v59, %v4637_v13  ;;  %v12386_v22 = vmax.f32 %v4618_v50, %v4650_v47  ;;  %v9482_v47 = vld [vmem:[%s13387_s10 + $0x1f0] ss:$8 sps:$4 sm:$0xff]  }
 0x5de   : > { %v4624_v4 = vmax.f32 %v4604_v29, 0.0  ;;  %v4606_v41 = vadd.f32 %v4605_v20, %v4533_v36  ;;  %v4639_v15 = vrot.slane %v4623_v24, 1  ;;  %v4648_v28 = vsel %vm1139_vm0, %v4636_v3, %v4638_v16  ;;  %v4890_v3 = vld [vmem:[%s13386_s7 + $0x18] sm:$0xff] }
 0x5df   : > { %v4607_v12 = vpop.f32.mrf.mxu1  ;;  %v4632_v36 = vrot.slane %v4616_v49, 1  ;;  %v12399_v58 = vmax.f32 %v4619_v10, %v4651_v30  ;;  %v9442_v10 = vld [vmem:[%s13387_s10 + $0x164] ss:$8 sps:$4 sm:$0xff]  }
 0x5e0   : > { %v4625_v21 = vmax.f32 %v4606_v41, 0.0  ;;  %v4608_v39 = vadd.f32 %v4607_v12, %v4535_v1  ;;  %v4640_v23 = vrot.slane %v4624_v4, 1  ;;  %v4649_v20 = vsel %vm1139_vm0, %v4637_v13, %v4639_v15  ;;  %v9458_v13 = vld [vmem:[%s13387_s10 + $0x130] ss:$8 sps:$4 sm:$0xff]  }
 0x5e1   : > { %v4609_v35 = vpop.f32.mrf.mxu1  ;;  %v12375_v1 = vmax.f32 %v4620_v2, %v4648_v28  ;;  %v4633_v41 = vrot.slane %v4617_v38, 1  ;;  %v4652_v63 = vsel %vm1139_vm0, %v4632_v36, %v4634_v31  ;;  %v12388_v5 = vmax.f32 %v4621_v52, %v4649_v20  ;;  %v9460_v31 = vld [vmem:[%s13387_s10 + $0x134] ss:$8 sps:$4 sm:$0xff]   ;;  %v9466_v28 = vld [vmem:[%s13387_s10 + $0x124] ss:$8 sps:$4 sm:$0xff]  }
 0x5e2   : > { %v4626_v43 = vmax.f32 %v4608_v39, 0.0  ;;  %v4610_v34 = vadd.f32 %v4609_v35, %v4537_v37  ;;  %v4641_v51 = vrot.slane %v4625_v21, 1  ;;  %v4646_v40 = vsel %vm1139_vm0, %v4638_v16, %v4640_v23  ;;  %v4887_v16 = vld [vmem:[%s13386_s7] sm:$0xff] }
 0x5e3   : > { %v12363_v42 = vmax.f32 %v4622_v6, %v4646_v40  ;;  %v4631_v6 = vrot.slane %v4615_v48, 1  ;;  %v4653_v39 = vsel %vm1139_vm0, %v4633_v41, %v4635_v59  ;;  %v12397_v0 = vmax.f32 %v4616_v49, %v4652_v63  ;;  %v9448_v40 = vld [vmem:[%s13387_s10 + $0x154] ss:$8 sps:$4 sm:$0xff]   ;;  %v9490_v20 = vld [vmem:[%s13387_s10 + $0x1e4] ss:$8 sps:$4 sm:$0xff]  }
 0x5e4   : > { %v4642_v7 = vrot.slane %v4626_v43, 1  ;;  %v4627_v14 = vmax.f32 %v4610_v34, 0.0  ;;  %v4647_v62 = vsel %vm1139_vm0, %v4639_v15, %v4641_v51  ;;  %v9440_v15 = vld [vmem:[%s13387_s10 + $0x160] ss:$8 sps:$4 sm:$0xff]   ;;  %v9484_v59 = vld [vmem:[%s13387_s10 + $0x1f4] ss:$8 sps:$4 sm:$0xff]  }
 0x5e5   : > { %v12377_v37 = vmax.f32 %v4623_v24, %v4647_v62  ;;  %v9013_v12 = vpack.i.bf16 %v12363_v42, %v12375_v1  ;;  %v4655_v35 = vsel %vm1139_vm0, %v4631_v6, %v4633_v41  ;;  %v9028_v34 = vpack.i.bf16 %v12386_v22, %v12397_v0  ;;  %v9464_v62 = vld [vmem:[%s13387_s10 + $0x120] ss:$8 sps:$4 sm:$0xff]   ;;  %v9494_v41 = vld [vmem:[%s13387_s10 + $0x1d0] ss:$8 sps:$4 sm:$0xff]  }
 0x5e6   : > { %v4658_v33 = vsel %vm1139_vm0, %v4642_v7, %v12324_v25  ;;  %v4643_v45 = vrot.slane %v4627_v14, 1  ;;  %v4644_v44 = vsel %vm1139_vm0, %v4640_v23, %v4642_v7  ;;  %v4657_v49 = vsel %vm1139_vm0, %v12334_v17, %v4631_v6  ;;  %v4889_v7 = vld [vmem:[%s13386_s7 + $0x10] sm:$0xff] }
 0x5e7   : > { %v12350_v27 = vmax.f32 %v4626_v43, %v4658_v33  ;;  %v12352_v8 = vmax.f32 %v4624_v4, %v4644_v44  ;;  %v4630_v4 = vrot.slane %v4614_v32, 1  ;;  %v9023_v2 = vpack.i.bf16 %v12377_v37, %v12388_v5  ;;  %v9446_v33 = vld [vmem:[%s13387_s10 + $0x150] ss:$8 sps:$4 sm:$0xff]   ;;  %v9452_v44 = vld [vmem:[%s13387_s10 + $0x140] ss:$8 sps:$4 sm:$0xff]  }
 0x5e8   : > { %v4659_v53 = vsel %vm1139_vm0, %v4643_v45, %v12334_v17  ;;  %v4645_v55 = vsel %vm1139_vm0, %v4641_v51, %v4643_v45  ;;  %v12411_v43 = vmax.f32 %v4617_v38, %v4653_v39  ;;  %v12430_v52 = vmax.f32 %v4613_v57, %v4657_v49  ;;  %v4839_v17 = vld [vmem:[%s13385_s1] sm:$0xff]  ;;  %v4841_v57 = vld [vmem:[%s13385_s1 + $0x10] sm:$0xff]  ;;  %v4888_v51 = vld [vmem:[%s13386_s7 + $0x8] sm:$0xff] }
 0x5e9   : > { %v12365_v60 = vmax.f32 %v4627_v14, %v4659_v53  ;;  %v9008_v61 = vpack.i.bf16 %v12350_v27, %v12352_v8  ;;  %v12369_v29 = vmax.f32 %v4625_v21, %v4645_v55  ;;  %v4654_v21 = vsel %vm1139_vm0, %v4630_v4, %v4632_v36  ;;  %v9434_v14 = vld [vmem:[%s13387_s10 + $0x170] ss:$8 sps:$4 sm:$0xff]   ;;  %v9436_v38 = vld [vmem:[%s13387_s10 + $0x174] ss:$8 sps:$4 sm:$0xff]   ;;  %v9454_v45 = vld [vmem:[%s13387_s10 + $0x144] ss:$8 sps:$4 sm:$0xff]  }
 0x5ea   : > { %v4656_v24 = vsel %vm1139_vm0, %v12324_v25, %v4630_v4  ;;  %v12409_v23 = vmax.f32 %v4614_v32, %v4654_v21  ;;  %v12423_v32 = vmax.f32 %v4615_v48, %v4655_v35  ;;  %v9033_v50 = vpack.i.bf16 %v12399_v58, %v12411_v43  ;;  %v4842_v48 = vld [vmem:[%s13385_s1 + $0x18] sm:$0xff]  ;;  %5572 = vmatprep.subr.bf16.mxu1 %v9436_v38  ;;  %v9476_v36 = vld [vmem:[%s13387_s10 + $0x100] ss:$8 sps:$4 sm:$0xff]   ;;  %s13389_s1 = sld [smem:[#allocation12_spill]] }
 0x5eb   : > { %9009 = vrot.lane.b32.xlu0 %v9008_v61, %s9995_s18  ;;  %v9018_v18 = vpack.i.bf16 %v12365_v60, %v12369_v29  ;;  %v12421_v25 = vmax.f32 %v4612_v19, %v4656_v24  ;;  %5573 = vmatpush1.bf16.msra.mxu1 %v9434_v14  ;;  %v9472_v53 = vld [vmem:[%s13387_s10 + $0x114] ss:$8 sps:$4 sm:$0xff]   ;;  %v9470_v55 = vld [vmem:[%s13387_s10 + $0x110] ss:$8 sps:$4 sm:$0xff]   ;;  %v9478_v61 = vld [vmem:[%s13387_s10 + $0x104] ss:$8 sps:$4 sm:$0xff]  }
 0x5ec   : > { %v9043_v19 = vpack.i.bf16 %v12423_v32, %v12430_v52  ;;  %5574 = vmatprep.subr.bf16.mxu1 %v9442_v10  ;;  %v9496_v4 = vld [vmem:[%s13387_s10 + $0x1d4] ss:$8 sps:$4 sm:$0xff]  }
 0x5ed   : > { %9019 = vrot.lane.b32.xlu1 %v9018_v18, %s9995_s18  ;;  %v9038_v9 = vpack.i.bf16 %v12409_v23, %v12421_v25  ;;  %v9488_v18 = vld [vmem:[%s13387_s10 + $0x1e0] ss:$8 sps:$4 sm:$0xff]  }
 0x5ef   : > { %9014 = vrot.lane.b32.xlu0 %v9013_v12, %s9995_s18  ;;  %5575 = vmatpush1.bf16.msra.mxu1 %v9440_v15 }
 0x5f0   : > { %5576 = vmatprep.subr.bf16.mxu1 %v9448_v40 }
 0x5f1   : > { %9024 = vrot.lane.b32.xlu1 %v9023_v2, %s9995_s18 }
 0x5f3   : > { %9029 = vrot.lane.b32.xlu0 %v9028_v34, %s9995_s18  ;;  %5577 = vmatpush1.bf16.msra.mxu1 %v9446_v33 }
 0x5f4   : > { %5578 = vmatprep.subr.bf16.mxu1 %v9454_v45 }
 0x5f5   : > { %9034 = vrot.lane.b32.xlu1 %v9033_v50, %s9995_s18 }
 0x5f7   : > { %9039 = vrot.lane.b32.xlu0 %v9038_v9, %s9995_s18  ;;  %5579 = vmatpush1.bf16.msra.mxu1 %v9452_v44 }
 0x5f8   : > { %5580 = vmatprep.subr.bf16.mxu1 %v9460_v31 }
 0x5f9   : > { %9044 = vrot.lane.b32.xlu1 %v9043_v19, %s9995_s18  ;;  %s13388_s18 = sld [smem:[#allocation10_spill]] }
 0x5fb   : > { %4845 = vperm.xlu0 %8926, %v4839_v17   ;;  %5581 = vmatpush1.bf16.msra.mxu1 %v9458_v13 }
 0x5fc   : > { %5582 = vmatprep.subr.bf16.mxu1 %v9466_v28 }
 0x5fd   : > { %4850 = vperm.xlu1 %8927, %v4840_v46  }
 0x5ff   : > { %4855 = vperm.xlu0 %8926, %v4841_v57   ;;  %5583 = vmatpush1.bf16.msra.mxu1 %v9464_v62 }
 0x600   : > { %5584 = vmatprep.subr.bf16.mxu1 %v9472_v53 }
 0x601   : > { %4860 = vperm.xlu1 %8927, %v4842_v48  }
 0x603   : > { %4893 = vperm.xlu0 %8926, %v4887_v16   ;;  %5585 = vmatpush1.bf16.msra.mxu1 %v9470_v55 }
 0x604   : > { %5586 = vmatprep.subr.bf16.mxu1 %v9478_v61 }
 0x605   : > { %4898 = vperm.xlu1 %8927, %v4888_v51  }
 0x607   : > { %4903 = vperm.xlu0 %8926, %v4889_v7   ;;  %5587 = vmatpush1.bf16.msra.mxu1 %v9476_v36 }
 0x608   : > { %5588 = vmatprep.subr.bf16.mxu1 %v9484_v59 }
 0x609   : > { %4908 = vperm.xlu1 %8927, %v4890_v3  }
 0x60b   : > { %5589 = vmatpush2.bf16.msra.mxu1 %v9482_v47 }
 0x60c   : > { %5590 = vmatprep.subr.bf16.mxu1 %v9490_v20 }
 0x60f   : > { %5591 = vmatpush2.bf16.msra.mxu1 %v9488_v18 }
 0x610   : > { %5592 = vmatprep.subr.bf16.mxu1 %v9496_v4 }
 0x613   : > { %5593 = vmatpush2.bf16.msra.mxu1 %v9494_v41 }
 0x65d   : > { %v9010_v63 = vpop.permute.xlu0 %9009 }
 0x65e   : > { %v9012_v12 = vunpack.i.h.bf16 %v9010_v63  ;;  %v9011_v6 = vunpack.i.l.bf16 %v9010_v63 }
 0x65f   : > { %v9020_v30 = vpop.permute.xlu1 %9019 }
 0x660   : > { %v9022_v21 = vunpack.i.h.bf16 %v9020_v30  ;;  %v9021_v39 = vunpack.i.l.bf16 %v9020_v30 }
 0x661   : > { %v9015_v2 = vpop.permute.xlu0 %9014 }
 0x662   : > { %v4715_v24 = vsel %vm4708_vm3, %v9011_v6, %v9021_v39  ;;  %v4716_v35 = vsel %vm4708_vm3, %v9012_v12, %v9022_v21  ;;  %v4723_v34 = vsel %vm4708_vm3, %v9021_v39, %v9011_v6  ;;  %v4724_v49 = vsel %vm4708_vm3, %v9022_v21, %v9012_v12 }
 0x663   : > { %v4737_v50 = vmax.f32 %v12352_v8, %v4715_v24  ;;  %v4739_v9 = vmax.f32 %v12350_v27, %v4716_v35  ;;  %v9017_v19 = vunpack.i.h.bf16 %v9015_v2  ;;  %v9016_v17 = vunpack.i.l.bf16 %v9015_v2  ;;  %v9025_v46 = vpop.permute.xlu1 %9024  ;;  %v9439_v35 = vld [vmem:[%s13387_s10 + $0x74] ss:$8 sps:$4 sm:$0xff]  }
 0x664   : > { %v9027_v57 = vunpack.i.h.bf16 %v9025_v46  ;;  %v9026_v48 = vunpack.i.l.bf16 %v9025_v46  ;;  %v4738_v16 = vmax.f32 %v12369_v29, %v4723_v34  ;;  %v4740_v51 = vmax.f32 %v12365_v60, %v4724_v49  ;;  %v9451_v34 = vld [vmem:[%s13387_s10 + $0x54] ss:$8 sps:$4 sm:$0xff]   ;;  %v9433_v49 = vld [vmem:[%s13388_s18 + $0x8] sm:$0xff]   ;;  %v9461_v46 = vld [vmem:[%s13387_s10 + $0x30] ss:$8 sps:$4 sm:$0xff]  }
 0x665   : > { %v9030_v7 = vpop.permute.xlu0 %9029  ;;  %v4751_v14 = vpack.c.bf16 %v4739_v9, %v4737_v50  ;;  %v9449_v50 = vld [vmem:[%s13387_s10 + $0x50] ss:$8 sps:$4 sm:$0xff]   ;;  %v9457_v9 = vld [vmem:[%s13387_s10 + $0x44] ss:$8 sps:$4 sm:$0xff]  }
 0x666   : > { %v4713_v38 = vsel %vm4708_vm3, %v9016_v17, %v9026_v48  ;;  %v4714_v10 = vsel %vm4708_vm3, %v9017_v19, %v9027_v57  ;;  %v4721_v27 = vsel %vm4708_vm3, %v9026_v48, %v9016_v17  ;;  %v4722_v8 = vsel %vm4708_vm3, %v9027_v57, %v9017_v19  ;;  %v9455_v19 = vld [vmem:[%s13387_s10 + $0x40] ss:$8 sps:$4 sm:$0xff]   ;;  %v9463_v17 = vld [vmem:[%s13387_s10 + $0x34] ss:$8 sps:$4 sm:$0xff]   ;;  %v9469_v57 = vld [vmem:[%s13387_s10 + $0x24] ss:$8 sps:$4 sm:$0xff]  }
 0x667   : > { %v4733_v3 = vmax.f32 %v12375_v1, %v4713_v38  ;;  %v4735_v29 = vmax.f32 %v12363_v42, %v4714_v10  ;;  %v9032_v15 = vunpack.i.h.bf16 %v9030_v7  ;;  %v9031_v60 = vunpack.i.l.bf16 %v9030_v7  ;;  %v9035_v40 = vpop.permute.xlu1 %9034  ;;  %v9467_v48 = vld [vmem:[%s13387_s10 + $0x20] ss:$8 sps:$4 sm:$0xff]   ;;  %v9481_v7 = vld [vmem:[%s13387_s10 + $0x4] ss:$8 sps:$4 sm:$0xff]   ;;  %v9487_v38 = vld [vmem:[%s13387_s10 + $0xf4] ss:$8 sps:$4 sm:$0xff]  }
 0x668   : > { %v9037_v33 = vunpack.i.h.bf16 %v9035_v40  ;;  %v9036_v45 = vunpack.i.l.bf16 %v9035_v40  ;;  %v4752_v44 = vpack.c.bf16 %v4740_v51, %v4738_v16  ;;  %v4734_v31 = vmax.f32 %v12388_v5, %v4721_v27  ;;  %v9475_v16 = vld [vmem:[%s13387_s10 + $0x14] ss:$8 sps:$4 sm:$0xff]   ;;  %v9473_v51 = vld [vmem:[%s13387_s10 + $0x10] ss:$8 sps:$4 sm:$0xff]   ;;  %v9493_v27 = vld [vmem:[%s13387_s10 + $0xe4] ss:$8 sps:$4 sm:$0xff]  }
 0x669   : > { %v9040_v13 = vpop.permute.xlu0 %9039  ;;  %v4736_v28 = vmax.f32 %v12377_v37, %v4722_v8  ;;  %v4749_v62 = vpack.c.bf16 %v4735_v29, %v4733_v3  ;;  %v9485_v10 = vld [vmem:[%s13387_s10 + $0xf0] ss:$8 sps:$4 sm:$0xff]   ;;  %v9491_v8 = vld [vmem:[%s13387_s10 + $0xe0] ss:$8 sps:$4 sm:$0xff]   ;;  %v9499_v3 = vld [vmem:[%s13387_s10 + $0xd4] ss:$8 sps:$4 sm:$0xff]  }
 0x66a   : > { %v4711_v53 = vsel %vm4708_vm3, %v9031_v60, %v9036_v45  ;;  %v4712_v1 = vsel %vm4708_vm3, %v9032_v15, %v9037_v33  ;;  %v4719_v42 = vsel %vm4708_vm3, %v9036_v45, %v9031_v60  ;;  %v4720_v55 = vsel %vm4708_vm3, %v9037_v33, %v9032_v15  ;;  %4778 = vmatprep.subr.bf16.mxu0 %v4752_v44  ;;  %v9497_v29 = vld [vmem:[%s13387_s10 + $0xd0] ss:$8 sps:$4 sm:$0xff]   ;;  %v9500_v15 = vld [vmem:[%s13387_s10 + $0x1c0] ss:$8 sps:$4 sm:$0xff]   ;;  %v9502_v60 = vld [vmem:[%s13387_s10 + $0x1c4] ss:$8 sps:$4 sm:$0xff]  }
 0x66b   : > { %v4729_v61 = vmax.f32 %v12397_v0, %v4711_v53  ;;  %v4731_v5 = vmax.f32 %v12386_v22, %v4712_v1  ;;  %4779 = vmatpush1.bf16.msra.mxu0 %v4751_v14  ;;  %v9042_v37 = vunpack.i.h.bf16 %v9040_v13  ;;  %v9041_v36 = vunpack.i.l.bf16 %v9040_v13  ;;  %v9045_v59 = vpop.permute.xlu1 %9044  ;;  %v9479_v14 = vld [vmem:[%s13387_s10] ss:$8 sps:$4 sm:$0xff]   ;;  %5594 = vmatprep.subr.bf16.mxu1 %v9502_v60  ;;  %v9505_v33 = vld [vmem:[%s13387_s10 + $0xc4] ss:$8 sps:$4 sm:$0xff]   ;;  %v9506_v45 = vld [vmem:[%s13387_s10 + $0x1b0] ss:$8 sps:$4 sm:$0xff]  }
 0x66c   : > { %v9047_v47 = vunpack.i.h.bf16 %v9045_v59  ;;  %v9046_v20 = vunpack.i.l.bf16 %v9045_v59  ;;  %v4750_v18 = vpack.c.bf16 %v4736_v28, %v4734_v31  ;;  %v4730_v4 = vmax.f32 %v12411_v43, %v4719_v42  ;;  %v9503_v40 = vld [vmem:[%s13387_s10 + $0xc0] ss:$8 sps:$4 sm:$0xff]   ;;  %5595 = vmatpush2.bf16.msra.mxu1 %v9500_v15  ;;  %v9508_v44 = vld [vmem:[%s13387_s10 + $0x1b4] ss:$8 sps:$4 sm:$0xff]   ;;  %v9509_v31 = vld [vmem:[%s13387_s10 + $0xb0] ss:$8 sps:$4 sm:$0xff]  }
 0x66d   : > { %v4732_v41 = vmax.f32 %v12399_v58, %v4720_v55  ;;  %v4747_v63 = vpack.c.bf16 %v4731_v5, %v4729_v61  ;;  %v9511_v13 = vld [vmem:[%s13387_s10 + $0xb4] ss:$8 sps:$4 sm:$0xff]   ;;  %5596 = vmatprep.subr.bf16.mxu1 %v9508_v44  ;;  %v9512_v28 = vld [vmem:[%s13387_s10 + $0x1a0] ss:$8 sps:$4 sm:$0xff]   ;;  %v9517_v1 = vld [vmem:[%s13387_s10 + $0xa4] ss:$8 sps:$4 sm:$0xff]  }
 0x66e   : > { %v4709_v30 = vsel %vm4708_vm3, %v9041_v36, %v9046_v20  ;;  %v4710_v0 = vsel %vm4708_vm3, %v9042_v37, %v9047_v47  ;;  %v4717_v22 = vsel %vm4708_vm3, %v9046_v20, %v9041_v36  ;;  %v4718_v12 = vsel %vm4708_vm3, %v9047_v47, %v9042_v37  ;;  %4780 = vmatprep.subr.bf16.mxu0 %v4750_v18  ;;  %v9515_v53 = vld [vmem:[%s13387_s10 + $0xa0] ss:$8 sps:$4 sm:$0xff]   ;;  %v9518_v42 = vld [vmem:[%s13387_s10 + $0x190] ss:$8 sps:$4 sm:$0xff]   ;;  %v9520_v55 = vld [vmem:[%s13387_s10 + $0x194] ss:$8 sps:$4 sm:$0xff]  }
 0x66f   : > { %v4725_v43 = vmax.f32 %v12421_v25, %v4709_v30  ;;  %v4727_v58 = vmax.f32 %v12409_v23, %v4710_v0  ;;  %4781 = vmatpush1.bf16.msra.mxu0 %v4749_v62  ;;  %v4748_v6 = vpack.c.bf16 %v4732_v41, %v4730_v4  ;;  %v4726_v21 = vmax.f32 %v12430_v52, %v4717_v22  ;;  %v9432_v25 = vld [vmem:[%s13388_s18] sm:$0xff]   ;;  %v9437_v23 = vld [vmem:[%s13387_s10 + $0x70] ss:$8 sps:$4 sm:$0xff]   ;;  %v9523_v5 = vld [vmem:[%s13387_s10 + $0x94] ss:$8 sps:$4 sm:$0xff]  }
 0x670   : > { %v4728_v39 = vmax.f32 %v12423_v32, %v4718_v12  ;;  %v9445_v52 = vld [vmem:[%s13387_s10 + $0x64] ss:$8 sps:$4 sm:$0xff]   ;;  %v9443_v32 = vld [vmem:[%s13387_s10 + $0x60] ss:$8 sps:$4 sm:$0xff]   ;;  %5597 = vmatpush2.bf16.msra.mxu1 %v9506_v45  ;;  %v9521_v61 = vld [vmem:[%s13387_s10 + $0x90] ss:$8 sps:$4 sm:$0xff]  }
 0x671   : > { %4782 = vmatprep.subr.bf16.mxu0 %v4748_v6  ;;  %v4745_v24 = vpack.c.bf16 %v4727_v58, %v4725_v43  ;;  %v9514_v62 = vld [vmem:[%s13387_s10 + $0x1a4] ss:$8 sps:$4 sm:$0xff]   ;;  %v9524_v59 = vld [vmem:[%s13387_s10 + $0x180] ss:$8 sps:$4 sm:$0xff]   ;;  %v9532_v20 = vld [vmem:[%s13387_s10 + $0x274] ss:$8 sps:$4 sm:$0xff]  }
 0x672   : > { %v4746_v2 = vpack.c.bf16 %v4728_v39, %v4726_v21  ;;  %5598 = vmatprep.subr.bf16.mxu1 %v9514_v62  ;;  %v9526_v37 = vld [vmem:[%s13387_s10 + $0x184] ss:$8 sps:$4 sm:$0xff]   ;;  %v9527_v47 = vld [vmem:[%s13387_s10 + $0x80] ss:$8 sps:$4 sm:$0xff]  }
 0x673   : > { %4783 = vmatpush1.bf16.msra.mxu0 %v4747_v63  ;;  %v9529_v36 = vld [vmem:[%s13387_s10 + $0x84] ss:$8 sps:$4 sm:$0xff]  }
 0x674   : > { %4784 = vmatprep.subr.bf16.mxu0 %v4746_v2  ;;  %5599 = vmatpush2.bf16.msra.mxu1 %v9512_v28 }
 0x675   : > { %5600 = vmatprep.subr.bf16.mxu1 %v9520_v55 }
 0x676   : > { %v4846_v18 = vpop.permute.xlu0 %4845 }
 0x677   : > { %4785 = vmatpush1.bf16.msra.mxu0 %v4745_v24 }
 0x678   : > { %5519 = vmatprep.subr.bf16.mxu0 %v9439_v35  ;;  %5601 = vmatpush2.bf16.msra.mxu1 %v9518_v42  ;;  %v4851_v4 = vpop.permute.xlu1 %4850 }
 0x679   : > { %5602 = vmatprep.subr.bf16.mxu1 %v9526_v37  ;;  %v9530_v37 = vld [vmem:[%s13387_s10 + $0x270] ss:$8 sps:$4 sm:$0xff]  }
 0x67a   : > { %8385 = vmatmul.mubr.msk.bf16.vlgmr.msra.gmra.mxu0 %vm4763_vm4, %v9432_v25  ;;  %v12566_v30 = vpop.permute.xlu0 %4855 }
 0x67b   : > { %4812 = vmatprep.mubr.bf16.mxu0 %v13376_v11  ;;  %5520 = vmatpush1.bf16.msra.mxu0 %v9437_v23 }
 0x67c   : > { %5521 = vmatprep.subr.bf16.mxu0 %v9445_v52  ;;  %5603 = vmatpush2.bf16.msra.mxu1 %v9524_v59  ;;  %v12568_v0 = vpop.permute.xlu1 %4860 }
 0x67e   : > { %v12581_v2 = vpop.permute.xlu0 %4893 }
 0x67f   : > { %5522 = vmatpush1.bf16.msra.mxu0 %v9443_v32 }
 0x680   : > { %5523 = vmatprep.subr.bf16.mxu0 %v9451_v34  ;;  %v12583_v24 = vpop.permute.xlu1 %4898 }
 0x682   : > { %8386 = vmatmul.mubr.msk.bf16.gmra.mxu0 %vm4763_vm4, %v9433_v49 }
 0x683   : > { %5524 = vmatpush1.bf16.msra.mxu0 %v9449_v50 }
 0x684   : > { %5525 = vmatprep.subr.bf16.mxu0 %v9457_v9 }
 0x687   : > { %5526 = vmatpush1.bf16.msra.mxu0 %v9455_v19 }
 0x688   : > { %5527 = vmatprep.subr.bf16.mxu0 %v9463_v17 }
 0x68b   : > { %5528 = vmatpush1.bf16.msra.mxu0 %v9461_v46 }
 0x68c   : > { %5529 = vmatprep.subr.bf16.mxu0 %v9469_v57 }
 0x68f   : > { %5530 = vmatpush1.bf16.msra.mxu0 %v9467_v48 }
 0x690   : > { %5531 = vmatprep.subr.bf16.mxu0 %v9475_v16 }
 0x693   : > { %5532 = vmatpush1.bf16.msra.mxu0 %v9473_v51 }
 0x694   : > { %5533 = vmatprep.subr.bf16.mxu0 %v9481_v7 }
 0x697   : > { %5534 = vmatpush1.bf16.msra.mxu0 %v9479_v14  ;;  %v12607_v14 = vpop.permute.xlu0 %4903 }
 0x698   : > { %5535 = vmatprep.subr.bf16.mxu0 %v9487_v38  ;;  %v12609_v38 = vpop.permute.xlu1 %4908 }
 0x69b   : > { %5536 = vmatpush2.bf16.msra.mxu0 %v9485_v10 }
 0x69c   : > { %5537 = vmatprep.subr.bf16.mxu0 %v9493_v27 }
 0x69f   : > { %5538 = vmatpush2.bf16.msra.mxu0 %v9491_v8 }
 0x6a0   : > { %5539 = vmatprep.subr.bf16.mxu0 %v9499_v3 }
 0x6a3   : > { %5540 = vmatpush2.bf16.msra.mxu0 %v9497_v29 }
 0x6a4   : > { %5541 = vmatprep.subr.bf16.mxu0 %v9505_v33 }
 0x6a7   : > { %5542 = vmatpush2.bf16.msra.mxu0 %v9503_v40 }
 0x6a8   : > { %5543 = vmatprep.subr.bf16.mxu0 %v9511_v13 }
 0x6ab   : > { %5544 = vmatpush2.bf16.msra.mxu0 %v9509_v31 }
 0x6ac   : > { %5545 = vmatprep.subr.bf16.mxu0 %v9517_v1 }
 0x6af   : > { %5546 = vmatpush2.bf16.msra.mxu0 %v9515_v53 }
 0x6b0   : > { %5547 = vmatprep.subr.bf16.mxu0 %v9523_v5 }
 0x6b3   : > { %5548 = vmatpush2.bf16.msra.mxu0 %v9521_v61 }
 0x6b4   : > { %5549 = vmatprep.subr.bf16.mxu0 %v9529_v36 }
 0x6b7   : > { %5550 = vmatpush2.bf16.msra.mxu0 %v9527_v47 }
 0x6b8   : > { %5625 = vmatprep.subr.bf16.mxu0 %v9532_v20  ;;  %v9535_v20 = vld [vmem:[%s13387_s10 + $0x264] ss:$8 sps:$4 sm:$0xff]  }
 0x73a   : > { %v4804_v41 = vpop.f32.mrf.mxu0 }
 0x73b   : > { %v4871_v12 = vrot.slane %v4804_v41, 1  ;;  %v4823_v46 = vrot.slane %v4804_v41, 7 }
 0x73c   : > { %v12564_v63 = vpop.f32.mrf.mxu0 }
 0x73d   : > { %v4824_v32 = vrot.slane %v12564_v63, 7 }
 0x73e   : > { %v12570_v22 = vpop.f32.mrf.mxu0 }
 0x73f   : > { %v4873_v43 = vrot.slane %v12570_v22, 1  ;;  %v4923_v35 = vpack.c.bf16 %v12570_v22, %v4804_v41  ;;  %v4825_v49 = vrot.slane %v12570_v22, 7  ;;  %v4872_v41 = vrot.slane %v12564_v63, 1 }
 0x740   : > { %v12573_v58 = vpop.f32.mrf.mxu0 }
 0x741   : > { %v4883_v6 = vsel %vm1139_vm0, %v4871_v12, %v4873_v43  ;;  %v4924_v21 = vpack.c.bf16 %v12573_v58, %v12564_v63  ;;  %v4826_v23 = vrot.slane %v12573_v58, 7  ;;  %v4835_v29 = vsel %vm994_vm1, %v4823_v46, %v4825_v49 }
 0x742   : > { %v12579_v39 = vpop.f32.mrf.mxu0  ;;  %v12595_v50 = vmul.f32 %v12581_v2, %v4883_v6  ;;  %v4865_v1 = vmul.f32 %v4851_v4, %v4835_v29  ;;  %v4874_v59 = vrot.slane %v12573_v58, 1  ;;  %v9538_v58 = vld [vmem:[%s13387_s10 + $0x254] ss:$8 sps:$4 sm:$0xff]   ;;  %v9560_v29 = vld [vmem:[%s13387_s10 + $0x2d0] ss:$8 sps:$4 sm:$0xff]  }
 0x743   : > { %v4875_v25 = vrot.slane %v12579_v39, 1  ;;  %5604 = vmatprep.mubr.bf16.mxu1 %v4924_v21  ;;  %v4836_v7 = vsel %vm994_vm1, %v4824_v32, %v4826_v23  ;;  %v4827_v61 = vrot.slane %v12579_v39, 7 }
 0x744   : > { %v12588_v52 = vpop.f32.mrf.mxu0  ;;  %5605 = vmatmul.mubr.bf16.vlgmr.msra.gmra.mxu1 %v4923_v35  ;;  %v4866_v62 = vmul.f32 %v4851_v4, %v4836_v7  ;;  %v4884_v21 = vsel %vm1139_vm0, %v4872_v41, %v4874_v59  ;;  %v9556_v7 = vld [vmem:[%s13387_s10 + $0x2f4] ss:$8 sps:$4 sm:$0xff]  }
 0x745   : > { %v4881_v34 = vsel %vm1139_vm0, %v4873_v43, %v4875_v25  ;;  %v4828_v19 = vrot.slane %v12588_v52, 7  ;;  %v4876_v42 = vrot.slane %v12588_v52, 1  ;;  %v4833_v43 = vsel %vm994_vm1, %v4825_v49, %v4827_v61  ;;  %v9542_v49 = vld [vmem:[%s13387_s10 + $0x230] ss:$8 sps:$4 sm:$0xff]  }
 0x746   : > { %v12598_v9 = vmul.f32 %v12583_v24, %v4881_v34  ;;  %v4818_v17 = vpop.f32.mrf.mxu0  ;;  %v4867_v35 = vmul.f32 %v12566_v30, %v4833_v43 }
 0x747   : > { %v4829_v57 = vrot.slane %v4818_v17, 7  ;;  %v4877_v48 = vrot.slane %v4818_v17, 1  ;;  %v4834_v40 = vsel %vm994_vm1, %v4826_v23, %v4828_v19  ;;  %v4925_v13 = vpack.c.bf16 %v4818_v17, %v12579_v39  ;;  %v9550_v17 = vld [vmem:[%s13387_s10 + $0x214] ss:$8 sps:$4 sm:$0xff]  }
 0x748   : > { %v4927_v16 = vpack.c.bf16 %v12598_v9, %v12595_v50  ;;  %v12603_v51 = vpop.f32.mrf.mxu0  ;;  %v4868_v36 = vmul.f32 %v12566_v30, %v4834_v40  ;;  %v4882_v22 = vsel %vm1139_vm0, %v4874_v59, %v4876_v42  ;;  %v4912_v23 = vmul.f32 %v12581_v2, %v4884_v21  ;;  %v9544_v30 = vld [vmem:[%s13387_s10 + $0x234] ss:$8 sps:$4 sm:$0xff]   ;;  %v9547_v2 = vld [vmem:[%s13387_s10 + $0x224] ss:$8 sps:$4 sm:$0xff]  }
 0x749   : > { %v4837_v10 = vsel %vm994_vm1, %v4829_v57, %v4823_v46  ;;  %v4879_v27 = vsel %vm1139_vm0, %v4875_v25, %v4877_v48  ;;  %v4885_v8 = vsel %vm1139_vm0, %v4877_v48, %v4871_v12  ;;  %v4830_v3 = vrot.slane %v12603_v51, 7  ;;  %v9533_v12 = vld [vmem:[%s13387_s10 + $0x260] ss:$8 sps:$4 sm:$0xff]   ;;  %v9536_v25 = vld [vmem:[%s13387_s10 + $0x250] ss:$8 sps:$4 sm:$0xff]  }
 0x74a   : > { %v12621_v15 = vmul.f32 %v12607_v14, %v4879_v27  ;;  %v12624_v60 = vmul.f32 %v12609_v38, %v4885_v8  ;;  %v4863_v33 = vmul.f32 %v4846_v18, %v4837_v10  ;;  %v4926_v45 = vpack.c.bf16 %v12603_v51, %v12588_v52  ;;  %v9548_v46 = vld [vmem:[%s13387_s10 + $0x210] ss:$8 sps:$4 sm:$0xff]   ;;  %v9551_v48 = vld [vmem:[%s13387_s10 + $0x200] ss:$8 sps:$4 sm:$0xff]   ;;  %v9559_v27 = vld [vmem:[%s13387_s10 + $0x2e4] ss:$8 sps:$4 sm:$0xff]  }
 0x74b   : > { %v4838_v44 = vsel %vm994_vm1, %v4830_v3, %v4824_v32  ;;  %v4832_v31 = vsel %vm994_vm1, %v4828_v19, %v4830_v3  ;;  %v4831_v4 = vsel %vm994_vm1, %v4827_v61, %v4829_v57  ;;  %v4914_v39 = vmul.f32 %v12583_v24, %v4882_v22  ;;  %v9539_v24 = vld [vmem:[%s13387_s10 + $0x240] ss:$8 sps:$4 sm:$0xff]   ;;  %v9553_v57 = vld [vmem:[%s13387_s10 + $0x204] ss:$8 sps:$4 sm:$0xff]   ;;  %v9554_v10 = vld [vmem:[%s13387_s10 + $0x2f0] ss:$8 sps:$4 sm:$0xff]  }
 0x74c   : > { %v4864_v28 = vmul.f32 %v4846_v18, %v4838_v44  ;;  %v4870_v53 = vmul.f32 %v12568_v0, %v4832_v31  ;;  %5614 = vmatprep.mubr.bf16.mxu1 %v4926_v45  ;;  %v4929_v55 = vpack.c.bf16 %v12624_v60, %v12621_v15  ;;  %v4919_v47 = vpack.c.bf16 %v4865_v1, %v4863_v33  ;;  %v9545_v19 = vld [vmem:[%s13387_s10 + $0x220] ss:$8 sps:$4 sm:$0xff]   ;;  %v9562_v3 = vld [vmem:[%s13387_s10 + $0x2d4] ss:$8 sps:$4 sm:$0xff]   ;;  %v9565_v40 = vld [vmem:[%s13387_s10 + $0x2c4] ss:$8 sps:$4 sm:$0xff]  }
 0x74d   : > { %5615 = vmatmul.mubr.bf16.gmra.mxu1 %v4925_v13  ;;  %v4869_v6 = vmul.f32 %v12568_v0, %v4831_v4  ;;  %v9541_v0 = vld [vmem:[%s13387_s10 + $0x244] ss:$8 sps:$4 sm:$0xff]   ;;  %v4928_v34 = vpack.c.bf16 %v4914_v39, %v4912_v23  ;;  %v9557_v8 = vld [vmem:[%s13387_s10 + $0x2e0] ss:$8 sps:$4 sm:$0xff]   ;;  %v9568_v45 = vld [vmem:[%s13387_s10 + $0x2b4] ss:$8 sps:$4 sm:$0xff]  }
 0x74e   : > { %v4920_v5 = vpack.c.bf16 %v4866_v62, %v4864_v28  ;;  %5790 = vmatprep.mubr.bf16.mxu1 %v13376_v11  ;;  %v4922_v18 = vpack.c.bf16 %v4870_v53, %v4868_v36  ;;  %v9563_v33 = vld [vmem:[%s13387_s10 + $0x2c0] ss:$8 sps:$4 sm:$0xff]   ;;  %v9566_v44 = vld [vmem:[%s13387_s10 + $0x2b0] ss:$8 sps:$4 sm:$0xff]   ;;  %v9571_v31 = vld [vmem:[%s13387_s10 + $0x2a4] ss:$8 sps:$4 sm:$0xff]  }
 0x74f   : > { %v4921_v32 = vpack.c.bf16 %v4869_v6, %v4867_v35  ;;  %v9569_v13 = vld [vmem:[%s13387_s10 + $0x2a0] ss:$8 sps:$4 sm:$0xff]   ;;  %v9574_v28 = vld [vmem:[%s13387_s10 + $0x294] ss:$8 sps:$4 sm:$0xff]   ;;  %v4878_v62 = vrot.slane %v12603_v51, 1 }
 0x750   : > { %5551 = vmatprep.mubr.bf16.mxu0 %v4920_v5  ;;  %v9572_v53 = vld [vmem:[%s13387_s10 + $0x290] ss:$8 sps:$4 sm:$0xff]   ;;  %v9577_v1 = vld [vmem:[%s13387_s10 + $0x284] ss:$8 sps:$4 sm:$0xff]   ;;  %v5027_v22 = vld [vmem:[%s13389_s1] sm:$0x3] }
 0x751   : > { %5552 = vmatmul.mubr.bf16.vlgmr.msra.gmra.mxu0 %v4919_v47  ;;  %v4880_v61 = vsel %vm1139_vm0, %v4876_v42, %v4878_v62  ;;  %v4886_v5 = vsel %vm1139_vm0, %v4878_v62, %v4872_v41  ;;  %v5032_v50 = vrot.slane %v5027_v22, %v13383_v26  ;;  %s13391_s1 = sld [smem:[#allocation18_spill]] }
 0x752   : > { %5626 = vmatpush1.bf16.msra.mxu0 %v9530_v37  ;;  %5561 = vmatprep.mubr.bf16.mxu0 %v4922_v18  ;;  %v9575_v37 = vld [vmem:[%s13387_s10 + $0x280] ss:$8 sps:$4 sm:$0xff]   ;;  %v4916_v36 = vmul.f32 %v12607_v14, %v4880_v61  ;;  %v4918_v51 = vmul.f32 %v12609_v38, %v4886_v5  ;;  %s9999_s10 = smov [#allocation2]  }
 0x753   : > { %5627 = vmatprep.subr.bf16.mxu0 %v9535_v20 }
 0x754   : > { %v4930_v59 = vpack.c.bf16 %v4918_v51, %v4916_v36 }
 0x756   : > { %5628 = vmatpush1.bf16.msra.mxu0 %v9533_v12 }
 0x757   : > { %5629 = vmatprep.subr.bf16.mxu0 %v9538_v58 }
 0x759   : > { %5562 = vmatmul.mubr.bf16.gmra.mxu0 %v4921_v32 }
 0x75a   : > { %5630 = vmatpush1.bf16.msra.mxu0 %v9536_v25  ;;  %5657 = vmatprep.mubr.bf16.mxu0 %v4928_v34 }
 0x75b   : > { %5631 = vmatprep.subr.bf16.mxu0 %v9541_v0 }
 0x75e   : > { %5632 = vmatpush1.bf16.msra.mxu0 %v9539_v24 }
 0x75f   : > { %5633 = vmatprep.subr.bf16.mxu0 %v9544_v30 }
 0x762   : > { %5634 = vmatpush1.bf16.msra.mxu0 %v9542_v49 }
 0x763   : > { %5635 = vmatprep.subr.bf16.mxu0 %v9547_v2 }
 0x766   : > { %5636 = vmatpush1.bf16.msra.mxu0 %v9545_v19 }
 0x767   : > { %5637 = vmatprep.subr.bf16.mxu0 %v9550_v17 }
 0x76a   : > { %5638 = vmatpush1.bf16.msra.mxu0 %v9548_v46 }
 0x76b   : > { %5639 = vmatprep.subr.bf16.mxu0 %v9553_v57 }
 0x76e   : > { %5640 = vmatpush1.bf16.msra.mxu0 %v9551_v48 }
 0x76f   : > { %5641 = vmatprep.subr.bf16.mxu0 %v9556_v7 }
 0x772   : > { %5642 = vmatpush2.bf16.msra.mxu0 %v9554_v10 }
 0x773   : > { %5643 = vmatprep.subr.bf16.mxu0 %v9559_v27 }
 0x776   : > { %5644 = vmatpush2.bf16.msra.mxu0 %v9557_v8 }
 0x777   : > { %5645 = vmatprep.subr.bf16.mxu0 %v9562_v3 }
 0x77a   : > { %5646 = vmatpush2.bf16.msra.mxu0 %v9560_v29 }
 0x77b   : > { %5647 = vmatprep.subr.bf16.mxu0 %v9565_v40 }
 0x77e   : > { %5648 = vmatpush2.bf16.msra.mxu0 %v9563_v33 }
 0x77f   : > { %5649 = vmatprep.subr.bf16.mxu0 %v9568_v45 }
 0x782   : > { %5650 = vmatpush2.bf16.msra.mxu0 %v9566_v44 }
 0x783   : > { %5651 = vmatprep.subr.bf16.mxu0 %v9571_v31 }
 0x786   : > { %5652 = vmatpush2.bf16.msra.mxu0 %v9569_v13 }
 0x787   : > { %5653 = vmatprep.subr.bf16.mxu0 %v9574_v28 }
 0x78a   : > { %5654 = vmatpush2.bf16.msra.mxu0 %v9572_v53 }
 0x78b   : > { %5655 = vmatprep.subr.bf16.mxu0 %v9577_v1 }
 0x78e   : > { %5656 = vmatpush2.bf16.msra.mxu0 %v9575_v37 }
 0x791   : > { %5658 = vmatmul.mubr.bf16.vlgmr.msra.gmra.mxu0 %v4927_v16  ;;  %v13390_v16 = vld [vmem:[#allocation27_spill] sm:$0xff] }
 0x792   : > { %5667 = vmatprep.mubr.bf16.mxu0 %v4930_v59  ;;  %v5036_v43 = vrot.slane %v5027_v22, %v13390_v16 }
 0x799   : > { %5668 = vmatmul.mubr.bf16.gmra.mxu0 %v4929_v55 }
 0x804   : > { %v5606_v20 = vpop.f32.mrf.mxu1 }
 0x806   : > { %v5608_v18 = vpop.f32.mrf.mxu1 }
 0x808   : > { %v5610_v4 = vpop.f32.mrf.mxu1 }
 0x80a   : > { %v5612_v12 = vpop.f32.mrf.mxu1 }
 0x80d   : > { %v5616_v58 = vpop.f32.mrf.mxu1 }
 0x80f   : > { %v5618_v25 = vpop.f32.mrf.mxu1 }
 0x811   : > { %v5553_v63 = vpop.f32.mrf.mxu0  ;;  %v5620_v2 = vpop.f32.mrf.mxu1 }
 0x812   : > { %v5554_v60 = vadd.f32 %v5553_v63, %v5032_v50 }
 0x813   : > { %v5555_v52 = vpop.f32.mrf.mxu0  ;;  %v5622_v44 = vpop.f32.mrf.mxu1 }
 0x814   : > { %v5556_v39 = vadd.f32 %v5555_v52, %v5036_v43  ;;  %v5607_v0 = vadd.f32 %v5606_v20, %v5554_v60 }
 0x815   : > { %v5557_v42 = vpop.f32.mrf.mxu0 }
 0x816   : > { %v5558_v6 = vadd.f32 %v5557_v42, %v5032_v50  ;;  %v5609_v17 = vadd.f32 %v5608_v18, %v5556_v39 }
 0x817   : > { %v5559_v47 = vpop.f32.mrf.mxu0 }
 0x818   : > { %v5560_v35 = vadd.f32 %v5559_v47, %v5036_v43  ;;  %v5611_v30 = vadd.f32 %v5610_v4, %v5558_v6 }
 0x819   : > { %v5563_v14 = vpop.f32.mrf.mxu0 }
 0x81a   : > { %v5564_v21 = vadd.f32 %v5563_v14, %v5032_v50  ;;  %v5613_v46 = vadd.f32 %v5612_v12, %v5560_v35 }
 0x81b   : > { %v5565_v38 = vpop.f32.mrf.mxu0 }
 0x81c   : > { %v5566_v32 = vadd.f32 %v5565_v38, %v5036_v43  ;;  %v5617_v49 = vadd.f32 %v5616_v58, %v5564_v21 }
 0x81d   : > { %v5567_v41 = vpop.f32.mrf.mxu0 }
 0x81e   : > { %v5568_v24 = vadd.f32 %v5567_v41, %v5032_v50  ;;  %v5619_v27 = vadd.f32 %v5618_v25, %v5566_v32 }
 0x81f   : > { %v5569_v9 = vpop.f32.mrf.mxu0 }
 0x820   : > { %v5570_v48 = vadd.f32 %v5569_v9, %v5036_v43  ;;  %v5621_v45 = vadd.f32 %v5620_v2, %v5568_v24  ;;  %v5809_v24 = vld [vmem:[%s13391_s1] sm:$0xff]  ;;  %v9581_v2 = vld [vmem:[%s13393_s5 + $0x178] sm:$0xff]  }
 0x821   : > { %8776 = vmatprep.subr.bf16.mxu0 %v9581_v2  ;;  %v9605_v2 = vld [vmem:[%s13393_s5 + $0x148] sm:$0xff]  }
 0x822   : > { %v5623_v1 = vadd.f32 %v5622_v44, %v5570_v48  ;;  %v9589_v48 = vld [vmem:[%s13393_s5 + $0x168] sm:$0xff]  }
 0x851   : > { %v5659_v15 = vpop.f32.mrf.mxu0 }
 0x852   : > { %v5660_v19 = vadd.f32 %v5659_v15, %v5607_v0 }
 0x853   : > { %v5661_v55 = vpop.f32.mrf.mxu0 }
 0x854   : > { %v5662_v8 = vadd.f32 %v5661_v55, %v5609_v17  ;;  %v5678_v31 = vmax.f32 %v5660_v19, 0.0  ;;  %v9582_v19 = vld [vmem:[%s13393_s5 + $0x138] sm:$0xff]   ;;  %v5834_v17 = vld [vmem:[%s13392_s3 + $0x8] sm:$0xff] }
 0x855   : > { %v5663_v23 = vpop.f32.mrf.mxu0  ;;  %8777 = vmatpush3.bf16.msra.mxu0 %v9582_v19  ;;  %v9607_v19 = vld [vmem:[%s13393_s5 + $0x40] sm:$0xff]  }
 0x856   : > { %v5664_v7 = vadd.f32 %v5663_v23, %v5611_v30  ;;  %v5679_v61 = vmax.f32 %v5662_v8, 0.0  ;;  %v5686_v63 = vrot.slane %v5678_v31, 1  ;;  %v5810_v30 = vld [vmem:[%s13391_s1 + $0x8] sm:$0xff]  ;;  %v9597_v8 = vld [vmem:[%s13393_s5 + $0x158] sm:$0xff]   ;;  %s13396_s1 = sld [smem:[#allocation17_spill]] }
 0x857   : > { %v5665_v34 = vpop.f32.mrf.mxu0 }
 0x858   : > { %v5666_v3 = vadd.f32 %v5665_v34, %v5613_v46  ;;  %v5680_v28 = vmax.f32 %v5664_v7, 0.0  ;;  %v5687_v14 = vrot.slane %v5679_v61, 1  ;;  %v9585_v46 = vld [vmem:[%s13393_s5 + $0x170] sm:$0xff]   ;;  %v9590_v7 = vld [vmem:[%s13393_s5 + $0x128] sm:$0xff]  }
 0x859   : > { %v5669_v57 = vpop.f32.mrf.mxu0  ;;  %8778 = vmatprep.subr.bf16.mxu0 %v9585_v46  ;;  %v9608_v46 = vld [vmem:[%s13393_s5] sm:$0xff]  }
 0x85a   : > { %v5670_v10 = vadd.f32 %v5669_v57, %v5617_v49  ;;  %v5681_v5 = vmax.f32 %v5666_v3, 0.0  ;;  %v5688_v52 = vrot.slane %v5680_v28, 1  ;;  %v5833_v49 = vld [vmem:[%s13392_s3] sm:$0xff]  ;;  %v9586_v57 = vld [vmem:[%s13393_s5 + $0x130] sm:$0xff]   ;;  %s13397_s3 = sld [smem:[#allocation20_spill]] }
 0x85b   : > { %v5671_v29 = vpop.f32.mrf.mxu0  ;;  %8779 = vmatpush3.bf16.msra.mxu0 %v9586_v57  ;;  %v9609_v57 = vld [vmem:[%s13393_s5 + $0x140] sm:$0xff]  }
 0x85c   : > { %v5682_v40 = vmax.f32 %v5670_v10, 0.0  ;;  %v5672_v33 = vadd.f32 %v5671_v29, %v5619_v27  ;;  %v5689_v18 = vrot.slane %v5681_v5, 1  ;;  %v5698_v9 = vsel %vm1139_vm0, %v5686_v63, %v5688_v52  ;;  %8780 = vmatprep.subr.bf16.mxu0 %v9589_v48  ;;  %v9593_v10 = vld [vmem:[%s13393_s5 + $0x160] sm:$0xff]  }
 0x85d   : > { %v5673_v13 = vpop.f32.mrf.mxu0  ;;  %v12739_v35 = vmax.f32 %v5678_v31, %v5698_v9  ;;  %v9594_v27 = vld [vmem:[%s13393_s5 + $0x120] sm:$0xff]  }
 0x85e   : > { %v5683_v62 = vmax.f32 %v5672_v33, 0.0  ;;  %v5674_v53 = vadd.f32 %v5673_v13, %v5621_v45  ;;  %v5690_v36 = vrot.slane %v5682_v40, 1  ;;  %v5699_v39 = vsel %vm1139_vm0, %v5687_v14, %v5689_v18  ;;  %v9610_v48 = vld [vmem:[%s13393_s5 + $0x100] sm:$0xff]  }
 0x85f   : > { %v5675_v37 = vpop.f32.mrf.mxu0  ;;  %v12745_v32 = vmax.f32 %v5679_v61, %v5699_v39  ;;  %8781 = vmatpush3.bf16.msra.mxu0 %v9590_v7  ;;  %v9592_v39 = vld [vmem:[%s13393_s5 + $0x20] sm:$0xff]   ;;  %v9611_v7 = vld [vmem:[%s13393_s5 + $0xf8] sm:$0xff]  }
 0x860   : > { %v5684_v51 = vmax.f32 %v5674_v53, 0.0  ;;  %v5676_v59 = vadd.f32 %v5675_v37, %v5623_v1  ;;  %v5691_v42 = vrot.slane %v5683_v62, 1  ;;  %v5696_v38 = vsel %vm1139_vm0, %v5688_v52, %v5690_v36  ;;  %8782 = vmatprep.subr.bf16.mxu0 %v9593_v10 }
 0x861   : > { %v12729_v60 = vmax.f32 %v5680_v28, %v5696_v38 }
 0x862   : > { %v5692_v47 = vrot.slane %v5684_v51, 1  ;;  %v5685_v20 = vmax.f32 %v5676_v59, 0.0  ;;  %v5697_v43 = vsel %vm1139_vm0, %v5689_v18, %v5691_v42 }
 0x863   : > { %v12741_v25 = vmax.f32 %v5681_v5, %v5697_v43  ;;  %v9053_v0 = vpack.i.bf16 %v12729_v60, %v12739_v35  ;;  %8783 = vmatpush3.bf16.msra.mxu0 %v9594_v27 }
 0x864   : > { %v5694_v4 = vsel %vm1139_vm0, %v5690_v36, %v5692_v47  ;;  %v5700_v41 = vsel %vm1139_vm0, %v5692_v47, %v5686_v63  ;;  %v5693_v22 = vrot.slane %v5685_v20, 1  ;;  %8784 = vmatprep.subr.bf16.mxu0 %v9597_v8 }
 0x865   : > { %v12717_v12 = vmax.f32 %v5682_v40, %v5694_v4  ;;  %v12719_v50 = vmax.f32 %v5684_v51, %v5700_v41  ;;  %v9063_v34 = vpack.i.bf16 %v12741_v25, %v12745_v32 }
 0x866   : > { %v5695_v58 = vsel %vm1139_vm0, %v5691_v42, %v5693_v22  ;;  %v5701_v15 = vsel %vm1139_vm0, %v5693_v22, %v5687_v14 }
 0x867   : > { %v9048_v55 = vpack.i.bf16 %v12719_v50, %v12717_v12  ;;  %v12733_v6 = vmax.f32 %v5683_v62, %v5695_v58  ;;  %v12735_v21 = vmax.f32 %v5685_v20, %v5701_v15  ;;  %v9580_v58 = vld [vmem:[%s13393_s5 + $0x38] sm:$0xff]   ;;  %v9583_v15 = vld [vmem:[%s13393_s5 + $0x70] sm:$0xff]  }
 0x869   : > { %v9058_v23 = vpack.i.bf16 %v12735_v21, %v12733_v6  ;;  %9049 = vrot.lane.b32.xlu0 %v9048_v55, %s9996_s6  ;;  %v9587_v55 = vld [vmem:[%s13393_s5 + $0x68] sm:$0xff]  }
 0x86b   : > { %9059 = vrot.lane.b32.xlu1 %v9058_v23, %s9996_s6  ;;  %v9598_v23 = vld [vmem:[%s13393_s5 + $0x118] sm:$0xff]  }
 0x86c   : > { %8785 = vmatpush3.bf16.msra.mxu0 %v9598_v23  ;;  %v9621_v23 = vld [vmem:[%s13393_s5 + $0xd0] sm:$0xff]  }
 0x86d   : > { %9054 = vrot.lane.b32.xlu0 %v9053_v0, %s9996_s6  ;;  %v9600_v0 = vld [vmem:[%s13393_s5 + $0x10] sm:$0xff]  }
 0x86f   : > { %9064 = vrot.lane.b32.xlu1 %v9063_v34, %s9996_s6  ;;  %s13394_s6 = sld [smem:[#allocation15_spill]]  ;;  %v9601_v34 = vld [vmem:[%s13393_s5 + $0x150] sm:$0xff]  }
 0x870   : > { %8786 = vmatprep.subr.bf16.mxu0 %v9601_v34  ;;  %v9624_v34 = vld [vmem:[%s13393_s5 + $0x88] sm:$0xff]  }
 0x871   : > { %5813 = vperm.xlu0 %8926, %v5809_v24   ;;  %v9602_v24 = vld [vmem:[%s13393_s5 + $0x110] sm:$0xff]  }
 0x872   : > { %8787 = vmatpush3.bf16.msra.mxu0 %v9602_v24  ;;  %v9625_v24 = vld [vmem:[%s13393_s5 + $0xc0] sm:$0xff]  }
 0x873   : > { %5818 = vperm.xlu1 %8927, %v5810_v30   ;;  %v9603_v30 = vld [vmem:[%s13393_s5 + $0x48] sm:$0xff]   ;;  %8788 = vmatprep.subr.bf16.mxu0 %v9605_v2  ;;  %v9997_v2 = vmov 0.0  }
 0x875   : > { %5837 = vperm.xlu0 %8926, %v5833_v49   ;;  %v9578_v43 = vld [vmem:[%s13394_s6] sm:$0xff]   ;;  %v9604_v49 = vld [vmem:[%s13393_s5 + $0x8] sm:$0xff]   ;;  %s13395_s6 = sld [smem:[#allocation21_spill]] }
 0x877   : > { %5842 = vperm.xlu1 %8927, %v5834_v17   ;;  %v9606_v17 = vld [vmem:[%s13393_s5 + $0x108] sm:$0xff]  }
 0x878   : > { %8789 = vmatpush3.bf16.msra.mxu0 %v9606_v17 }
 0x879   : > { %8790 = vmatprep.subr.bf16.mxu0 %v9609_v57 }
 0x87b   : > { %v9632_v17 = vld [vmem:[%s13395_s6 + $0xec] ss:$16 sps:$4 sm:$0xff]   ;;  %v9636_v57 = vld [vmem:[%s13395_s6 + $0xc8] ss:$16 sps:$4 sm:$0xff]  }
 0x87c   : > { %8791 = vmatpush3.bf16.msra.mxu0 %v9610_v48  ;;  %v9644_v48 = vld [vmem:[%s13395_s6 + $0xac] ss:$16 sps:$4 sm:$0xff]  }
 0x87d   : > { %6673 = vmatprep.subr.bf16.mxu0 %v9632_v17 }
 0x8db   : > { %v9050_v3 = vpop.permute.xlu0 %9049 }
 0x8dc   : > { %v9052_v40 = vunpack.i.h.bf16 %v9050_v3  ;;  %v9051_v33 = vunpack.i.l.bf16 %v9050_v3 }
 0x8dd   : > { %v9060_v29 = vpop.permute.xlu1 %9059 }
 0x8de   : > { %v9062_v45 = vunpack.i.h.bf16 %v9060_v29  ;;  %v9061_v44 = vunpack.i.l.bf16 %v9060_v29 }
 0x8df   : > { %v9055_v31 = vpop.permute.xlu0 %9054 }
 0x8e0   : > { %v5729_v13 = vsel %vm5726_vm5, %v9051_v33, %v9061_v44  ;;  %v5730_v28 = vsel %vm5726_vm5, %v9052_v40, %v9062_v45  ;;  %v5733_v62 = vsel %vm5726_vm5, %v9061_v44, %v9051_v33  ;;  %v5734_v53 = vsel %vm5726_vm5, %v9062_v45, %v9052_v40 }
 0x8e1   : > { %v5739_v1 = vmax.f32 %v12717_v12, %v5729_v13  ;;  %v5741_v61 = vmax.f32 %v12719_v50, %v5730_v28  ;;  %v9057_v5 = vunpack.i.h.bf16 %v9055_v31  ;;  %v9056_v37 = vunpack.i.l.bf16 %v9055_v31  ;;  %v9065_v36 = vpop.permute.xlu1 %9064 }
 0x8e2   : > { %v9067_v51 = vunpack.i.h.bf16 %v9065_v36  ;;  %v9066_v59 = vunpack.i.l.bf16 %v9065_v36  ;;  %v5740_v63 = vmax.f32 %v12733_v6, %v5733_v62  ;;  %v5742_v52 = vmax.f32 %v12735_v21, %v5734_v53  ;;  %v9588_v6 = vld [vmem:[%s13393_s5 + $0x28] sm:$0xff]   ;;  %v9591_v21 = vld [vmem:[%s13393_s5 + $0x60] sm:$0xff]  }
 0x8e3   : > { %v5747_v42 = vpack.c.bf16 %v5741_v61, %v5739_v1 }
 0x8e4   : > { %v5727_v47 = vsel %vm5726_vm5, %v9056_v37, %v9066_v59  ;;  %v5728_v20 = vsel %vm5726_vm5, %v9057_v5, %v9067_v51  ;;  %v5731_v14 = vsel %vm5726_vm5, %v9066_v59, %v9056_v37  ;;  %v5732_v18 = vsel %vm5726_vm5, %v9067_v51, %v9057_v5 }
 0x8e5   : > { %v5735_v38 = vmax.f32 %v12739_v35, %v5727_v47  ;;  %v5737_v4 = vmax.f32 %v12729_v60, %v5728_v20  ;;  %v5748_v41 = vpack.c.bf16 %v5742_v52, %v5740_v63  ;;  %v5736_v22 = vmax.f32 %v12745_v32, %v5731_v14  ;;  %v9584_v60 = vld [vmem:[%s13393_s5 + $0x30] sm:$0xff]   ;;  %v9595_v35 = vld [vmem:[%s13393_s5 + $0x58] sm:$0xff]  }
 0x8e6   : > { %v5738_v12 = vmax.f32 %v12741_v25, %v5732_v18  ;;  %v9596_v25 = vld [vmem:[%s13393_s5 + $0x18] sm:$0xff]   ;;  %v9599_v32 = vld [vmem:[%s13393_s5 + $0x50] sm:$0xff]  }
 0x8e7   : > { %5770 = vmatprep.subr.bf16.mxu1 %v5748_v41  ;;  %v5745_v9 = vpack.c.bf16 %v5737_v4, %v5735_v38 }
 0x8e8   : > { %5771 = vmatpush1.bf16.msra.mxu1 %v5747_v42  ;;  %v5746_v50 = vpack.c.bf16 %v5738_v12, %v5736_v22 }
 0x8ea   : > { %5772 = vmatprep.subr.bf16.mxu1 %v5746_v50 }
 0x8ec   : > { %5773 = vmatpush1.bf16.msra.mxu1 %v5745_v9  ;;  %v5814_v8 = vpop.permute.xlu0 %5813  ;;  %v9612_v9 = vld [vmem:[%s13393_s5 + $0xb8] sm:$0xff]  }
 0x8ed   : > { %8732 = vmatprep.subr.bf16.mxu1 %v9579_v56 }
 0x8ee   : > { %v5819_v3 = vpop.permute.xlu1 %5818 }
 0x8ef   : > { %8484 = vmatmul.mubr.msk.bf16.vlgmr.msra.gmra.mxu1 %vm5754_vm6, %v9578_v43 }
 0x8f0   : > { %8733 = vmatpush3.bf16.msra.mxu1 %v9580_v58  ;;  %v5838_v1 = vpop.permute.xlu0 %5837  ;;  %v9613_v58 = vld [vmem:[%s13393_s5 + $0xf0] sm:$0xff]  }
 0x8f1   : > { %8734 = vmatprep.subr.bf16.mxu1 %v9583_v15 }
 0x8f2   : > { %v5843_v61 = vpop.permute.xlu1 %5842 }
 0x8f4   : > { %8735 = vmatpush3.bf16.msra.mxu1 %v9584_v60  ;;  %v9614_v60 = vld [vmem:[%s13393_s5 + $0xb0] sm:$0xff]  }
 0x8f5   : > { %8736 = vmatprep.subr.bf16.mxu1 %v9587_v55  ;;  %v9615_v55 = vld [vmem:[%s13393_s5 + $0xe8] sm:$0xff]  }
 0x8f8   : > { %8737 = vmatpush3.bf16.msra.mxu1 %v9588_v6  ;;  %v9616_v6 = vld [vmem:[%s13393_s5 + $0xa8] sm:$0xff]  }
 0x8f9   : > { %8738 = vmatprep.subr.bf16.mxu1 %v9591_v21  ;;  %v9617_v21 = vld [vmem:[%s13393_s5 + $0xe0] sm:$0xff]  }
 0x8fc   : > { %8739 = vmatpush3.bf16.msra.mxu1 %v9592_v39  ;;  %v9618_v39 = vld [vmem:[%s13393_s5 + $0xa0] sm:$0xff]  }
 0x8fd   : > { %8740 = vmatprep.subr.bf16.mxu1 %v9595_v35  ;;  %v9619_v35 = vld [vmem:[%s13393_s5 + $0xd8] sm:$0xff]  }
 0x900   : > { %8741 = vmatpush3.bf16.msra.mxu1 %v9596_v25  ;;  %v9620_v25 = vld [vmem:[%s13393_s5 + $0x98] sm:$0xff]  }
 0x901   : > { %8742 = vmatprep.subr.bf16.mxu1 %v9599_v32  ;;  %v9622_v32 = vld [vmem:[%s13393_s5 + $0x90] sm:$0xff]  }
 0x904   : > { %8743 = vmatpush3.bf16.msra.mxu1 %v9600_v0  ;;  %v9623_v0 = vld [vmem:[%s13393_s5 + $0xc8] sm:$0xff]  }
 0x905   : > { %8744 = vmatprep.subr.bf16.mxu1 %v9603_v30  ;;  %v9626_v30 = vld [vmem:[%s13393_s5 + $0x80] sm:$0xff]  }
 0x908   : > { %8745 = vmatpush3.bf16.msra.mxu1 %v9604_v49 }
 0x909   : > { %8746 = vmatprep.subr.bf16.mxu1 %v9607_v19  ;;  %v9630_v19 = vld [vmem:[%s13395_s6 + $0xe8] ss:$16 sps:$4 sm:$0xff]  }
 0x90c   : > { %8747 = vmatpush3.bf16.msra.mxu1 %v9608_v46  ;;  %v9638_v46 = vld [vmem:[%s13395_s6 + $0xcc] ss:$16 sps:$4 sm:$0xff]  }
 0x90d   : > { %8754 = vmatprep.subr.bf16.mxu1 %v9611_v7  ;;  %v9642_v7 = vld [vmem:[%s13395_s6 + $0xa8] ss:$16 sps:$4 sm:$0xff]  }
 0x9af   : > { %v12814_v10 = vpop.f32.mrf.mxu1 }
 0x9b0   : > { %v5801_v40 = vrot.slane %v12814_v10, 7  ;;  %v5825_v33 = vrot.slane %v12814_v10, 1 }
 0x9b1   : > { %v5794_v27 = vpop.f32.mrf.mxu1 }
 0x9b2   : > { %v5802_v5 = vrot.slane %v5794_v27, 7  ;;  %v5826_v37 = vrot.slane %v5794_v27, 1 }
 0x9b3   : > { %v12816_v29 = vpop.f32.mrf.mxu1 }
 0x9b4   : > { %v5803_v45 = vrot.slane %v12816_v29, 7  ;;  %v5827_v44 = vrot.slane %v12816_v29, 1  ;;  %v5851_v49 = vpack.c.bf16 %v12816_v29, %v12814_v10  ;;  %v9650_v10 = vld [vmem:[%s13395_s6 + $0x8c] ss:$16 sps:$4 sm:$0xff]  }
 0x9b5   : > { %v5798_v31 = vpop.f32.mrf.mxu1  ;;  %v9662_v29 = vld [vmem:[%s13395_s6 + $0x4c] ss:$16 sps:$4 sm:$0xff]  }
 0x9b6   : > { %v5805_v13 = vsel %vm994_vm1, %v5801_v40, %v5803_v45  ;;  %v5807_v28 = vsel %vm994_vm1, %v5803_v45, %v5801_v40  ;;  %v5829_v62 = vsel %vm1139_vm0, %v5825_v33, %v5827_v44  ;;  %v5831_v53 = vsel %vm1139_vm0, %v5827_v44, %v5825_v33  ;;  %v9660_v40 = vld [vmem:[%s13395_s6 + $0x48] ss:$16 sps:$4 sm:$0xff]   ;;  %v9668_v33 = vld [vmem:[%s13395_s6 + $0x2c] ss:$16 sps:$4 sm:$0xff]  }
 0x9b7   : > { %v5804_v36 = vrot.slane %v5798_v31, 7  ;;  %v5828_v51 = vrot.slane %v5798_v31, 1  ;;  %v5821_v59 = vmul.f32 %v5814_v8, %v5807_v28  ;;  %v5823_v63 = vmul.f32 %v5819_v3, %v5805_v13  ;;  %v9666_v45 = vld [vmem:[%s13395_s6 + $0x28] ss:$16 sps:$4 sm:$0xff]   ;;  %v9674_v44 = vld [vmem:[%s13395_s6 + $0xc] ss:$16 sps:$4 sm:$0xff]  }
 0x9b8   : > { %v5845_v52 = vmul.f32 %v5838_v1, %v5829_v62  ;;  %v5847_v42 = vmul.f32 %v5843_v61, %v5831_v53  ;;  %v5852_v15 = vpack.c.bf16 %v5798_v31, %v5794_v27  ;;  %v9648_v27 = vld [vmem:[%s13395_s6 + $0x88] ss:$16 sps:$4 sm:$0xff]  }
 0x9b9   : > { %v5806_v47 = vsel %vm994_vm1, %v5802_v5, %v5804_v36  ;;  %v5808_v20 = vsel %vm994_vm1, %v5804_v36, %v5802_v5  ;;  %v5830_v14 = vsel %vm1139_vm0, %v5826_v37, %v5828_v51  ;;  %v5832_v18 = vsel %vm1139_vm0, %v5828_v51, %v5826_v37  ;;  %v9672_v31 = vld [vmem:[%s13395_s6 + $0x8] ss:$16 sps:$4 sm:$0xff]   ;;  %v8485_v37 = vld [vmem:[%s13396_s1] ss:$0 sm:$0xff]  ;;  %s13399_s1 = sld [smem:[#allocation22_spill]] }
 0x9ba   : > { %v5822_v38 = vmul.f32 %v5814_v8, %v5808_v20  ;;  %v5824_v4 = vmul.f32 %v5819_v3, %v5806_v47  ;;  %v5846_v41 = vmul.f32 %v5838_v1, %v5830_v14  ;;  %v5848_v22 = vmul.f32 %v5843_v61, %v5832_v18  ;;  %v9656_v8 = vld [vmem:[%s13395_s6 + $0x6c] ss:$16 sps:$4 sm:$0xff]   ;;  %v9654_v3 = vld [vmem:[%s13395_s6 + $0x68] ss:$16 sps:$4 sm:$0xff]  }
 0x9bb   : > { %v5849_v56 = vpack.c.bf16 %v5823_v63, %v5821_v59  ;;  %v5853_v43 = vpack.c.bf16 %v5847_v42, %v5845_v52 }
 0x9bc   : > { %v5850_v12 = vpack.c.bf16 %v5824_v4, %v5822_v38  ;;  %v5854_v50 = vpack.c.bf16 %v5848_v22, %v5846_v41 }
 0x9be   : > { %6278 = vmatprep.mubr.bf16.mxu1 %v5850_v12  ;;  %6360 = vmatprep.mubr.bf16.mxu0 %v5854_v50 }
 0x9bf   : > { %6279 = vmatmul.mubr.bf16.vlgmr.msra.gmra.mxu1 %v5849_v56  ;;  %6361 = vmatmul.mubr.bf16.vlgmr.msra.gmra.mxu0 %v5853_v43 }
 0x9c0   : > { %8755 = vmatpush3.bf16.msra.mxu1 %v9612_v9  ;;  %6319 = vmatprep.mubr.bf16.mxu1 %v5852_v15 }
 0x9c1   : > { %8756 = vmatprep.subr.bf16.mxu1 %v9613_v58  ;;  %6705 = vmatprep.mubr.bf16.mxu0 %v13376_v11  ;;  %v9629_v58 = vld [vmem:[%s13395_s6 + $0xe4] ss:$16 sps:$4 sm:$0xff]  }
 0x9c2   : > { %6674 = vmatpush1.bf16.msra.mxu0 %v9630_v19 }
 0x9c3   : > { %6675 = vmatprep.subr.bf16.mxu0 %v9638_v46 }
 0x9c4   : > { %8757 = vmatpush3.bf16.msra.mxu1 %v9614_v60  ;;  %v6371_v60 = vld [vmem:[%s13397_s3] sm:$0xf]  ;;  %s13398_s3 = sld [smem:[#allocation23_spill]] }
 0x9c5   : > { %8758 = vmatprep.subr.bf16.mxu1 %v9615_v55  ;;  %v9627_v55 = vld [vmem:[%s13395_s6 + $0xe0] ss:$16 sps:$4 sm:$0xff]  }
 0x9c6   : > { %6676 = vmatpush1.bf16.msra.mxu0 %v9636_v57 }
 0x9c7   : > { %6677 = vmatprep.subr.bf16.mxu0 %v9644_v48 }
 0x9c8   : > { %8759 = vmatpush3.bf16.msra.mxu1 %v9616_v6  ;;  %v9635_v6 = vld [vmem:[%s13395_s6 + $0xc4] ss:$16 sps:$4 sm:$0xff]  }
 0x9c9   : > { %8760 = vmatprep.subr.bf16.mxu1 %v9617_v21  ;;  %v9633_v21 = vld [vmem:[%s13395_s6 + $0xc0] ss:$16 sps:$4 sm:$0xff]  }
 0x9ca   : > { %6678 = vmatpush1.bf16.msra.mxu0 %v9642_v7  ;;  %v9677_v19 = vld [vmem:[%s13398_s3 + $0xe4] ss:$16 sps:$4 sm:$0xff]   ;;  %v9675_v57 = vld [vmem:[%s13398_s3 + $0xe0] ss:$16 sps:$4 sm:$0xff]  }
 0x9cb   : > { %6679 = vmatprep.subr.bf16.mxu0 %v9650_v10  ;;  %v9680_v17 = vld [vmem:[%s13398_s3 + $0x2e4] ss:$16 sps:$4 sm:$0xff]   ;;  %v9678_v48 = vld [vmem:[%s13398_s3 + $0x2e0] ss:$16 sps:$4 sm:$0xff]  }
 0x9cc   : > { %8761 = vmatpush3.bf16.msra.mxu1 %v9618_v39  ;;  %v9641_v39 = vld [vmem:[%s13395_s6 + $0xa4] ss:$16 sps:$4 sm:$0xff]  }
 0x9cd   : > { %8762 = vmatprep.subr.bf16.mxu1 %v9619_v35  ;;  %v9639_v35 = vld [vmem:[%s13395_s6 + $0xa0] ss:$16 sps:$4 sm:$0xff]   ;;  %v9683_v10 = vld [vmem:[%s13398_s3 + $0xc4] ss:$16 sps:$4 sm:$0xff]  }
 0x9ce   : > { %6680 = vmatpush1.bf16.msra.mxu0 %v9648_v27  ;;  %v9686_v27 = vld [vmem:[%s13398_s3 + $0x2c4] ss:$16 sps:$4 sm:$0xff]  }
 0x9cf   : > { %6681 = vmatprep.subr.bf16.mxu0 %v9656_v8 }
 0x9d0   : > { %8763 = vmatpush3.bf16.msra.mxu1 %v9620_v25  ;;  %v9647_v25 = vld [vmem:[%s13395_s6 + $0x84] ss:$16 sps:$4 sm:$0xff]  }
 0x9d1   : > { %8764 = vmatprep.subr.bf16.mxu1 %v9621_v23  ;;  %v9645_v23 = vld [vmem:[%s13395_s6 + $0x80] ss:$16 sps:$4 sm:$0xff]  }
 0x9d2   : > { %6682 = vmatpush1.bf16.msra.mxu0 %v9654_v3 }
 0x9d3   : > { %6683 = vmatprep.subr.bf16.mxu0 %v9662_v29  ;;  %v9681_v29 = vld [vmem:[%s13398_s3 + $0xc0] ss:$16 sps:$4 sm:$0xff]  }
 0x9d4   : > { %8765 = vmatpush3.bf16.msra.mxu1 %v9622_v32  ;;  %v9653_v32 = vld [vmem:[%s13395_s6 + $0x64] ss:$16 sps:$4 sm:$0xff]  }
 0x9d5   : > { %8766 = vmatprep.subr.bf16.mxu1 %v9623_v0  ;;  %v9651_v0 = vld [vmem:[%s13395_s6 + $0x60] ss:$16 sps:$4 sm:$0xff]  }
 0x9d6   : > { %6684 = vmatpush1.bf16.msra.mxu0 %v9660_v40  ;;  %v9684_v40 = vld [vmem:[%s13398_s3 + $0x2c0] ss:$16 sps:$4 sm:$0xff]  }
 0x9d7   : > { %6685 = vmatprep.subr.bf16.mxu0 %v9668_v33  ;;  %v9689_v33 = vld [vmem:[%s13398_s3 + $0xa4] ss:$16 sps:$4 sm:$0xff]  }
 0x9d8   : > { %8767 = vmatpush3.bf16.msra.mxu1 %v9624_v34  ;;  %v9657_v34 = vld [vmem:[%s13395_s6 + $0x40] ss:$16 sps:$4 sm:$0xff]  }
 0x9d9   : > { %8768 = vmatprep.subr.bf16.mxu1 %v9625_v24  ;;  %v9665_v24 = vld [vmem:[%s13395_s6 + $0x24] ss:$16 sps:$4 sm:$0xff]  }
 0x9da   : > { %6686 = vmatpush1.bf16.msra.mxu0 %v9666_v45  ;;  %v9692_v45 = vld [vmem:[%s13398_s3 + $0x2a4] ss:$16 sps:$4 sm:$0xff]  }
 0x9db   : > { %6687 = vmatprep.subr.bf16.mxu0 %v9674_v44 }
 0x9dc   : > { %8769 = vmatpush3.bf16.msra.mxu1 %v9626_v30  ;;  %v9663_v30 = vld [vmem:[%s13395_s6 + $0x20] ss:$16 sps:$4 sm:$0xff]  }
 0x9dd   : > { %8844 = vmatprep.subr.bf16.mxu1 %v9997_v2 }
 0x9de   : > { %6688 = vmatpush1.bf16.msra.mxu0 %v9672_v31  ;;  %v9687_v31 = vld [vmem:[%s13398_s3 + $0xa0] ss:$16 sps:$4 sm:$0xff]  }
 0x9df   : > { %6320 = vmatmul.mubr.bf16.vlgmr.msra.gmra.mxu1 %v5851_v49  ;;  %v9671_v49 = vld [vmem:[%s13395_s6 + $0x4] ss:$16 sps:$4 sm:$0xff]   ;;  %7553 = vmatprep.subr.bf16.mxu0 %v9680_v17 }
 0x9e0   : > { %8846 = vmatprep.mubr.msk.bf16.mxu1 %vm9998_vm7, %v9997_v2  ;;  %v9669_v2 = vld [vmem:[%s13395_s6] ss:$16 sps:$4 sm:$0xff]   ;;  %v9761_v17 = vld [vmem:[%s13398_s3 + $0x124] ss:$16 sps:$4 sm:$0xff]  }
 0xa7f   : > { %v8748_v13 = vpop.f32.mrf.mxu1  ;;  %v8792_v62 = vpop.f32.mrf.mxu0 }
 0xa81   : > { %v8749_v28 = vpop.f32.mrf.mxu1  ;;  %v8793_v1 = vpop.f32.mrf.mxu0 }
 0xa82   : > { %v8750_v5 = vadd.f32 %v8749_v28, %v8748_v13  ;;  %v8794_v38 = vadd.f32 %v8793_v1, %v8792_v62  ;;  %v9690_v13 = vld [vmem:[%s13398_s3 + $0x2a0] ss:$16 sps:$4 sm:$0xff]   ;;  %v9695_v28 = vld [vmem:[%s13398_s3 + $0x84] ss:$16 sps:$4 sm:$0xff]  }
 0xa83   : > { %v8751_v53 = vpop.f32.mrf.mxu1  ;;  %v8795_v51 = vpop.f32.mrf.mxu0  ;;  %v9698_v62 = vld [vmem:[%s13398_s3 + $0x284] ss:$16 sps:$4 sm:$0xff]   ;;  %v9696_v1 = vld [vmem:[%s13398_s3 + $0x280] ss:$16 sps:$4 sm:$0xff]  }
 0xa84   : > { %v6281_v63 = vadd.f32 %v8750_v5, %v8485_v37  ;;  %v9704_v5 = vld [vmem:[%s13398_s3 + $0x264] ss:$16 sps:$4 sm:$0xff]  }
 0xa85   : > { %v8752_v61 = vpop.f32.mrf.mxu1  ;;  %v8796_v14 = vpop.f32.mrf.mxu0 }
 0xa86   : > { %v8753_v52 = vadd.f32 %v8752_v61, %v8751_v53  ;;  %v8797_v22 = vadd.f32 %v8796_v14, %v8795_v51  ;;  %v9693_v53 = vld [vmem:[%s13398_s3 + $0x80] ss:$16 sps:$4 sm:$0xff]   ;;  %v9701_v61 = vld [vmem:[%s13398_s3 + $0x64] ss:$16 sps:$4 sm:$0xff]  }
 0xa87   : > { %v9707_v51 = vld [vmem:[%s13398_s3 + $0x44] ss:$16 sps:$4 sm:$0xff]   ;;  %v9714_v14 = vld [vmem:[%s13398_s3 + $0x220] ss:$16 sps:$4 sm:$0xff]  }
 0xa88   : > { %v6284_v4 = vadd.f32 %v8753_v52, %v8485_v37  ;;  %v9699_v37 = vld [vmem:[%s13398_s3 + $0x60] ss:$16 sps:$4 sm:$0xff]  }
 0xa89   : > { %v9708_v52 = vld [vmem:[%s13398_s3 + $0x240] ss:$16 sps:$4 sm:$0xff]  }
 0xa9f   : > { %v8770_v36 = vpop.f32.mrf.mxu1 }
 0xaa1   : > { %v8771_v59 = vpop.f32.mrf.mxu1 }
 0xaa2   : > { %v8772_v42 = vadd.f32 %v8771_v59, %v8770_v36  ;;  %v9702_v36 = vld [vmem:[%s13398_s3 + $0x260] ss:$16 sps:$4 sm:$0xff]   ;;  %v9710_v59 = vld [vmem:[%s13398_s3 + $0x244] ss:$16 sps:$4 sm:$0xff]  }
 0xaa3   : > { %v8773_v47 = vpop.f32.mrf.mxu1 }
 0xaa4   : > { %v6322_v20 = vadd.f32 %v8772_v42, %v6281_v63  ;;  %v9705_v63 = vld [vmem:[%s13398_s3 + $0x40] ss:$16 sps:$4 sm:$0xff]   ;;  %v9713_v42 = vld [vmem:[%s13398_s3 + $0x24] ss:$16 sps:$4 sm:$0xff]  }
 0xaa5   : > { %v8774_v18 = vpop.f32.mrf.mxu1 }
 0xaa6   : > { %v8775_v41 = vadd.f32 %v8774_v18, %v8773_v47  ;;  %v6363_v12 = vadd.f32 %v8794_v38, %v6322_v20  ;;  %v9716_v47 = vld [vmem:[%s13398_s3 + $0x224] ss:$16 sps:$4 sm:$0xff]   ;;  %v9711_v20 = vld [vmem:[%s13398_s3 + $0x20] ss:$16 sps:$4 sm:$0xff]  }
 0xaa7   : > { %v9719_v18 = vld [vmem:[%s13398_s3 + $0x4] ss:$16 sps:$4 sm:$0xff]  }
 0xaa8   : > { %v6325_v50 = vadd.f32 %v8775_v41, %v6284_v4  ;;  %v6369_v56 = vmax.f32 %v6363_v12, 0.0  ;;  %v9722_v38 = vld [vmem:[%s13398_s3 + $0x204] ss:$16 sps:$4 sm:$0xff]   ;;  %v9717_v4 = vld [vmem:[%s13398_s3] ss:$16 sps:$4 sm:$0xff]  }
 0xaa9   : > { %v9720_v41 = vld [vmem:[%s13398_s3 + $0x200] ss:$16 sps:$4 sm:$0xff]   ;;  %v9728_v12 = vld [vmem:[%s13398_s3 + $0x3e4] ss:$16 sps:$4 sm:$0xff]  }
 0xaaa   : > { %v6366_v9 = vadd.f32 %v8797_v22, %v6325_v50  ;;  %v9725_v22 = vld [vmem:[%s13398_s3 + $0x1e4] ss:$16 sps:$4 sm:$0xff]   ;;  %v9723_v50 = vld [vmem:[%s13398_s3 + $0x1e0] ss:$16 sps:$4 sm:$0xff]  }
 0xaac   : > { %v6370_v43 = vmax.f32 %v6366_v9, 0.0  ;;  %v9726_v9 = vld [vmem:[%s13398_s3 + $0x3e0] ss:$16 sps:$4 sm:$0xff]  }
 0xaae   : > { %v6372_v15 = vpack.c.bf16 %v6370_v43, %v6369_v56  ;;  %v9731_v56 = vld [vmem:[%s13398_s3 + $0x1c4] ss:$16 sps:$4 sm:$0xff]  }
 0xaaf   : > { %v9734_v43 = vld [vmem:[%s13398_s3 + $0x3c4] ss:$16 sps:$4 sm:$0xff]  }
 0xab0   : > { %8845 = vmatpush3.bf16.msra.mxu1 %v6372_v15  ;;  %v9732_v15 = vld [vmem:[%s13398_s3 + $0x3c0] ss:$16 sps:$4 sm:$0xff]  }
 0xab1   : > { %6632 = vmatprep.subr.bf16.mxu1 %v9629_v58  ;;  %v9729_v58 = vld [vmem:[%s13398_s3 + $0x1c0] ss:$16 sps:$4 sm:$0xff]  }
 0xab3   : > { %8847 = vmatmul.mubr.msk.bf16.vlgmr.msra.gmra.mxu1 %vm6373_vm8, %v6371_v60  ;;  %v9737_v60 = vld [vmem:[%s13398_s3 + $0x1a4] ss:$16 sps:$4 sm:$0xff]  }
 0xab4   : > { %6633 = vmatpush1.bf16.msra.mxu1 %v9627_v55  ;;  %6664 = vmatprep.mubr.bf16.mxu1 %v13376_v11  ;;  %v9659_v11 = vld [vmem:[%s13395_s6 + $0x44] ss:$16 sps:$4 sm:$0xff]  }
 0xab5   : > { %6634 = vmatprep.subr.bf16.mxu1 %v9635_v6  ;;  %v9740_v55 = vld [vmem:[%s13398_s3 + $0x3a4] ss:$16 sps:$4 sm:$0xff]   ;;  %v9735_v6 = vld [vmem:[%s13398_s3 + $0x1a0] ss:$16 sps:$4 sm:$0xff]  }
 0xab8   : > { %6635 = vmatpush1.bf16.msra.mxu1 %v9633_v21  ;;  %v9738_v21 = vld [vmem:[%s13398_s3 + $0x3a0] ss:$16 sps:$4 sm:$0xff]  }
 0xab9   : > { %6636 = vmatprep.subr.bf16.mxu1 %v9641_v39  ;;  %v9743_v39 = vld [vmem:[%s13398_s3 + $0x184] ss:$16 sps:$4 sm:$0xff]  }
 0xabc   : > { %6637 = vmatpush1.bf16.msra.mxu1 %v9639_v35  ;;  %v9746_v35 = vld [vmem:[%s13398_s3 + $0x384] ss:$16 sps:$4 sm:$0xff]  }
 0xabd   : > { %6638 = vmatprep.subr.bf16.mxu1 %v9647_v25  ;;  %v9741_v25 = vld [vmem:[%s13398_s3 + $0x180] ss:$16 sps:$4 sm:$0xff]  }
 0xac0   : > { %6639 = vmatpush1.bf16.msra.mxu1 %v9645_v23  ;;  %v9744_v23 = vld [vmem:[%s13398_s3 + $0x380] ss:$16 sps:$4 sm:$0xff]  }
 0xac1   : > { %6640 = vmatprep.subr.bf16.mxu1 %v9653_v32  ;;  %v9749_v32 = vld [vmem:[%s13398_s3 + $0x164] ss:$16 sps:$4 sm:$0xff]  }
 0xac4   : > { %6641 = vmatpush1.bf16.msra.mxu1 %v9651_v0  ;;  %v9752_v0 = vld [vmem:[%s13398_s3 + $0x364] ss:$16 sps:$4 sm:$0xff]  }
 0xac5   : > { %6642 = vmatprep.subr.bf16.mxu1 %v9659_v11  ;;  %v9747_v11 = vld [vmem:[%s13398_s3 + $0x160] ss:$16 sps:$4 sm:$0xff]  }
 0xac8   : > { %6643 = vmatpush1.bf16.msra.mxu1 %v9657_v34  ;;  %v9750_v34 = vld [vmem:[%s13398_s3 + $0x360] ss:$16 sps:$4 sm:$0xff]  }
 0xac9   : > { %6644 = vmatprep.subr.bf16.mxu1 %v9665_v24  ;;  %v9755_v24 = vld [vmem:[%s13398_s3 + $0x144] ss:$16 sps:$4 sm:$0xff]  }
 0xacc   : > { %6645 = vmatpush1.bf16.msra.mxu1 %v9663_v30  ;;  %v9758_v30 = vld [vmem:[%s13398_s3 + $0x344] ss:$16 sps:$4 sm:$0xff]  }
 0xacd   : > { %6646 = vmatprep.subr.bf16.mxu1 %v9671_v49  ;;  %v9753_v49 = vld [vmem:[%s13398_s3 + $0x140] ss:$16 sps:$4 sm:$0xff]  }
 0xad0   : > { %6647 = vmatpush1.bf16.msra.mxu1 %v9669_v2  ;;  %v9756_v2 = vld [vmem:[%s13398_s3 + $0x340] ss:$16 sps:$4 sm:$0xff]  }
 0xad1   : > { %7512 = vmatprep.subr.bf16.mxu1 %v9677_v19  ;;  %v9759_v19 = vld [vmem:[%s13398_s3 + $0x120] ss:$16 sps:$4 sm:$0xff]  }
 0xb73   : > { %v6411_v46 = vpop.f32.mrf.mxu1 }
 0xb74   : > { %v6417_v7 = vpack.c.bf16 %v6411_v46, %v6411_v46  ;;  %v9762_v46 = vld [vmem:[%s13398_s3 + $0x320] ss:$16 sps:$4 sm:$0xff]  }
 0xb75   : > { %v8848_v8 = vpop.f32.mrf.mxu1 }
 0xb76   : > { %6665 = vmatmul.mubr.bf16.vlgmr.msra.gmra.mxu1 %v6417_v7  ;;  %6706 = vmatmul.mubr.bf16.vlgmr.msra.gmra.mxu0 %v6417_v7  ;;  %v9765_v7 = vld [vmem:[%s13398_s3 + $0x100] ss:$16 sps:$4 sm:$0xff]   ;;  %v9773_v8 = vld [vmem:[%s13398_s3 + $0xec] ss:$16 sps:$4 sm:$0xff]  }
 0xb77   : > { %v6414_v3 = vpop.f32.mrf.mxu1  ;;  %7513 = vmatpush1.bf16.msra.mxu1 %v9675_v57  ;;  %7554 = vmatpush1.bf16.msra.mxu0 %v9678_v48  ;;  %v9764_v57 = vld [vmem:[%s13398_s3 + $0x324] ss:$16 sps:$4 sm:$0xff]  }
 0xb78   : > { %7514 = vmatprep.subr.bf16.mxu1 %v9683_v10  ;;  %7555 = vmatprep.subr.bf16.mxu0 %v9686_v27  ;;  %v9767_v48 = vld [vmem:[%s13398_s3 + $0x104] ss:$16 sps:$4 sm:$0xff]   ;;  %v9768_v27 = vld [vmem:[%s13398_s3 + $0x300] ss:$16 sps:$4 sm:$0xff]   ;;  %v9776_v3 = vld [vmem:[%s13398_s3 + $0x2ec] ss:$16 sps:$4 sm:$0xff]  }
 0xb79   : > { %v8849_v44 = vpop.f32.mrf.mxu1  ;;  %v9770_v10 = vld [vmem:[%s13398_s3 + $0x304] ss:$16 sps:$4 sm:$0xff]  }
 0xb7b   : > { %7515 = vmatpush1.bf16.msra.mxu1 %v9681_v29  ;;  %7556 = vmatpush1.bf16.msra.mxu0 %v9684_v40  ;;  %v6462_v29 = vsub.s32 2, %v10270_v54  ;;  %v6450_v40 = vld [vmem:[%s13399_s1] sm:$0xf]  ;;  %s950_s1 = sand.u32 1, %s9952_s23  }
 0xb7c   : > { %7516 = vmatprep.subr.bf16.mxu1 %v9689_v33  ;;  %7557 = vmatprep.subr.bf16.mxu0 %v9692_v45  ;;  %v6466_v33 = vsub.s32 3, %v10270_v54  ;;  %v6455_v45 = vrot.slane %v6450_v40, %v13383_v26  ;;  %s8029_s8 = scalar_lea.sflag [#allocation3], %s950_s1 }
 0xb7d   : > { %v6463_v44 = vrot.slane %v6450_v40, %v6462_v29 }
 0xb7f   : > { %7517 = vmatpush1.bf16.msra.mxu1 %v9687_v31  ;;  %7558 = vmatpush1.bf16.msra.mxu0 %v9690_v13  ;;  %v6459_v31 = vrot.slane %v6450_v40, %v13390_v16  ;;  %v6467_v13 = vrot.slane %v6450_v40, %v6466_v33  ;;  %v9827_v40 = vld [vmem:[%s13398_s3 + $0x1cc] ss:$16 sps:$4 sm:$0xff]  }
 0xb80   : > { %7518 = vmatprep.subr.bf16.mxu1 %v9695_v28  ;;  %7559 = vmatprep.subr.bf16.mxu0 %v9698_v62 }
 0xb83   : > { %7519 = vmatpush1.bf16.msra.mxu1 %v9693_v53  ;;  %7560 = vmatpush1.bf16.msra.mxu0 %v9696_v1 }
 0xb84   : > { %7520 = vmatprep.subr.bf16.mxu1 %v9701_v61  ;;  %7561 = vmatprep.subr.bf16.mxu0 %v9704_v5 }
 0xb87   : > { %7521 = vmatpush1.bf16.msra.mxu1 %v9699_v37  ;;  %7562 = vmatpush1.bf16.msra.mxu0 %v9702_v36 }
 0xb88   : > { %7522 = vmatprep.subr.bf16.mxu1 %v9707_v51  ;;  %7563 = vmatprep.subr.bf16.mxu0 %v9710_v59 }
 0xb8b   : > { %7523 = vmatpush1.bf16.msra.mxu1 %v9705_v63  ;;  %7564 = vmatpush1.bf16.msra.mxu0 %v9708_v52 }
 0xb8c   : > { %7524 = vmatprep.subr.bf16.mxu1 %v9713_v42  ;;  %7565 = vmatprep.subr.bf16.mxu0 %v9716_v47 }
 0xb8f   : > { %7525 = vmatpush1.bf16.msra.mxu1 %v9711_v20  ;;  %7566 = vmatpush1.bf16.msra.mxu0 %v9714_v14 }
 0xb90   : > { %7526 = vmatprep.subr.bf16.mxu1 %v9719_v18  ;;  %7567 = vmatprep.subr.bf16.mxu0 %v9722_v38 }
 0xb93   : > { %7527 = vmatpush1.bf16.msra.mxu1 %v9717_v4  ;;  %7568 = vmatpush1.bf16.msra.mxu0 %v9720_v41  ;;  %v9771_v4 = vld [vmem:[%s13398_s3 + $0xe8] ss:$16 sps:$4 sm:$0xff]  }
 0xb94   : > { %7528 = vmatprep.subr.bf16.mxu1 %v9725_v22  ;;  %7569 = vmatprep.subr.bf16.mxu0 %v9728_v12  ;;  %v9774_v41 = vld [vmem:[%s13398_s3 + $0x2e8] ss:$16 sps:$4 sm:$0xff]  }
 0xb97   : > { %7529 = vmatpush2.bf16.msra.mxu1 %v9723_v50  ;;  %7570 = vmatpush2.bf16.msra.mxu0 %v9726_v9  ;;  %v9779_v50 = vld [vmem:[%s13398_s3 + $0xcc] ss:$16 sps:$4 sm:$0xff]  }
 0xb98   : > { %7530 = vmatprep.subr.bf16.mxu1 %v9731_v56  ;;  %7571 = vmatprep.subr.bf16.mxu0 %v9734_v43  ;;  %v9782_v9 = vld [vmem:[%s13398_s3 + $0x2cc] ss:$16 sps:$4 sm:$0xff]   ;;  %v9777_v56 = vld [vmem:[%s13398_s3 + $0xc8] ss:$16 sps:$4 sm:$0xff]  }
 0xb99   : > { %v9780_v43 = vld [vmem:[%s13398_s3 + $0x2c8] ss:$16 sps:$4 sm:$0xff]  }
 0xb9b   : > { %7531 = vmatpush2.bf16.msra.mxu1 %v9729_v58  ;;  %7572 = vmatpush2.bf16.msra.mxu0 %v9732_v15  ;;  %v9785_v58 = vld [vmem:[%s13398_s3 + $0xac] ss:$16 sps:$4 sm:$0xff]  }
 0xb9c   : > { %7532 = vmatprep.subr.bf16.mxu1 %v9737_v60  ;;  %7573 = vmatprep.subr.bf16.mxu0 %v9740_v55  ;;  %v9788_v15 = vld [vmem:[%s13398_s3 + $0x2ac] ss:$16 sps:$4 sm:$0xff]   ;;  %v9783_v60 = vld [vmem:[%s13398_s3 + $0xa8] ss:$16 sps:$4 sm:$0xff]  }
 0xb9d   : > { %v9786_v55 = vld [vmem:[%s13398_s3 + $0x2a8] ss:$16 sps:$4 sm:$0xff]  }
 0xb9f   : > { %7533 = vmatpush2.bf16.msra.mxu1 %v9735_v6  ;;  %7574 = vmatpush2.bf16.msra.mxu0 %v9738_v21  ;;  %v9791_v6 = vld [vmem:[%s13398_s3 + $0x8c] ss:$16 sps:$4 sm:$0xff]  }
 0xba0   : > { %7534 = vmatprep.subr.bf16.mxu1 %v9743_v39  ;;  %7575 = vmatprep.subr.bf16.mxu0 %v9746_v35  ;;  %v9794_v21 = vld [vmem:[%s13398_s3 + $0x28c] ss:$16 sps:$4 sm:$0xff]   ;;  %v9789_v39 = vld [vmem:[%s13398_s3 + $0x88] ss:$16 sps:$4 sm:$0xff]  }
 0xba1   : > { %v9792_v35 = vld [vmem:[%s13398_s3 + $0x288] ss:$16 sps:$4 sm:$0xff]  }
 0xba3   : > { %7535 = vmatpush2.bf16.msra.mxu1 %v9741_v25  ;;  %7576 = vmatpush2.bf16.msra.mxu0 %v9744_v23  ;;  %v9797_v25 = vld [vmem:[%s13398_s3 + $0x6c] ss:$16 sps:$4 sm:$0xff]  }
 0xba4   : > { %7536 = vmatprep.subr.bf16.mxu1 %v9749_v32  ;;  %7577 = vmatprep.subr.bf16.mxu0 %v9752_v0  ;;  %v9800_v23 = vld [vmem:[%s13398_s3 + $0x26c] ss:$16 sps:$4 sm:$0xff]   ;;  %v9795_v32 = vld [vmem:[%s13398_s3 + $0x68] ss:$16 sps:$4 sm:$0xff]  }
 0xba5   : > { %v9798_v0 = vld [vmem:[%s13398_s3 + $0x268] ss:$16 sps:$4 sm:$0xff]  }
 0xba7   : > { %7537 = vmatpush2.bf16.msra.mxu1 %v9747_v11  ;;  %7578 = vmatpush2.bf16.msra.mxu0 %v9750_v34  ;;  %v9803_v11 = vld [vmem:[%s13398_s3 + $0x4c] ss:$16 sps:$4 sm:$0xff]  }
 0xba8   : > { %7538 = vmatprep.subr.bf16.mxu1 %v9755_v24  ;;  %7579 = vmatprep.subr.bf16.mxu0 %v9758_v30  ;;  %v9806_v34 = vld [vmem:[%s13398_s3 + $0x24c] ss:$16 sps:$4 sm:$0xff]   ;;  %v9801_v24 = vld [vmem:[%s13398_s3 + $0x48] ss:$16 sps:$4 sm:$0xff]  }
 0xba9   : > { %v9804_v30 = vld [vmem:[%s13398_s3 + $0x248] ss:$16 sps:$4 sm:$0xff]  }
 0xbab   : > { %7539 = vmatpush2.bf16.msra.mxu1 %v9753_v49  ;;  %7580 = vmatpush2.bf16.msra.mxu0 %v9756_v2  ;;  %v9809_v49 = vld [vmem:[%s13398_s3 + $0x2c] ss:$16 sps:$4 sm:$0xff]  }
 0xbac   : > { %7540 = vmatprep.subr.bf16.mxu1 %v9761_v17  ;;  %7581 = vmatprep.subr.bf16.mxu0 %v9764_v57  ;;  %v9812_v2 = vld [vmem:[%s13398_s3 + $0x22c] ss:$16 sps:$4 sm:$0xff]   ;;  %v9810_v17 = vld [vmem:[%s13398_s3 + $0x228] ss:$16 sps:$4 sm:$0xff]  }
 0xbad   : > { %v9818_v57 = vld [vmem:[%s13398_s3 + $0x20c] ss:$16 sps:$4 sm:$0xff]  }
 0xbaf   : > { %7541 = vmatpush2.bf16.msra.mxu1 %v9759_v19  ;;  %7582 = vmatpush2.bf16.msra.mxu0 %v9762_v46  ;;  %v9807_v19 = vld [vmem:[%s13398_s3 + $0x28] ss:$16 sps:$4 sm:$0xff]   ;;  %v9815_v46 = vld [vmem:[%s13398_s3 + $0xc] ss:$16 sps:$4 sm:$0xff]  }
 0xbb0   : > { %7542 = vmatprep.subr.bf16.mxu1 %v9767_v48  ;;  %7583 = vmatprep.subr.bf16.mxu0 %v9770_v10  ;;  %v9813_v48 = vld [vmem:[%s13398_s3 + $0x8] ss:$16 sps:$4 sm:$0xff]   ;;  %v9821_v10 = vld [vmem:[%s13398_s3 + $0x1ec] ss:$16 sps:$4 sm:$0xff]  }
 0xbb3   : > { %7543 = vmatpush2.bf16.msra.mxu1 %v9765_v7  ;;  %7584 = vmatpush2.bf16.msra.mxu0 %v9768_v27  ;;  %v9816_v7 = vld [vmem:[%s13398_s3 + $0x208] ss:$16 sps:$4 sm:$0xff]   ;;  %v9824_v27 = vld [vmem:[%s13398_s3 + $0x3ec] ss:$16 sps:$4 sm:$0xff]  }
 0xbb4   : > { %7594 = vmatprep.subr.bf16.mxu1 %v9773_v8  ;;  %7635 = vmatprep.subr.bf16.mxu0 %v9776_v3  ;;  %v9819_v8 = vld [vmem:[%s13398_s3 + $0x1e8] ss:$16 sps:$4 sm:$0xff]  }
 0xbb5   : > { %v9822_v3 = vld [vmem:[%s13398_s3 + $0x3e8] ss:$16 sps:$4 sm:$0xff]  }
 0xc36   : > { %v6666_v28 = vpop.f32.mrf.mxu1  ;;  %v6707_v62 = vpop.f32.mrf.mxu0 }
 0xc37   : > { %v6667_v53 = vadd.f32 %v6666_v28, %v6455_v45  ;;  %v6708_v1 = vadd.f32 %v6707_v62, %v6463_v44  ;;  %v9830_v45 = vld [vmem:[%s13398_s3 + $0x3cc] ss:$16 sps:$4 sm:$0xff]   ;;  %v9825_v44 = vld [vmem:[%s13398_s3 + $0x1c8] ss:$16 sps:$4 sm:$0xff]  }
 0xc38   : > { %v6668_v61 = vpop.f32.mrf.mxu1  ;;  %v6709_v5 = vpop.f32.mrf.mxu0  ;;  %v9836_v28 = vld [vmem:[%s13398_s3 + $0x3ac] ss:$16 sps:$4 sm:$0xff]   ;;  %v9831_v62 = vld [vmem:[%s13398_s3 + $0x1a8] ss:$16 sps:$4 sm:$0xff]  }
 0xc39   : > { %v6669_v37 = vadd.f32 %v6668_v61, %v6459_v31  ;;  %v6710_v36 = vadd.f32 %v6709_v5, %v6467_v13  ;;  %v6714_v51 = vmax.f32 %v6667_v53, 0.0  ;;  %v6716_v59 = vmax.f32 %v6708_v1, 0.0  ;;  %v9828_v31 = vld [vmem:[%s13398_s3 + $0x3c8] ss:$16 sps:$4 sm:$0xff]   ;;  %v9833_v13 = vld [vmem:[%s13398_s3 + $0x1ac] ss:$16 sps:$4 sm:$0xff]  }
 0xc3a   : > { %v6670_v63 = vpop.f32.mrf.mxu1  ;;  %v6711_v52 = vpop.f32.mrf.mxu0  ;;  %v9834_v53 = vld [vmem:[%s13398_s3 + $0x3a8] ss:$16 sps:$4 sm:$0xff]   ;;  %v9839_v1 = vld [vmem:[%s13398_s3 + $0x18c] ss:$16 sps:$4 sm:$0xff]  }
 0xc3b   : > { %v6715_v42 = vmax.f32 %v6669_v37, 0.0  ;;  %v6717_v47 = vmax.f32 %v6710_v36, 0.0  ;;  %v12968_v22 = vpack.c.bf16 %v6714_v51, %v6714_v51  ;;  %v12970_v12 = vpack.c.bf16 %v6716_v59, %v6716_v59  ;;  %v9842_v61 = vld [vmem:[%s13398_s3 + $0x38c] ss:$16 sps:$4 sm:$0xff]   ;;  %v9837_v5 = vld [vmem:[%s13398_s3 + $0x188] ss:$16 sps:$4 sm:$0xff]  }
 0xc3c   : > { %v6671_v20 = vpop.f32.mrf.mxu1  ;;  %v6712_v14 = vpop.f32.mrf.mxu0  ;;  %v9840_v37 = vld [vmem:[%s13398_s3 + $0x388] ss:$16 sps:$4 sm:$0xff]   ;;  %v9845_v36 = vld [vmem:[%s13398_s3 + $0x16c] ss:$16 sps:$4 sm:$0xff]  }
 0xc3d   : > { %v6719_v18 = vpack.c.bf16 %v6715_v42, %v6715_v42  ;;  %v6721_v38 = vpack.c.bf16 %v6717_v47, %v6717_v47  ;;  %v9848_v51 = vld [vmem:[%s13398_s3 + $0x36c] ss:$16 sps:$4 sm:$0xff]   ;;  %v9843_v59 = vld [vmem:[%s13398_s3 + $0x168] ss:$16 sps:$4 sm:$0xff]  }
 0xc3e   : > { %v9846_v63 = vld [vmem:[%s13398_s3 + $0x368] ss:$16 sps:$4 sm:$0xff]   ;;  %v9851_v52 = vld [vmem:[%s13398_s3 + $0x14c] ss:$16 sps:$4 sm:$0xff]  }
 0xc3f   : > { %7544 = vmatprep.mubr.bf16.mxu1 %v6719_v18  ;;  %7585 = vmatprep.mubr.bf16.mxu0 %v6721_v38  ;;  %v9854_v42 = vld [vmem:[%s13398_s3 + $0x34c] ss:$16 sps:$4 sm:$0xff]   ;;  %v9849_v47 = vld [vmem:[%s13398_s3 + $0x148] ss:$16 sps:$4 sm:$0xff]  }
 0xc40   : > { %7545 = vmatmul.mubr.bf16.vlgmr.msra.gmra.mxu1 %v12968_v22  ;;  %7586 = vmatmul.mubr.bf16.vlgmr.msra.gmra.mxu0 %v12970_v12  ;;  %v9852_v20 = vld [vmem:[%s13398_s3 + $0x348] ss:$16 sps:$4 sm:$0xff]   ;;  %v9857_v14 = vld [vmem:[%s13398_s3 + $0x12c] ss:$16 sps:$4 sm:$0xff]  }
 0xc41   : > { %7595 = vmatpush1.bf16.msra.mxu1 %v9771_v4  ;;  %7636 = vmatpush1.bf16.msra.mxu0 %v9774_v41  ;;  %v9858_v4 = vld [vmem:[%s13398_s3 + $0x328] ss:$16 sps:$4 sm:$0xff]   ;;  %v9863_v41 = vld [vmem:[%s13398_s3 + $0x10c] ss:$16 sps:$4 sm:$0xff]  }
 0xc42   : > { %7596 = vmatprep.subr.bf16.mxu1 %v9779_v50  ;;  %7637 = vmatprep.subr.bf16.mxu0 %v9782_v9  ;;  %v9866_v50 = vld [vmem:[%s13398_s3 + $0x30c] ss:$16 sps:$4 sm:$0xff]   ;;  %v9861_v9 = vld [vmem:[%s13398_s3 + $0x108] ss:$16 sps:$4 sm:$0xff]  }
 0xc43   : > { %7626 = vmatprep.mubr.bf16.mxu1 %v6719_v18  ;;  %7667 = vmatprep.mubr.bf16.mxu0 %v6721_v38  ;;  %v9860_v18 = vld [vmem:[%s13398_s3 + $0x32c] ss:$16 sps:$4 sm:$0xff]   ;;  %v9855_v38 = vld [vmem:[%s13398_s3 + $0x128] ss:$16 sps:$4 sm:$0xff]  }
 0xc45   : > { %7597 = vmatpush1.bf16.msra.mxu1 %v9777_v56  ;;  %7638 = vmatpush1.bf16.msra.mxu0 %v9780_v43  ;;  %v9864_v56 = vld [vmem:[%s13398_s3 + $0x308] ss:$16 sps:$4 sm:$0xff]   ;;  %s8136_s3 = sshll.u32 %s950_s1, 3 }
 0xc46   : > { %7598 = vmatprep.subr.bf16.mxu1 %v9785_v58  ;;  %7639 = vmatprep.subr.bf16.mxu0 %v9788_v15  ;;  %v9867_v43 = vld [vmem:[%s13208_s4 + $0x78] sm:$0xff]   ;;  %v9869_v15 = vld [vmem:[%s13208_s4 + $0x70] sm:$0xff]   ;;  %s952_s5 = scalar_lea.vmem [#allocation2], %s8136_s3 }
 0xc47   : > { %v9868_v58 = vld [vmem:[%s13208_s4 + $0x38] sm:$0xff]   ;;  %s8042_s6 = sshll.u32 %s952_s5, 4  ;;  %s8043_s6 = int_to_ptr.vmem [resolvable:$true] %s8042_s6 }
 0xc48   : > { %s9900_s9 = scalar_lea.vmem %s8043_s6, 128 }
 0xc49   : > { %7599 = vmatpush1.bf16.msra.mxu1 %v9783_v60  ;;  %7640 = vmatpush1.bf16.msra.mxu0 %v9786_v55  ;;  %v9870_v60 = vld [vmem:[%s13208_s4 + $0x30] sm:$0xff]   ;;  %v9871_v55 = vld [vmem:[%s13208_s4 + $0x68] sm:$0xff]   ;;  %p9901_p11 = scmp.ne.s32.totalorder %s8043_s6, %s9900_s9 }
 0xc4a   : > { %7600 = vmatprep.subr.bf16.mxu1 %v9791_v6  ;;  %7641 = vmatprep.subr.bf16.mxu0 %v9794_v21  ;;  %v9872_v6 = vld [vmem:[%s13208_s4 + $0x28] sm:$0xff]   ;;  %v9873_v21 = vld [vmem:[%s13208_s4 + $0x60] sm:$0xff]  }
 0xc4b   : > { %p9902_p12 = pnand %p9901_p11, %p10203_p5 }
 0xc4d   : > { %7601 = vmatpush1.bf16.msra.mxu1 %v9789_v39  ;;  %7642 = vmatpush1.bf16.msra.mxu0 %v9792_v35  ;;  %v9874_v39 = vld [vmem:[%s13208_s4 + $0x20] sm:$0xff]   ;;  %v9883_v35 = vld [vmem:[%s13208_s4 + $0xf8] sm:$0xff]   ;;  %p9903_p13 = pneg %p9902_p12 }
 0xc4e   : > { %7602 = vmatprep.subr.bf16.mxu1 %v9797_v25  ;;  %7643 = vmatprep.subr.bf16.mxu0 %v9800_v23  ;;  %v9885_v25 = vld [vmem:[%s13208_s4 + $0xf0] sm:$0xff]   ;;  %v9876_v23 = vld [vmem:[%s13208_s4 + $0x18] sm:$0xff]  }
 0xc51   : > { %7603 = vmatpush1.bf16.msra.mxu1 %v9795_v32  ;;  %7644 = vmatpush1.bf16.msra.mxu0 %v9798_v0  ;;  %v9877_v32 = vld [vmem:[%s13208_s4 + $0x50] sm:$0xff]  }
 0xc52   : > { %7604 = vmatprep.subr.bf16.mxu1 %v9803_v11  ;;  %7645 = vmatprep.subr.bf16.mxu0 %v9806_v34  ;;  %v9886_v0 = vld [vmem:[%s13208_s4 + $0xb0] sm:$0xff]   ;;  %v9887_v11 = vld [vmem:[%s13208_s4 + $0xe8] sm:$0xff]  }
 0xc53   : > { %v9878_v34 = vld [vmem:[%s13208_s4 + $0x10] sm:$0xff]  }
 0xc55   : > { %7605 = vmatpush1.bf16.msra.mxu1 %v9801_v24  ;;  %7646 = vmatpush1.bf16.msra.mxu0 %v9804_v30  ;;  %v9879_v24 = vld [vmem:[%s13208_s4 + $0x48] sm:$0xff]  }
 0xc56   : > { %7606 = vmatprep.subr.bf16.mxu1 %v9809_v49  ;;  %7647 = vmatprep.subr.bf16.mxu0 %v9812_v2  ;;  %v9888_v30 = vld [vmem:[%s13208_s4 + $0xa8] sm:$0xff]   ;;  %v9889_v49 = vld [vmem:[%s13208_s4 + $0xe0] sm:$0xff]  }
 0xc57   : > { %v9880_v2 = vld [vmem:[%s13208_s4 + $0x8] sm:$0xff]  }
 0xc59   : > { %7607 = vmatpush1.bf16.msra.mxu1 %v9807_v19  ;;  %7648 = vmatpush1.bf16.msra.mxu0 %v9810_v17  ;;  %v9881_v19 = vld [vmem:[%s13208_s4 + $0x40] sm:$0xff]  }
 0xc5a   : > { %7608 = vmatprep.subr.bf16.mxu1 %v9815_v46  ;;  %7649 = vmatprep.subr.bf16.mxu0 %v9818_v57  ;;  %v9890_v17 = vld [vmem:[%s13208_s4 + $0xa0] sm:$0xff]   ;;  %v9891_v46 = vld [vmem:[%s13208_s4 + $0xd8] sm:$0xff]  }
 0xc5b   : > { %v9882_v57 = vld [vmem:[%s13208_s4] sm:$0xff]  }
 0xc5d   : > { %7609 = vmatpush1.bf16.msra.mxu1 %v9813_v48  ;;  %7650 = vmatpush1.bf16.msra.mxu0 %v9816_v7  ;;  %v9892_v48 = vld [vmem:[%s13208_s4 + $0x98] sm:$0xff]   ;;  %v9893_v7 = vld [vmem:[%s13208_s4 + $0xd0] sm:$0xff]  }
 0xc5e   : > { %7610 = vmatprep.subr.bf16.mxu1 %v9821_v10  ;;  %7651 = vmatprep.subr.bf16.mxu0 %v9824_v27  ;;  %v9894_v10 = vld [vmem:[%s13208_s4 + $0x90] sm:$0xff]   ;;  %v9895_v27 = vld [vmem:[%s13208_s4 + $0xc8] sm:$0xff]  }
 0xc61   : > { %7611 = vmatpush2.bf16.msra.mxu1 %v9819_v8  ;;  %7652 = vmatpush2.bf16.msra.mxu0 %v9822_v3  ;;  %v9896_v8 = vld [vmem:[%s13208_s4 + $0x88] sm:$0xff]   ;;  %v9897_v3 = vld [vmem:[%s13208_s4 + $0xc0] sm:$0xff]  }
 0xc62   : > { %7612 = vmatprep.subr.bf16.mxu1 %v9827_v40  ;;  %7653 = vmatprep.subr.bf16.mxu0 %v9830_v45  ;;  %v9898_v40 = vld [vmem:[%s13208_s4 + $0x80] sm:$0xff]  }
 0xc63   : > { %v6850_v45 = vld [vmem:[%s10148_s27] sm:$0xf] }
 0xc65   : > { %7613 = vmatpush2.bf16.msra.mxu1 %v9825_v44  ;;  %7654 = vmatpush2.bf16.msra.mxu0 %v9828_v31  ;;  %v6855_v44 = vrot.slane %v6850_v45, %v13383_v26  ;;  %v6859_v31 = vrot.slane %v6850_v45, %v13390_v16  ;;  %v6863_v26 = vrot.slane %v6850_v45, %v6462_v29 }
 0xc66   : > { %7614 = vmatprep.subr.bf16.mxu1 %v9833_v13  ;;  %7655 = vmatprep.subr.bf16.mxu0 %v9836_v28  ;;  %v6867_v16 = vrot.slane %v6850_v45, %v6466_v33 }
 0xc69   : > { %7615 = vmatpush2.bf16.msra.mxu1 %v9831_v62  ;;  %7656 = vmatpush2.bf16.msra.mxu0 %v9834_v53 }
 0xc6a   : > { %7616 = vmatprep.subr.bf16.mxu1 %v9839_v1  ;;  %7657 = vmatprep.subr.bf16.mxu0 %v9842_v61 }
 0xc6d   : > { %7617 = vmatpush2.bf16.msra.mxu1 %v9837_v5  ;;  %7658 = vmatpush2.bf16.msra.mxu0 %v9840_v37 }
 0xc6e   : > { %7618 = vmatprep.subr.bf16.mxu1 %v9845_v36  ;;  %7659 = vmatprep.subr.bf16.mxu0 %v9848_v51 }
 0xc71   : > { %7619 = vmatpush2.bf16.msra.mxu1 %v9843_v59  ;;  %7660 = vmatpush2.bf16.msra.mxu0 %v9846_v63 }
 0xc72   : > { %7620 = vmatprep.subr.bf16.mxu1 %v9851_v52  ;;  %7661 = vmatprep.subr.bf16.mxu0 %v9854_v42 }
 0xc75   : > { %7621 = vmatpush2.bf16.msra.mxu1 %v9849_v47  ;;  %7662 = vmatpush2.bf16.msra.mxu0 %v9852_v20 }
 0xc76   : > { %7622 = vmatprep.subr.bf16.mxu1 %v9857_v14  ;;  %7663 = vmatprep.subr.bf16.mxu0 %v9860_v18 }
 0xc79   : > { %7623 = vmatpush2.bf16.msra.mxu1 %v9855_v38  ;;  %7664 = vmatpush2.bf16.msra.mxu0 %v9858_v4 }
 0xc7a   : > { %7624 = vmatprep.subr.bf16.mxu1 %v9863_v41  ;;  %7665 = vmatprep.subr.bf16.mxu0 %v9866_v50 }
 0xc7d   : > { %7625 = vmatpush2.bf16.msra.mxu1 %v9861_v9  ;;  %7666 = vmatpush2.bf16.msra.mxu0 %v9864_v56 }
 0xc7e   : > { %8800 = vmatprep.subr.bf16.mxu1 %v9867_v43  ;;  %8822 = vmatprep.subr.bf16.mxu0 %v9883_v35 }
 0xc80   : > { %7627 = vmatmul.mubr.bf16.vlgmr.msra.gmra.mxu1 %v12968_v22  ;;  %7668 = vmatmul.mubr.bf16.vlgmr.msra.gmra.mxu0 %v12970_v12  ;;  %v9875_v22 = vld [vmem:[%s13208_s4 + $0x58] sm:$0xff]  }
 0xc81   : > { %8801 = vmatpush3.bf16.msra.mxu1 %v9868_v58  ;;  %v9884_v12 = vld [vmem:[%s13208_s4 + $0xb8] sm:$0xff]   ;;  %s8729_s4 = sshll.u32 %s10186_s0, 7 }
 0xc82   : > { %8802 = vmatprep.subr.bf16.mxu1 %v9869_v15  ;;  %8823 = vmatpush3.bf16.msra.mxu0 %v9884_v12  ;;  %v8695_v12 = vld [vmem:[%s13400_s12] ss:$0 sm:$0xff]  ;;  %s13079_s7 = scalar_lea.hbm %s10163_s20, %s8729_s4  ;;  %s9904_s12 = sshll.u32 %s9999_s10, 4  ;;  %s9905_s12 = int_to_ptr.vmem [resolvable:$false] %s9904_s12 }
 0xc83   : > { %8824 = vmatprep.subr.bf16.mxu0 %v9885_v25  ;;  %s9906_s0 = scalar_lea.vmem %s9905_s12, 256  ;;  %p9907_p0 = scmp.lt.s32.totalorder %s8043_s6, %s9905_s12 }
 0xc84   : > { %p9908_p1 = scmp.lt.s32.totalorder %s9906_s0, %s9900_s9 }
 0xc85   : > { %8803 = vmatpush3.bf16.msra.mxu1 %v9870_v60 }
 0xc86   : > { %8804 = vmatprep.subr.bf16.mxu1 %v9871_v55  ;;  %8825 = vmatpush3.bf16.msra.mxu0 %v9886_v0  ;;  %p9909_p2 = por %p9908_p1, %p9907_p0 }
 0xc87   : > { %8826 = vmatprep.subr.bf16.mxu0 %v9887_v11 }
 0xc88   : > { %p9910_p3 = pnand %p9909_p2, %p9903_p13 }
 0xc89   : > { %8805 = vmatpush3.bf16.msra.mxu1 %v9872_v6 }
 0xc8a   : > { %8806 = vmatprep.subr.bf16.mxu1 %v9873_v21  ;;  %8827 = vmatpush3.bf16.msra.mxu0 %v9888_v30 }
 0xc8b   : > { %8828 = vmatprep.subr.bf16.mxu0 %v9889_v49 }
 0xc8d   : > { %8807 = vmatpush3.bf16.msra.mxu1 %v9874_v39 }
 0xc8e   : > { %8808 = vmatprep.subr.bf16.mxu1 %v9875_v22  ;;  %8829 = vmatpush3.bf16.msra.mxu0 %v9890_v17 }
 0xc8f   : > { %8830 = vmatprep.subr.bf16.mxu0 %v9891_v46 }
 0xc91   : > { %8809 = vmatpush3.bf16.msra.mxu1 %v9876_v23 }
 0xc92   : > { %8810 = vmatprep.subr.bf16.mxu1 %v9877_v32  ;;  %8831 = vmatpush3.bf16.msra.mxu0 %v9892_v48 }
 0xc93   : > { %8832 = vmatprep.subr.bf16.mxu0 %v9893_v7 }
 0xc95   : > { %8811 = vmatpush3.bf16.msra.mxu1 %v9878_v34 }
 0xc96   : > { %8812 = vmatprep.subr.bf16.mxu1 %v9879_v24  ;;  %8833 = vmatpush3.bf16.msra.mxu0 %v9894_v10 }
 0xc97   : > { %8834 = vmatprep.subr.bf16.mxu0 %v9895_v27 }
 0xc99   : > { %8813 = vmatpush3.bf16.msra.mxu1 %v9880_v2 }
 0xc9a   : > { %8814 = vmatprep.subr.bf16.mxu1 %v9881_v19  ;;  %8835 = vmatpush3.bf16.msra.mxu0 %v9896_v8 }
 0xc9b   : > { %8836 = vmatprep.subr.bf16.mxu0 %v9897_v3 }
 0xc9d   : > { %8815 = vmatpush3.bf16.msra.mxu1 %v9882_v57 }
 0xc9e   : > { %8837 = vmatpush3.bf16.msra.mxu0 %v9898_v40 }
 0xd00   : > { %v7546_v13 = vpop.f32.mrf.mxu1  ;;  %v7587_v28 = vpop.f32.mrf.mxu0 }
 0xd01   : > { %v7547_v62 = vadd.f32 %v7546_v13, %v6855_v44 }
 0xd02   : > { %v7548_v53 = vpop.f32.mrf.mxu1  ;;  %v7589_v1 = vpop.f32.mrf.mxu0 }
 0xd03   : > { %v7549_v61 = vadd.f32 %v7548_v53, %v6859_v31  ;;  %v7588_v5 = vadd.f32 %v7587_v28, %v7547_v62 }
 0xd04   : > { %v7550_v37 = vpop.f32.mrf.mxu1  ;;  %v7591_v36 = vpop.f32.mrf.mxu0 }
 0xd05   : > { %v7590_v51 = vadd.f32 %v7589_v1, %v7549_v61  ;;  %v7676_v59 = vmax.f32 %v7588_v5, 0.0 }
 0xd06   : > { %v7551_v63 = vpop.f32.mrf.mxu1  ;;  %v7592_v52 = vpop.f32.mrf.mxu0 }
 0xd07   : > { %v7677_v42 = vmax.f32 %v7590_v51, 0.0  ;;  %v7680_v20 = vpack.c.bf16 %v7676_v59, %v7676_v59 }
 0xd09   : > { %v7681_v47 = vpack.c.bf16 %v7677_v42, %v7677_v42 }
 0xd0b   : > { %7979 = vmatprep.mubr.bf16.mxu1 %v7681_v47 }
 0xd0c   : > { %7980 = vmatmul.mubr.bf16.vlgmr.msra.gmra.mxu1 %v7680_v20 }
 0xd40   : > { %v7628_v14 = vpop.f32.mrf.mxu1  ;;  %v7669_v18 = vpop.f32.mrf.mxu0 }
 0xd41   : > { %v7629_v38 = vadd.f32 %v7628_v14, %v6863_v26 }
 0xd42   : > { %v7630_v4 = vpop.f32.mrf.mxu1  ;;  %v7671_v41 = vpop.f32.mrf.mxu0 }
 0xd43   : > { %v7670_v50 = vadd.f32 %v7669_v18, %v7629_v38  ;;  %v7631_v9 = vadd.f32 %v7630_v4, %v6867_v16 }
 0xd44   : > { %v7632_v56 = vpop.f32.mrf.mxu1  ;;  %v7673_v43 = vpop.f32.mrf.mxu0 }
 0xd45   : > { %v7672_v58 = vadd.f32 %v7671_v41, %v7631_v9  ;;  %v7678_v15 = vmax.f32 %v7670_v50, 0.0 }
 0xd46   : > { %v7633_v60 = vpop.f32.mrf.mxu1  ;;  %v7674_v55 = vpop.f32.mrf.mxu0 }
 0xd47   : > { %v7679_v29 = vmax.f32 %v7672_v58, 0.0  ;;  %v7682_v54 = vpack.c.bf16 %v7678_v15, %v7678_v15 }
 0xd49   : > { %v7683_v6 = vpack.c.bf16 %v7679_v29, %v7679_v29 }
 0xd4b   : > { %8019 = vmatprep.mubr.bf16.mxu0 %v7683_v6 }
 0xd4c   : > { %8020 = vmatmul.mubr.bf16.vlgmr.msra.gmra.mxu0 %v7682_v54 }
 0xdcc   : > { %v8816_v33 = vpop.f32.mrf.mxu1 }
 0xdce   : > { %v8817_v21 = vpop.f32.mrf.mxu1 }
 0xdcf   : > { %v8818_v35 = vadd.f32 %v8817_v21, %v8816_v33 }
 0xdd0   : > { %v8819_v39 = vpop.f32.mrf.mxu1 }
 0xdd1   : > { %v7982_v32 = vadd.f32 %v8818_v35, %v8695_v12 }
 0xdd2   : > { %v8820_v22 = vpop.f32.mrf.mxu1 }
 0xe0c   : > { %v8838_v25 = vpop.f32.mrf.mxu0 }
 0xe0e   : > { %v8839_v23 = vpop.f32.mrf.mxu0 }
 0xe0f   : > { %v8840_v0 = vadd.f32 %v8839_v23, %v8838_v25 }
 0xe10   : > { %v8841_v11 = vpop.f32.mrf.mxu0 }
 0xe11   : > { %v8022_v34 = vadd.f32 %v8840_v0, %v7982_v32 }
 0xe12   : > { %v8842_v24 = vpop.f32.mrf.mxu0 }
 0xe13   : > { %8027 = vst [vmem:[%s952_s5] sm:$0xff] %v8022_v34 }
 0xe14   : > { %9913 = shalt.err (!%p9910_p3)
}
 0xe15   : > { %s9914_s5 = scalar_lea.hbm %s13079_s7, 128  ;;  %s9918_s4 = scalar_lea.hbm %s10163_s20, 256 }
 0xe16   : > { %p9915_p4 = scmp.ne.s32.totalorder %s13079_s7, %s9914_s5  ;;  %p9919_p9 = scmp.lt.s32.totalorder %s13079_s7, %s10163_s20 }
 0xe17   : > { %p9920_p10 = scmp.lt.s32.totalorder %s9918_s4, %s9914_s5 }
 0xe18   : > { %p9916_p7 = pnand %p9915_p4, %p10203_p5 }
 0xe19   : > { %p9921_p11 = por %p9920_p10, %p9919_p9 }
 0xe1a   : > { %p9917_p8 = pneg %p9916_p7 }
 0xe1c   : > { %p9922_p12 = pnand %p9921_p11, %p9917_p8 }
 0xe1e   : > { %9925 = shalt.err (!%p9922_p12)
}
 0xe1f   : > { %8850 = dma.vmem_to_hbm [thread:$0]  (%p10203_p5), %s8043_s6, 128, %s13079_s7, %s8029_s8  }
 0xe20 PF: > { %p8856_p13 = scmp.ge.s32.totalorder %s9960_s28, 2  ;;  %s8054_s9 = sand.u32 1, %s9948_s22  }
 0xe21   : > { %s8055_s12 = scalar_lea.sflag [#allocation3], %s8054_s9 }
 0xe22   : > { %p8853_p0 = pnand %p8856_p13, %p10207_p6 }
 0xe24   : > { %p8854_p1 = pneg %p8853_p0 }
 0xe26   : > { %9943 = dma.done.wait (%p8854_p1), %s8055_s12, 128  }
 0xe27   : > { %9945 = vsyncadd (%p8854_p1), %s8055_s12, 4294967168  ;;  %p73_p2 = scmp.ge.s32.totalorder %s10190_s2, 4   ;;  %s13401_s22 = smov %s9952_s23 }
 0xe28   : > { %s13402_s23 = smov %s9956_s26  ;;  %s13403_s26 = smov %s10201_s11 }
 0xe29   : > { %s13404_s28 = smov %s10190_s2  ;;  %75 = sbr.rel (!%p73_p2) target bundleno = 67 (0x43), region = 210 }
 0xe2e   :  { %8060 = vsyncpa [#allocation3], 1 }
 0xe2f   :  { %8062 = vsyncpa [#allocation3 + $0x1], 1 }

</bundles_post_ra>
